<compile_context>
chip_gen: v7x
topology: tpu7x:2x2x1
jax: 0.10.0
libtpu: 0.0.40
codegen_flags: <defaults>
</compile_context>

<pallas_src>
import functools
import math

import jax
import jax.numpy as jnp
from jax.experimental import pallas as pl
from jax.experimental.pallas import tpu as pltpu


_VMEM = pl.BlockSpec(memory_space=pltpu.MemorySpace.VMEM)

CFG = dict(
    img_size=32, patch=16, in_chans=3, embed_dim=64, depth=2, vit_heads=4, mlp_ratio=4,
    num_features=32, num_classes=4, nhead=4, num_encoder_layers=2, num_decoder_layers=2,
    dim_feedforward=64,
)


# ----------------------------------------------------------------------------- packing

def _pack_params(named_arrays):
    """Pack 2-D f32 params into a few slabs grouped by column width.

    Every parameter starts at an 8-row-aligned offset inside its slab so in-kernel row
    slices stay sublane-aligned.  Returns ({cols: slab}, {name: (cols, offset, rows)}).
    """
    groups = {}
    index = {}
    for name, a in named_arrays:
        assert a.ndim == 2, name
        cols = a.shape[1]
        parts = groups.setdefault(cols, [])
        off = sum(part.shape[0] for part in parts)
        rows = a.shape[0]
        index[name] = (cols, off, rows)
        pad = (-rows) % 8
        if pad:
            a = jnp.concatenate([a, jnp.zeros((pad, cols), a.dtype)], axis=0)
        parts.append(a)
    slabs = {c: jnp.concatenate(parts, axis=0) for c, parts in groups.items()}
    return slabs, index


# ----------------------------------------------------------------------------- in-kernel helpers

def _layer_norm(x, g, b, eps):
    mu = jnp.mean(x, axis=-1, keepdims=True)
    xc = x - mu
    var = jnp.mean(xc * xc, axis=-1, keepdims=True)
    return xc * jax.lax.rsqrt(var + eps) * g + b


def _gelu(x):
    # exact (erf-based) GELU, matching torch.nn.GELU used by timm ViT
    return 0.5 * x * (1.0 + jax.lax.erf(x * 0.7071067811865476))


def _softmax_rows(s):
    s = s - jnp.max(s, axis=-1, keepdims=True)
    p = jnp.exp(s)
    return p * pl.reciprocal(jnp.sum(p, axis=-1, keepdims=True), approx=True)


# ----------------------------------------------------------------------------- fused kernel

def _fused_kernel(patches_ref, *refs, index, widths, B, N, T, E, heads, depth,
                  d, nhead, num_enc, num_dec, num_classes):
    """ViT backbone + nn.Transformer + fc head, fully in VMEM, one invocation."""
    out_ref = refs[-1]
    slab_refs = dict(zip(widths, refs[:-1]))

    def p(name):
        cols, off, rows = index[name]
        return slab_refs[cols][off:off + rows, :]

    dh = E // heads
    BT = B * T

    # ---------------- ViT backbone ----------------
    # Patch embedding (Conv2d == matmul on pre-flattened patches).  The token template
    # already contains cls+pos (row 0), pos+patch-bias (rows 1..N) and zero pad rows,
    # so no per-batch concatenation is needed.
    x = (jnp.dot(patches_ref[...], p("vit_w_patch"),
                 preferred_element_type=jnp.float32)
         .reshape(B, T, E) + p("vit_tok_tmpl")[None]).reshape(BT, E)

    # key mask: keys >= N+1 are token padding (T was padded to a sublane tile)
    kmask = jax.lax.broadcasted_iota(jnp.int32, (1, T), 1) < (N + 1)

    for l in range(depth):
        # --- attention: LN -> fused QKV -> per-head batch-contracted SDPA -> one out-proj
        h = _layer_norm(x, p(f"vit{l}_ln1_g"), p(f"vit{l}_ln1_b"), 1e-6)
        qkv = (jnp.dot(h, p(f"vit{l}_w_qkv"), preferred_element_type=jnp.float32)
               + p(f"vit{l}_b_qkv"))                                        # [BT, 3E]
        heads_out = []
        for hh in range(heads):
            q = qkv[:, hh * dh:(hh + 1) * dh].reshape(B, T, dh)             # scale pre-folded
            k = qkv[:, E + hh * dh:E + (hh + 1) * dh].reshape(B, T, dh)
            v = qkv[:, 2 * E + hh * dh:2 * E + (hh + 1) * dh].reshape(B, T, dh)
            s = jnp.einsum('bqd,bkd->bqk', q, k, preferred_element_type=jnp.float32)
            pr = _softmax_rows(jnp.where(kmask, s, -1e30))
            o = jnp.einsum('bqk,bkd->bqd', pr, v, preferred_element_type=jnp.float32)
            heads_out.append(o.reshape(BT, dh))
        o_cat = jnp.concatenate(heads_out, axis=-1)                         # [BT, E]
        x = x + (jnp.dot(o_cat, p(f"vit{l}_w_proj"),
                         preferred_element_type=jnp.float32) + p(f"vit{l}_b_proj"))
        # --- MLP: LN -> fc1 + GELU -> fc2 -> residual ---
        h = _layer_norm(x, p(f"vit{l}_ln2_g"), p(f"vit{l}_ln2_b"), 1e-6)
        h = _gelu(jnp.dot(h, p(f"vit{l}_w_fc1"), preferred_element_type=jnp.float32)
                  + p(f"vit{l}_b_fc1"))
        x = x + (jnp.dot(h, p(f"vit{l}_w_fc2"), preferred_element_type=jnp.float32)
                 + p(f"vit{l}_b_fc2"))

    # final LN + cls pooling + head projection
    x = _layer_norm(x, p("vit_ln_g"), p("vit_ln_b"), 1e-6)
    cls = x.reshape(B, T, E)[:, 0, :]                                       # [B, E]
    feat = (jnp.dot(cls, p("vit_w_head"), preferred_element_type=jnp.float32)
            + p("vit_b_head"))                                              # [B, d]

    # ---------------- nn.Transformer (src = tgt = feat, unbatched [S=B, d]) ----------------
    dh_t = d // nhead

    def mha_self(xx, w_in, b_in, wo, bo):
        qkv2 = jnp.dot(xx, w_in, preferred_element_type=jnp.float32) + b_in   # [S, 3d]
        outs = []
        for hh in range(nhead):
            cs = slice(hh * dh_t, (hh + 1) * dh_t)
            s = jax.lax.dot_general(qkv2[:, cs], qkv2[:, d + hh * dh_t:d + (hh + 1) * dh_t],
                                    (((1,), (1,)), ((), ())),
                                    preferred_element_type=jnp.float32)
            outs.append(jnp.dot(_softmax_rows(s),
                                qkv2[:, 2 * d + hh * dh_t:2 * d + (hh + 1) * dh_t],
                                preferred_element_type=jnp.float32))
        return jnp.dot(jnp.concatenate(outs, axis=-1), wo,
                       preferred_element_type=jnp.float32) + bo

    def mha_cross(xq, wq, bq, xkv, wkv, bkv, wo, bo):
        q = jnp.dot(xq, wq, preferred_element_type=jnp.float32) + bq          # [S, d]
        kv = jnp.dot(xkv, wkv, preferred_element_type=jnp.float32) + bkv      # [S, 2d]
        outs = []
        for hh in range(nhead):
            cs = slice(hh * dh_t, (hh + 1) * dh_t)
            s = jax.lax.dot_general(q[:, cs], kv[:, cs],
                                    (((1,), (1,)), ((), ())),
                                    preferred_element_type=jnp.float32)
            outs.append(jnp.dot(_softmax_rows(s),
                                kv[:, d + hh * dh_t:d + (hh + 1) * dh_t],
                                preferred_element_type=jnp.float32))
        return jnp.dot(jnp.concatenate(outs, axis=-1), wo,
                       preferred_element_type=jnp.float32) + bo

    # ----- encoder (post-norm) -----
    mem = feat
    for l in range(num_enc):
        a = mha_self(mem, p(f"enc{l}_w_in"), p(f"enc{l}_b_in"),
                     p(f"enc{l}_wo"), p(f"enc{l}_bo"))
        mem = _layer_norm(mem + a, p(f"enc{l}_n1_g"), p(f"enc{l}_n1_b"), 1e-5)
        ff = jnp.dot(
            jnp.maximum(jnp.dot(mem, p(f"enc{l}_w1"), preferred_element_type=jnp.float32)
                        + p(f"enc{l}_b1"), 0.0),
            p(f"enc{l}_w2"), preferred_element_type=jnp.float32) + p(f"enc{l}_b2")
        mem = _layer_norm(mem + ff, p(f"enc{l}_n2_g"), p(f"enc{l}_n2_b"), 1e-5)
    mem = _layer_norm(mem, p("enc_norm_g"), p("enc_norm_b"), 1e-5)

    # ----- decoder (post-norm), tgt == src -----
    y = feat
    for l in range(num_dec):
        a = mha_self(y, p(f"dec{l}_sa_w"), p(f"dec{l}_sa_b"),
                     p(f"dec{l}_sa_wo"), p(f"dec{l}_sa_bo"))
        y = _layer_norm(y + a, p(f"dec{l}_n1_g"), p(f"dec{l}_n1_b"), 1e-5)
        a = mha_cross(y, p(f"dec{l}_ca_wq"), p(f"dec{l}_ca_bq"),
                      mem, p(f"dec{l}_ca_wkv"), p(f"dec{l}_ca_bkv"),
                      p(f"dec{l}_ca_wo"), p(f"dec{l}_ca_bo"))
        y = _layer_norm(y + a, p(f"dec{l}_n2_g"), p(f"dec{l}_n2_b"), 1e-5)
        ff = jnp.dot(
            jnp.maximum(jnp.dot(y, p(f"dec{l}_w1"), preferred_element_type=jnp.float32)
                        + p(f"dec{l}_b1"), 0.0),
            p(f"dec{l}_w2"), preferred_element_type=jnp.float32) + p(f"dec{l}_b2")
        y = _layer_norm(y + ff, p(f"dec{l}_n3_g"), p(f"dec{l}_n3_b"), 1e-5)
    y = _layer_norm(y, p("dec_norm_g"), p("dec_norm_b"), 1e-5)

    # ----- classification head (fc weights zero-padded to d columns at init) -----
    logits = jnp.dot(y, p("fc_w"), preferred_element_type=jnp.float32) + p("fc_b")
    out_ref[...] = logits[:, :num_classes].astype(out_ref.dtype)


# ----------------------------------------------------------------------------- full model

def vit_transformer_forward(x, slabs, index, cfg):
    B, C, H, W = x.shape
    P, E = cfg["patch"], cfg["embed_dim"]
    gh, gw = H // P, W // P
    N = gh * gw
    T = N + 1
    T_pad = max(8, -(-T // 8) * 8)

    # Conv2d(C, E, kernel=P, stride=P) == patchify + matmul (flattened in (C, P, P) order).
    # Rows padded to T_pad tokens: row 0 reserved for cls, trailing rows are padding.
    patches = (x.reshape(B, C, gh, P, gw, P)
                 .transpose(0, 2, 4, 1, 3, 5)
                 .reshape(B, N, C * P * P))
    patches = jnp.pad(patches, ((0, 0), (1, T_pad - 1 - N), (0, 0)))
    patches = patches.reshape(B * T_pad, C * P * P)

    widths = sorted(slabs.keys())
    args = [patches] + [slabs[w] for w in widths]

    kernel = functools.partial(
        _fused_kernel, index=index, widths=tuple(widths),
        B=B, N=N, T=T_pad, E=E, heads=cfg["vit_heads"], depth=cfg["depth"],
        d=cfg["num_features"], nhead=cfg["nhead"],
        num_enc=cfg["num_encoder_layers"], num_dec=cfg["num_decoder_layers"],
        num_classes=cfg["num_classes"])

    return pl.pallas_call(
        kernel,
        out_shape=jax.ShapeDtypeStruct((B, cfg["num_classes"]), x.dtype),
        in_specs=[_VMEM] * len(args),
        out_specs=_VMEM,
    )(*args)


# ----------------------------------------------------------------------------- params

def init_params(key, cfg):
    keys = iter(jax.random.split(key, 128))
    std = 0.02
    W = lambda r, c: std * jax.random.normal(next(keys), (r, c), jnp.float32)
    Z = lambda r, c: jnp.zeros((r, c), jnp.float32)
    O = lambda r, c: jnp.ones((r, c), jnp.float32)

    E, d = cfg["embed_dim"], cfg["num_features"]
    depth, heads = cfg["depth"], cfg["vit_heads"]
    Hd = E * cfg["mlp_ratio"]
    Cpp = cfg["in_chans"] * cfg["patch"] ** 2
    N = (cfg["img_size"] // cfg["patch"]) ** 2
    T = N + 1
    T_pad = max(8, -(-T // 8) * 8)
    nhead, F, C = cfg["nhead"], cfg["dim_feedforward"], cfg["num_classes"]
    assert C <= d

    prm = []
    # ---- ViT ----
    prm.append(("vit_w_patch", W(Cpp, E)))
    cls, pos, b_patch = W(1, E), W(T, E), Z(1, E)
    tmpl = jnp.concatenate(          # row0=cls+pos0, rows1..N=pos+patch-bias, pad rows=0
        [cls + pos[0:1], pos[1:] + b_patch, jnp.zeros((T_pad - T, E), jnp.float32)], 0)
    prm.append(("vit_tok_tmpl", tmpl))
    sc = 1.0 / math.sqrt(E // heads)
    for l in range(depth):
        prm += [(f"vit{l}_ln1_g", O(1, E)), (f"vit{l}_ln1_b", Z(1, E))]
        # attention scale folded into the Q columns (bias is zero, so unscaled bias is exact)
        prm += [(f"vit{l}_w_qkv", jnp.concatenate([W(E, E) * sc, W(E, E), W(E, E)], 1)),
                (f"vit{l}_b_qkv", Z(1, 3 * E)),
                (f"vit{l}_w_proj", W(E, E)), (f"vit{l}_b_proj", Z(1, E)),
                (f"vit{l}_ln2_g", O(1, E)), (f"vit{l}_ln2_b", Z(1, E)),
                (f"vit{l}_w_fc1", W(E, Hd)), (f"vit{l}_b_fc1", Z(1, Hd)),
                (f"vit{l}_w_fc2", W(Hd, E)), (f"vit{l}_b_fc2", Z(1, E))]
    prm += [("vit_ln_g", O(1, E)), ("vit_ln_b", Z(1, E)),
            ("vit_w_head", W(E, d)), ("vit_b_head", Z(1, d))]

    # ---- nn.Transformer ----
    sct = 1.0 / math.sqrt(d // nhead)
    for l in range(cfg["num_encoder_layers"]):
        prm += [(f"enc{l}_w_in", jnp.concatenate([W(d, d) * sct, W(d, d), W(d, d)], 1)),
                (f"enc{l}_b_in", Z(1, 3 * d)),
                (f"enc{l}_wo", W(d, d)), (f"enc{l}_bo", Z(1, d)),
                (f"enc{l}_n1_g", O(1, d)), (f"enc{l}_n1_b", Z(1, d)),
                (f"enc{l}_w1", W(d, F)), (f"enc{l}_b1", Z(1, F)),
                (f"enc{l}_w2", W(F, d)), (f"enc{l}_b2", Z(1, d)),
                (f"enc{l}_n2_g", O(1, d)), (f"enc{l}_n2_b", Z(1, d))]
    for l in range(cfg["num_decoder_layers"]):
        prm += [(f"dec{l}_sa_w", jnp.concatenate([W(d, d) * sct, W(d, d), W(d, d)], 1)),
                (f"dec{l}_sa_b", Z(1, 3 * d)),
                (f"dec{l}_sa_wo", W(d, d)), (f"dec{l}_sa_bo", Z(1, d)),
                (f"dec{l}_n1_g", O(1, d)), (f"dec{l}_n1_b", Z(1, d)),
                (f"dec{l}_ca_wq", W(d, d) * sct), (f"dec{l}_ca_bq", Z(1, d)),
                (f"dec{l}_ca_wkv", jnp.concatenate([W(d, d), W(d, d)], 1)),
                (f"dec{l}_ca_bkv", Z(1, 2 * d)),
                (f"dec{l}_ca_wo", W(d, d)), (f"dec{l}_ca_bo", Z(1, d)),
                (f"dec{l}_n2_g", O(1, d)), (f"dec{l}_n2_b", Z(1, d)),
                (f"dec{l}_w1", W(d, F)), (f"dec{l}_b1", Z(1, F)),
                (f"dec{l}_w2", W(F, d)), (f"dec{l}_b2", Z(1, d)),
                (f"dec{l}_n3_g", O(1, d)), (f"dec{l}_n3_b", Z(1, d))]
    prm += [("enc_norm_g", O(1, d)), ("enc_norm_b", Z(1, d)),
            ("dec_norm_g", O(1, d)), ("dec_norm_b", Z(1, d))]
    fc_w = W(d, C)
    if C < d:   # pad the tiny fc head to d columns so it shares the d-wide slab
        fc_w = jnp.concatenate([fc_w, jnp.zeros((d, d - C), jnp.float32)], 1)
    prm += [("fc_w", fc_w), ("fc_b", Z(1, d))]

    return _pack_params(prm)


# ----------------------------------------------------------------------------- main

if __name__ == "__main__":
    key = jax.random.PRNGKey(0)
    pkey, xkey = jax.random.split(key)
    slabs, index = init_params(pkey, CFG)
    x = jax.random.normal(xkey, (2, CFG["in_chans"], CFG["img_size"], CFG["img_size"]),
                          dtype=jnp.float32)

    fwd = jax.jit(lambda xx, ss: vit_transformer_forward(xx, ss, index, CFG))
    out = fwd(x, slabs)
    jax.block_until_ready(out)

    assert out.shape == (2, CFG["num_classes"]), out.shape
    assert bool(jnp.all(jnp.isfinite(out)))
    print("KERNEL_OK")
</pallas_src>

<mosaic_0001>
module attributes {stable_mosaic.version = 11 : i64} {
  func.func @_fused_kernel(%arg0: memref<16x768xf32, #tpu.memory_space<vmem>>, %arg1: memref<912x32xf32, #tpu.memory_space<vmem>>, %arg2: memref<1768x64xf32, #tpu.memory_space<vmem>>, %arg3: memref<160x96xf32, #tpu.memory_space<vmem>>, %arg4: memref<144x192xf32, #tpu.memory_space<vmem>>, %arg5: memref<144x256xf32, #tpu.memory_space<vmem>>, %arg6: memref<2x4xf32, #tpu.memory_space<vmem>>) attributes {dimension_semantics = [], scalar_prefetch = 0 : i64, scratch_operands = 0 : i64, tpu.core_type = #tpu.core_type<tc>} {
    %c0 = arith.constant 0 : index
    %c0_0 = arith.constant 0 : index
    %0 = vector.load %arg0[%c0, %c0_0] : memref<16x768xf32, #tpu.memory_space<vmem>>, vector<16x768xf32>
    %c0_1 = arith.constant 0 : index
    %c0_2 = arith.constant 0 : index
    %1 = vector.load %arg2[%c0_1, %c0_2] : memref<1768x64xf32, #tpu.memory_space<vmem>>, vector<768x64xf32>
    %cst = arith.constant dense<0.000000e+00> : vector<16x64xf32>
    %2 = tpu.matmul %0, %1, %cst {dimension_numbers = #tpu.dot_dimension_numbers<[1], [0], [0], [1], [0, 0, 1, 1], [], []>} : vector<16x768xf32>, vector<768x64xf32>, vector<16x64xf32> -> vector<16x64xf32>
    %3 = vector.shape_cast %2 : vector<16x64xf32> to vector<2x8x64xf32>
    %c768 = arith.constant 768 : index
    %c0_3 = arith.constant 0 : index
    %4 = vector.load %arg2[%c768, %c0_3] : memref<1768x64xf32, #tpu.memory_space<vmem>>, vector<8x64xf32>
    %5 = vector.shape_cast %4 : vector<8x64xf32> to vector<1x8x64xf32>
    %6 = vector.broadcast %5 : vector<1x8x64xf32> to vector<2x8x64xf32>
    %7 = arith.addf %3, %6 : vector<2x8x64xf32>
    %8 = vector.shape_cast %7 : vector<2x8x64xf32> to vector<16x64xf32>
    %9 = tpu.iota {dimensions = array<i32: 1>} : vector<1x8xi32>
    %c5_i32 = arith.constant 5 : i32
    %10 = vector.broadcast %c5_i32 : i32 to vector<1x8xi32>
    %11 = arith.cmpi slt, %9, %10 : vector<1x8xi32>
    %c776 = arith.constant 776 : index
    %c0_4 = arith.constant 0 : index
    %12 = vector.load %arg2[%c776, %c0_4] : memref<1768x64xf32, #tpu.memory_space<vmem>>, vector<1x64xf32>
    %c784 = arith.constant 784 : index
    %c0_5 = arith.constant 0 : index
    %13 = vector.load %arg2[%c784, %c0_5] : memref<1768x64xf32, #tpu.memory_space<vmem>>, vector<1x64xf32>
    %cst_6 = arith.constant dense<0.000000e+00> : vector<16xf32>
    %14 = vector.multi_reduction <add>, %8, %cst_6 [1] : vector<16x64xf32> to vector<16xf32>
    %15 = vector.shape_cast %14 : vector<16xf32> to vector<16x1xf32>
    %cst_7 = arith.constant 6.400000e+01 : f32
    %16 = vector.broadcast %cst_7 : f32 to vector<16x1xf32>
    %17 = arith.divf %15, %16 : vector<16x1xf32>
    %18 = vector.broadcast %17 : vector<16x1xf32> to vector<16x64xf32>
    %19 = arith.subf %8, %18 : vector<16x64xf32>
    %20 = arith.mulf %19, %19 : vector<16x64xf32>
    %cst_8 = arith.constant dense<0.000000e+00> : vector<16xf32>
    %21 = vector.multi_reduction <add>, %20, %cst_8 [1] : vector<16x64xf32> to vector<16xf32>
    %22 = vector.shape_cast %21 : vector<16xf32> to vector<16x1xf32>
    %cst_9 = arith.constant 6.400000e+01 : f32
    %23 = vector.broadcast %cst_9 : f32 to vector<16x1xf32>
    %24 = arith.divf %22, %23 : vector<16x1xf32>
    %cst_10 = arith.constant 9.99999997E-7 : f32
    %25 = vector.broadcast %cst_10 : f32 to vector<16x1xf32>
    %26 = arith.addf %24, %25 : vector<16x1xf32>
    %27 = math.rsqrt %26 : vector<16x1xf32>
    %28 = vector.broadcast %27 : vector<16x1xf32> to vector<16x64xf32>
    %29 = arith.mulf %19, %28 : vector<16x64xf32>
    %30 = vector.broadcast %12 : vector<1x64xf32> to vector<16x64xf32>
    %31 = arith.mulf %29, %30 : vector<16x64xf32>
    %32 = vector.broadcast %13 : vector<1x64xf32> to vector<16x64xf32>
    %33 = arith.addf %31, %32 : vector<16x64xf32>
    %c0_11 = arith.constant 0 : index
    %c0_12 = arith.constant 0 : index
    %34 = vector.load %arg4[%c0_11, %c0_12] : memref<144x192xf32, #tpu.memory_space<vmem>>, vector<64x192xf32>
    %cst_13 = arith.constant dense<0.000000e+00> : vector<16x192xf32>
    %35 = tpu.matmul %33, %34, %cst_13 {dimension_numbers = #tpu.dot_dimension_numbers<[1], [0], [0], [1], [0, 0, 1, 1], [], []>} : vector<16x64xf32>, vector<64x192xf32>, vector<16x192xf32> -> vector<16x192xf32>
    %c64 = arith.constant 64 : index
    %c0_14 = arith.constant 0 : index
    %36 = vector.load %arg4[%c64, %c0_14] : memref<144x192xf32, #tpu.memory_space<vmem>>, vector<1x192xf32>
    %37 = vector.broadcast %36 : vector<1x192xf32> to vector<16x192xf32>
    %38 = arith.addf %35, %37 : vector<16x192xf32>
    %39 = vector.extract_strided_slice %38 {offsets = [0, 0], sizes = [16, 16], strides = [1, 1]} : vector<16x192xf32> to vector<16x16xf32>
    %40 = vector.shape_cast %39 : vector<16x16xf32> to vector<2x8x16xf32>
    %41 = vector.extract_strided_slice %38 {offsets = [0, 64], sizes = [16, 16], strides = [1, 1]} : vector<16x192xf32> to vector<16x16xf32>
    %42 = vector.shape_cast %41 : vector<16x16xf32> to vector<2x8x16xf32>
    %43 = vector.extract_strided_slice %38 {offsets = [0, 128], sizes = [16, 16], strides = [1, 1]} : vector<16x192xf32> to vector<16x16xf32>
    %44 = vector.shape_cast %43 : vector<16x16xf32> to vector<2x8x16xf32>
    "tpu.trace_start"() <{level = 10 : i32, message = "bqd,bkd->bqk"}> : () -> ()
    %cst_15 = arith.constant dense<0.000000e+00> : vector<2x8x8xf32>
    %45 = tpu.matmul %40, %42, %cst_15 {dimension_numbers = #tpu.dot_dimension_numbers<[2], [2], [1], [1], [0, 0, 0, 1, 1, 1], [0], [0]>} : vector<2x8x16xf32>, vector<2x8x16xf32>, vector<2x8x8xf32> -> vector<2x8x8xf32>
    %cst_16 = arith.constant -1.000000e+30 : f32
    "tpu.trace_stop"() : () -> ()
    %46 = vector.shape_cast %11 : vector<1x8xi1> to vector<1x1x8xi1>
    %47 = vector.broadcast %46 : vector<1x1x8xi1> to vector<2x8x8xi1>
    %48 = vector.broadcast %cst_16 : f32 to vector<2x8x8xf32>
    %49 = arith.select %47, %45, %48 : vector<2x8x8xi1>, vector<2x8x8xf32>
    %cst_17 = arith.constant dense<0xFF800000> : vector<2x8xf32>
    %50 = vector.multi_reduction <maximumf>, %49, %cst_17 [2] : vector<2x8x8xf32> to vector<2x8xf32>
    %51 = vector.shape_cast %50 : vector<2x8xf32> to vector<2x8x1xf32>
    %52 = vector.broadcast %51 : vector<2x8x1xf32> to vector<2x8x8xf32>
    %53 = arith.subf %49, %52 : vector<2x8x8xf32>
    %54 = math.exp %53 : vector<2x8x8xf32>
    %cst_18 = arith.constant dense<0.000000e+00> : vector<2x8xf32>
    %55 = vector.multi_reduction <add>, %54, %cst_18 [2] : vector<2x8x8xf32> to vector<2x8xf32>
    %56 = vector.shape_cast %55 : vector<2x8xf32> to vector<2x8x1xf32>
    %57 = tpu.reciprocal %56 {approx = true} : vector<2x8x1xf32> -> vector<2x8x1xf32>
    %58 = vector.broadcast %57 : vector<2x8x1xf32> to vector<2x8x8xf32>
    %59 = arith.mulf %54, %58 : vector<2x8x8xf32>
    "tpu.trace_start"() <{level = 10 : i32, message = "bqk,bkd->bqd"}> : () -> ()
    %cst_19 = arith.constant dense<0.000000e+00> : vector<2x8x16xf32>
    %60 = tpu.matmul %59, %44, %cst_19 {dimension_numbers = #tpu.dot_dimension_numbers<[2], [1], [1], [2], [0, 0, 0, 1, 1, 2], [0], [0]>} : vector<2x8x8xf32>, vector<2x8x16xf32>, vector<2x8x16xf32> -> vector<2x8x16xf32>
    "tpu.trace_stop"() : () -> ()
    %61 = vector.shape_cast %60 : vector<2x8x16xf32> to vector<16x16xf32>
    %62 = vector.extract_strided_slice %38 {offsets = [0, 16], sizes = [16, 16], strides = [1, 1]} : vector<16x192xf32> to vector<16x16xf32>
    %63 = vector.shape_cast %62 : vector<16x16xf32> to vector<2x8x16xf32>
    %64 = vector.extract_strided_slice %38 {offsets = [0, 80], sizes = [16, 16], strides = [1, 1]} : vector<16x192xf32> to vector<16x16xf32>
    %65 = vector.shape_cast %64 : vector<16x16xf32> to vector<2x8x16xf32>
    %66 = vector.extract_strided_slice %38 {offsets = [0, 144], sizes = [16, 16], strides = [1, 1]} : vector<16x192xf32> to vector<16x16xf32>
    %67 = vector.shape_cast %66 : vector<16x16xf32> to vector<2x8x16xf32>
    "tpu.trace_start"() <{level = 10 : i32, message = "bqd,bkd->bqk"}> : () -> ()
    %cst_20 = arith.constant dense<0.000000e+00> : vector<2x8x8xf32>
    %68 = tpu.matmul %63, %65, %cst_20 {dimension_numbers = #tpu.dot_dimension_numbers<[2], [2], [1], [1], [0, 0, 0, 1, 1, 1], [0], [0]>} : vector<2x8x16xf32>, vector<2x8x16xf32>, vector<2x8x8xf32> -> vector<2x8x8xf32>
    %cst_21 = arith.constant -1.000000e+30 : f32
    "tpu.trace_stop"() : () -> ()
    %69 = vector.shape_cast %11 : vector<1x8xi1> to vector<1x1x8xi1>
    %70 = vector.broadcast %69 : vector<1x1x8xi1> to vector<2x8x8xi1>
    %71 = vector.broadcast %cst_21 : f32 to vector<2x8x8xf32>
    %72 = arith.select %70, %68, %71 : vector<2x8x8xi1>, vector<2x8x8xf32>
    %cst_22 = arith.constant dense<0xFF800000> : vector<2x8xf32>
    %73 = vector.multi_reduction <maximumf>, %72, %cst_22 [2] : vector<2x8x8xf32> to vector<2x8xf32>
    %74 = vector.shape_cast %73 : vector<2x8xf32> to vector<2x8x1xf32>
    %75 = vector.broadcast %74 : vector<2x8x1xf32> to vector<2x8x8xf32>
    %76 = arith.subf %72, %75 : vector<2x8x8xf32>
    %77 = math.exp %76 : vector<2x8x8xf32>
    %cst_23 = arith.constant dense<0.000000e+00> : vector<2x8xf32>
    %78 = vector.multi_reduction <add>, %77, %cst_23 [2] : vector<2x8x8xf32> to vector<2x8xf32>
    %79 = vector.shape_cast %78 : vector<2x8xf32> to vector<2x8x1xf32>
    %80 = tpu.reciprocal %79 {approx = true} : vector<2x8x1xf32> -> vector<2x8x1xf32>
    %81 = vector.broadcast %80 : vector<2x8x1xf32> to vector<2x8x8xf32>
    %82 = arith.mulf %77, %81 : vector<2x8x8xf32>
    "tpu.trace_start"() <{level = 10 : i32, message = "bqk,bkd->bqd"}> : () -> ()
    %cst_24 = arith.constant dense<0.000000e+00> : vector<2x8x16xf32>
    %83 = tpu.matmul %82, %67, %cst_24 {dimension_numbers = #tpu.dot_dimension_numbers<[2], [1], [1], [2], [0, 0, 0, 1, 1, 2], [0], [0]>} : vector<2x8x8xf32>, vector<2x8x16xf32>, vector<2x8x16xf32> -> vector<2x8x16xf32>
    "tpu.trace_stop"() : () -> ()
    %84 = vector.shape_cast %83 : vector<2x8x16xf32> to vector<16x16xf32>
    %85 = vector.extract_strided_slice %38 {offsets = [0, 32], sizes = [16, 16], strides = [1, 1]} : vector<16x192xf32> to vector<16x16xf32>
    %86 = vector.shape_cast %85 : vector<16x16xf32> to vector<2x8x16xf32>
    %87 = vector.extract_strided_slice %38 {offsets = [0, 96], sizes = [16, 16], strides = [1, 1]} : vector<16x192xf32> to vector<16x16xf32>
    %88 = vector.shape_cast %87 : vector<16x16xf32> to vector<2x8x16xf32>
    %89 = vector.extract_strided_slice %38 {offsets = [0, 160], sizes = [16, 16], strides = [1, 1]} : vector<16x192xf32> to vector<16x16xf32>
    %90 = vector.shape_cast %89 : vector<16x16xf32> to vector<2x8x16xf32>
    "tpu.trace_start"() <{level = 10 : i32, message = "bqd,bkd->bqk"}> : () -> ()
    %cst_25 = arith.constant dense<0.000000e+00> : vector<2x8x8xf32>
    %91 = tpu.matmul %86, %88, %cst_25 {dimension_numbers = #tpu.dot_dimension_numbers<[2], [2], [1], [1], [0, 0, 0, 1, 1, 1], [0], [0]>} : vector<2x8x16xf32>, vector<2x8x16xf32>, vector<2x8x8xf32> -> vector<2x8x8xf32>
    %cst_26 = arith.constant -1.000000e+30 : f32
    "tpu.trace_stop"() : () -> ()
    %92 = vector.shape_cast %11 : vector<1x8xi1> to vector<1x1x8xi1>
    %93 = vector.broadcast %92 : vector<1x1x8xi1> to vector<2x8x8xi1>
    %94 = vector.broadcast %cst_26 : f32 to vector<2x8x8xf32>
    %95 = arith.select %93, %91, %94 : vector<2x8x8xi1>, vector<2x8x8xf32>
    %cst_27 = arith.constant dense<0xFF800000> : vector<2x8xf32>
    %96 = vector.multi_reduction <maximumf>, %95, %cst_27 [2] : vector<2x8x8xf32> to vector<2x8xf32>
    %97 = vector.shape_cast %96 : vector<2x8xf32> to vector<2x8x1xf32>
    %98 = vector.broadcast %97 : vector<2x8x1xf32> to vector<2x8x8xf32>
    %99 = arith.subf %95, %98 : vector<2x8x8xf32>
    %100 = math.exp %99 : vector<2x8x8xf32>
    %cst_28 = arith.constant dense<0.000000e+00> : vector<2x8xf32>
    %101 = vector.multi_reduction <add>, %100, %cst_28 [2] : vector<2x8x8xf32> to vector<2x8xf32>
    %102 = vector.shape_cast %101 : vector<2x8xf32> to vector<2x8x1xf32>
    %103 = tpu.reciprocal %102 {approx = true} : vector<2x8x1xf32> -> vector<2x8x1xf32>
    %104 = vector.broadcast %103 : vector<2x8x1xf32> to vector<2x8x8xf32>
    %105 = arith.mulf %100, %104 : vector<2x8x8xf32>
    "tpu.trace_start"() <{level = 10 : i32, message = "bqk,bkd->bqd"}> : () -> ()
    %cst_29 = arith.constant dense<0.000000e+00> : vector<2x8x16xf32>
    %106 = tpu.matmul %105, %90, %cst_29 {dimension_numbers = #tpu.dot_dimension_numbers<[2], [1], [1], [2], [0, 0, 0, 1, 1, 2], [0], [0]>} : vector<2x8x8xf32>, vector<2x8x16xf32>, vector<2x8x16xf32> -> vector<2x8x16xf32>
    "tpu.trace_stop"() : () -> ()
    %107 = vector.shape_cast %106 : vector<2x8x16xf32> to vector<16x16xf32>
    %108 = vector.extract_strided_slice %38 {offsets = [0, 48], sizes = [16, 16], strides = [1, 1]} : vector<16x192xf32> to vector<16x16xf32>
    %109 = vector.shape_cast %108 : vector<16x16xf32> to vector<2x8x16xf32>
    %110 = vector.extract_strided_slice %38 {offsets = [0, 112], sizes = [16, 16], strides = [1, 1]} : vector<16x192xf32> to vector<16x16xf32>
    %111 = vector.shape_cast %110 : vector<16x16xf32> to vector<2x8x16xf32>
    %112 = vector.extract_strided_slice %38 {offsets = [0, 176], sizes = [16, 16], strides = [1, 1]} : vector<16x192xf32> to vector<16x16xf32>
    %113 = vector.shape_cast %112 : vector<16x16xf32> to vector<2x8x16xf32>
    "tpu.trace_start"() <{level = 10 : i32, message = "bqd,bkd->bqk"}> : () -> ()
    %cst_30 = arith.constant dense<0.000000e+00> : vector<2x8x8xf32>
    %114 = tpu.matmul %109, %111, %cst_30 {dimension_numbers = #tpu.dot_dimension_numbers<[2], [2], [1], [1], [0, 0, 0, 1, 1, 1], [0], [0]>} : vector<2x8x16xf32>, vector<2x8x16xf32>, vector<2x8x8xf32> -> vector<2x8x8xf32>
    %cst_31 = arith.constant -1.000000e+30 : f32
    "tpu.trace_stop"() : () -> ()
    %115 = vector.shape_cast %11 : vector<1x8xi1> to vector<1x1x8xi1>
    %116 = vector.broadcast %115 : vector<1x1x8xi1> to vector<2x8x8xi1>
    %117 = vector.broadcast %cst_31 : f32 to vector<2x8x8xf32>
    %118 = arith.select %116, %114, %117 : vector<2x8x8xi1>, vector<2x8x8xf32>
    %cst_32 = arith.constant dense<0xFF800000> : vector<2x8xf32>
    %119 = vector.multi_reduction <maximumf>, %118, %cst_32 [2] : vector<2x8x8xf32> to vector<2x8xf32>
    %120 = vector.shape_cast %119 : vector<2x8xf32> to vector<2x8x1xf32>
    %121 = vector.broadcast %120 : vector<2x8x1xf32> to vector<2x8x8xf32>
    %122 = arith.subf %118, %121 : vector<2x8x8xf32>
    %123 = math.exp %122 : vector<2x8x8xf32>
    %cst_33 = arith.constant dense<0.000000e+00> : vector<2x8xf32>
    %124 = vector.multi_reduction <add>, %123, %cst_33 [2] : vector<2x8x8xf32> to vector<2x8xf32>
    %125 = vector.shape_cast %124 : vector<2x8xf32> to vector<2x8x1xf32>
    %126 = tpu.reciprocal %125 {approx = true} : vector<2x8x1xf32> -> vector<2x8x1xf32>
    %127 = vector.broadcast %126 : vector<2x8x1xf32> to vector<2x8x8xf32>
    %128 = arith.mulf %123, %127 : vector<2x8x8xf32>
    "tpu.trace_start"() <{level = 10 : i32, message = "bqk,bkd->bqd"}> : () -> ()
    %cst_34 = arith.constant dense<0.000000e+00> : vector<2x8x16xf32>
    %129 = tpu.matmul %128, %113, %cst_34 {dimension_numbers = #tpu.dot_dimension_numbers<[2], [1], [1], [2], [0, 0, 0, 1, 1, 2], [0], [0]>} : vector<2x8x8xf32>, vector<2x8x16xf32>, vector<2x8x16xf32> -> vector<2x8x16xf32>
    "tpu.trace_stop"() : () -> ()
    %130 = vector.shape_cast %129 : vector<2x8x16xf32> to vector<16x16xf32>
    %131 = tpu.concatenate %61, %84, %107, %130 in 1 : vector<16x16xf32>, vector<16x16xf32>, vector<16x16xf32>, vector<16x16xf32> -> vector<16x64xf32>
    %c792 = arith.constant 792 : index
    %c0_35 = arith.constant 0 : index
    %132 = vector.load %arg2[%c792, %c0_35] : memref<1768x64xf32, #tpu.memory_space<vmem>>, vector<64x64xf32>
    %cst_36 = arith.constant dense<0.000000e+00> : vector<16x64xf32>
    %133 = tpu.matmul %131, %132, %cst_36 {dimension_numbers = #tpu.dot_dimension_numbers<[1], [0], [0], [1], [0, 0, 1, 1], [], []>} : vector<16x64xf32>, vector<64x64xf32>, vector<16x64xf32> -> vector<16x64xf32>
    %c856 = arith.constant 856 : index
    %c0_37 = arith.constant 0 : index
    %134 = vector.load %arg2[%c856, %c0_37] : memref<1768x64xf32, #tpu.memory_space<vmem>>, vector<1x64xf32>
    %135 = vector.broadcast %134 : vector<1x64xf32> to vector<16x64xf32>
    %136 = arith.addf %133, %135 : vector<16x64xf32>
    %137 = arith.addf %8, %136 : vector<16x64xf32>
    %c864 = arith.constant 864 : index
    %c0_38 = arith.constant 0 : index
    %138 = vector.load %arg2[%c864, %c0_38] : memref<1768x64xf32, #tpu.memory_space<vmem>>, vector<1x64xf32>
    %c872 = arith.constant 872 : index
    %c0_39 = arith.constant 0 : index
    %139 = vector.load %arg2[%c872, %c0_39] : memref<1768x64xf32, #tpu.memory_space<vmem>>, vector<1x64xf32>
    %cst_40 = arith.constant dense<0.000000e+00> : vector<16xf32>
    %140 = vector.multi_reduction <add>, %137, %cst_40 [1] : vector<16x64xf32> to vector<16xf32>
    %141 = vector.shape_cast %140 : vector<16xf32> to vector<16x1xf32>
    %cst_41 = arith.constant 6.400000e+01 : f32
    %142 = vector.broadcast %cst_41 : f32 to vector<16x1xf32>
    %143 = arith.divf %141, %142 : vector<16x1xf32>
    %144 = vector.broadcast %143 : vector<16x1xf32> to vector<16x64xf32>
    %145 = arith.subf %137, %144 : vector<16x64xf32>
    %146 = arith.mulf %145, %145 : vector<16x64xf32>
    %cst_42 = arith.constant dense<0.000000e+00> : vector<16xf32>
    %147 = vector.multi_reduction <add>, %146, %cst_42 [1] : vector<16x64xf32> to vector<16xf32>
    %148 = vector.shape_cast %147 : vector<16xf32> to vector<16x1xf32>
    %cst_43 = arith.constant 6.400000e+01 : f32
    %149 = vector.broadcast %cst_43 : f32 to vector<16x1xf32>
    %150 = arith.divf %148, %149 : vector<16x1xf32>
    %cst_44 = arith.constant 9.99999997E-7 : f32
    %151 = vector.broadcast %cst_44 : f32 to vector<16x1xf32>
    %152 = arith.addf %150, %151 : vector<16x1xf32>
    %153 = math.rsqrt %152 : vector<16x1xf32>
    %154 = vector.broadcast %153 : vector<16x1xf32> to vector<16x64xf32>
    %155 = arith.mulf %145, %154 : vector<16x64xf32>
    %156 = vector.broadcast %138 : vector<1x64xf32> to vector<16x64xf32>
    %157 = arith.mulf %155, %156 : vector<16x64xf32>
    %158 = vector.broadcast %139 : vector<1x64xf32> to vector<16x64xf32>
    %159 = arith.addf %157, %158 : vector<16x64xf32>
    %c0_45 = arith.constant 0 : index
    %c0_46 = arith.constant 0 : index
    %160 = vector.load %arg5[%c0_45, %c0_46] : memref<144x256xf32, #tpu.memory_space<vmem>>, vector<64x256xf32>
    %cst_47 = arith.constant dense<0.000000e+00> : vector<16x256xf32>
    %161 = tpu.matmul %159, %160, %cst_47 {dimension_numbers = #tpu.dot_dimension_numbers<[1], [0], [0], [1], [0, 0, 1, 1], [], []>} : vector<16x64xf32>, vector<64x256xf32>, vector<16x256xf32> -> vector<16x256xf32>
    %c64_48 = arith.constant 64 : index
    %c0_49 = arith.constant 0 : index
    %162 = vector.load %arg5[%c64_48, %c0_49] : memref<144x256xf32, #tpu.memory_space<vmem>>, vector<1x256xf32>
    %163 = vector.broadcast %162 : vector<1x256xf32> to vector<16x256xf32>
    %164 = arith.addf %161, %163 : vector<16x256xf32>
    %cst_50 = arith.constant 5.000000e-01 : f32
    %165 = vector.broadcast %cst_50 : f32 to vector<16x256xf32>
    %166 = arith.mulf %165, %164 : vector<16x256xf32>
    %cst_51 = arith.constant 0.707106769 : f32
    %167 = vector.broadcast %cst_51 : f32 to vector<16x256xf32>
    %168 = arith.mulf %164, %167 : vector<16x256xf32>
    %169 = math.erf %168 : vector<16x256xf32>
    %cst_52 = arith.constant 1.000000e+00 : f32
    %170 = vector.broadcast %cst_52 : f32 to vector<16x256xf32>
    %171 = arith.addf %170, %169 : vector<16x256xf32>
    %172 = arith.mulf %166, %171 : vector<16x256xf32>
    %c880 = arith.constant 880 : index
    %c0_53 = arith.constant 0 : index
    %173 = vector.load %arg2[%c880, %c0_53] : memref<1768x64xf32, #tpu.memory_space<vmem>>, vector<256x64xf32>
    %cst_54 = arith.constant dense<0.000000e+00> : vector<16x64xf32>
    %174 = tpu.matmul %172, %173, %cst_54 {dimension_numbers = #tpu.dot_dimension_numbers<[1], [0], [0], [1], [0, 0, 1, 1], [], []>} : vector<16x256xf32>, vector<256x64xf32>, vector<16x64xf32> -> vector<16x64xf32>
    %c1136 = arith.constant 1136 : index
    %c0_55 = arith.constant 0 : index
    %175 = vector.load %arg2[%c1136, %c0_55] : memref<1768x64xf32, #tpu.memory_space<vmem>>, vector<1x64xf32>
    %176 = vector.broadcast %175 : vector<1x64xf32> to vector<16x64xf32>
    %177 = arith.addf %174, %176 : vector<16x64xf32>
    %178 = arith.addf %137, %177 : vector<16x64xf32>
    %c1144 = arith.constant 1144 : index
    %c0_56 = arith.constant 0 : index
    %179 = vector.load %arg2[%c1144, %c0_56] : memref<1768x64xf32, #tpu.memory_space<vmem>>, vector<1x64xf32>
    %c1152 = arith.constant 1152 : index
    %c0_57 = arith.constant 0 : index
    %180 = vector.load %arg2[%c1152, %c0_57] : memref<1768x64xf32, #tpu.memory_space<vmem>>, vector<1x64xf32>
    %cst_58 = arith.constant dense<0.000000e+00> : vector<16xf32>
    %181 = vector.multi_reduction <add>, %178, %cst_58 [1] : vector<16x64xf32> to vector<16xf32>
    %182 = vector.shape_cast %181 : vector<16xf32> to vector<16x1xf32>
    %cst_59 = arith.constant 6.400000e+01 : f32
    %183 = vector.broadcast %cst_59 : f32 to vector<16x1xf32>
    %184 = arith.divf %182, %183 : vector<16x1xf32>
    %185 = vector.broadcast %184 : vector<16x1xf32> to vector<16x64xf32>
    %186 = arith.subf %178, %185 : vector<16x64xf32>
    %187 = arith.mulf %186, %186 : vector<16x64xf32>
    %cst_60 = arith.constant dense<0.000000e+00> : vector<16xf32>
    %188 = vector.multi_reduction <add>, %187, %cst_60 [1] : vector<16x64xf32> to vector<16xf32>
    %189 = vector.shape_cast %188 : vector<16xf32> to vector<16x1xf32>
    %cst_61 = arith.constant 6.400000e+01 : f32
    %190 = vector.broadcast %cst_61 : f32 to vector<16x1xf32>
    %191 = arith.divf %189, %190 : vector<16x1xf32>
    %cst_62 = arith.constant 9.99999997E-7 : f32
    %192 = vector.broadcast %cst_62 : f32 to vector<16x1xf32>
    %193 = arith.addf %191, %192 : vector<16x1xf32>
    %194 = math.rsqrt %193 : vector<16x1xf32>
    %195 = vector.broadcast %194 : vector<16x1xf32> to vector<16x64xf32>
    %196 = arith.mulf %186, %195 : vector<16x64xf32>
    %197 = vector.broadcast %179 : vector<1x64xf32> to vector<16x64xf32>
    %198 = arith.mulf %196, %197 : vector<16x64xf32>
    %199 = vector.broadcast %180 : vector<1x64xf32> to vector<16x64xf32>
    %200 = arith.addf %198, %199 : vector<16x64xf32>
    %c72 = arith.constant 72 : index
    %c0_63 = arith.constant 0 : index
    %201 = vector.load %arg4[%c72, %c0_63] : memref<144x192xf32, #tpu.memory_space<vmem>>, vector<64x192xf32>
    %cst_64 = arith.constant dense<0.000000e+00> : vector<16x192xf32>
    %202 = tpu.matmul %200, %201, %cst_64 {dimension_numbers = #tpu.dot_dimension_numbers<[1], [0], [0], [1], [0, 0, 1, 1], [], []>} : vector<16x64xf32>, vector<64x192xf32>, vector<16x192xf32> -> vector<16x192xf32>
    %c136 = arith.constant 136 : index
    %c0_65 = arith.constant 0 : index
    %203 = vector.load %arg4[%c136, %c0_65] : memref<144x192xf32, #tpu.memory_space<vmem>>, vector<1x192xf32>
    %204 = vector.broadcast %203 : vector<1x192xf32> to vector<16x192xf32>
    %205 = arith.addf %202, %204 : vector<16x192xf32>
    %206 = vector.extract_strided_slice %205 {offsets = [0, 0], sizes = [16, 16], strides = [1, 1]} : vector<16x192xf32> to vector<16x16xf32>
    %207 = vector.shape_cast %206 : vector<16x16xf32> to vector<2x8x16xf32>
    %208 = vector.extract_strided_slice %205 {offsets = [0, 64], sizes = [16, 16], strides = [1, 1]} : vector<16x192xf32> to vector<16x16xf32>
    %209 = vector.shape_cast %208 : vector<16x16xf32> to vector<2x8x16xf32>
    %210 = vector.extract_strided_slice %205 {offsets = [0, 128], sizes = [16, 16], strides = [1, 1]} : vector<16x192xf32> to vector<16x16xf32>
    %211 = vector.shape_cast %210 : vector<16x16xf32> to vector<2x8x16xf32>
    "tpu.trace_start"() <{level = 10 : i32, message = "bqd,bkd->bqk"}> : () -> ()
    %cst_66 = arith.constant dense<0.000000e+00> : vector<2x8x8xf32>
    %212 = tpu.matmul %207, %209, %cst_66 {dimension_numbers = #tpu.dot_dimension_numbers<[2], [2], [1], [1], [0, 0, 0, 1, 1, 1], [0], [0]>} : vector<2x8x16xf32>, vector<2x8x16xf32>, vector<2x8x8xf32> -> vector<2x8x8xf32>
    %cst_67 = arith.constant -1.000000e+30 : f32
    "tpu.trace_stop"() : () -> ()
    %213 = vector.shape_cast %11 : vector<1x8xi1> to vector<1x1x8xi1>
    %214 = vector.broadcast %213 : vector<1x1x8xi1> to vector<2x8x8xi1>
    %215 = vector.broadcast %cst_67 : f32 to vector<2x8x8xf32>
    %216 = arith.select %214, %212, %215 : vector<2x8x8xi1>, vector<2x8x8xf32>
    %cst_68 = arith.constant dense<0xFF800000> : vector<2x8xf32>
    %217 = vector.multi_reduction <maximumf>, %216, %cst_68 [2] : vector<2x8x8xf32> to vector<2x8xf32>
    %218 = vector.shape_cast %217 : vector<2x8xf32> to vector<2x8x1xf32>
    %219 = vector.broadcast %218 : vector<2x8x1xf32> to vector<2x8x8xf32>
    %220 = arith.subf %216, %219 : vector<2x8x8xf32>
    %221 = math.exp %220 : vector<2x8x8xf32>
    %cst_69 = arith.constant dense<0.000000e+00> : vector<2x8xf32>
    %222 = vector.multi_reduction <add>, %221, %cst_69 [2] : vector<2x8x8xf32> to vector<2x8xf32>
    %223 = vector.shape_cast %222 : vector<2x8xf32> to vector<2x8x1xf32>
    %224 = tpu.reciprocal %223 {approx = true} : vector<2x8x1xf32> -> vector<2x8x1xf32>
    %225 = vector.broadcast %224 : vector<2x8x1xf32> to vector<2x8x8xf32>
    %226 = arith.mulf %221, %225 : vector<2x8x8xf32>
    "tpu.trace_start"() <{level = 10 : i32, message = "bqk,bkd->bqd"}> : () -> ()
    %cst_70 = arith.constant dense<0.000000e+00> : vector<2x8x16xf32>
    %227 = tpu.matmul %226, %211, %cst_70 {dimension_numbers = #tpu.dot_dimension_numbers<[2], [1], [1], [2], [0, 0, 0, 1, 1, 2], [0], [0]>} : vector<2x8x8xf32>, vector<2x8x16xf32>, vector<2x8x16xf32> -> vector<2x8x16xf32>
    "tpu.trace_stop"() : () -> ()
    %228 = vector.shape_cast %227 : vector<2x8x16xf32> to vector<16x16xf32>
    %229 = vector.extract_strided_slice %205 {offsets = [0, 16], sizes = [16, 16], strides = [1, 1]} : vector<16x192xf32> to vector<16x16xf32>
    %230 = vector.shape_cast %229 : vector<16x16xf32> to vector<2x8x16xf32>
    %231 = vector.extract_strided_slice %205 {offsets = [0, 80], sizes = [16, 16], strides = [1, 1]} : vector<16x192xf32> to vector<16x16xf32>
    %232 = vector.shape_cast %231 : vector<16x16xf32> to vector<2x8x16xf32>
    %233 = vector.extract_strided_slice %205 {offsets = [0, 144], sizes = [16, 16], strides = [1, 1]} : vector<16x192xf32> to vector<16x16xf32>
    %234 = vector.shape_cast %233 : vector<16x16xf32> to vector<2x8x16xf32>
    "tpu.trace_start"() <{level = 10 : i32, message = "bqd,bkd->bqk"}> : () -> ()
    %cst_71 = arith.constant dense<0.000000e+00> : vector<2x8x8xf32>
    %235 = tpu.matmul %230, %232, %cst_71 {dimension_numbers = #tpu.dot_dimension_numbers<[2], [2], [1], [1], [0, 0, 0, 1, 1, 1], [0], [0]>} : vector<2x8x16xf32>, vector<2x8x16xf32>, vector<2x8x8xf32> -> vector<2x8x8xf32>
    %cst_72 = arith.constant -1.000000e+30 : f32
    "tpu.trace_stop"() : () -> ()
    %236 = vector.shape_cast %11 : vector<1x8xi1> to vector<1x1x8xi1>
    %237 = vector.broadcast %236 : vector<1x1x8xi1> to vector<2x8x8xi1>
    %238 = vector.broadcast %cst_72 : f32 to vector<2x8x8xf32>
    %239 = arith.select %237, %235, %238 : vector<2x8x8xi1>, vector<2x8x8xf32>
    %cst_73 = arith.constant dense<0xFF800000> : vector<2x8xf32>
    %240 = vector.multi_reduction <maximumf>, %239, %cst_73 [2] : vector<2x8x8xf32> to vector<2x8xf32>
    %241 = vector.shape_cast %240 : vector<2x8xf32> to vector<2x8x1xf32>
    %242 = vector.broadcast %241 : vector<2x8x1xf32> to vector<2x8x8xf32>
    %243 = arith.subf %239, %242 : vector<2x8x8xf32>
    %244 = math.exp %243 : vector<2x8x8xf32>
    %cst_74 = arith.constant dense<0.000000e+00> : vector<2x8xf32>
    %245 = vector.multi_reduction <add>, %244, %cst_74 [2] : vector<2x8x8xf32> to vector<2x8xf32>
    %246 = vector.shape_cast %245 : vector<2x8xf32> to vector<2x8x1xf32>
    %247 = tpu.reciprocal %246 {approx = true} : vector<2x8x1xf32> -> vector<2x8x1xf32>
    %248 = vector.broadcast %247 : vector<2x8x1xf32> to vector<2x8x8xf32>
    %249 = arith.mulf %244, %248 : vector<2x8x8xf32>
    "tpu.trace_start"() <{level = 10 : i32, message = "bqk,bkd->bqd"}> : () -> ()
    %cst_75 = arith.constant dense<0.000000e+00> : vector<2x8x16xf32>
    %250 = tpu.matmul %249, %234, %cst_75 {dimension_numbers = #tpu.dot_dimension_numbers<[2], [1], [1], [2], [0, 0, 0, 1, 1, 2], [0], [0]>} : vector<2x8x8xf32>, vector<2x8x16xf32>, vector<2x8x16xf32> -> vector<2x8x16xf32>
    "tpu.trace_stop"() : () -> ()
    %251 = vector.shape_cast %250 : vector<2x8x16xf32> to vector<16x16xf32>
    %252 = vector.extract_strided_slice %205 {offsets = [0, 32], sizes = [16, 16], strides = [1, 1]} : vector<16x192xf32> to vector<16x16xf32>
    %253 = vector.shape_cast %252 : vector<16x16xf32> to vector<2x8x16xf32>
    %254 = vector.extract_strided_slice %205 {offsets = [0, 96], sizes = [16, 16], strides = [1, 1]} : vector<16x192xf32> to vector<16x16xf32>
    %255 = vector.shape_cast %254 : vector<16x16xf32> to vector<2x8x16xf32>
    %256 = vector.extract_strided_slice %205 {offsets = [0, 160], sizes = [16, 16], strides = [1, 1]} : vector<16x192xf32> to vector<16x16xf32>
    %257 = vector.shape_cast %256 : vector<16x16xf32> to vector<2x8x16xf32>
    "tpu.trace_start"() <{level = 10 : i32, message = "bqd,bkd->bqk"}> : () -> ()
    %cst_76 = arith.constant dense<0.000000e+00> : vector<2x8x8xf32>
    %258 = tpu.matmul %253, %255, %cst_76 {dimension_numbers = #tpu.dot_dimension_numbers<[2], [2], [1], [1], [0, 0, 0, 1, 1, 1], [0], [0]>} : vector<2x8x16xf32>, vector<2x8x16xf32>, vector<2x8x8xf32> -> vector<2x8x8xf32>
    %cst_77 = arith.constant -1.000000e+30 : f32
    "tpu.trace_stop"() : () -> ()
    %259 = vector.shape_cast %11 : vector<1x8xi1> to vector<1x1x8xi1>
    %260 = vector.broadcast %259 : vector<1x1x8xi1> to vector<2x8x8xi1>
    %261 = vector.broadcast %cst_77 : f32 to vector<2x8x8xf32>
    %262 = arith.select %260, %258, %261 : vector<2x8x8xi1>, vector<2x8x8xf32>
    %cst_78 = arith.constant dense<0xFF800000> : vector<2x8xf32>
    %263 = vector.multi_reduction <maximumf>, %262, %cst_78 [2] : vector<2x8x8xf32> to vector<2x8xf32>
    %264 = vector.shape_cast %263 : vector<2x8xf32> to vector<2x8x1xf32>
    %265 = vector.broadcast %264 : vector<2x8x1xf32> to vector<2x8x8xf32>
    %266 = arith.subf %262, %265 : vector<2x8x8xf32>
    %267 = math.exp %266 : vector<2x8x8xf32>
    %cst_79 = arith.constant dense<0.000000e+00> : vector<2x8xf32>
    %268 = vector.multi_reduction <add>, %267, %cst_79 [2] : vector<2x8x8xf32> to vector<2x8xf32>
    %269 = vector.shape_cast %268 : vector<2x8xf32> to vector<2x8x1xf32>
    %270 = tpu.reciprocal %269 {approx = true} : vector<2x8x1xf32> -> vector<2x8x1xf32>
    %271 = vector.broadcast %270 : vector<2x8x1xf32> to vector<2x8x8xf32>
    %272 = arith.mulf %267, %271 : vector<2x8x8xf32>
    "tpu.trace_start"() <{level = 10 : i32, message = "bqk,bkd->bqd"}> : () -> ()
    %cst_80 = arith.constant dense<0.000000e+00> : vector<2x8x16xf32>
    %273 = tpu.matmul %272, %257, %cst_80 {dimension_numbers = #tpu.dot_dimension_numbers<[2], [1], [1], [2], [0, 0, 0, 1, 1, 2], [0], [0]>} : vector<2x8x8xf32>, vector<2x8x16xf32>, vector<2x8x16xf32> -> vector<2x8x16xf32>
    "tpu.trace_stop"() : () -> ()
    %274 = vector.shape_cast %273 : vector<2x8x16xf32> to vector<16x16xf32>
    %275 = vector.extract_strided_slice %205 {offsets = [0, 48], sizes = [16, 16], strides = [1, 1]} : vector<16x192xf32> to vector<16x16xf32>
    %276 = vector.shape_cast %275 : vector<16x16xf32> to vector<2x8x16xf32>
    %277 = vector.extract_strided_slice %205 {offsets = [0, 112], sizes = [16, 16], strides = [1, 1]} : vector<16x192xf32> to vector<16x16xf32>
    %278 = vector.shape_cast %277 : vector<16x16xf32> to vector<2x8x16xf32>
    %279 = vector.extract_strided_slice %205 {offsets = [0, 176], sizes = [16, 16], strides = [1, 1]} : vector<16x192xf32> to vector<16x16xf32>
    %280 = vector.shape_cast %279 : vector<16x16xf32> to vector<2x8x16xf32>
    "tpu.trace_start"() <{level = 10 : i32, message = "bqd,bkd->bqk"}> : () -> ()
    %cst_81 = arith.constant dense<0.000000e+00> : vector<2x8x8xf32>
    %281 = tpu.matmul %276, %278, %cst_81 {dimension_numbers = #tpu.dot_dimension_numbers<[2], [2], [1], [1], [0, 0, 0, 1, 1, 1], [0], [0]>} : vector<2x8x16xf32>, vector<2x8x16xf32>, vector<2x8x8xf32> -> vector<2x8x8xf32>
    %cst_82 = arith.constant -1.000000e+30 : f32
    "tpu.trace_stop"() : () -> ()
    %282 = vector.shape_cast %11 : vector<1x8xi1> to vector<1x1x8xi1>
    %283 = vector.broadcast %282 : vector<1x1x8xi1> to vector<2x8x8xi1>
    %284 = vector.broadcast %cst_82 : f32 to vector<2x8x8xf32>
    %285 = arith.select %283, %281, %284 : vector<2x8x8xi1>, vector<2x8x8xf32>
    %cst_83 = arith.constant dense<0xFF800000> : vector<2x8xf32>
    %286 = vector.multi_reduction <maximumf>, %285, %cst_83 [2] : vector<2x8x8xf32> to vector<2x8xf32>
    %287 = vector.shape_cast %286 : vector<2x8xf32> to vector<2x8x1xf32>
    %288 = vector.broadcast %287 : vector<2x8x1xf32> to vector<2x8x8xf32>
    %289 = arith.subf %285, %288 : vector<2x8x8xf32>
    %290 = math.exp %289 : vector<2x8x8xf32>
    %cst_84 = arith.constant dense<0.000000e+00> : vector<2x8xf32>
    %291 = vector.multi_reduction <add>, %290, %cst_84 [2] : vector<2x8x8xf32> to vector<2x8xf32>
    %292 = vector.shape_cast %291 : vector<2x8xf32> to vector<2x8x1xf32>
    %293 = tpu.reciprocal %292 {approx = true} : vector<2x8x1xf32> -> vector<2x8x1xf32>
    %294 = vector.broadcast %293 : vector<2x8x1xf32> to vector<2x8x8xf32>
    %295 = arith.mulf %290, %294 : vector<2x8x8xf32>
    "tpu.trace_start"() <{level = 10 : i32, message = "bqk,bkd->bqd"}> : () -> ()
    %cst_85 = arith.constant dense<0.000000e+00> : vector<2x8x16xf32>
    %296 = tpu.matmul %295, %280, %cst_85 {dimension_numbers = #tpu.dot_dimension_numbers<[2], [1], [1], [2], [0, 0, 0, 1, 1, 2], [0], [0]>} : vector<2x8x8xf32>, vector<2x8x16xf32>, vector<2x8x16xf32> -> vector<2x8x16xf32>
    "tpu.trace_stop"() : () -> ()
    %297 = vector.shape_cast %296 : vector<2x8x16xf32> to vector<16x16xf32>
    %298 = tpu.concatenate %228, %251, %274, %297 in 1 : vector<16x16xf32>, vector<16x16xf32>, vector<16x16xf32>, vector<16x16xf32> -> vector<16x64xf32>
    %c1160 = arith.constant 1160 : index
    %c0_86 = arith.constant 0 : index
    %299 = vector.load %arg2[%c1160, %c0_86] : memref<1768x64xf32, #tpu.memory_space<vmem>>, vector<64x64xf32>
    %cst_87 = arith.constant dense<0.000000e+00> : vector<16x64xf32>
    %300 = tpu.matmul %298, %299, %cst_87 {dimension_numbers = #tpu.dot_dimension_numbers<[1], [0], [0], [1], [0, 0, 1, 1], [], []>} : vector<16x64xf32>, vector<64x64xf32>, vector<16x64xf32> -> vector<16x64xf32>
    %c1224 = arith.constant 1224 : index
    %c0_88 = arith.constant 0 : index
    %301 = vector.load %arg2[%c1224, %c0_88] : memref<1768x64xf32, #tpu.memory_space<vmem>>, vector<1x64xf32>
    %302 = vector.broadcast %301 : vector<1x64xf32> to vector<16x64xf32>
    %303 = arith.addf %300, %302 : vector<16x64xf32>
    %304 = arith.addf %178, %303 : vector<16x64xf32>
    %c1232 = arith.constant 1232 : index
    %c0_89 = arith.constant 0 : index
    %305 = vector.load %arg2[%c1232, %c0_89] : memref<1768x64xf32, #tpu.memory_space<vmem>>, vector<1x64xf32>
    %c1240 = arith.constant 1240 : index
    %c0_90 = arith.constant 0 : index
    %306 = vector.load %arg2[%c1240, %c0_90] : memref<1768x64xf32, #tpu.memory_space<vmem>>, vector<1x64xf32>
    %cst_91 = arith.constant dense<0.000000e+00> : vector<16xf32>
    %307 = vector.multi_reduction <add>, %304, %cst_91 [1] : vector<16x64xf32> to vector<16xf32>
    %308 = vector.shape_cast %307 : vector<16xf32> to vector<16x1xf32>
    %cst_92 = arith.constant 6.400000e+01 : f32
    %309 = vector.broadcast %cst_92 : f32 to vector<16x1xf32>
    %310 = arith.divf %308, %309 : vector<16x1xf32>
    %311 = vector.broadcast %310 : vector<16x1xf32> to vector<16x64xf32>
    %312 = arith.subf %304, %311 : vector<16x64xf32>
    %313 = arith.mulf %312, %312 : vector<16x64xf32>
    %cst_93 = arith.constant dense<0.000000e+00> : vector<16xf32>
    %314 = vector.multi_reduction <add>, %313, %cst_93 [1] : vector<16x64xf32> to vector<16xf32>
    %315 = vector.shape_cast %314 : vector<16xf32> to vector<16x1xf32>
    %cst_94 = arith.constant 6.400000e+01 : f32
    %316 = vector.broadcast %cst_94 : f32 to vector<16x1xf32>
    %317 = arith.divf %315, %316 : vector<16x1xf32>
    %cst_95 = arith.constant 9.99999997E-7 : f32
    %318 = vector.broadcast %cst_95 : f32 to vector<16x1xf32>
    %319 = arith.addf %317, %318 : vector<16x1xf32>
    %320 = math.rsqrt %319 : vector<16x1xf32>
    %321 = vector.broadcast %320 : vector<16x1xf32> to vector<16x64xf32>
    %322 = arith.mulf %312, %321 : vector<16x64xf32>
    %323 = vector.broadcast %305 : vector<1x64xf32> to vector<16x64xf32>
    %324 = arith.mulf %322, %323 : vector<16x64xf32>
    %325 = vector.broadcast %306 : vector<1x64xf32> to vector<16x64xf32>
    %326 = arith.addf %324, %325 : vector<16x64xf32>
    %c72_96 = arith.constant 72 : index
    %c0_97 = arith.constant 0 : index
    %327 = vector.load %arg5[%c72_96, %c0_97] : memref<144x256xf32, #tpu.memory_space<vmem>>, vector<64x256xf32>
    %cst_98 = arith.constant dense<0.000000e+00> : vector<16x256xf32>
    %328 = tpu.matmul %326, %327, %cst_98 {dimension_numbers = #tpu.dot_dimension_numbers<[1], [0], [0], [1], [0, 0, 1, 1], [], []>} : vector<16x64xf32>, vector<64x256xf32>, vector<16x256xf32> -> vector<16x256xf32>
    %c136_99 = arith.constant 136 : index
    %c0_100 = arith.constant 0 : index
    %329 = vector.load %arg5[%c136_99, %c0_100] : memref<144x256xf32, #tpu.memory_space<vmem>>, vector<1x256xf32>
    %330 = vector.broadcast %329 : vector<1x256xf32> to vector<16x256xf32>
    %331 = arith.addf %328, %330 : vector<16x256xf32>
    %cst_101 = arith.constant 5.000000e-01 : f32
    %332 = vector.broadcast %cst_101 : f32 to vector<16x256xf32>
    %333 = arith.mulf %332, %331 : vector<16x256xf32>
    %cst_102 = arith.constant 0.707106769 : f32
    %334 = vector.broadcast %cst_102 : f32 to vector<16x256xf32>
    %335 = arith.mulf %331, %334 : vector<16x256xf32>
    %336 = math.erf %335 : vector<16x256xf32>
    %cst_103 = arith.constant 1.000000e+00 : f32
    %337 = vector.broadcast %cst_103 : f32 to vector<16x256xf32>
    %338 = arith.addf %337, %336 : vector<16x256xf32>
    %339 = arith.mulf %333, %338 : vector<16x256xf32>
    %c1248 = arith.constant 1248 : index
    %c0_104 = arith.constant 0 : index
    %340 = vector.load %arg2[%c1248, %c0_104] : memref<1768x64xf32, #tpu.memory_space<vmem>>, vector<256x64xf32>
    %cst_105 = arith.constant dense<0.000000e+00> : vector<16x64xf32>
    %341 = tpu.matmul %339, %340, %cst_105 {dimension_numbers = #tpu.dot_dimension_numbers<[1], [0], [0], [1], [0, 0, 1, 1], [], []>} : vector<16x256xf32>, vector<256x64xf32>, vector<16x64xf32> -> vector<16x64xf32>
    %c1504 = arith.constant 1504 : index
    %c0_106 = arith.constant 0 : index
    %342 = vector.load %arg2[%c1504, %c0_106] : memref<1768x64xf32, #tpu.memory_space<vmem>>, vector<1x64xf32>
    %343 = vector.broadcast %342 : vector<1x64xf32> to vector<16x64xf32>
    %344 = arith.addf %341, %343 : vector<16x64xf32>
    %345 = arith.addf %304, %344 : vector<16x64xf32>
    %c1512 = arith.constant 1512 : index
    %c0_107 = arith.constant 0 : index
    %346 = vector.load %arg2[%c1512, %c0_107] : memref<1768x64xf32, #tpu.memory_space<vmem>>, vector<1x64xf32>
    %c1520 = arith.constant 1520 : index
    %c0_108 = arith.constant 0 : index
    %347 = vector.load %arg2[%c1520, %c0_108] : memref<1768x64xf32, #tpu.memory_space<vmem>>, vector<1x64xf32>
    %cst_109 = arith.constant dense<0.000000e+00> : vector<16xf32>
    %348 = vector.multi_reduction <add>, %345, %cst_109 [1] : vector<16x64xf32> to vector<16xf32>
    %349 = vector.shape_cast %348 : vector<16xf32> to vector<16x1xf32>
    %cst_110 = arith.constant 6.400000e+01 : f32
    %350 = vector.broadcast %cst_110 : f32 to vector<16x1xf32>
    %351 = arith.divf %349, %350 : vector<16x1xf32>
    %352 = vector.broadcast %351 : vector<16x1xf32> to vector<16x64xf32>
    %353 = arith.subf %345, %352 : vector<16x64xf32>
    %354 = arith.mulf %353, %353 : vector<16x64xf32>
    %cst_111 = arith.constant dense<0.000000e+00> : vector<16xf32>
    %355 = vector.multi_reduction <add>, %354, %cst_111 [1] : vector<16x64xf32> to vector<16xf32>
    %356 = vector.shape_cast %355 : vector<16xf32> to vector<16x1xf32>
    %cst_112 = arith.constant 6.400000e+01 : f32
    %357 = vector.broadcast %cst_112 : f32 to vector<16x1xf32>
    %358 = arith.divf %356, %357 : vector<16x1xf32>
    %cst_113 = arith.constant 9.99999997E-7 : f32
    %359 = vector.broadcast %cst_113 : f32 to vector<16x1xf32>
    %360 = arith.addf %358, %359 : vector<16x1xf32>
    %361 = math.rsqrt %360 : vector<16x1xf32>
    %362 = vector.broadcast %361 : vector<16x1xf32> to vector<16x64xf32>
    %363 = arith.mulf %353, %362 : vector<16x64xf32>
    %364 = vector.broadcast %346 : vector<1x64xf32> to vector<16x64xf32>
    %365 = arith.mulf %363, %364 : vector<16x64xf32>
    %366 = vector.broadcast %347 : vector<1x64xf32> to vector<16x64xf32>
    %367 = arith.addf %365, %366 : vector<16x64xf32>
    %368 = vector.shape_cast %367 : vector<16x64xf32> to vector<2x8x64xf32>
    %369 = vector.extract_strided_slice %368 {offsets = [0, 0, 0], sizes = [2, 1, 64], strides = [1, 1, 1]} : vector<2x8x64xf32> to vector<2x1x64xf32>
    %370 = vector.shape_cast %369 : vector<2x1x64xf32> to vector<2x64xf32>
    %c0_114 = arith.constant 0 : index
    %c0_115 = arith.constant 0 : index
    %371 = vector.load %arg1[%c0_114, %c0_115] : memref<912x32xf32, #tpu.memory_space<vmem>>, vector<64x32xf32>
    %cst_116 = arith.constant dense<0.000000e+00> : vector<2x32xf32>
    %372 = tpu.matmul %370, %371, %cst_116 {dimension_numbers = #tpu.dot_dimension_numbers<[1], [0], [0], [1], [0, 0, 1, 1], [], []>} : vector<2x64xf32>, vector<64x32xf32>, vector<2x32xf32> -> vector<2x32xf32>
    %c64_117 = arith.constant 64 : index
    %c0_118 = arith.constant 0 : index
    %373 = vector.load %arg1[%c64_117, %c0_118] : memref<912x32xf32, #tpu.memory_space<vmem>>, vector<1x32xf32>
    %374 = vector.broadcast %373 : vector<1x32xf32> to vector<2x32xf32>
    %375 = arith.addf %372, %374 : vector<2x32xf32>
    %c0_119 = arith.constant 0 : index
    %c0_120 = arith.constant 0 : index
    %376 = vector.load %arg3[%c0_119, %c0_120] : memref<160x96xf32, #tpu.memory_space<vmem>>, vector<32x96xf32>
    %c32 = arith.constant 32 : index
    %c0_121 = arith.constant 0 : index
    %377 = vector.load %arg3[%c32, %c0_121] : memref<160x96xf32, #tpu.memory_space<vmem>>, vector<1x96xf32>
    %c72_122 = arith.constant 72 : index
    %c0_123 = arith.constant 0 : index
    %378 = vector.load %arg1[%c72_122, %c0_123] : memref<912x32xf32, #tpu.memory_space<vmem>>, vector<32x32xf32>
    %c104 = arith.constant 104 : index
    %c0_124 = arith.constant 0 : index
    %379 = vector.load %arg1[%c104, %c0_124] : memref<912x32xf32, #tpu.memory_space<vmem>>, vector<1x32xf32>
    %cst_125 = arith.constant dense<0.000000e+00> : vector<2x96xf32>
    %380 = tpu.matmul %375, %376, %cst_125 {dimension_numbers = #tpu.dot_dimension_numbers<[1], [0], [0], [1], [0, 0, 1, 1], [], []>} : vector<2x32xf32>, vector<32x96xf32>, vector<2x96xf32> -> vector<2x96xf32>
    %381 = vector.broadcast %377 : vector<1x96xf32> to vector<2x96xf32>
    %382 = arith.addf %380, %381 : vector<2x96xf32>
    %383 = vector.extract_strided_slice %382 {offsets = [0, 0], sizes = [2, 8], strides = [1, 1]} : vector<2x96xf32> to vector<2x8xf32>
    %384 = vector.extract_strided_slice %382 {offsets = [0, 32], sizes = [2, 8], strides = [1, 1]} : vector<2x96xf32> to vector<2x8xf32>
    %cst_126 = arith.constant dense<0.000000e+00> : vector<2x2xf32>
    %385 = tpu.matmul %383, %384, %cst_126 {dimension_numbers = #tpu.dot_dimension_numbers<[1], [1], [0], [0], [0, 0, 1, 0], [], []>} : vector<2x8xf32>, vector<2x8xf32>, vector<2x2xf32> -> vector<2x2xf32>
    %cst_127 = arith.constant dense<0xFF800000> : vector<2xf32>
    %386 = vector.multi_reduction <maximumf>, %385, %cst_127 [1] : vector<2x2xf32> to vector<2xf32>
    %387 = vector.shape_cast %386 : vector<2xf32> to vector<2x1xf32>
    %388 = vector.broadcast %387 : vector<2x1xf32> to vector<2x2xf32>
    %389 = arith.subf %385, %388 : vector<2x2xf32>
    %390 = math.exp %389 : vector<2x2xf32>
    %cst_128 = arith.constant dense<0.000000e+00> : vector<2xf32>
    %391 = vector.multi_reduction <add>, %390, %cst_128 [1] : vector<2x2xf32> to vector<2xf32>
    %392 = vector.shape_cast %391 : vector<2xf32> to vector<2x1xf32>
    %393 = tpu.reciprocal %392 {approx = true} : vector<2x1xf32> -> vector<2x1xf32>
    %394 = vector.broadcast %393 : vector<2x1xf32> to vector<2x2xf32>
    %395 = arith.mulf %390, %394 : vector<2x2xf32>
    %396 = vector.extract_strided_slice %382 {offsets = [0, 64], sizes = [2, 8], strides = [1, 1]} : vector<2x96xf32> to vector<2x8xf32>
    %cst_129 = arith.constant dense<0.000000e+00> : vector<2x8xf32>
    %397 = tpu.matmul %395, %396, %cst_129 {dimension_numbers = #tpu.dot_dimension_numbers<[1], [0], [0], [1], [0, 0, 1, 1], [], []>} : vector<2x2xf32>, vector<2x8xf32>, vector<2x8xf32> -> vector<2x8xf32>
    %398 = vector.extract_strided_slice %382 {offsets = [0, 8], sizes = [2, 8], strides = [1, 1]} : vector<2x96xf32> to vector<2x8xf32>
    %399 = vector.extract_strided_slice %382 {offsets = [0, 40], sizes = [2, 8], strides = [1, 1]} : vector<2x96xf32> to vector<2x8xf32>
    %cst_130 = arith.constant dense<0.000000e+00> : vector<2x2xf32>
    %400 = tpu.matmul %398, %399, %cst_130 {dimension_numbers = #tpu.dot_dimension_numbers<[1], [1], [0], [0], [0, 0, 1, 0], [], []>} : vector<2x8xf32>, vector<2x8xf32>, vector<2x2xf32> -> vector<2x2xf32>
    %cst_131 = arith.constant dense<0xFF800000> : vector<2xf32>
    %401 = vector.multi_reduction <maximumf>, %400, %cst_131 [1] : vector<2x2xf32> to vector<2xf32>
    %402 = vector.shape_cast %401 : vector<2xf32> to vector<2x1xf32>
    %403 = vector.broadcast %402 : vector<2x1xf32> to vector<2x2xf32>
    %404 = arith.subf %400, %403 : vector<2x2xf32>
    %405 = math.exp %404 : vector<2x2xf32>
    %cst_132 = arith.constant dense<0.000000e+00> : vector<2xf32>
    %406 = vector.multi_reduction <add>, %405, %cst_132 [1] : vector<2x2xf32> to vector<2xf32>
    %407 = vector.shape_cast %406 : vector<2xf32> to vector<2x1xf32>
    %408 = tpu.reciprocal %407 {approx = true} : vector<2x1xf32> -> vector<2x1xf32>
    %409 = vector.broadcast %408 : vector<2x1xf32> to vector<2x2xf32>
    %410 = arith.mulf %405, %409 : vector<2x2xf32>
    %411 = vector.extract_strided_slice %382 {offsets = [0, 72], sizes = [2, 8], strides = [1, 1]} : vector<2x96xf32> to vector<2x8xf32>
    %cst_133 = arith.constant dense<0.000000e+00> : vector<2x8xf32>
    %412 = tpu.matmul %410, %411, %cst_133 {dimension_numbers = #tpu.dot_dimension_numbers<[1], [0], [0], [1], [0, 0, 1, 1], [], []>} : vector<2x2xf32>, vector<2x8xf32>, vector<2x8xf32> -> vector<2x8xf32>
    %413 = vector.extract_strided_slice %382 {offsets = [0, 16], sizes = [2, 8], strides = [1, 1]} : vector<2x96xf32> to vector<2x8xf32>
    %414 = vector.extract_strided_slice %382 {offsets = [0, 48], sizes = [2, 8], strides = [1, 1]} : vector<2x96xf32> to vector<2x8xf32>
    %cst_134 = arith.constant dense<0.000000e+00> : vector<2x2xf32>
    %415 = tpu.matmul %413, %414, %cst_134 {dimension_numbers = #tpu.dot_dimension_numbers<[1], [1], [0], [0], [0, 0, 1, 0], [], []>} : vector<2x8xf32>, vector<2x8xf32>, vector<2x2xf32> -> vector<2x2xf32>
    %cst_135 = arith.constant dense<0xFF800000> : vector<2xf32>
    %416 = vector.multi_reduction <maximumf>, %415, %cst_135 [1] : vector<2x2xf32> to vector<2xf32>
    %417 = vector.shape_cast %416 : vector<2xf32> to vector<2x1xf32>
    %418 = vector.broadcast %417 : vector<2x1xf32> to vector<2x2xf32>
    %419 = arith.subf %415, %418 : vector<2x2xf32>
    %420 = math.exp %419 : vector<2x2xf32>
    %cst_136 = arith.constant dense<0.000000e+00> : vector<2xf32>
    %421 = vector.multi_reduction <add>, %420, %cst_136 [1] : vector<2x2xf32> to vector<2xf32>
    %422 = vector.shape_cast %421 : vector<2xf32> to vector<2x1xf32>
    %423 = tpu.reciprocal %422 {approx = true} : vector<2x1xf32> -> vector<2x1xf32>
    %424 = vector.broadcast %423 : vector<2x1xf32> to vector<2x2xf32>
    %425 = arith.mulf %420, %424 : vector<2x2xf32>
    %426 = vector.extract_strided_slice %382 {offsets = [0, 80], sizes = [2, 8], strides = [1, 1]} : vector<2x96xf32> to vector<2x8xf32>
    %cst_137 = arith.constant dense<0.000000e+00> : vector<2x8xf32>
    %427 = tpu.matmul %425, %426, %cst_137 {dimension_numbers = #tpu.dot_dimension_numbers<[1], [0], [0], [1], [0, 0, 1, 1], [], []>} : vector<2x2xf32>, vector<2x8xf32>, vector<2x8xf32> -> vector<2x8xf32>
    %428 = vector.extract_strided_slice %382 {offsets = [0, 24], sizes = [2, 8], strides = [1, 1]} : vector<2x96xf32> to vector<2x8xf32>
    %429 = vector.extract_strided_slice %382 {offsets = [0, 56], sizes = [2, 8], strides = [1, 1]} : vector<2x96xf32> to vector<2x8xf32>
    %cst_138 = arith.constant dense<0.000000e+00> : vector<2x2xf32>
    %430 = tpu.matmul %428, %429, %cst_138 {dimension_numbers = #tpu.dot_dimension_numbers<[1], [1], [0], [0], [0, 0, 1, 0], [], []>} : vector<2x8xf32>, vector<2x8xf32>, vector<2x2xf32> -> vector<2x2xf32>
    %cst_139 = arith.constant dense<0xFF800000> : vector<2xf32>
    %431 = vector.multi_reduction <maximumf>, %430, %cst_139 [1] : vector<2x2xf32> to vector<2xf32>
    %432 = vector.shape_cast %431 : vector<2xf32> to vector<2x1xf32>
    %433 = vector.broadcast %432 : vector<2x1xf32> to vector<2x2xf32>
    %434 = arith.subf %430, %433 : vector<2x2xf32>
    %435 = math.exp %434 : vector<2x2xf32>
    %cst_140 = arith.constant dense<0.000000e+00> : vector<2xf32>
    %436 = vector.multi_reduction <add>, %435, %cst_140 [1] : vector<2x2xf32> to vector<2xf32>
    %437 = vector.shape_cast %436 : vector<2xf32> to vector<2x1xf32>
    %438 = tpu.reciprocal %437 {approx = true} : vector<2x1xf32> -> vector<2x1xf32>
    %439 = vector.broadcast %438 : vector<2x1xf32> to vector<2x2xf32>
    %440 = arith.mulf %435, %439 : vector<2x2xf32>
    %441 = vector.extract_strided_slice %382 {offsets = [0, 88], sizes = [2, 8], strides = [1, 1]} : vector<2x96xf32> to vector<2x8xf32>
    %cst_141 = arith.constant dense<0.000000e+00> : vector<2x8xf32>
    %442 = tpu.matmul %440, %441, %cst_141 {dimension_numbers = #tpu.dot_dimension_numbers<[1], [0], [0], [1], [0, 0, 1, 1], [], []>} : vector<2x2xf32>, vector<2x8xf32>, vector<2x8xf32> -> vector<2x8xf32>
    %443 = tpu.concatenate %397, %412, %427, %442 in 1 : vector<2x8xf32>, vector<2x8xf32>, vector<2x8xf32>, vector<2x8xf32> -> vector<2x32xf32>
    %cst_142 = arith.constant dense<0.000000e+00> : vector<2x32xf32>
    %444 = tpu.matmul %443, %378, %cst_142 {dimension_numbers = #tpu.dot_dimension_numbers<[1], [0], [0], [1], [0, 0, 1, 1], [], []>} : vector<2x32xf32>, vector<32x32xf32>, vector<2x32xf32> -> vector<2x32xf32>
    %445 = vector.broadcast %379 : vector<1x32xf32> to vector<2x32xf32>
    %446 = arith.addf %444, %445 : vector<2x32xf32>
    %447 = arith.addf %375, %446 : vector<2x32xf32>
    %c112 = arith.constant 112 : index
    %c0_143 = arith.constant 0 : index
    %448 = vector.load %arg1[%c112, %c0_143] : memref<912x32xf32, #tpu.memory_space<vmem>>, vector<1x32xf32>
    %c120 = arith.constant 120 : index
    %c0_144 = arith.constant 0 : index
    %449 = vector.load %arg1[%c120, %c0_144] : memref<912x32xf32, #tpu.memory_space<vmem>>, vector<1x32xf32>
    %cst_145 = arith.constant dense<0.000000e+00> : vector<2xf32>
    %450 = vector.multi_reduction <add>, %447, %cst_145 [1] : vector<2x32xf32> to vector<2xf32>
    %451 = vector.shape_cast %450 : vector<2xf32> to vector<2x1xf32>
    %cst_146 = arith.constant 3.200000e+01 : f32
    %452 = vector.broadcast %cst_146 : f32 to vector<2x1xf32>
    %453 = arith.divf %451, %452 : vector<2x1xf32>
    %454 = vector.broadcast %453 : vector<2x1xf32> to vector<2x32xf32>
    %455 = arith.subf %447, %454 : vector<2x32xf32>
    %456 = arith.mulf %455, %455 : vector<2x32xf32>
    %cst_147 = arith.constant dense<0.000000e+00> : vector<2xf32>
    %457 = vector.multi_reduction <add>, %456, %cst_147 [1] : vector<2x32xf32> to vector<2xf32>
    %458 = vector.shape_cast %457 : vector<2xf32> to vector<2x1xf32>
    %cst_148 = arith.constant 3.200000e+01 : f32
    %459 = vector.broadcast %cst_148 : f32 to vector<2x1xf32>
    %460 = arith.divf %458, %459 : vector<2x1xf32>
    %cst_149 = arith.constant 9.99999974E-6 : f32
    %461 = vector.broadcast %cst_149 : f32 to vector<2x1xf32>
    %462 = arith.addf %460, %461 : vector<2x1xf32>
    %463 = math.rsqrt %462 : vector<2x1xf32>
    %464 = vector.broadcast %463 : vector<2x1xf32> to vector<2x32xf32>
    %465 = arith.mulf %455, %464 : vector<2x32xf32>
    %466 = vector.broadcast %448 : vector<1x32xf32> to vector<2x32xf32>
    %467 = arith.mulf %465, %466 : vector<2x32xf32>
    %468 = vector.broadcast %449 : vector<1x32xf32> to vector<2x32xf32>
    %469 = arith.addf %467, %468 : vector<2x32xf32>
    %c1528 = arith.constant 1528 : index
    %c0_150 = arith.constant 0 : index
    %470 = vector.load %arg2[%c1528, %c0_150] : memref<1768x64xf32, #tpu.memory_space<vmem>>, vector<32x64xf32>
    %cst_151 = arith.constant dense<0.000000e+00> : vector<2x64xf32>
    %471 = tpu.matmul %469, %470, %cst_151 {dimension_numbers = #tpu.dot_dimension_numbers<[1], [0], [0], [1], [0, 0, 1, 1], [], []>} : vector<2x32xf32>, vector<32x64xf32>, vector<2x64xf32> -> vector<2x64xf32>
    %c1560 = arith.constant 1560 : index
    %c0_152 = arith.constant 0 : index
    %472 = vector.load %arg2[%c1560, %c0_152] : memref<1768x64xf32, #tpu.memory_space<vmem>>, vector<1x64xf32>
    %473 = vector.broadcast %472 : vector<1x64xf32> to vector<2x64xf32>
    %474 = arith.addf %471, %473 : vector<2x64xf32>
    %cst_153 = arith.constant 0.000000e+00 : f32
    %475 = vector.broadcast %cst_153 : f32 to vector<2x64xf32>
    %476 = arith.maximumf %474, %475 : vector<2x64xf32>
    %c128 = arith.constant 128 : index
    %c0_154 = arith.constant 0 : index
    %477 = vector.load %arg1[%c128, %c0_154] : memref<912x32xf32, #tpu.memory_space<vmem>>, vector<64x32xf32>
    %cst_155 = arith.constant dense<0.000000e+00> : vector<2x32xf32>
    %478 = tpu.matmul %476, %477, %cst_155 {dimension_numbers = #tpu.dot_dimension_numbers<[1], [0], [0], [1], [0, 0, 1, 1], [], []>} : vector<2x64xf32>, vector<64x32xf32>, vector<2x32xf32> -> vector<2x32xf32>
    %c192 = arith.constant 192 : index
    %c0_156 = arith.constant 0 : index
    %479 = vector.load %arg1[%c192, %c0_156] : memref<912x32xf32, #tpu.memory_space<vmem>>, vector<1x32xf32>
    %480 = vector.broadcast %479 : vector<1x32xf32> to vector<2x32xf32>
    %481 = arith.addf %478, %480 : vector<2x32xf32>
    %482 = arith.addf %469, %481 : vector<2x32xf32>
    %c200 = arith.constant 200 : index
    %c0_157 = arith.constant 0 : index
    %483 = vector.load %arg1[%c200, %c0_157] : memref<912x32xf32, #tpu.memory_space<vmem>>, vector<1x32xf32>
    %c208 = arith.constant 208 : index
    %c0_158 = arith.constant 0 : index
    %484 = vector.load %arg1[%c208, %c0_158] : memref<912x32xf32, #tpu.memory_space<vmem>>, vector<1x32xf32>
    %cst_159 = arith.constant dense<0.000000e+00> : vector<2xf32>
    %485 = vector.multi_reduction <add>, %482, %cst_159 [1] : vector<2x32xf32> to vector<2xf32>
    %486 = vector.shape_cast %485 : vector<2xf32> to vector<2x1xf32>
    %cst_160 = arith.constant 3.200000e+01 : f32
    %487 = vector.broadcast %cst_160 : f32 to vector<2x1xf32>
    %488 = arith.divf %486, %487 : vector<2x1xf32>
    %489 = vector.broadcast %488 : vector<2x1xf32> to vector<2x32xf32>
    %490 = arith.subf %482, %489 : vector<2x32xf32>
    %491 = arith.mulf %490, %490 : vector<2x32xf32>
    %cst_161 = arith.constant dense<0.000000e+00> : vector<2xf32>
    %492 = vector.multi_reduction <add>, %491, %cst_161 [1] : vector<2x32xf32> to vector<2xf32>
    %493 = vector.shape_cast %492 : vector<2xf32> to vector<2x1xf32>
    %cst_162 = arith.constant 3.200000e+01 : f32
    %494 = vector.broadcast %cst_162 : f32 to vector<2x1xf32>
    %495 = arith.divf %493, %494 : vector<2x1xf32>
    %cst_163 = arith.constant 9.99999974E-6 : f32
    %496 = vector.broadcast %cst_163 : f32 to vector<2x1xf32>
    %497 = arith.addf %495, %496 : vector<2x1xf32>
    %498 = math.rsqrt %497 : vector<2x1xf32>
    %499 = vector.broadcast %498 : vector<2x1xf32> to vector<2x32xf32>
    %500 = arith.mulf %490, %499 : vector<2x32xf32>
    %501 = vector.broadcast %483 : vector<1x32xf32> to vector<2x32xf32>
    %502 = arith.mulf %500, %501 : vector<2x32xf32>
    %503 = vector.broadcast %484 : vector<1x32xf32> to vector<2x32xf32>
    %504 = arith.addf %502, %503 : vector<2x32xf32>
    %c40 = arith.constant 40 : index
    %c0_164 = arith.constant 0 : index
    %505 = vector.load %arg3[%c40, %c0_164] : memref<160x96xf32, #tpu.memory_space<vmem>>, vector<32x96xf32>
    %c72_165 = arith.constant 72 : index
    %c0_166 = arith.constant 0 : index
    %506 = vector.load %arg3[%c72_165, %c0_166] : memref<160x96xf32, #tpu.memory_space<vmem>>, vector<1x96xf32>
    %c216 = arith.constant 216 : index
    %c0_167 = arith.constant 0 : index
    %507 = vector.load %arg1[%c216, %c0_167] : memref<912x32xf32, #tpu.memory_space<vmem>>, vector<32x32xf32>
    %c248 = arith.constant 248 : index
    %c0_168 = arith.constant 0 : index
    %508 = vector.load %arg1[%c248, %c0_168] : memref<912x32xf32, #tpu.memory_space<vmem>>, vector<1x32xf32>
    %cst_169 = arith.constant dense<0.000000e+00> : vector<2x96xf32>
    %509 = tpu.matmul %504, %505, %cst_169 {dimension_numbers = #tpu.dot_dimension_numbers<[1], [0], [0], [1], [0, 0, 1, 1], [], []>} : vector<2x32xf32>, vector<32x96xf32>, vector<2x96xf32> -> vector<2x96xf32>
    %510 = vector.broadcast %506 : vector<1x96xf32> to vector<2x96xf32>
    %511 = arith.addf %509, %510 : vector<2x96xf32>
    %512 = vector.extract_strided_slice %511 {offsets = [0, 0], sizes = [2, 8], strides = [1, 1]} : vector<2x96xf32> to vector<2x8xf32>
    %513 = vector.extract_strided_slice %511 {offsets = [0, 32], sizes = [2, 8], strides = [1, 1]} : vector<2x96xf32> to vector<2x8xf32>
    %cst_170 = arith.constant dense<0.000000e+00> : vector<2x2xf32>
    %514 = tpu.matmul %512, %513, %cst_170 {dimension_numbers = #tpu.dot_dimension_numbers<[1], [1], [0], [0], [0, 0, 1, 0], [], []>} : vector<2x8xf32>, vector<2x8xf32>, vector<2x2xf32> -> vector<2x2xf32>
    %cst_171 = arith.constant dense<0xFF800000> : vector<2xf32>
    %515 = vector.multi_reduction <maximumf>, %514, %cst_171 [1] : vector<2x2xf32> to vector<2xf32>
    %516 = vector.shape_cast %515 : vector<2xf32> to vector<2x1xf32>
    %517 = vector.broadcast %516 : vector<2x1xf32> to vector<2x2xf32>
    %518 = arith.subf %514, %517 : vector<2x2xf32>
    %519 = math.exp %518 : vector<2x2xf32>
    %cst_172 = arith.constant dense<0.000000e+00> : vector<2xf32>
    %520 = vector.multi_reduction <add>, %519, %cst_172 [1] : vector<2x2xf32> to vector<2xf32>
    %521 = vector.shape_cast %520 : vector<2xf32> to vector<2x1xf32>
    %522 = tpu.reciprocal %521 {approx = true} : vector<2x1xf32> -> vector<2x1xf32>
    %523 = vector.broadcast %522 : vector<2x1xf32> to vector<2x2xf32>
    %524 = arith.mulf %519, %523 : vector<2x2xf32>
    %525 = vector.extract_strided_slice %511 {offsets = [0, 64], sizes = [2, 8], strides = [1, 1]} : vector<2x96xf32> to vector<2x8xf32>
    %cst_173 = arith.constant dense<0.000000e+00> : vector<2x8xf32>
    %526 = tpu.matmul %524, %525, %cst_173 {dimension_numbers = #tpu.dot_dimension_numbers<[1], [0], [0], [1], [0, 0, 1, 1], [], []>} : vector<2x2xf32>, vector<2x8xf32>, vector<2x8xf32> -> vector<2x8xf32>
    %527 = vector.extract_strided_slice %511 {offsets = [0, 8], sizes = [2, 8], strides = [1, 1]} : vector<2x96xf32> to vector<2x8xf32>
    %528 = vector.extract_strided_slice %511 {offsets = [0, 40], sizes = [2, 8], strides = [1, 1]} : vector<2x96xf32> to vector<2x8xf32>
    %cst_174 = arith.constant dense<0.000000e+00> : vector<2x2xf32>
    %529 = tpu.matmul %527, %528, %cst_174 {dimension_numbers = #tpu.dot_dimension_numbers<[1], [1], [0], [0], [0, 0, 1, 0], [], []>} : vector<2x8xf32>, vector<2x8xf32>, vector<2x2xf32> -> vector<2x2xf32>
    %cst_175 = arith.constant dense<0xFF800000> : vector<2xf32>
    %530 = vector.multi_reduction <maximumf>, %529, %cst_175 [1] : vector<2x2xf32> to vector<2xf32>
    %531 = vector.shape_cast %530 : vector<2xf32> to vector<2x1xf32>
    %532 = vector.broadcast %531 : vector<2x1xf32> to vector<2x2xf32>
    %533 = arith.subf %529, %532 : vector<2x2xf32>
    %534 = math.exp %533 : vector<2x2xf32>
    %cst_176 = arith.constant dense<0.000000e+00> : vector<2xf32>
    %535 = vector.multi_reduction <add>, %534, %cst_176 [1] : vector<2x2xf32> to vector<2xf32>
    %536 = vector.shape_cast %535 : vector<2xf32> to vector<2x1xf32>
    %537 = tpu.reciprocal %536 {approx = true} : vector<2x1xf32> -> vector<2x1xf32>
    %538 = vector.broadcast %537 : vector<2x1xf32> to vector<2x2xf32>
    %539 = arith.mulf %534, %538 : vector<2x2xf32>
    %540 = vector.extract_strided_slice %511 {offsets = [0, 72], sizes = [2, 8], strides = [1, 1]} : vector<2x96xf32> to vector<2x8xf32>
    %cst_177 = arith.constant dense<0.000000e+00> : vector<2x8xf32>
    %541 = tpu.matmul %539, %540, %cst_177 {dimension_numbers = #tpu.dot_dimension_numbers<[1], [0], [0], [1], [0, 0, 1, 1], [], []>} : vector<2x2xf32>, vector<2x8xf32>, vector<2x8xf32> -> vector<2x8xf32>
    %542 = vector.extract_strided_slice %511 {offsets = [0, 16], sizes = [2, 8], strides = [1, 1]} : vector<2x96xf32> to vector<2x8xf32>
    %543 = vector.extract_strided_slice %511 {offsets = [0, 48], sizes = [2, 8], strides = [1, 1]} : vector<2x96xf32> to vector<2x8xf32>
    %cst_178 = arith.constant dense<0.000000e+00> : vector<2x2xf32>
    %544 = tpu.matmul %542, %543, %cst_178 {dimension_numbers = #tpu.dot_dimension_numbers<[1], [1], [0], [0], [0, 0, 1, 0], [], []>} : vector<2x8xf32>, vector<2x8xf32>, vector<2x2xf32> -> vector<2x2xf32>
    %cst_179 = arith.constant dense<0xFF800000> : vector<2xf32>
    %545 = vector.multi_reduction <maximumf>, %544, %cst_179 [1] : vector<2x2xf32> to vector<2xf32>
    %546 = vector.shape_cast %545 : vector<2xf32> to vector<2x1xf32>
    %547 = vector.broadcast %546 : vector<2x1xf32> to vector<2x2xf32>
    %548 = arith.subf %544, %547 : vector<2x2xf32>
    %549 = math.exp %548 : vector<2x2xf32>
    %cst_180 = arith.constant dense<0.000000e+00> : vector<2xf32>
    %550 = vector.multi_reduction <add>, %549, %cst_180 [1] : vector<2x2xf32> to vector<2xf32>
    %551 = vector.shape_cast %550 : vector<2xf32> to vector<2x1xf32>
    %552 = tpu.reciprocal %551 {approx = true} : vector<2x1xf32> -> vector<2x1xf32>
    %553 = vector.broadcast %552 : vector<2x1xf32> to vector<2x2xf32>
    %554 = arith.mulf %549, %553 : vector<2x2xf32>
    %555 = vector.extract_strided_slice %511 {offsets = [0, 80], sizes = [2, 8], strides = [1, 1]} : vector<2x96xf32> to vector<2x8xf32>
    %cst_181 = arith.constant dense<0.000000e+00> : vector<2x8xf32>
    %556 = tpu.matmul %554, %555, %cst_181 {dimension_numbers = #tpu.dot_dimension_numbers<[1], [0], [0], [1], [0, 0, 1, 1], [], []>} : vector<2x2xf32>, vector<2x8xf32>, vector<2x8xf32> -> vector<2x8xf32>
    %557 = vector.extract_strided_slice %511 {offsets = [0, 24], sizes = [2, 8], strides = [1, 1]} : vector<2x96xf32> to vector<2x8xf32>
    %558 = vector.extract_strided_slice %511 {offsets = [0, 56], sizes = [2, 8], strides = [1, 1]} : vector<2x96xf32> to vector<2x8xf32>
    %cst_182 = arith.constant dense<0.000000e+00> : vector<2x2xf32>
    %559 = tpu.matmul %557, %558, %cst_182 {dimension_numbers = #tpu.dot_dimension_numbers<[1], [1], [0], [0], [0, 0, 1, 0], [], []>} : vector<2x8xf32>, vector<2x8xf32>, vector<2x2xf32> -> vector<2x2xf32>
    %cst_183 = arith.constant dense<0xFF800000> : vector<2xf32>
    %560 = vector.multi_reduction <maximumf>, %559, %cst_183 [1] : vector<2x2xf32> to vector<2xf32>
    %561 = vector.shape_cast %560 : vector<2xf32> to vector<2x1xf32>
    %562 = vector.broadcast %561 : vector<2x1xf32> to vector<2x2xf32>
    %563 = arith.subf %559, %562 : vector<2x2xf32>
    %564 = math.exp %563 : vector<2x2xf32>
    %cst_184 = arith.constant dense<0.000000e+00> : vector<2xf32>
    %565 = vector.multi_reduction <add>, %564, %cst_184 [1] : vector<2x2xf32> to vector<2xf32>
    %566 = vector.shape_cast %565 : vector<2xf32> to vector<2x1xf32>
    %567 = tpu.reciprocal %566 {approx = true} : vector<2x1xf32> -> vector<2x1xf32>
    %568 = vector.broadcast %567 : vector<2x1xf32> to vector<2x2xf32>
    %569 = arith.mulf %564, %568 : vector<2x2xf32>
    %570 = vector.extract_strided_slice %511 {offsets = [0, 88], sizes = [2, 8], strides = [1, 1]} : vector<2x96xf32> to vector<2x8xf32>
    %cst_185 = arith.constant dense<0.000000e+00> : vector<2x8xf32>
    %571 = tpu.matmul %569, %570, %cst_185 {dimension_numbers = #tpu.dot_dimension_numbers<[1], [0], [0], [1], [0, 0, 1, 1], [], []>} : vector<2x2xf32>, vector<2x8xf32>, vector<2x8xf32> -> vector<2x8xf32>
    %572 = tpu.concatenate %526, %541, %556, %571 in 1 : vector<2x8xf32>, vector<2x8xf32>, vector<2x8xf32>, vector<2x8xf32> -> vector<2x32xf32>
    %cst_186 = arith.constant dense<0.000000e+00> : vector<2x32xf32>
    %573 = tpu.matmul %572, %507, %cst_186 {dimension_numbers = #tpu.dot_dimension_numbers<[1], [0], [0], [1], [0, 0, 1, 1], [], []>} : vector<2x32xf32>, vector<32x32xf32>, vector<2x32xf32> -> vector<2x32xf32>
    %574 = vector.broadcast %508 : vector<1x32xf32> to vector<2x32xf32>
    %575 = arith.addf %573, %574 : vector<2x32xf32>
    %576 = arith.addf %504, %575 : vector<2x32xf32>
    %c256 = arith.constant 256 : index
    %c0_187 = arith.constant 0 : index
    %577 = vector.load %arg1[%c256, %c0_187] : memref<912x32xf32, #tpu.memory_space<vmem>>, vector<1x32xf32>
    %c264 = arith.constant 264 : index
    %c0_188 = arith.constant 0 : index
    %578 = vector.load %arg1[%c264, %c0_188] : memref<912x32xf32, #tpu.memory_space<vmem>>, vector<1x32xf32>
    %cst_189 = arith.constant dense<0.000000e+00> : vector<2xf32>
    %579 = vector.multi_reduction <add>, %576, %cst_189 [1] : vector<2x32xf32> to vector<2xf32>
    %580 = vector.shape_cast %579 : vector<2xf32> to vector<2x1xf32>
    %cst_190 = arith.constant 3.200000e+01 : f32
    %581 = vector.broadcast %cst_190 : f32 to vector<2x1xf32>
    %582 = arith.divf %580, %581 : vector<2x1xf32>
    %583 = vector.broadcast %582 : vector<2x1xf32> to vector<2x32xf32>
    %584 = arith.subf %576, %583 : vector<2x32xf32>
    %585 = arith.mulf %584, %584 : vector<2x32xf32>
    %cst_191 = arith.constant dense<0.000000e+00> : vector<2xf32>
    %586 = vector.multi_reduction <add>, %585, %cst_191 [1] : vector<2x32xf32> to vector<2xf32>
    %587 = vector.shape_cast %586 : vector<2xf32> to vector<2x1xf32>
    %cst_192 = arith.constant 3.200000e+01 : f32
    %588 = vector.broadcast %cst_192 : f32 to vector<2x1xf32>
    %589 = arith.divf %587, %588 : vector<2x1xf32>
    %cst_193 = arith.constant 9.99999974E-6 : f32
    %590 = vector.broadcast %cst_193 : f32 to vector<2x1xf32>
    %591 = arith.addf %589, %590 : vector<2x1xf32>
    %592 = math.rsqrt %591 : vector<2x1xf32>
    %593 = vector.broadcast %592 : vector<2x1xf32> to vector<2x32xf32>
    %594 = arith.mulf %584, %593 : vector<2x32xf32>
    %595 = vector.broadcast %577 : vector<1x32xf32> to vector<2x32xf32>
    %596 = arith.mulf %594, %595 : vector<2x32xf32>
    %597 = vector.broadcast %578 : vector<1x32xf32> to vector<2x32xf32>
    %598 = arith.addf %596, %597 : vector<2x32xf32>
    %c1568 = arith.constant 1568 : index
    %c0_194 = arith.constant 0 : index
    %599 = vector.load %arg2[%c1568, %c0_194] : memref<1768x64xf32, #tpu.memory_space<vmem>>, vector<32x64xf32>
    %cst_195 = arith.constant dense<0.000000e+00> : vector<2x64xf32>
    %600 = tpu.matmul %598, %599, %cst_195 {dimension_numbers = #tpu.dot_dimension_numbers<[1], [0], [0], [1], [0, 0, 1, 1], [], []>} : vector<2x32xf32>, vector<32x64xf32>, vector<2x64xf32> -> vector<2x64xf32>
    %c1600 = arith.constant 1600 : index
    %c0_196 = arith.constant 0 : index
    %601 = vector.load %arg2[%c1600, %c0_196] : memref<1768x64xf32, #tpu.memory_space<vmem>>, vector<1x64xf32>
    %602 = vector.broadcast %601 : vector<1x64xf32> to vector<2x64xf32>
    %603 = arith.addf %600, %602 : vector<2x64xf32>
    %cst_197 = arith.constant 0.000000e+00 : f32
    %604 = vector.broadcast %cst_197 : f32 to vector<2x64xf32>
    %605 = arith.maximumf %603, %604 : vector<2x64xf32>
    %c272 = arith.constant 272 : index
    %c0_198 = arith.constant 0 : index
    %606 = vector.load %arg1[%c272, %c0_198] : memref<912x32xf32, #tpu.memory_space<vmem>>, vector<64x32xf32>
    %cst_199 = arith.constant dense<0.000000e+00> : vector<2x32xf32>
    %607 = tpu.matmul %605, %606, %cst_199 {dimension_numbers = #tpu.dot_dimension_numbers<[1], [0], [0], [1], [0, 0, 1, 1], [], []>} : vector<2x64xf32>, vector<64x32xf32>, vector<2x32xf32> -> vector<2x32xf32>
    %c336 = arith.constant 336 : index
    %c0_200 = arith.constant 0 : index
    %608 = vector.load %arg1[%c336, %c0_200] : memref<912x32xf32, #tpu.memory_space<vmem>>, vector<1x32xf32>
    %609 = vector.broadcast %608 : vector<1x32xf32> to vector<2x32xf32>
    %610 = arith.addf %607, %609 : vector<2x32xf32>
    %611 = arith.addf %598, %610 : vector<2x32xf32>
    %c344 = arith.constant 344 : index
    %c0_201 = arith.constant 0 : index
    %612 = vector.load %arg1[%c344, %c0_201] : memref<912x32xf32, #tpu.memory_space<vmem>>, vector<1x32xf32>
    %c352 = arith.constant 352 : index
    %c0_202 = arith.constant 0 : index
    %613 = vector.load %arg1[%c352, %c0_202] : memref<912x32xf32, #tpu.memory_space<vmem>>, vector<1x32xf32>
    %cst_203 = arith.constant dense<0.000000e+00> : vector<2xf32>
    %614 = vector.multi_reduction <add>, %611, %cst_203 [1] : vector<2x32xf32> to vector<2xf32>
    %615 = vector.shape_cast %614 : vector<2xf32> to vector<2x1xf32>
    %cst_204 = arith.constant 3.200000e+01 : f32
    %616 = vector.broadcast %cst_204 : f32 to vector<2x1xf32>
    %617 = arith.divf %615, %616 : vector<2x1xf32>
    %618 = vector.broadcast %617 : vector<2x1xf32> to vector<2x32xf32>
    %619 = arith.subf %611, %618 : vector<2x32xf32>
    %620 = arith.mulf %619, %619 : vector<2x32xf32>
    %cst_205 = arith.constant dense<0.000000e+00> : vector<2xf32>
    %621 = vector.multi_reduction <add>, %620, %cst_205 [1] : vector<2x32xf32> to vector<2xf32>
    %622 = vector.shape_cast %621 : vector<2xf32> to vector<2x1xf32>
    %cst_206 = arith.constant 3.200000e+01 : f32
    %623 = vector.broadcast %cst_206 : f32 to vector<2x1xf32>
    %624 = arith.divf %622, %623 : vector<2x1xf32>
    %cst_207 = arith.constant 9.99999974E-6 : f32
    %625 = vector.broadcast %cst_207 : f32 to vector<2x1xf32>
    %626 = arith.addf %624, %625 : vector<2x1xf32>
    %627 = math.rsqrt %626 : vector<2x1xf32>
    %628 = vector.broadcast %627 : vector<2x1xf32> to vector<2x32xf32>
    %629 = arith.mulf %619, %628 : vector<2x32xf32>
    %630 = vector.broadcast %612 : vector<1x32xf32> to vector<2x32xf32>
    %631 = arith.mulf %629, %630 : vector<2x32xf32>
    %632 = vector.broadcast %613 : vector<1x32xf32> to vector<2x32xf32>
    %633 = arith.addf %631, %632 : vector<2x32xf32>
    %c840 = arith.constant 840 : index
    %c0_208 = arith.constant 0 : index
    %634 = vector.load %arg1[%c840, %c0_208] : memref<912x32xf32, #tpu.memory_space<vmem>>, vector<1x32xf32>
    %c848 = arith.constant 848 : index
    %c0_209 = arith.constant 0 : index
    %635 = vector.load %arg1[%c848, %c0_209] : memref<912x32xf32, #tpu.memory_space<vmem>>, vector<1x32xf32>
    %cst_210 = arith.constant dense<0.000000e+00> : vector<2xf32>
    %636 = vector.multi_reduction <add>, %633, %cst_210 [1] : vector<2x32xf32> to vector<2xf32>
    %637 = vector.shape_cast %636 : vector<2xf32> to vector<2x1xf32>
    %cst_211 = arith.constant 3.200000e+01 : f32
    %638 = vector.broadcast %cst_211 : f32 to vector<2x1xf32>
    %639 = arith.divf %637, %638 : vector<2x1xf32>
    %640 = vector.broadcast %639 : vector<2x1xf32> to vector<2x32xf32>
    %641 = arith.subf %633, %640 : vector<2x32xf32>
    %642 = arith.mulf %641, %641 : vector<2x32xf32>
    %cst_212 = arith.constant dense<0.000000e+00> : vector<2xf32>
    %643 = vector.multi_reduction <add>, %642, %cst_212 [1] : vector<2x32xf32> to vector<2xf32>
    %644 = vector.shape_cast %643 : vector<2xf32> to vector<2x1xf32>
    %cst_213 = arith.constant 3.200000e+01 : f32
    %645 = vector.broadcast %cst_213 : f32 to vector<2x1xf32>
    %646 = arith.divf %644, %645 : vector<2x1xf32>
    %cst_214 = arith.constant 9.99999974E-6 : f32
    %647 = vector.broadcast %cst_214 : f32 to vector<2x1xf32>
    %648 = arith.addf %646, %647 : vector<2x1xf32>
    %649 = math.rsqrt %648 : vector<2x1xf32>
    %650 = vector.broadcast %649 : vector<2x1xf32> to vector<2x32xf32>
    %651 = arith.mulf %641, %650 : vector<2x32xf32>
    %652 = vector.broadcast %634 : vector<1x32xf32> to vector<2x32xf32>
    %653 = arith.mulf %651, %652 : vector<2x32xf32>
    %654 = vector.broadcast %635 : vector<1x32xf32> to vector<2x32xf32>
    %655 = arith.addf %653, %654 : vector<2x32xf32>
    %c80 = arith.constant 80 : index
    %c0_215 = arith.constant 0 : index
    %656 = vector.load %arg3[%c80, %c0_215] : memref<160x96xf32, #tpu.memory_space<vmem>>, vector<32x96xf32>
    %c112_216 = arith.constant 112 : index
    %c0_217 = arith.constant 0 : index
    %657 = vector.load %arg3[%c112_216, %c0_217] : memref<160x96xf32, #tpu.memory_space<vmem>>, vector<1x96xf32>
    %c360 = arith.constant 360 : index
    %c0_218 = arith.constant 0 : index
    %658 = vector.load %arg1[%c360, %c0_218] : memref<912x32xf32, #tpu.memory_space<vmem>>, vector<32x32xf32>
    %c392 = arith.constant 392 : index
    %c0_219 = arith.constant 0 : index
    %659 = vector.load %arg1[%c392, %c0_219] : memref<912x32xf32, #tpu.memory_space<vmem>>, vector<1x32xf32>
    %cst_220 = arith.constant dense<0.000000e+00> : vector<2x96xf32>
    %660 = tpu.matmul %375, %656, %cst_220 {dimension_numbers = #tpu.dot_dimension_numbers<[1], [0], [0], [1], [0, 0, 1, 1], [], []>} : vector<2x32xf32>, vector<32x96xf32>, vector<2x96xf32> -> vector<2x96xf32>
    %661 = vector.broadcast %657 : vector<1x96xf32> to vector<2x96xf32>
    %662 = arith.addf %660, %661 : vector<2x96xf32>
    %663 = vector.extract_strided_slice %662 {offsets = [0, 0], sizes = [2, 8], strides = [1, 1]} : vector<2x96xf32> to vector<2x8xf32>
    %664 = vector.extract_strided_slice %662 {offsets = [0, 32], sizes = [2, 8], strides = [1, 1]} : vector<2x96xf32> to vector<2x8xf32>
    %cst_221 = arith.constant dense<0.000000e+00> : vector<2x2xf32>
    %665 = tpu.matmul %663, %664, %cst_221 {dimension_numbers = #tpu.dot_dimension_numbers<[1], [1], [0], [0], [0, 0, 1, 0], [], []>} : vector<2x8xf32>, vector<2x8xf32>, vector<2x2xf32> -> vector<2x2xf32>
    %cst_222 = arith.constant dense<0xFF800000> : vector<2xf32>
    %666 = vector.multi_reduction <maximumf>, %665, %cst_222 [1] : vector<2x2xf32> to vector<2xf32>
    %667 = vector.shape_cast %666 : vector<2xf32> to vector<2x1xf32>
    %668 = vector.broadcast %667 : vector<2x1xf32> to vector<2x2xf32>
    %669 = arith.subf %665, %668 : vector<2x2xf32>
    %670 = math.exp %669 : vector<2x2xf32>
    %cst_223 = arith.constant dense<0.000000e+00> : vector<2xf32>
    %671 = vector.multi_reduction <add>, %670, %cst_223 [1] : vector<2x2xf32> to vector<2xf32>
    %672 = vector.shape_cast %671 : vector<2xf32> to vector<2x1xf32>
    %673 = tpu.reciprocal %672 {approx = true} : vector<2x1xf32> -> vector<2x1xf32>
    %674 = vector.broadcast %673 : vector<2x1xf32> to vector<2x2xf32>
    %675 = arith.mulf %670, %674 : vector<2x2xf32>
    %676 = vector.extract_strided_slice %662 {offsets = [0, 64], sizes = [2, 8], strides = [1, 1]} : vector<2x96xf32> to vector<2x8xf32>
    %cst_224 = arith.constant dense<0.000000e+00> : vector<2x8xf32>
    %677 = tpu.matmul %675, %676, %cst_224 {dimension_numbers = #tpu.dot_dimension_numbers<[1], [0], [0], [1], [0, 0, 1, 1], [], []>} : vector<2x2xf32>, vector<2x8xf32>, vector<2x8xf32> -> vector<2x8xf32>
    %678 = vector.extract_strided_slice %662 {offsets = [0, 8], sizes = [2, 8], strides = [1, 1]} : vector<2x96xf32> to vector<2x8xf32>
    %679 = vector.extract_strided_slice %662 {offsets = [0, 40], sizes = [2, 8], strides = [1, 1]} : vector<2x96xf32> to vector<2x8xf32>
    %cst_225 = arith.constant dense<0.000000e+00> : vector<2x2xf32>
    %680 = tpu.matmul %678, %679, %cst_225 {dimension_numbers = #tpu.dot_dimension_numbers<[1], [1], [0], [0], [0, 0, 1, 0], [], []>} : vector<2x8xf32>, vector<2x8xf32>, vector<2x2xf32> -> vector<2x2xf32>
    %cst_226 = arith.constant dense<0xFF800000> : vector<2xf32>
    %681 = vector.multi_reduction <maximumf>, %680, %cst_226 [1] : vector<2x2xf32> to vector<2xf32>
    %682 = vector.shape_cast %681 : vector<2xf32> to vector<2x1xf32>
    %683 = vector.broadcast %682 : vector<2x1xf32> to vector<2x2xf32>
    %684 = arith.subf %680, %683 : vector<2x2xf32>
    %685 = math.exp %684 : vector<2x2xf32>
    %cst_227 = arith.constant dense<0.000000e+00> : vector<2xf32>
    %686 = vector.multi_reduction <add>, %685, %cst_227 [1] : vector<2x2xf32> to vector<2xf32>
    %687 = vector.shape_cast %686 : vector<2xf32> to vector<2x1xf32>
    %688 = tpu.reciprocal %687 {approx = true} : vector<2x1xf32> -> vector<2x1xf32>
    %689 = vector.broadcast %688 : vector<2x1xf32> to vector<2x2xf32>
    %690 = arith.mulf %685, %689 : vector<2x2xf32>
    %691 = vector.extract_strided_slice %662 {offsets = [0, 72], sizes = [2, 8], strides = [1, 1]} : vector<2x96xf32> to vector<2x8xf32>
    %cst_228 = arith.constant dense<0.000000e+00> : vector<2x8xf32>
    %692 = tpu.matmul %690, %691, %cst_228 {dimension_numbers = #tpu.dot_dimension_numbers<[1], [0], [0], [1], [0, 0, 1, 1], [], []>} : vector<2x2xf32>, vector<2x8xf32>, vector<2x8xf32> -> vector<2x8xf32>
    %693 = vector.extract_strided_slice %662 {offsets = [0, 16], sizes = [2, 8], strides = [1, 1]} : vector<2x96xf32> to vector<2x8xf32>
    %694 = vector.extract_strided_slice %662 {offsets = [0, 48], sizes = [2, 8], strides = [1, 1]} : vector<2x96xf32> to vector<2x8xf32>
    %cst_229 = arith.constant dense<0.000000e+00> : vector<2x2xf32>
    %695 = tpu.matmul %693, %694, %cst_229 {dimension_numbers = #tpu.dot_dimension_numbers<[1], [1], [0], [0], [0, 0, 1, 0], [], []>} : vector<2x8xf32>, vector<2x8xf32>, vector<2x2xf32> -> vector<2x2xf32>
    %cst_230 = arith.constant dense<0xFF800000> : vector<2xf32>
    %696 = vector.multi_reduction <maximumf>, %695, %cst_230 [1] : vector<2x2xf32> to vector<2xf32>
    %697 = vector.shape_cast %696 : vector<2xf32> to vector<2x1xf32>
    %698 = vector.broadcast %697 : vector<2x1xf32> to vector<2x2xf32>
    %699 = arith.subf %695, %698 : vector<2x2xf32>
    %700 = math.exp %699 : vector<2x2xf32>
    %cst_231 = arith.constant dense<0.000000e+00> : vector<2xf32>
    %701 = vector.multi_reduction <add>, %700, %cst_231 [1] : vector<2x2xf32> to vector<2xf32>
    %702 = vector.shape_cast %701 : vector<2xf32> to vector<2x1xf32>
    %703 = tpu.reciprocal %702 {approx = true} : vector<2x1xf32> -> vector<2x1xf32>
    %704 = vector.broadcast %703 : vector<2x1xf32> to vector<2x2xf32>
    %705 = arith.mulf %700, %704 : vector<2x2xf32>
    %706 = vector.extract_strided_slice %662 {offsets = [0, 80], sizes = [2, 8], strides = [1, 1]} : vector<2x96xf32> to vector<2x8xf32>
    %cst_232 = arith.constant dense<0.000000e+00> : vector<2x8xf32>
    %707 = tpu.matmul %705, %706, %cst_232 {dimension_numbers = #tpu.dot_dimension_numbers<[1], [0], [0], [1], [0, 0, 1, 1], [], []>} : vector<2x2xf32>, vector<2x8xf32>, vector<2x8xf32> -> vector<2x8xf32>
    %708 = vector.extract_strided_slice %662 {offsets = [0, 24], sizes = [2, 8], strides = [1, 1]} : vector<2x96xf32> to vector<2x8xf32>
    %709 = vector.extract_strided_slice %662 {offsets = [0, 56], sizes = [2, 8], strides = [1, 1]} : vector<2x96xf32> to vector<2x8xf32>
    %cst_233 = arith.constant dense<0.000000e+00> : vector<2x2xf32>
    %710 = tpu.matmul %708, %709, %cst_233 {dimension_numbers = #tpu.dot_dimension_numbers<[1], [1], [0], [0], [0, 0, 1, 0], [], []>} : vector<2x8xf32>, vector<2x8xf32>, vector<2x2xf32> -> vector<2x2xf32>
    %cst_234 = arith.constant dense<0xFF800000> : vector<2xf32>
    %711 = vector.multi_reduction <maximumf>, %710, %cst_234 [1] : vector<2x2xf32> to vector<2xf32>
    %712 = vector.shape_cast %711 : vector<2xf32> to vector<2x1xf32>
    %713 = vector.broadcast %712 : vector<2x1xf32> to vector<2x2xf32>
    %714 = arith.subf %710, %713 : vector<2x2xf32>
    %715 = math.exp %714 : vector<2x2xf32>
    %cst_235 = arith.constant dense<0.000000e+00> : vector<2xf32>
    %716 = vector.multi_reduction <add>, %715, %cst_235 [1] : vector<2x2xf32> to vector<2xf32>
    %717 = vector.shape_cast %716 : vector<2xf32> to vector<2x1xf32>
    %718 = tpu.reciprocal %717 {approx = true} : vector<2x1xf32> -> vector<2x1xf32>
    %719 = vector.broadcast %718 : vector<2x1xf32> to vector<2x2xf32>
    %720 = arith.mulf %715, %719 : vector<2x2xf32>
    %721 = vector.extract_strided_slice %662 {offsets = [0, 88], sizes = [2, 8], strides = [1, 1]} : vector<2x96xf32> to vector<2x8xf32>
    %cst_236 = arith.constant dense<0.000000e+00> : vector<2x8xf32>
    %722 = tpu.matmul %720, %721, %cst_236 {dimension_numbers = #tpu.dot_dimension_numbers<[1], [0], [0], [1], [0, 0, 1, 1], [], []>} : vector<2x2xf32>, vector<2x8xf32>, vector<2x8xf32> -> vector<2x8xf32>
    %723 = tpu.concatenate %677, %692, %707, %722 in 1 : vector<2x8xf32>, vector<2x8xf32>, vector<2x8xf32>, vector<2x8xf32> -> vector<2x32xf32>
    %cst_237 = arith.constant dense<0.000000e+00> : vector<2x32xf32>
    %724 = tpu.matmul %723, %658, %cst_237 {dimension_numbers = #tpu.dot_dimension_numbers<[1], [0], [0], [1], [0, 0, 1, 1], [], []>} : vector<2x32xf32>, vector<32x32xf32>, vector<2x32xf32> -> vector<2x32xf32>
    %725 = vector.broadcast %659 : vector<1x32xf32> to vector<2x32xf32>
    %726 = arith.addf %724, %725 : vector<2x32xf32>
    %727 = arith.addf %375, %726 : vector<2x32xf32>
    %c400 = arith.constant 400 : index
    %c0_238 = arith.constant 0 : index
    %728 = vector.load %arg1[%c400, %c0_238] : memref<912x32xf32, #tpu.memory_space<vmem>>, vector<1x32xf32>
    %c408 = arith.constant 408 : index
    %c0_239 = arith.constant 0 : index
    %729 = vector.load %arg1[%c408, %c0_239] : memref<912x32xf32, #tpu.memory_space<vmem>>, vector<1x32xf32>
    %cst_240 = arith.constant dense<0.000000e+00> : vector<2xf32>
    %730 = vector.multi_reduction <add>, %727, %cst_240 [1] : vector<2x32xf32> to vector<2xf32>
    %731 = vector.shape_cast %730 : vector<2xf32> to vector<2x1xf32>
    %cst_241 = arith.constant 3.200000e+01 : f32
    %732 = vector.broadcast %cst_241 : f32 to vector<2x1xf32>
    %733 = arith.divf %731, %732 : vector<2x1xf32>
    %734 = vector.broadcast %733 : vector<2x1xf32> to vector<2x32xf32>
    %735 = arith.subf %727, %734 : vector<2x32xf32>
    %736 = arith.mulf %735, %735 : vector<2x32xf32>
    %cst_242 = arith.constant dense<0.000000e+00> : vector<2xf32>
    %737 = vector.multi_reduction <add>, %736, %cst_242 [1] : vector<2x32xf32> to vector<2xf32>
    %738 = vector.shape_cast %737 : vector<2xf32> to vector<2x1xf32>
    %cst_243 = arith.constant 3.200000e+01 : f32
    %739 = vector.broadcast %cst_243 : f32 to vector<2x1xf32>
    %740 = arith.divf %738, %739 : vector<2x1xf32>
    %cst_244 = arith.constant 9.99999974E-6 : f32
    %741 = vector.broadcast %cst_244 : f32 to vector<2x1xf32>
    %742 = arith.addf %740, %741 : vector<2x1xf32>
    %743 = math.rsqrt %742 : vector<2x1xf32>
    %744 = vector.broadcast %743 : vector<2x1xf32> to vector<2x32xf32>
    %745 = arith.mulf %735, %744 : vector<2x32xf32>
    %746 = vector.broadcast %728 : vector<1x32xf32> to vector<2x32xf32>
    %747 = arith.mulf %745, %746 : vector<2x32xf32>
    %748 = vector.broadcast %729 : vector<1x32xf32> to vector<2x32xf32>
    %749 = arith.addf %747, %748 : vector<2x32xf32>
    %c416 = arith.constant 416 : index
    %c0_245 = arith.constant 0 : index
    %750 = vector.load %arg1[%c416, %c0_245] : memref<912x32xf32, #tpu.memory_space<vmem>>, vector<32x32xf32>
    %c448 = arith.constant 448 : index
    %c0_246 = arith.constant 0 : index
    %751 = vector.load %arg1[%c448, %c0_246] : memref<912x32xf32, #tpu.memory_space<vmem>>, vector<1x32xf32>
    %c1608 = arith.constant 1608 : index
    %c0_247 = arith.constant 0 : index
    %752 = vector.load %arg2[%c1608, %c0_247] : memref<1768x64xf32, #tpu.memory_space<vmem>>, vector<32x64xf32>
    %c1640 = arith.constant 1640 : index
    %c0_248 = arith.constant 0 : index
    %753 = vector.load %arg2[%c1640, %c0_248] : memref<1768x64xf32, #tpu.memory_space<vmem>>, vector<1x64xf32>
    %c456 = arith.constant 456 : index
    %c0_249 = arith.constant 0 : index
    %754 = vector.load %arg1[%c456, %c0_249] : memref<912x32xf32, #tpu.memory_space<vmem>>, vector<32x32xf32>
    %c488 = arith.constant 488 : index
    %c0_250 = arith.constant 0 : index
    %755 = vector.load %arg1[%c488, %c0_250] : memref<912x32xf32, #tpu.memory_space<vmem>>, vector<1x32xf32>
    %cst_251 = arith.constant dense<0.000000e+00> : vector<2x32xf32>
    %756 = tpu.matmul %749, %750, %cst_251 {dimension_numbers = #tpu.dot_dimension_numbers<[1], [0], [0], [1], [0, 0, 1, 1], [], []>} : vector<2x32xf32>, vector<32x32xf32>, vector<2x32xf32> -> vector<2x32xf32>
    %757 = vector.broadcast %751 : vector<1x32xf32> to vector<2x32xf32>
    %758 = arith.addf %756, %757 : vector<2x32xf32>
    %cst_252 = arith.constant dense<0.000000e+00> : vector<2x64xf32>
    %759 = tpu.matmul %655, %752, %cst_252 {dimension_numbers = #tpu.dot_dimension_numbers<[1], [0], [0], [1], [0, 0, 1, 1], [], []>} : vector<2x32xf32>, vector<32x64xf32>, vector<2x64xf32> -> vector<2x64xf32>
    %760 = vector.broadcast %753 : vector<1x64xf32> to vector<2x64xf32>
    %761 = arith.addf %759, %760 : vector<2x64xf32>
    %762 = vector.extract_strided_slice %758 {offsets = [0, 0], sizes = [2, 8], strides = [1, 1]} : vector<2x32xf32> to vector<2x8xf32>
    %763 = vector.extract_strided_slice %761 {offsets = [0, 0], sizes = [2, 8], strides = [1, 1]} : vector<2x64xf32> to vector<2x8xf32>
    %cst_253 = arith.constant dense<0.000000e+00> : vector<2x2xf32>
    %764 = tpu.matmul %762, %763, %cst_253 {dimension_numbers = #tpu.dot_dimension_numbers<[1], [1], [0], [0], [0, 0, 1, 0], [], []>} : vector<2x8xf32>, vector<2x8xf32>, vector<2x2xf32> -> vector<2x2xf32>
    %cst_254 = arith.constant dense<0xFF800000> : vector<2xf32>
    %765 = vector.multi_reduction <maximumf>, %764, %cst_254 [1] : vector<2x2xf32> to vector<2xf32>
    %766 = vector.shape_cast %765 : vector<2xf32> to vector<2x1xf32>
    %767 = vector.broadcast %766 : vector<2x1xf32> to vector<2x2xf32>
    %768 = arith.subf %764, %767 : vector<2x2xf32>
    %769 = math.exp %768 : vector<2x2xf32>
    %cst_255 = arith.constant dense<0.000000e+00> : vector<2xf32>
    %770 = vector.multi_reduction <add>, %769, %cst_255 [1] : vector<2x2xf32> to vector<2xf32>
    %771 = vector.shape_cast %770 : vector<2xf32> to vector<2x1xf32>
    %772 = tpu.reciprocal %771 {approx = true} : vector<2x1xf32> -> vector<2x1xf32>
    %773 = vector.broadcast %772 : vector<2x1xf32> to vector<2x2xf32>
    %774 = arith.mulf %769, %773 : vector<2x2xf32>
    %775 = vector.extract_strided_slice %761 {offsets = [0, 32], sizes = [2, 8], strides = [1, 1]} : vector<2x64xf32> to vector<2x8xf32>
    %cst_256 = arith.constant dense<0.000000e+00> : vector<2x8xf32>
    %776 = tpu.matmul %774, %775, %cst_256 {dimension_numbers = #tpu.dot_dimension_numbers<[1], [0], [0], [1], [0, 0, 1, 1], [], []>} : vector<2x2xf32>, vector<2x8xf32>, vector<2x8xf32> -> vector<2x8xf32>
    %777 = vector.extract_strided_slice %758 {offsets = [0, 8], sizes = [2, 8], strides = [1, 1]} : vector<2x32xf32> to vector<2x8xf32>
    %778 = vector.extract_strided_slice %761 {offsets = [0, 8], sizes = [2, 8], strides = [1, 1]} : vector<2x64xf32> to vector<2x8xf32>
    %cst_257 = arith.constant dense<0.000000e+00> : vector<2x2xf32>
    %779 = tpu.matmul %777, %778, %cst_257 {dimension_numbers = #tpu.dot_dimension_numbers<[1], [1], [0], [0], [0, 0, 1, 0], [], []>} : vector<2x8xf32>, vector<2x8xf32>, vector<2x2xf32> -> vector<2x2xf32>
    %cst_258 = arith.constant dense<0xFF800000> : vector<2xf32>
    %780 = vector.multi_reduction <maximumf>, %779, %cst_258 [1] : vector<2x2xf32> to vector<2xf32>
    %781 = vector.shape_cast %780 : vector<2xf32> to vector<2x1xf32>
    %782 = vector.broadcast %781 : vector<2x1xf32> to vector<2x2xf32>
    %783 = arith.subf %779, %782 : vector<2x2xf32>
    %784 = math.exp %783 : vector<2x2xf32>
    %cst_259 = arith.constant dense<0.000000e+00> : vector<2xf32>
    %785 = vector.multi_reduction <add>, %784, %cst_259 [1] : vector<2x2xf32> to vector<2xf32>
    %786 = vector.shape_cast %785 : vector<2xf32> to vector<2x1xf32>
    %787 = tpu.reciprocal %786 {approx = true} : vector<2x1xf32> -> vector<2x1xf32>
    %788 = vector.broadcast %787 : vector<2x1xf32> to vector<2x2xf32>
    %789 = arith.mulf %784, %788 : vector<2x2xf32>
    %790 = vector.extract_strided_slice %761 {offsets = [0, 40], sizes = [2, 8], strides = [1, 1]} : vector<2x64xf32> to vector<2x8xf32>
    %cst_260 = arith.constant dense<0.000000e+00> : vector<2x8xf32>
    %791 = tpu.matmul %789, %790, %cst_260 {dimension_numbers = #tpu.dot_dimension_numbers<[1], [0], [0], [1], [0, 0, 1, 1], [], []>} : vector<2x2xf32>, vector<2x8xf32>, vector<2x8xf32> -> vector<2x8xf32>
    %792 = vector.extract_strided_slice %758 {offsets = [0, 16], sizes = [2, 8], strides = [1, 1]} : vector<2x32xf32> to vector<2x8xf32>
    %793 = vector.extract_strided_slice %761 {offsets = [0, 16], sizes = [2, 8], strides = [1, 1]} : vector<2x64xf32> to vector<2x8xf32>
    %cst_261 = arith.constant dense<0.000000e+00> : vector<2x2xf32>
    %794 = tpu.matmul %792, %793, %cst_261 {dimension_numbers = #tpu.dot_dimension_numbers<[1], [1], [0], [0], [0, 0, 1, 0], [], []>} : vector<2x8xf32>, vector<2x8xf32>, vector<2x2xf32> -> vector<2x2xf32>
    %cst_262 = arith.constant dense<0xFF800000> : vector<2xf32>
    %795 = vector.multi_reduction <maximumf>, %794, %cst_262 [1] : vector<2x2xf32> to vector<2xf32>
    %796 = vector.shape_cast %795 : vector<2xf32> to vector<2x1xf32>
    %797 = vector.broadcast %796 : vector<2x1xf32> to vector<2x2xf32>
    %798 = arith.subf %794, %797 : vector<2x2xf32>
    %799 = math.exp %798 : vector<2x2xf32>
    %cst_263 = arith.constant dense<0.000000e+00> : vector<2xf32>
    %800 = vector.multi_reduction <add>, %799, %cst_263 [1] : vector<2x2xf32> to vector<2xf32>
    %801 = vector.shape_cast %800 : vector<2xf32> to vector<2x1xf32>
    %802 = tpu.reciprocal %801 {approx = true} : vector<2x1xf32> -> vector<2x1xf32>
    %803 = vector.broadcast %802 : vector<2x1xf32> to vector<2x2xf32>
    %804 = arith.mulf %799, %803 : vector<2x2xf32>
    %805 = vector.extract_strided_slice %761 {offsets = [0, 48], sizes = [2, 8], strides = [1, 1]} : vector<2x64xf32> to vector<2x8xf32>
    %cst_264 = arith.constant dense<0.000000e+00> : vector<2x8xf32>
    %806 = tpu.matmul %804, %805, %cst_264 {dimension_numbers = #tpu.dot_dimension_numbers<[1], [0], [0], [1], [0, 0, 1, 1], [], []>} : vector<2x2xf32>, vector<2x8xf32>, vector<2x8xf32> -> vector<2x8xf32>
    %807 = vector.extract_strided_slice %758 {offsets = [0, 24], sizes = [2, 8], strides = [1, 1]} : vector<2x32xf32> to vector<2x8xf32>
    %808 = vector.extract_strided_slice %761 {offsets = [0, 24], sizes = [2, 8], strides = [1, 1]} : vector<2x64xf32> to vector<2x8xf32>
    %cst_265 = arith.constant dense<0.000000e+00> : vector<2x2xf32>
    %809 = tpu.matmul %807, %808, %cst_265 {dimension_numbers = #tpu.dot_dimension_numbers<[1], [1], [0], [0], [0, 0, 1, 0], [], []>} : vector<2x8xf32>, vector<2x8xf32>, vector<2x2xf32> -> vector<2x2xf32>
    %cst_266 = arith.constant dense<0xFF800000> : vector<2xf32>
    %810 = vector.multi_reduction <maximumf>, %809, %cst_266 [1] : vector<2x2xf32> to vector<2xf32>
    %811 = vector.shape_cast %810 : vector<2xf32> to vector<2x1xf32>
    %812 = vector.broadcast %811 : vector<2x1xf32> to vector<2x2xf32>
    %813 = arith.subf %809, %812 : vector<2x2xf32>
    %814 = math.exp %813 : vector<2x2xf32>
    %cst_267 = arith.constant dense<0.000000e+00> : vector<2xf32>
    %815 = vector.multi_reduction <add>, %814, %cst_267 [1] : vector<2x2xf32> to vector<2xf32>
    %816 = vector.shape_cast %815 : vector<2xf32> to vector<2x1xf32>
    %817 = tpu.reciprocal %816 {approx = true} : vector<2x1xf32> -> vector<2x1xf32>
    %818 = vector.broadcast %817 : vector<2x1xf32> to vector<2x2xf32>
    %819 = arith.mulf %814, %818 : vector<2x2xf32>
    %820 = vector.extract_strided_slice %761 {offsets = [0, 56], sizes = [2, 8], strides = [1, 1]} : vector<2x64xf32> to vector<2x8xf32>
    %cst_268 = arith.constant dense<0.000000e+00> : vector<2x8xf32>
    %821 = tpu.matmul %819, %820, %cst_268 {dimension_numbers = #tpu.dot_dimension_numbers<[1], [0], [0], [1], [0, 0, 1, 1], [], []>} : vector<2x2xf32>, vector<2x8xf32>, vector<2x8xf32> -> vector<2x8xf32>
    %822 = tpu.concatenate %776, %791, %806, %821 in 1 : vector<2x8xf32>, vector<2x8xf32>, vector<2x8xf32>, vector<2x8xf32> -> vector<2x32xf32>
    %cst_269 = arith.constant dense<0.000000e+00> : vector<2x32xf32>
    %823 = tpu.matmul %822, %754, %cst_269 {dimension_numbers = #tpu.dot_dimension_numbers<[1], [0], [0], [1], [0, 0, 1, 1], [], []>} : vector<2x32xf32>, vector<32x32xf32>, vector<2x32xf32> -> vector<2x32xf32>
    %824 = vector.broadcast %755 : vector<1x32xf32> to vector<2x32xf32>
    %825 = arith.addf %823, %824 : vector<2x32xf32>
    %826 = arith.addf %749, %825 : vector<2x32xf32>
    %c496 = arith.constant 496 : index
    %c0_270 = arith.constant 0 : index
    %827 = vector.load %arg1[%c496, %c0_270] : memref<912x32xf32, #tpu.memory_space<vmem>>, vector<1x32xf32>
    %c504 = arith.constant 504 : index
    %c0_271 = arith.constant 0 : index
    %828 = vector.load %arg1[%c504, %c0_271] : memref<912x32xf32, #tpu.memory_space<vmem>>, vector<1x32xf32>
    %cst_272 = arith.constant dense<0.000000e+00> : vector<2xf32>
    %829 = vector.multi_reduction <add>, %826, %cst_272 [1] : vector<2x32xf32> to vector<2xf32>
    %830 = vector.shape_cast %829 : vector<2xf32> to vector<2x1xf32>
    %cst_273 = arith.constant 3.200000e+01 : f32
    %831 = vector.broadcast %cst_273 : f32 to vector<2x1xf32>
    %832 = arith.divf %830, %831 : vector<2x1xf32>
    %833 = vector.broadcast %832 : vector<2x1xf32> to vector<2x32xf32>
    %834 = arith.subf %826, %833 : vector<2x32xf32>
    %835 = arith.mulf %834, %834 : vector<2x32xf32>
    %cst_274 = arith.constant dense<0.000000e+00> : vector<2xf32>
    %836 = vector.multi_reduction <add>, %835, %cst_274 [1] : vector<2x32xf32> to vector<2xf32>
    %837 = vector.shape_cast %836 : vector<2xf32> to vector<2x1xf32>
    %cst_275 = arith.constant 3.200000e+01 : f32
    %838 = vector.broadcast %cst_275 : f32 to vector<2x1xf32>
    %839 = arith.divf %837, %838 : vector<2x1xf32>
    %cst_276 = arith.constant 9.99999974E-6 : f32
    %840 = vector.broadcast %cst_276 : f32 to vector<2x1xf32>
    %841 = arith.addf %839, %840 : vector<2x1xf32>
    %842 = math.rsqrt %841 : vector<2x1xf32>
    %843 = vector.broadcast %842 : vector<2x1xf32> to vector<2x32xf32>
    %844 = arith.mulf %834, %843 : vector<2x32xf32>
    %845 = vector.broadcast %827 : vector<1x32xf32> to vector<2x32xf32>
    %846 = arith.mulf %844, %845 : vector<2x32xf32>
    %847 = vector.broadcast %828 : vector<1x32xf32> to vector<2x32xf32>
    %848 = arith.addf %846, %847 : vector<2x32xf32>
    %c1648 = arith.constant 1648 : index
    %c0_277 = arith.constant 0 : index
    %849 = vector.load %arg2[%c1648, %c0_277] : memref<1768x64xf32, #tpu.memory_space<vmem>>, vector<32x64xf32>
    %cst_278 = arith.constant dense<0.000000e+00> : vector<2x64xf32>
    %850 = tpu.matmul %848, %849, %cst_278 {dimension_numbers = #tpu.dot_dimension_numbers<[1], [0], [0], [1], [0, 0, 1, 1], [], []>} : vector<2x32xf32>, vector<32x64xf32>, vector<2x64xf32> -> vector<2x64xf32>
    %c1680 = arith.constant 1680 : index
    %c0_279 = arith.constant 0 : index
    %851 = vector.load %arg2[%c1680, %c0_279] : memref<1768x64xf32, #tpu.memory_space<vmem>>, vector<1x64xf32>
    %852 = vector.broadcast %851 : vector<1x64xf32> to vector<2x64xf32>
    %853 = arith.addf %850, %852 : vector<2x64xf32>
    %cst_280 = arith.constant 0.000000e+00 : f32
    %854 = vector.broadcast %cst_280 : f32 to vector<2x64xf32>
    %855 = arith.maximumf %853, %854 : vector<2x64xf32>
    %c512 = arith.constant 512 : index
    %c0_281 = arith.constant 0 : index
    %856 = vector.load %arg1[%c512, %c0_281] : memref<912x32xf32, #tpu.memory_space<vmem>>, vector<64x32xf32>
    %cst_282 = arith.constant dense<0.000000e+00> : vector<2x32xf32>
    %857 = tpu.matmul %855, %856, %cst_282 {dimension_numbers = #tpu.dot_dimension_numbers<[1], [0], [0], [1], [0, 0, 1, 1], [], []>} : vector<2x64xf32>, vector<64x32xf32>, vector<2x32xf32> -> vector<2x32xf32>
    %c576 = arith.constant 576 : index
    %c0_283 = arith.constant 0 : index
    %858 = vector.load %arg1[%c576, %c0_283] : memref<912x32xf32, #tpu.memory_space<vmem>>, vector<1x32xf32>
    %859 = vector.broadcast %858 : vector<1x32xf32> to vector<2x32xf32>
    %860 = arith.addf %857, %859 : vector<2x32xf32>
    %861 = arith.addf %848, %860 : vector<2x32xf32>
    %c584 = arith.constant 584 : index
    %c0_284 = arith.constant 0 : index
    %862 = vector.load %arg1[%c584, %c0_284] : memref<912x32xf32, #tpu.memory_space<vmem>>, vector<1x32xf32>
    %c592 = arith.constant 592 : index
    %c0_285 = arith.constant 0 : index
    %863 = vector.load %arg1[%c592, %c0_285] : memref<912x32xf32, #tpu.memory_space<vmem>>, vector<1x32xf32>
    %cst_286 = arith.constant dense<0.000000e+00> : vector<2xf32>
    %864 = vector.multi_reduction <add>, %861, %cst_286 [1] : vector<2x32xf32> to vector<2xf32>
    %865 = vector.shape_cast %864 : vector<2xf32> to vector<2x1xf32>
    %cst_287 = arith.constant 3.200000e+01 : f32
    %866 = vector.broadcast %cst_287 : f32 to vector<2x1xf32>
    %867 = arith.divf %865, %866 : vector<2x1xf32>
    %868 = vector.broadcast %867 : vector<2x1xf32> to vector<2x32xf32>
    %869 = arith.subf %861, %868 : vector<2x32xf32>
    %870 = arith.mulf %869, %869 : vector<2x32xf32>
    %cst_288 = arith.constant dense<0.000000e+00> : vector<2xf32>
    %871 = vector.multi_reduction <add>, %870, %cst_288 [1] : vector<2x32xf32> to vector<2xf32>
    %872 = vector.shape_cast %871 : vector<2xf32> to vector<2x1xf32>
    %cst_289 = arith.constant 3.200000e+01 : f32
    %873 = vector.broadcast %cst_289 : f32 to vector<2x1xf32>
    %874 = arith.divf %872, %873 : vector<2x1xf32>
    %cst_290 = arith.constant 9.99999974E-6 : f32
    %875 = vector.broadcast %cst_290 : f32 to vector<2x1xf32>
    %876 = arith.addf %874, %875 : vector<2x1xf32>
    %877 = math.rsqrt %876 : vector<2x1xf32>
    %878 = vector.broadcast %877 : vector<2x1xf32> to vector<2x32xf32>
    %879 = arith.mulf %869, %878 : vector<2x32xf32>
    %880 = vector.broadcast %862 : vector<1x32xf32> to vector<2x32xf32>
    %881 = arith.mulf %879, %880 : vector<2x32xf32>
    %882 = vector.broadcast %863 : vector<1x32xf32> to vector<2x32xf32>
    %883 = arith.addf %881, %882 : vector<2x32xf32>
    %c120_291 = arith.constant 120 : index
    %c0_292 = arith.constant 0 : index
    %884 = vector.load %arg3[%c120_291, %c0_292] : memref<160x96xf32, #tpu.memory_space<vmem>>, vector<32x96xf32>
    %c152 = arith.constant 152 : index
    %c0_293 = arith.constant 0 : index
    %885 = vector.load %arg3[%c152, %c0_293] : memref<160x96xf32, #tpu.memory_space<vmem>>, vector<1x96xf32>
    %c600 = arith.constant 600 : index
    %c0_294 = arith.constant 0 : index
    %886 = vector.load %arg1[%c600, %c0_294] : memref<912x32xf32, #tpu.memory_space<vmem>>, vector<32x32xf32>
    %c632 = arith.constant 632 : index
    %c0_295 = arith.constant 0 : index
    %887 = vector.load %arg1[%c632, %c0_295] : memref<912x32xf32, #tpu.memory_space<vmem>>, vector<1x32xf32>
    %cst_296 = arith.constant dense<0.000000e+00> : vector<2x96xf32>
    %888 = tpu.matmul %883, %884, %cst_296 {dimension_numbers = #tpu.dot_dimension_numbers<[1], [0], [0], [1], [0, 0, 1, 1], [], []>} : vector<2x32xf32>, vector<32x96xf32>, vector<2x96xf32> -> vector<2x96xf32>
    %889 = vector.broadcast %885 : vector<1x96xf32> to vector<2x96xf32>
    %890 = arith.addf %888, %889 : vector<2x96xf32>
    %891 = vector.extract_strided_slice %890 {offsets = [0, 0], sizes = [2, 8], strides = [1, 1]} : vector<2x96xf32> to vector<2x8xf32>
    %892 = vector.extract_strided_slice %890 {offsets = [0, 32], sizes = [2, 8], strides = [1, 1]} : vector<2x96xf32> to vector<2x8xf32>
    %cst_297 = arith.constant dense<0.000000e+00> : vector<2x2xf32>
    %893 = tpu.matmul %891, %892, %cst_297 {dimension_numbers = #tpu.dot_dimension_numbers<[1], [1], [0], [0], [0, 0, 1, 0], [], []>} : vector<2x8xf32>, vector<2x8xf32>, vector<2x2xf32> -> vector<2x2xf32>
    %cst_298 = arith.constant dense<0xFF800000> : vector<2xf32>
    %894 = vector.multi_reduction <maximumf>, %893, %cst_298 [1] : vector<2x2xf32> to vector<2xf32>
    %895 = vector.shape_cast %894 : vector<2xf32> to vector<2x1xf32>
    %896 = vector.broadcast %895 : vector<2x1xf32> to vector<2x2xf32>
    %897 = arith.subf %893, %896 : vector<2x2xf32>
    %898 = math.exp %897 : vector<2x2xf32>
    %cst_299 = arith.constant dense<0.000000e+00> : vector<2xf32>
    %899 = vector.multi_reduction <add>, %898, %cst_299 [1] : vector<2x2xf32> to vector<2xf32>
    %900 = vector.shape_cast %899 : vector<2xf32> to vector<2x1xf32>
    %901 = tpu.reciprocal %900 {approx = true} : vector<2x1xf32> -> vector<2x1xf32>
    %902 = vector.broadcast %901 : vector<2x1xf32> to vector<2x2xf32>
    %903 = arith.mulf %898, %902 : vector<2x2xf32>
    %904 = vector.extract_strided_slice %890 {offsets = [0, 64], sizes = [2, 8], strides = [1, 1]} : vector<2x96xf32> to vector<2x8xf32>
    %cst_300 = arith.constant dense<0.000000e+00> : vector<2x8xf32>
    %905 = tpu.matmul %903, %904, %cst_300 {dimension_numbers = #tpu.dot_dimension_numbers<[1], [0], [0], [1], [0, 0, 1, 1], [], []>} : vector<2x2xf32>, vector<2x8xf32>, vector<2x8xf32> -> vector<2x8xf32>
    %906 = vector.extract_strided_slice %890 {offsets = [0, 8], sizes = [2, 8], strides = [1, 1]} : vector<2x96xf32> to vector<2x8xf32>
    %907 = vector.extract_strided_slice %890 {offsets = [0, 40], sizes = [2, 8], strides = [1, 1]} : vector<2x96xf32> to vector<2x8xf32>
    %cst_301 = arith.constant dense<0.000000e+00> : vector<2x2xf32>
    %908 = tpu.matmul %906, %907, %cst_301 {dimension_numbers = #tpu.dot_dimension_numbers<[1], [1], [0], [0], [0, 0, 1, 0], [], []>} : vector<2x8xf32>, vector<2x8xf32>, vector<2x2xf32> -> vector<2x2xf32>
    %cst_302 = arith.constant dense<0xFF800000> : vector<2xf32>
    %909 = vector.multi_reduction <maximumf>, %908, %cst_302 [1] : vector<2x2xf32> to vector<2xf32>
    %910 = vector.shape_cast %909 : vector<2xf32> to vector<2x1xf32>
    %911 = vector.broadcast %910 : vector<2x1xf32> to vector<2x2xf32>
    %912 = arith.subf %908, %911 : vector<2x2xf32>
    %913 = math.exp %912 : vector<2x2xf32>
    %cst_303 = arith.constant dense<0.000000e+00> : vector<2xf32>
    %914 = vector.multi_reduction <add>, %913, %cst_303 [1] : vector<2x2xf32> to vector<2xf32>
    %915 = vector.shape_cast %914 : vector<2xf32> to vector<2x1xf32>
    %916 = tpu.reciprocal %915 {approx = true} : vector<2x1xf32> -> vector<2x1xf32>
    %917 = vector.broadcast %916 : vector<2x1xf32> to vector<2x2xf32>
    %918 = arith.mulf %913, %917 : vector<2x2xf32>
    %919 = vector.extract_strided_slice %890 {offsets = [0, 72], sizes = [2, 8], strides = [1, 1]} : vector<2x96xf32> to vector<2x8xf32>
    %cst_304 = arith.constant dense<0.000000e+00> : vector<2x8xf32>
    %920 = tpu.matmul %918, %919, %cst_304 {dimension_numbers = #tpu.dot_dimension_numbers<[1], [0], [0], [1], [0, 0, 1, 1], [], []>} : vector<2x2xf32>, vector<2x8xf32>, vector<2x8xf32> -> vector<2x8xf32>
    %921 = vector.extract_strided_slice %890 {offsets = [0, 16], sizes = [2, 8], strides = [1, 1]} : vector<2x96xf32> to vector<2x8xf32>
    %922 = vector.extract_strided_slice %890 {offsets = [0, 48], sizes = [2, 8], strides = [1, 1]} : vector<2x96xf32> to vector<2x8xf32>
    %cst_305 = arith.constant dense<0.000000e+00> : vector<2x2xf32>
    %923 = tpu.matmul %921, %922, %cst_305 {dimension_numbers = #tpu.dot_dimension_numbers<[1], [1], [0], [0], [0, 0, 1, 0], [], []>} : vector<2x8xf32>, vector<2x8xf32>, vector<2x2xf32> -> vector<2x2xf32>
    %cst_306 = arith.constant dense<0xFF800000> : vector<2xf32>
    %924 = vector.multi_reduction <maximumf>, %923, %cst_306 [1] : vector<2x2xf32> to vector<2xf32>
    %925 = vector.shape_cast %924 : vector<2xf32> to vector<2x1xf32>
    %926 = vector.broadcast %925 : vector<2x1xf32> to vector<2x2xf32>
    %927 = arith.subf %923, %926 : vector<2x2xf32>
    %928 = math.exp %927 : vector<2x2xf32>
    %cst_307 = arith.constant dense<0.000000e+00> : vector<2xf32>
    %929 = vector.multi_reduction <add>, %928, %cst_307 [1] : vector<2x2xf32> to vector<2xf32>
    %930 = vector.shape_cast %929 : vector<2xf32> to vector<2x1xf32>
    %931 = tpu.reciprocal %930 {approx = true} : vector<2x1xf32> -> vector<2x1xf32>
    %932 = vector.broadcast %931 : vector<2x1xf32> to vector<2x2xf32>
    %933 = arith.mulf %928, %932 : vector<2x2xf32>
    %934 = vector.extract_strided_slice %890 {offsets = [0, 80], sizes = [2, 8], strides = [1, 1]} : vector<2x96xf32> to vector<2x8xf32>
    %cst_308 = arith.constant dense<0.000000e+00> : vector<2x8xf32>
    %935 = tpu.matmul %933, %934, %cst_308 {dimension_numbers = #tpu.dot_dimension_numbers<[1], [0], [0], [1], [0, 0, 1, 1], [], []>} : vector<2x2xf32>, vector<2x8xf32>, vector<2x8xf32> -> vector<2x8xf32>
    %936 = vector.extract_strided_slice %890 {offsets = [0, 24], sizes = [2, 8], strides = [1, 1]} : vector<2x96xf32> to vector<2x8xf32>
    %937 = vector.extract_strided_slice %890 {offsets = [0, 56], sizes = [2, 8], strides = [1, 1]} : vector<2x96xf32> to vector<2x8xf32>
    %cst_309 = arith.constant dense<0.000000e+00> : vector<2x2xf32>
    %938 = tpu.matmul %936, %937, %cst_309 {dimension_numbers = #tpu.dot_dimension_numbers<[1], [1], [0], [0], [0, 0, 1, 0], [], []>} : vector<2x8xf32>, vector<2x8xf32>, vector<2x2xf32> -> vector<2x2xf32>
    %cst_310 = arith.constant dense<0xFF800000> : vector<2xf32>
    %939 = vector.multi_reduction <maximumf>, %938, %cst_310 [1] : vector<2x2xf32> to vector<2xf32>
    %940 = vector.shape_cast %939 : vector<2xf32> to vector<2x1xf32>
    %941 = vector.broadcast %940 : vector<2x1xf32> to vector<2x2xf32>
    %942 = arith.subf %938, %941 : vector<2x2xf32>
    %943 = math.exp %942 : vector<2x2xf32>
    %cst_311 = arith.constant dense<0.000000e+00> : vector<2xf32>
    %944 = vector.multi_reduction <add>, %943, %cst_311 [1] : vector<2x2xf32> to vector<2xf32>
    %945 = vector.shape_cast %944 : vector<2xf32> to vector<2x1xf32>
    %946 = tpu.reciprocal %945 {approx = true} : vector<2x1xf32> -> vector<2x1xf32>
    %947 = vector.broadcast %946 : vector<2x1xf32> to vector<2x2xf32>
    %948 = arith.mulf %943, %947 : vector<2x2xf32>
    %949 = vector.extract_strided_slice %890 {offsets = [0, 88], sizes = [2, 8], strides = [1, 1]} : vector<2x96xf32> to vector<2x8xf32>
    %cst_312 = arith.constant dense<0.000000e+00> : vector<2x8xf32>
    %950 = tpu.matmul %948, %949, %cst_312 {dimension_numbers = #tpu.dot_dimension_numbers<[1], [0], [0], [1], [0, 0, 1, 1], [], []>} : vector<2x2xf32>, vector<2x8xf32>, vector<2x8xf32> -> vector<2x8xf32>
    %951 = tpu.concatenate %905, %920, %935, %950 in 1 : vector<2x8xf32>, vector<2x8xf32>, vector<2x8xf32>, vector<2x8xf32> -> vector<2x32xf32>
    %cst_313 = arith.constant dense<0.000000e+00> : vector<2x32xf32>
    %952 = tpu.matmul %951, %886, %cst_313 {dimension_numbers = #tpu.dot_dimension_numbers<[1], [0], [0], [1], [0, 0, 1, 1], [], []>} : vector<2x32xf32>, vector<32x32xf32>, vector<2x32xf32> -> vector<2x32xf32>
    %953 = vector.broadcast %887 : vector<1x32xf32> to vector<2x32xf32>
    %954 = arith.addf %952, %953 : vector<2x32xf32>
    %955 = arith.addf %883, %954 : vector<2x32xf32>
    %c640 = arith.constant 640 : index
    %c0_314 = arith.constant 0 : index
    %956 = vector.load %arg1[%c640, %c0_314] : memref<912x32xf32, #tpu.memory_space<vmem>>, vector<1x32xf32>
    %c648 = arith.constant 648 : index
    %c0_315 = arith.constant 0 : index
    %957 = vector.load %arg1[%c648, %c0_315] : memref<912x32xf32, #tpu.memory_space<vmem>>, vector<1x32xf32>
    %cst_316 = arith.constant dense<0.000000e+00> : vector<2xf32>
    %958 = vector.multi_reduction <add>, %955, %cst_316 [1] : vector<2x32xf32> to vector<2xf32>
    %959 = vector.shape_cast %958 : vector<2xf32> to vector<2x1xf32>
    %cst_317 = arith.constant 3.200000e+01 : f32
    %960 = vector.broadcast %cst_317 : f32 to vector<2x1xf32>
    %961 = arith.divf %959, %960 : vector<2x1xf32>
    %962 = vector.broadcast %961 : vector<2x1xf32> to vector<2x32xf32>
    %963 = arith.subf %955, %962 : vector<2x32xf32>
    %964 = arith.mulf %963, %963 : vector<2x32xf32>
    %cst_318 = arith.constant dense<0.000000e+00> : vector<2xf32>
    %965 = vector.multi_reduction <add>, %964, %cst_318 [1] : vector<2x32xf32> to vector<2xf32>
    %966 = vector.shape_cast %965 : vector<2xf32> to vector<2x1xf32>
    %cst_319 = arith.constant 3.200000e+01 : f32
    %967 = vector.broadcast %cst_319 : f32 to vector<2x1xf32>
    %968 = arith.divf %966, %967 : vector<2x1xf32>
    %cst_320 = arith.constant 9.99999974E-6 : f32
    %969 = vector.broadcast %cst_320 : f32 to vector<2x1xf32>
    %970 = arith.addf %968, %969 : vector<2x1xf32>
    %971 = math.rsqrt %970 : vector<2x1xf32>
    %972 = vector.broadcast %971 : vector<2x1xf32> to vector<2x32xf32>
    %973 = arith.mulf %963, %972 : vector<2x32xf32>
    %974 = vector.broadcast %956 : vector<1x32xf32> to vector<2x32xf32>
    %975 = arith.mulf %973, %974 : vector<2x32xf32>
    %976 = vector.broadcast %957 : vector<1x32xf32> to vector<2x32xf32>
    %977 = arith.addf %975, %976 : vector<2x32xf32>
    %c656 = arith.constant 656 : index
    %c0_321 = arith.constant 0 : index
    %978 = vector.load %arg1[%c656, %c0_321] : memref<912x32xf32, #tpu.memory_space<vmem>>, vector<32x32xf32>
    %c688 = arith.constant 688 : index
    %c0_322 = arith.constant 0 : index
    %979 = vector.load %arg1[%c688, %c0_322] : memref<912x32xf32, #tpu.memory_space<vmem>>, vector<1x32xf32>
    %c1688 = arith.constant 1688 : index
    %c0_323 = arith.constant 0 : index
    %980 = vector.load %arg2[%c1688, %c0_323] : memref<1768x64xf32, #tpu.memory_space<vmem>>, vector<32x64xf32>
    %c1720 = arith.constant 1720 : index
    %c0_324 = arith.constant 0 : index
    %981 = vector.load %arg2[%c1720, %c0_324] : memref<1768x64xf32, #tpu.memory_space<vmem>>, vector<1x64xf32>
    %c696 = arith.constant 696 : index
    %c0_325 = arith.constant 0 : index
    %982 = vector.load %arg1[%c696, %c0_325] : memref<912x32xf32, #tpu.memory_space<vmem>>, vector<32x32xf32>
    %c728 = arith.constant 728 : index
    %c0_326 = arith.constant 0 : index
    %983 = vector.load %arg1[%c728, %c0_326] : memref<912x32xf32, #tpu.memory_space<vmem>>, vector<1x32xf32>
    %cst_327 = arith.constant dense<0.000000e+00> : vector<2x32xf32>
    %984 = tpu.matmul %977, %978, %cst_327 {dimension_numbers = #tpu.dot_dimension_numbers<[1], [0], [0], [1], [0, 0, 1, 1], [], []>} : vector<2x32xf32>, vector<32x32xf32>, vector<2x32xf32> -> vector<2x32xf32>
    %985 = vector.broadcast %979 : vector<1x32xf32> to vector<2x32xf32>
    %986 = arith.addf %984, %985 : vector<2x32xf32>
    %cst_328 = arith.constant dense<0.000000e+00> : vector<2x64xf32>
    %987 = tpu.matmul %655, %980, %cst_328 {dimension_numbers = #tpu.dot_dimension_numbers<[1], [0], [0], [1], [0, 0, 1, 1], [], []>} : vector<2x32xf32>, vector<32x64xf32>, vector<2x64xf32> -> vector<2x64xf32>
    %988 = vector.broadcast %981 : vector<1x64xf32> to vector<2x64xf32>
    %989 = arith.addf %987, %988 : vector<2x64xf32>
    %990 = vector.extract_strided_slice %986 {offsets = [0, 0], sizes = [2, 8], strides = [1, 1]} : vector<2x32xf32> to vector<2x8xf32>
    %991 = vector.extract_strided_slice %989 {offsets = [0, 0], sizes = [2, 8], strides = [1, 1]} : vector<2x64xf32> to vector<2x8xf32>
    %cst_329 = arith.constant dense<0.000000e+00> : vector<2x2xf32>
    %992 = tpu.matmul %990, %991, %cst_329 {dimension_numbers = #tpu.dot_dimension_numbers<[1], [1], [0], [0], [0, 0, 1, 0], [], []>} : vector<2x8xf32>, vector<2x8xf32>, vector<2x2xf32> -> vector<2x2xf32>
    %cst_330 = arith.constant dense<0xFF800000> : vector<2xf32>
    %993 = vector.multi_reduction <maximumf>, %992, %cst_330 [1] : vector<2x2xf32> to vector<2xf32>
    %994 = vector.shape_cast %993 : vector<2xf32> to vector<2x1xf32>
    %995 = vector.broadcast %994 : vector<2x1xf32> to vector<2x2xf32>
    %996 = arith.subf %992, %995 : vector<2x2xf32>
    %997 = math.exp %996 : vector<2x2xf32>
    %cst_331 = arith.constant dense<0.000000e+00> : vector<2xf32>
    %998 = vector.multi_reduction <add>, %997, %cst_331 [1] : vector<2x2xf32> to vector<2xf32>
    %999 = vector.shape_cast %998 : vector<2xf32> to vector<2x1xf32>
    %1000 = tpu.reciprocal %999 {approx = true} : vector<2x1xf32> -> vector<2x1xf32>
    %1001 = vector.broadcast %1000 : vector<2x1xf32> to vector<2x2xf32>
    %1002 = arith.mulf %997, %1001 : vector<2x2xf32>
    %1003 = vector.extract_strided_slice %989 {offsets = [0, 32], sizes = [2, 8], strides = [1, 1]} : vector<2x64xf32> to vector<2x8xf32>
    %cst_332 = arith.constant dense<0.000000e+00> : vector<2x8xf32>
    %1004 = tpu.matmul %1002, %1003, %cst_332 {dimension_numbers = #tpu.dot_dimension_numbers<[1], [0], [0], [1], [0, 0, 1, 1], [], []>} : vector<2x2xf32>, vector<2x8xf32>, vector<2x8xf32> -> vector<2x8xf32>
    %1005 = vector.extract_strided_slice %986 {offsets = [0, 8], sizes = [2, 8], strides = [1, 1]} : vector<2x32xf32> to vector<2x8xf32>
    %1006 = vector.extract_strided_slice %989 {offsets = [0, 8], sizes = [2, 8], strides = [1, 1]} : vector<2x64xf32> to vector<2x8xf32>
    %cst_333 = arith.constant dense<0.000000e+00> : vector<2x2xf32>
    %1007 = tpu.matmul %1005, %1006, %cst_333 {dimension_numbers = #tpu.dot_dimension_numbers<[1], [1], [0], [0], [0, 0, 1, 0], [], []>} : vector<2x8xf32>, vector<2x8xf32>, vector<2x2xf32> -> vector<2x2xf32>
    %cst_334 = arith.constant dense<0xFF800000> : vector<2xf32>
    %1008 = vector.multi_reduction <maximumf>, %1007, %cst_334 [1] : vector<2x2xf32> to vector<2xf32>
    %1009 = vector.shape_cast %1008 : vector<2xf32> to vector<2x1xf32>
    %1010 = vector.broadcast %1009 : vector<2x1xf32> to vector<2x2xf32>
    %1011 = arith.subf %1007, %1010 : vector<2x2xf32>
    %1012 = math.exp %1011 : vector<2x2xf32>
    %cst_335 = arith.constant dense<0.000000e+00> : vector<2xf32>
    %1013 = vector.multi_reduction <add>, %1012, %cst_335 [1] : vector<2x2xf32> to vector<2xf32>
    %1014 = vector.shape_cast %1013 : vector<2xf32> to vector<2x1xf32>
    %1015 = tpu.reciprocal %1014 {approx = true} : vector<2x1xf32> -> vector<2x1xf32>
    %1016 = vector.broadcast %1015 : vector<2x1xf32> to vector<2x2xf32>
    %1017 = arith.mulf %1012, %1016 : vector<2x2xf32>
    %1018 = vector.extract_strided_slice %989 {offsets = [0, 40], sizes = [2, 8], strides = [1, 1]} : vector<2x64xf32> to vector<2x8xf32>
    %cst_336 = arith.constant dense<0.000000e+00> : vector<2x8xf32>
    %1019 = tpu.matmul %1017, %1018, %cst_336 {dimension_numbers = #tpu.dot_dimension_numbers<[1], [0], [0], [1], [0, 0, 1, 1], [], []>} : vector<2x2xf32>, vector<2x8xf32>, vector<2x8xf32> -> vector<2x8xf32>
    %1020 = vector.extract_strided_slice %986 {offsets = [0, 16], sizes = [2, 8], strides = [1, 1]} : vector<2x32xf32> to vector<2x8xf32>
    %1021 = vector.extract_strided_slice %989 {offsets = [0, 16], sizes = [2, 8], strides = [1, 1]} : vector<2x64xf32> to vector<2x8xf32>
    %cst_337 = arith.constant dense<0.000000e+00> : vector<2x2xf32>
    %1022 = tpu.matmul %1020, %1021, %cst_337 {dimension_numbers = #tpu.dot_dimension_numbers<[1], [1], [0], [0], [0, 0, 1, 0], [], []>} : vector<2x8xf32>, vector<2x8xf32>, vector<2x2xf32> -> vector<2x2xf32>
    %cst_338 = arith.constant dense<0xFF800000> : vector<2xf32>
    %1023 = vector.multi_reduction <maximumf>, %1022, %cst_338 [1] : vector<2x2xf32> to vector<2xf32>
    %1024 = vector.shape_cast %1023 : vector<2xf32> to vector<2x1xf32>
    %1025 = vector.broadcast %1024 : vector<2x1xf32> to vector<2x2xf32>
    %1026 = arith.subf %1022, %1025 : vector<2x2xf32>
    %1027 = math.exp %1026 : vector<2x2xf32>
    %cst_339 = arith.constant dense<0.000000e+00> : vector<2xf32>
    %1028 = vector.multi_reduction <add>, %1027, %cst_339 [1] : vector<2x2xf32> to vector<2xf32>
    %1029 = vector.shape_cast %1028 : vector<2xf32> to vector<2x1xf32>
    %1030 = tpu.reciprocal %1029 {approx = true} : vector<2x1xf32> -> vector<2x1xf32>
    %1031 = vector.broadcast %1030 : vector<2x1xf32> to vector<2x2xf32>
    %1032 = arith.mulf %1027, %1031 : vector<2x2xf32>
    %1033 = vector.extract_strided_slice %989 {offsets = [0, 48], sizes = [2, 8], strides = [1, 1]} : vector<2x64xf32> to vector<2x8xf32>
    %cst_340 = arith.constant dense<0.000000e+00> : vector<2x8xf32>
    %1034 = tpu.matmul %1032, %1033, %cst_340 {dimension_numbers = #tpu.dot_dimension_numbers<[1], [0], [0], [1], [0, 0, 1, 1], [], []>} : vector<2x2xf32>, vector<2x8xf32>, vector<2x8xf32> -> vector<2x8xf32>
    %1035 = vector.extract_strided_slice %986 {offsets = [0, 24], sizes = [2, 8], strides = [1, 1]} : vector<2x32xf32> to vector<2x8xf32>
    %1036 = vector.extract_strided_slice %989 {offsets = [0, 24], sizes = [2, 8], strides = [1, 1]} : vector<2x64xf32> to vector<2x8xf32>
    %cst_341 = arith.constant dense<0.000000e+00> : vector<2x2xf32>
    %1037 = tpu.matmul %1035, %1036, %cst_341 {dimension_numbers = #tpu.dot_dimension_numbers<[1], [1], [0], [0], [0, 0, 1, 0], [], []>} : vector<2x8xf32>, vector<2x8xf32>, vector<2x2xf32> -> vector<2x2xf32>
    %cst_342 = arith.constant dense<0xFF800000> : vector<2xf32>
    %1038 = vector.multi_reduction <maximumf>, %1037, %cst_342 [1] : vector<2x2xf32> to vector<2xf32>
    %1039 = vector.shape_cast %1038 : vector<2xf32> to vector<2x1xf32>
    %1040 = vector.broadcast %1039 : vector<2x1xf32> to vector<2x2xf32>
    %1041 = arith.subf %1037, %1040 : vector<2x2xf32>
    %1042 = math.exp %1041 : vector<2x2xf32>
    %cst_343 = arith.constant dense<0.000000e+00> : vector<2xf32>
    %1043 = vector.multi_reduction <add>, %1042, %cst_343 [1] : vector<2x2xf32> to vector<2xf32>
    %1044 = vector.shape_cast %1043 : vector<2xf32> to vector<2x1xf32>
    %1045 = tpu.reciprocal %1044 {approx = true} : vector<2x1xf32> -> vector<2x1xf32>
    %1046 = vector.broadcast %1045 : vector<2x1xf32> to vector<2x2xf32>
    %1047 = arith.mulf %1042, %1046 : vector<2x2xf32>
    %1048 = vector.extract_strided_slice %989 {offsets = [0, 56], sizes = [2, 8], strides = [1, 1]} : vector<2x64xf32> to vector<2x8xf32>
    %cst_344 = arith.constant dense<0.000000e+00> : vector<2x8xf32>
    %1049 = tpu.matmul %1047, %1048, %cst_344 {dimension_numbers = #tpu.dot_dimension_numbers<[1], [0], [0], [1], [0, 0, 1, 1], [], []>} : vector<2x2xf32>, vector<2x8xf32>, vector<2x8xf32> -> vector<2x8xf32>
    %1050 = tpu.concatenate %1004, %1019, %1034, %1049 in 1 : vector<2x8xf32>, vector<2x8xf32>, vector<2x8xf32>, vector<2x8xf32> -> vector<2x32xf32>
    %cst_345 = arith.constant dense<0.000000e+00> : vector<2x32xf32>
    %1051 = tpu.matmul %1050, %982, %cst_345 {dimension_numbers = #tpu.dot_dimension_numbers<[1], [0], [0], [1], [0, 0, 1, 1], [], []>} : vector<2x32xf32>, vector<32x32xf32>, vector<2x32xf32> -> vector<2x32xf32>
    %1052 = vector.broadcast %983 : vector<1x32xf32> to vector<2x32xf32>
    %1053 = arith.addf %1051, %1052 : vector<2x32xf32>
    %1054 = arith.addf %977, %1053 : vector<2x32xf32>
    %c736 = arith.constant 736 : index
    %c0_346 = arith.constant 0 : index
    %1055 = vector.load %arg1[%c736, %c0_346] : memref<912x32xf32, #tpu.memory_space<vmem>>, vector<1x32xf32>
    %c744 = arith.constant 744 : index
    %c0_347 = arith.constant 0 : index
    %1056 = vector.load %arg1[%c744, %c0_347] : memref<912x32xf32, #tpu.memory_space<vmem>>, vector<1x32xf32>
    %cst_348 = arith.constant dense<0.000000e+00> : vector<2xf32>
    %1057 = vector.multi_reduction <add>, %1054, %cst_348 [1] : vector<2x32xf32> to vector<2xf32>
    %1058 = vector.shape_cast %1057 : vector<2xf32> to vector<2x1xf32>
    %cst_349 = arith.constant 3.200000e+01 : f32
    %1059 = vector.broadcast %cst_349 : f32 to vector<2x1xf32>
    %1060 = arith.divf %1058, %1059 : vector<2x1xf32>
    %1061 = vector.broadcast %1060 : vector<2x1xf32> to vector<2x32xf32>
    %1062 = arith.subf %1054, %1061 : vector<2x32xf32>
    %1063 = arith.mulf %1062, %1062 : vector<2x32xf32>
    %cst_350 = arith.constant dense<0.000000e+00> : vector<2xf32>
    %1064 = vector.multi_reduction <add>, %1063, %cst_350 [1] : vector<2x32xf32> to vector<2xf32>
    %1065 = vector.shape_cast %1064 : vector<2xf32> to vector<2x1xf32>
    %cst_351 = arith.constant 3.200000e+01 : f32
    %1066 = vector.broadcast %cst_351 : f32 to vector<2x1xf32>
    %1067 = arith.divf %1065, %1066 : vector<2x1xf32>
    %cst_352 = arith.constant 9.99999974E-6 : f32
    %1068 = vector.broadcast %cst_352 : f32 to vector<2x1xf32>
    %1069 = arith.addf %1067, %1068 : vector<2x1xf32>
    %1070 = math.rsqrt %1069 : vector<2x1xf32>
    %1071 = vector.broadcast %1070 : vector<2x1xf32> to vector<2x32xf32>
    %1072 = arith.mulf %1062, %1071 : vector<2x32xf32>
    %1073 = vector.broadcast %1055 : vector<1x32xf32> to vector<2x32xf32>
    %1074 = arith.mulf %1072, %1073 : vector<2x32xf32>
    %1075 = vector.broadcast %1056 : vector<1x32xf32> to vector<2x32xf32>
    %1076 = arith.addf %1074, %1075 : vector<2x32xf32>
    %c1728 = arith.constant 1728 : index
    %c0_353 = arith.constant 0 : index
    %1077 = vector.load %arg2[%c1728, %c0_353] : memref<1768x64xf32, #tpu.memory_space<vmem>>, vector<32x64xf32>
    %cst_354 = arith.constant dense<0.000000e+00> : vector<2x64xf32>
    %1078 = tpu.matmul %1076, %1077, %cst_354 {dimension_numbers = #tpu.dot_dimension_numbers<[1], [0], [0], [1], [0, 0, 1, 1], [], []>} : vector<2x32xf32>, vector<32x64xf32>, vector<2x64xf32> -> vector<2x64xf32>
    %c1760 = arith.constant 1760 : index
    %c0_355 = arith.constant 0 : index
    %1079 = vector.load %arg2[%c1760, %c0_355] : memref<1768x64xf32, #tpu.memory_space<vmem>>, vector<1x64xf32>
    %1080 = vector.broadcast %1079 : vector<1x64xf32> to vector<2x64xf32>
    %1081 = arith.addf %1078, %1080 : vector<2x64xf32>
    %cst_356 = arith.constant 0.000000e+00 : f32
    %1082 = vector.broadcast %cst_356 : f32 to vector<2x64xf32>
    %1083 = arith.maximumf %1081, %1082 : vector<2x64xf32>
    %c752 = arith.constant 752 : index
    %c0_357 = arith.constant 0 : index
    %1084 = vector.load %arg1[%c752, %c0_357] : memref<912x32xf32, #tpu.memory_space<vmem>>, vector<64x32xf32>
    %cst_358 = arith.constant dense<0.000000e+00> : vector<2x32xf32>
    %1085 = tpu.matmul %1083, %1084, %cst_358 {dimension_numbers = #tpu.dot_dimension_numbers<[1], [0], [0], [1], [0, 0, 1, 1], [], []>} : vector<2x64xf32>, vector<64x32xf32>, vector<2x32xf32> -> vector<2x32xf32>
    %c816 = arith.constant 816 : index
    %c0_359 = arith.constant 0 : index
    %1086 = vector.load %arg1[%c816, %c0_359] : memref<912x32xf32, #tpu.memory_space<vmem>>, vector<1x32xf32>
    %1087 = vector.broadcast %1086 : vector<1x32xf32> to vector<2x32xf32>
    %1088 = arith.addf %1085, %1087 : vector<2x32xf32>
    %1089 = arith.addf %1076, %1088 : vector<2x32xf32>
    %c824 = arith.constant 824 : index
    %c0_360 = arith.constant 0 : index
    %1090 = vector.load %arg1[%c824, %c0_360] : memref<912x32xf32, #tpu.memory_space<vmem>>, vector<1x32xf32>
    %c832 = arith.constant 832 : index
    %c0_361 = arith.constant 0 : index
    %1091 = vector.load %arg1[%c832, %c0_361] : memref<912x32xf32, #tpu.memory_space<vmem>>, vector<1x32xf32>
    %cst_362 = arith.constant dense<0.000000e+00> : vector<2xf32>
    %1092 = vector.multi_reduction <add>, %1089, %cst_362 [1] : vector<2x32xf32> to vector<2xf32>
    %1093 = vector.shape_cast %1092 : vector<2xf32> to vector<2x1xf32>
    %cst_363 = arith.constant 3.200000e+01 : f32
    %1094 = vector.broadcast %cst_363 : f32 to vector<2x1xf32>
    %1095 = arith.divf %1093, %1094 : vector<2x1xf32>
    %1096 = vector.broadcast %1095 : vector<2x1xf32> to vector<2x32xf32>
    %1097 = arith.subf %1089, %1096 : vector<2x32xf32>
    %1098 = arith.mulf %1097, %1097 : vector<2x32xf32>
    %cst_364 = arith.constant dense<0.000000e+00> : vector<2xf32>
    %1099 = vector.multi_reduction <add>, %1098, %cst_364 [1] : vector<2x32xf32> to vector<2xf32>
    %1100 = vector.shape_cast %1099 : vector<2xf32> to vector<2x1xf32>
    %cst_365 = arith.constant 3.200000e+01 : f32
    %1101 = vector.broadcast %cst_365 : f32 to vector<2x1xf32>
    %1102 = arith.divf %1100, %1101 : vector<2x1xf32>
    %cst_366 = arith.constant 9.99999974E-6 : f32
    %1103 = vector.broadcast %cst_366 : f32 to vector<2x1xf32>
    %1104 = arith.addf %1102, %1103 : vector<2x1xf32>
    %1105 = math.rsqrt %1104 : vector<2x1xf32>
    %1106 = vector.broadcast %1105 : vector<2x1xf32> to vector<2x32xf32>
    %1107 = arith.mulf %1097, %1106 : vector<2x32xf32>
    %1108 = vector.broadcast %1090 : vector<1x32xf32> to vector<2x32xf32>
    %1109 = arith.mulf %1107, %1108 : vector<2x32xf32>
    %1110 = vector.broadcast %1091 : vector<1x32xf32> to vector<2x32xf32>
    %1111 = arith.addf %1109, %1110 : vector<2x32xf32>
    %c856_367 = arith.constant 856 : index
    %c0_368 = arith.constant 0 : index
    %1112 = vector.load %arg1[%c856_367, %c0_368] : memref<912x32xf32, #tpu.memory_space<vmem>>, vector<1x32xf32>
    %c864_369 = arith.constant 864 : index
    %c0_370 = arith.constant 0 : index
    %1113 = vector.load %arg1[%c864_369, %c0_370] : memref<912x32xf32, #tpu.memory_space<vmem>>, vector<1x32xf32>
    %cst_371 = arith.constant dense<0.000000e+00> : vector<2xf32>
    %1114 = vector.multi_reduction <add>, %1111, %cst_371 [1] : vector<2x32xf32> to vector<2xf32>
    %1115 = vector.shape_cast %1114 : vector<2xf32> to vector<2x1xf32>
    %cst_372 = arith.constant 3.200000e+01 : f32
    %1116 = vector.broadcast %cst_372 : f32 to vector<2x1xf32>
    %1117 = arith.divf %1115, %1116 : vector<2x1xf32>
    %1118 = vector.broadcast %1117 : vector<2x1xf32> to vector<2x32xf32>
    %1119 = arith.subf %1111, %1118 : vector<2x32xf32>
    %1120 = arith.mulf %1119, %1119 : vector<2x32xf32>
    %cst_373 = arith.constant dense<0.000000e+00> : vector<2xf32>
    %1121 = vector.multi_reduction <add>, %1120, %cst_373 [1] : vector<2x32xf32> to vector<2xf32>
    %1122 = vector.shape_cast %1121 : vector<2xf32> to vector<2x1xf32>
    %cst_374 = arith.constant 3.200000e+01 : f32
    %1123 = vector.broadcast %cst_374 : f32 to vector<2x1xf32>
    %1124 = arith.divf %1122, %1123 : vector<2x1xf32>
    %cst_375 = arith.constant 9.99999974E-6 : f32
    %1125 = vector.broadcast %cst_375 : f32 to vector<2x1xf32>
    %1126 = arith.addf %1124, %1125 : vector<2x1xf32>
    %1127 = math.rsqrt %1126 : vector<2x1xf32>
    %1128 = vector.broadcast %1127 : vector<2x1xf32> to vector<2x32xf32>
    %1129 = arith.mulf %1119, %1128 : vector<2x32xf32>
    %1130 = vector.broadcast %1112 : vector<1x32xf32> to vector<2x32xf32>
    %1131 = arith.mulf %1129, %1130 : vector<2x32xf32>
    %1132 = vector.broadcast %1113 : vector<1x32xf32> to vector<2x32xf32>
    %1133 = arith.addf %1131, %1132 : vector<2x32xf32>
    %c872_376 = arith.constant 872 : index
    %c0_377 = arith.constant 0 : index
    %1134 = vector.load %arg1[%c872_376, %c0_377] : memref<912x32xf32, #tpu.memory_space<vmem>>, vector<32x32xf32>
    %cst_378 = arith.constant dense<0.000000e+00> : vector<2x32xf32>
    %1135 = tpu.matmul %1133, %1134, %cst_378 {dimension_numbers = #tpu.dot_dimension_numbers<[1], [0], [0], [1], [0, 0, 1, 1], [], []>} : vector<2x32xf32>, vector<32x32xf32>, vector<2x32xf32> -> vector<2x32xf32>
    %c904 = arith.constant 904 : index
    %c0_379 = arith.constant 0 : index
    %1136 = vector.load %arg1[%c904, %c0_379] : memref<912x32xf32, #tpu.memory_space<vmem>>, vector<1x32xf32>
    %1137 = vector.broadcast %1136 : vector<1x32xf32> to vector<2x32xf32>
    %1138 = arith.addf %1135, %1137 : vector<2x32xf32>
    %1139 = vector.extract_strided_slice %1138 {offsets = [0, 0], sizes = [2, 4], strides = [1, 1]} : vector<2x32xf32> to vector<2x4xf32>
    %c0_380 = arith.constant 0 : index
    %c0_381 = arith.constant 0 : index
    %1140 = vector.load %arg6[%c0_380, %c0_381] : memref<2x4xf32, #tpu.memory_space<vmem>>, vector<2x4xf32>
    tpu.vector_store %arg6[%c0_380, %c0_381], %1139 {strides = array<i32>} : memref<2x4xf32, #tpu.memory_space<vmem>>, vector<2x4xf32>,
    return
  }
}

</mosaic_0001>

<bundles_post_ra>
// kernel: _lambda_.1
= control target key start
LH: loop header
LB: loop body
LE: loop exit
PB: predicated region body
PF: predicated region fallthrough
CT: control target
= control target key end

     0   :  { %s15262_s0 = inlined_call_operand.vmem [shape: f32[16,768], index: 0, kind: input, shape index: {}]   ;;  %s15263_s1 = inlined_call_operand.vmem [shape: f32[912,32], index: 1, kind: input, shape index: {}]   ;;  %s15264_s2 = inlined_call_operand.vmem [shape: f32[1768,64], index: 2, kind: input, shape index: {}]   ;;  %s15265_s3 = inlined_call_operand.vmem [shape: f32[160,96], index: 3, kind: input, shape index: {}]   ;;  %s15266_s4 = inlined_call_operand.vmem [shape: f32[144,192], index: 4, kind: input, shape index: {}]   ;;  %s15267_s5 = inlined_call_operand.vmem [shape: f32[144,256], index: 5, kind: input, shape index: {}]   ;;  %s15268_s6 = inlined_call_operand.hbm [shape: f32[2,4], index: 6, kind: output, shape index: {}]  }
   0x1   :  { %v52_v0 = vld [vmem:[%s15264_s2 + $0x80] sm:$0xff]  ;;  %v53_v1 = vld [vmem:[%s15264_s2 + $0x88] sm:$0xff]  ;;  %v54_v11 = vld [vmem:[%s15264_s2 + $0x90] sm:$0xff] }
   0x2   :  { %v84_v2 = vld [vmem:[%s15264_s2 + $0x180] sm:$0xff]  ;;  %v12069_v3 = vpack.c.bf16 %v53_v1, %v52_v0  ;;  %v85_v4 = vld [vmem:[%s15264_s2 + $0x188] sm:$0xff]  ;;  %v55_v13 = vld [vmem:[%s15264_s2 + $0x98] sm:$0xff] }
   0x3   :  { %v36_v5 = vld [vmem:[%s15264_s2] sm:$0xff]  ;;  %v37_v6 = vld [vmem:[%s15264_s2 + $0x8] sm:$0xff]  ;;  %v12101_v7 = vpack.c.bf16 %v85_v4, %v84_v2  ;;  %v86_v14 = vld [vmem:[%s15264_s2 + $0x190] sm:$0xff]  ;;  %v12073_v16 = vpack.c.bf16 %v55_v13, %v54_v11 }
   0x4   :  { %v12071_v8 = vpack.c.bf16 %v37_v6, %v36_v5  ;;  %v68_v9 = vld [vmem:[%s15264_s2 + $0x100] sm:$0xff]  ;;  %v69_v10 = vld [vmem:[%s15264_s2 + $0x108] sm:$0xff]  ;;  %12070 = vmatprep.subr.bf16.mxu0 %v12069_v3  ;;  %v87_v15 = vld [vmem:[%s15264_s2 + $0x198] sm:$0xff] }
   0x5   :  { %v12103_v12 = vpack.c.bf16 %v69_v10, %v68_v9  ;;  %12102 = vmatprep.subr.bf16.mxu1 %v12101_v7  ;;  %v12105_v17 = vpack.c.bf16 %v87_v15, %v86_v14  ;;  %v38_v18 = vld [vmem:[%s15264_s2 + $0x10] sm:$0xff]  ;;  %v39_v19 = vld [vmem:[%s15264_s2 + $0x18] sm:$0xff]  ;;  %v56_v23 = vld [vmem:[%s15264_s2 + $0xa0] sm:$0xff] }
   0x6   :  { %12072 = vmatpush3.bf16.msra.mxu0 %v12071_v8  ;;  %v70_v20 = vld [vmem:[%s15264_s2 + $0x110] sm:$0xff]  ;;  %v12075_v21 = vpack.c.bf16 %v39_v19, %v38_v18  ;;  %v71_v22 = vld [vmem:[%s15264_s2 + $0x118] sm:$0xff]  ;;  %v57_v24 = vld [vmem:[%s15264_s2 + $0xa8] sm:$0xff] }
   0x7   :  { %12104 = vmatpush3.bf16.msra.mxu1 %v12103_v12  ;;  %12074 = vmatprep.subr.bf16.mxu0 %v12073_v16  ;;  %v12107_v25 = vpack.c.bf16 %v71_v22, %v70_v20  ;;  %v12077_v26 = vpack.c.bf16 %v57_v24, %v56_v23  ;;  %v88_v27 = vld [vmem:[%s15264_s2 + $0x1a0] sm:$0xff]  ;;  %v89_v28 = vld [vmem:[%s15264_s2 + $0x1a8] sm:$0xff]  ;;  %v58_v35 = vld [vmem:[%s15264_s2 + $0xb0] sm:$0xff] }
   0x8   :  { %12106 = vmatprep.subr.bf16.mxu1 %v12105_v17  ;;  %v40_v29 = vld [vmem:[%s15264_s2 + $0x20] sm:$0xff]  ;;  %v12109_v30 = vpack.c.bf16 %v89_v28, %v88_v27  ;;  %v41_v31 = vld [vmem:[%s15264_s2 + $0x28] sm:$0xff]  ;;  %v59_v36 = vld [vmem:[%s15264_s2 + $0xb8] sm:$0xff] }
   0x9   :  { %v72_v32 = vld [vmem:[%s15264_s2 + $0x120] sm:$0xff]  ;;  %v73_v33 = vld [vmem:[%s15264_s2 + $0x128] sm:$0xff]  ;;  %v12079_v34 = vpack.c.bf16 %v41_v31, %v40_v29  ;;  %v90_v37 = vld [vmem:[%s15264_s2 + $0x1b0] sm:$0xff]  ;;  %v12081_v39 = vpack.c.bf16 %v59_v36, %v58_v35 }
   0xa   :  { %12076 = vmatpush3.bf16.msra.mxu0 %v12075_v21  ;;  %v12111_v38 = vpack.c.bf16 %v73_v33, %v72_v32  ;;  %v91_v40 = vld [vmem:[%s15264_s2 + $0x1b8] sm:$0xff]  ;;  %v42_v41 = vld [vmem:[%s15264_s2 + $0x30] sm:$0xff]  ;;  %v60_v46 = vld [vmem:[%s15264_s2 + $0xc0] sm:$0xff] }
   0xb   :  { %12108 = vmatpush3.bf16.msra.mxu1 %v12107_v25  ;;  %12078 = vmatprep.subr.bf16.mxu0 %v12077_v26  ;;  %v43_v42 = vld [vmem:[%s15264_s2 + $0x38] sm:$0xff]  ;;  %v12113_v43 = vpack.c.bf16 %v91_v40, %v90_v37  ;;  %v74_v44 = vld [vmem:[%s15264_s2 + $0x130] sm:$0xff]  ;;  %v61_v47 = vld [vmem:[%s15264_s2 + $0xc8] sm:$0xff] }
   0xc   :  { %12110 = vmatprep.subr.bf16.mxu1 %v12109_v30  ;;  %v75_v45 = vld [vmem:[%s15264_s2 + $0x138] sm:$0xff]  ;;  %v92_v48 = vld [vmem:[%s15264_s2 + $0x1c0] sm:$0xff]  ;;  %v93_v49 = vld [vmem:[%s15264_s2 + $0x1c8] sm:$0xff]  ;;  %v12083_v50 = vpack.c.bf16 %v43_v42, %v42_v41  ;;  %v12085_v52 = vpack.c.bf16 %v61_v47, %v60_v46 }
   0xd   :  { %v12115_v51 = vpack.c.bf16 %v75_v45, %v74_v44  ;;  %v44_v53 = vld [vmem:[%s15264_s2 + $0x40] sm:$0xff]  ;;  %v45_v54 = vld [vmem:[%s15264_s2 + $0x48] sm:$0xff]  ;;  %v12117_v56 = vpack.c.bf16 %v93_v49, %v92_v48  ;;  %v62_v58 = vld [vmem:[%s15264_s2 + $0xd0] sm:$0xff] }
   0xe   :  { %12080 = vmatpush3.bf16.msra.mxu0 %v12079_v34  ;;  %v76_v55 = vld [vmem:[%s15264_s2 + $0x140] sm:$0xff]  ;;  %v77_v57 = vld [vmem:[%s15264_s2 + $0x148] sm:$0xff]  ;;  %v63_v59 = vld [vmem:[%s15264_s2 + $0xd8] sm:$0xff]  ;;  %v12087_v62 = vpack.c.bf16 %v45_v54, %v44_v53 }
   0xf   :  { %12112 = vmatpush3.bf16.msra.mxu1 %v12111_v38  ;;  %12082 = vmatprep.subr.bf16.mxu0 %v12081_v39  ;;  %v94_v60 = vld [vmem:[%s15264_s2 + $0x1d0] sm:$0xff]  ;;  %v95_v61 = vld [vmem:[%s15264_s2 + $0x1d8] sm:$0xff]  ;;  %v12119_v63 = vpack.c.bf16 %v77_v57, %v76_v55  ;;  %v12089_v0 = vpack.c.bf16 %v63_v59, %v62_v58  ;;  %v64_v6 = vld [vmem:[%s15264_s2 + $0xe0] sm:$0xff] }
  0x10   :  { %12114 = vmatprep.subr.bf16.mxu1 %v12113_v43  ;;  %v46_v1 = vld [vmem:[%s15264_s2 + $0x50] sm:$0xff]  ;;  %v47_v2 = vld [vmem:[%s15264_s2 + $0x58] sm:$0xff]  ;;  %v12121_v4 = vpack.c.bf16 %v95_v61, %v94_v60  ;;  %v65_v7 = vld [vmem:[%s15264_s2 + $0xe8] sm:$0xff] }
  0x11   :  { %v78_v3 = vld [vmem:[%s15264_s2 + $0x150] sm:$0xff]  ;;  %v79_v5 = vld [vmem:[%s15264_s2 + $0x158] sm:$0xff]  ;;  %v96_v8 = vld [vmem:[%s15264_s2 + $0x1e0] sm:$0xff]  ;;  %v12091_v10 = vpack.c.bf16 %v47_v2, %v46_v1  ;;  %v12093_v14 = vpack.c.bf16 %v65_v7, %v64_v6 }
  0x12   :  { %12084 = vmatpush3.bf16.msra.mxu0 %v12083_v50  ;;  %v97_v9 = vld [vmem:[%s15264_s2 + $0x1e8] sm:$0xff]  ;;  %v48_v11 = vld [vmem:[%s15264_s2 + $0x60] sm:$0xff]  ;;  %v12123_v13 = vpack.c.bf16 %v79_v5, %v78_v3  ;;  %v27_v17 = vld [vmem:[%s15262_s0 + $0x18] sm:$0xff] }
  0x13   :  { %12116 = vmatpush3.bf16.msra.mxu1 %v12115_v51  ;;  %12086 = vmatprep.subr.bf16.mxu0 %v12085_v52  ;;  %v49_v12 = vld [vmem:[%s15264_s2 + $0x68] sm:$0xff]  ;;  %v80_v15 = vld [vmem:[%s15264_s2 + $0x160] sm:$0xff]  ;;  %v12125_v18 = vpack.c.bf16 %v97_v9, %v96_v8  ;;  %v66_v20 = vld [vmem:[%s15264_s2 + $0xf0] sm:$0xff] }
  0x14   :  { %12118 = vmatprep.subr.bf16.mxu1 %v12117_v56  ;;  %v25_v16 = vld [vmem:[%s15262_s0 + $0x8] sm:$0xff]  ;;  %v67_v21 = vld [vmem:[%s15264_s2 + $0xf8] sm:$0xff]  ;;  %v98_v22 = vld [vmem:[%s15264_s2 + $0x1f0] sm:$0xff]  ;;  %271 = vmatprep.mubr.f32.mxu1 %v27_v17  ;;  %v12095_v24 = vpack.c.bf16 %v49_v12, %v48_v11 }
  0x15   :  { %v81_v19 = vld [vmem:[%s15264_s2 + $0x168] sm:$0xff]  ;;  %196 = vmatprep.mubr.f32.mxu0 %v25_v16  ;;  %v99_v23 = vld [vmem:[%s15264_s2 + $0x1f8] sm:$0xff]  ;;  %v12097_v26 = vpack.c.bf16 %v67_v21, %v66_v20  ;;  %v50_v27 = vld [vmem:[%s15264_s2 + $0x70] sm:$0xff] }
  0x16   :  { %12088 = vmatpush3.bf16.msra.mxu0 %v12087_v62  ;;  %v12127_v25 = vpack.c.bf16 %v81_v19, %v80_v15  ;;  %v51_v28 = vld [vmem:[%s15264_s2 + $0x78] sm:$0xff]  ;;  %v82_v29 = vld [vmem:[%s15264_s2 + $0x170] sm:$0xff]  ;;  %v12129_v30 = vpack.c.bf16 %v99_v23, %v98_v22  ;;  %v116_v32 = vld [vmem:[%s15264_s2 + $0x280] sm:$0xff] }
  0x17   :  { %12120 = vmatpush3.bf16.msra.mxu1 %v12119_v63  ;;  %12090 = vmatprep.subr.bf16.mxu0 %v12089_v0  ;;  %v83_v31 = vld [vmem:[%s15264_s2 + $0x178] sm:$0xff]  ;;  %v117_v33 = vld [vmem:[%s15264_s2 + $0x288] sm:$0xff]  ;;  %v12099_v34 = vpack.c.bf16 %v51_v28, %v50_v27  ;;  %v100_v37 = vld [vmem:[%s15264_s2 + $0x200] sm:$0xff] }
  0x18   :  { %12122 = vmatprep.subr.bf16.mxu1 %v12121_v4  ;;  %v12131_v35 = vpack.c.bf16 %v83_v31, %v82_v29  ;;  %v12133_v36 = vpack.c.bf16 %v117_v33, %v116_v32  ;;  %v101_v38 = vld [vmem:[%s15264_s2 + $0x208] sm:$0xff]  ;;  %v118_v39 = vld [vmem:[%s15264_s2 + $0x290] sm:$0xff]  ;;  %v119_v40 = vld [vmem:[%s15264_s2 + $0x298] sm:$0xff] }
  0x19   :  { %v24_v41 = vld [vmem:[%s15262_s0] sm:$0xff]  ;;  %v12135_v42 = vpack.c.bf16 %v101_v38, %v100_v37  ;;  %v26_v43 = vld [vmem:[%s15262_s0 + $0x10] sm:$0xff]  ;;  %v12137_v44 = vpack.c.bf16 %v119_v40, %v118_v39  ;;  %v103_v46 = vld [vmem:[%s15264_s2 + $0x218] sm:$0xff] }
  0x1a   :  { %12092 = vmatpush3.bf16.msra.mxu0 %v12091_v10  ;;  %v102_v45 = vld [vmem:[%s15264_s2 + $0x210] sm:$0xff]  ;;  %v120_v47 = vld [vmem:[%s15264_s2 + $0x2a0] sm:$0xff]  ;;  %v121_v48 = vld [vmem:[%s15264_s2 + $0x2a8] sm:$0xff] }
  0x1b   :  { %12124 = vmatpush3.bf16.msra.mxu1 %v12123_v13  ;;  %12094 = vmatprep.subr.bf16.mxu0 %v12093_v14  ;;  %v31_v49 = vld [vmem:[%s15262_s0 + $0x38] sm:$0xff]  ;;  %v33_v50 = vld [vmem:[%s15262_s0 + $0x48] sm:$0xff]  ;;  %v12139_v51 = vpack.c.bf16 %v103_v46, %v102_v45  ;;  %v30_v52 = vld [vmem:[%s15262_s0 + $0x30] sm:$0xff] }
  0x1c   :  { %12126 = vmatprep.subr.bf16.mxu1 %v12125_v18 }
  0x1e   :  { %12096 = vmatpush3.bf16.msra.mxu0 %v12095_v24 }
  0x1f   :  { %12128 = vmatpush3.bf16.msra.mxu1 %v12127_v25  ;;  %12098 = vmatprep.subr.bf16.mxu0 %v12097_v26 }
  0x20   :  { %12130 = vmatprep.subr.bf16.mxu1 %v12129_v30 }
  0x22   :  { %12100 = vmatpush3.bf16.msra.mxu0 %v12099_v34 }
  0x23   :  { %12132 = vmatpush3.bf16.msra.mxu1 %v12131_v35  ;;  %12134 = vmatprep.subr.bf16.mxu0 %v12133_v36 }
  0x25   :  { %197 = vmatmul.mubr.f32.vlgmr.msra.gmra.mrb[0].mxu0 %v24_v41 }
  0x26   :  { %272 = vmatmul.mubr.f32.vlgmr.msra.gmra.mrb[0].mxu1 %v26_v43  ;;  %12136 = vmatpush3.bf16.msra.mxu0 %v12135_v42 }
  0x27   :  { %11 = vsyncpa [#allocation3], 0  ;;  %12138 = vmatprep.subr.bf16.mxu0 %v12137_v44  ;;  %v12141_v53 = vpack.c.bf16 %v121_v48, %v120_v47  ;;  %v104_v54 = vld [vmem:[%s15264_s2 + $0x220] sm:$0xff]  ;;  %v105_v55 = vld [vmem:[%s15264_s2 + $0x228] sm:$0xff]  ;;  %201 = vmatprep.mubr.f32.mxu0 %v31_v49  ;;  %vm365_vm0 = vcmask 523264   ;;  %vm12763_vm1 = vmmov 0  }
  0x28   :  { %v32_v56 = vld [vmem:[%s15262_s0 + $0x40] sm:$0xff]  ;;  %v122_v57 = vld [vmem:[%s15264_s2 + $0x2b0] sm:$0xff]  ;;  %v123_v58 = vld [vmem:[%s15264_s2 + $0x2b8] sm:$0xff]  ;;  %276 = vmatprep.mubr.f32.mxu1 %v33_v50  ;;  %v12143_v60 = vpack.c.bf16 %v105_v55, %v104_v54  ;;  %s12764_s11 = smov 64   ;;  %vm520_vm2 = vcmask 130048   ;;  %vm676_vm4 = vcmask 64512  }
  0x29   :  { %v29_v59 = vld [vmem:[%s15262_s0 + $0x28] sm:$0xff]  ;;  %202 = vmatmul.mubr.f32.gmra.mrb[2].mxu0 %v30_v52  ;;  %v12145_v61 = vpack.c.bf16 %v123_v58, %v122_v57  ;;  %v106_v62 = vld [vmem:[%s15264_s2 + $0x230] sm:$0xff]  ;;  %v107_v63 = vld [vmem:[%s15264_s2 + $0x238] sm:$0xff]  ;;  %s12765_s12 = smov 48   ;;  %s12766_s13 = smov 112   ;;  %vm1872_vm5 = vcmask 392192  }
  0x2a   :  { %12140 = vmatpush3.bf16.msra.mxu0 %v12139_v51  ;;  %277 = vmatmul.mubr.f32.gmra.mrb[2].mxu1 %v32_v56  ;;  %v124_v0 = vld [vmem:[%s15264_s2 + $0x2c0] sm:$0xff]  ;;  %v125_v1 = vld [vmem:[%s15264_s2 + $0x2c8] sm:$0xff]  ;;  %v12147_v2 = vpack.c.bf16 %v107_v63, %v106_v62  ;;  %v126_v6 = vld [vmem:[%s15264_s2 + $0x2d0] sm:$0xff]  ;;  %s12767_s14 = smov 32   ;;  %s12768_s15 = smov 96   ;;  %vm1869_vm6 = vcmask 261120  }
  0x2b   :  { %12142 = vmatprep.subr.bf16.mxu0 %v12141_v53  ;;  %346 = vmatprep.mubr.f32.mxu0 %v29_v59  ;;  %v12149_v3 = vpack.c.bf16 %v125_v1, %v124_v0  ;;  %v108_v4 = vld [vmem:[%s15264_s2 + $0x240] sm:$0xff]  ;;  %v109_v5 = vld [vmem:[%s15264_s2 + $0x248] sm:$0xff]  ;;  %v127_v7 = vld [vmem:[%s15264_s2 + $0x2d8] sm:$0xff]  ;;  %s12769_s16 = smov 16   ;;  %s12770_s17 = smov 80   ;;  %vm4199_vm7 = vcmask 1041409  }
  0x2c   :  { %v12151_v8 = vpack.c.bf16 %v109_v5, %v108_v4  ;;  %v12153_v9 = vpack.c.bf16 %v127_v7, %v126_v6  ;;  %v110_v10 = vld [vmem:[%s15264_s2 + $0x250] sm:$0xff]  ;;  %v111_v11 = vld [vmem:[%s15264_s2 + $0x258] sm:$0xff]  ;;  %v128_v12 = vld [vmem:[%s15264_s2 + $0x2e0] sm:$0xff]  ;;  %s12772_s25 = smov 88   ;;  %s12773_s26 = smov 72   ;;  %vm4437_vm8 = vcmask 9216  }
  0x2d   :  { %v129_v13 = vld [vmem:[%s15264_s2 + $0x2e8] sm:$0xff]  ;;  %v12155_v14 = vpack.c.bf16 %v111_v11, %v110_v10  ;;  %v112_v16 = vld [vmem:[%s15264_s2 + $0x260] sm:$0xff]  ;;  %v130_v18 = vld [vmem:[%s15264_s2 + $0x2f0] sm:$0xff]  ;;  %s12774_s27 = smov 120   ;;  %vm4455_vm9 = vcmask 1041408   ;;  %s12775_s28 = smov 104  }
  0x2e   :  { %12144 = vmatpush3.bf16.msra.mxu0 %v12143_v60  ;;  %v12157_v15 = vpack.c.bf16 %v129_v13, %v128_v12  ;;  %v113_v17 = vld [vmem:[%s15264_s2 + $0x268] sm:$0xff]  ;;  %v131_v19 = vld [vmem:[%s15264_s2 + $0x2f8] sm:$0xff]  ;;  %v114_v22 = vld [vmem:[%s15264_s2 + $0x270] sm:$0xff]  ;;  %vm4451_vm10 = vcmask 15360   ;;  %s12776_s29 = smov 40   ;;  %s12777_s30 = smov 56  }
  0x2f   :  { %12146 = vmatprep.subr.bf16.mxu0 %v12145_v61  ;;  %v12159_v20 = vpack.c.bf16 %v113_v17, %v112_v16  ;;  %v12161_v21 = vpack.c.bf16 %v131_v19, %v130_v18  ;;  %v115_v23 = vld [vmem:[%s15264_s2 + $0x278] sm:$0xff]  ;;  %v28_v25 = vld [vmem:[%s15262_s0 + $0x20] sm:$0xff]  ;;  %v34_v27 = vld [vmem:[%s15262_s0 + $0x50] sm:$0xff]  ;;  %s12778_s19 = smov 8   ;;  %s12779_s20 = smov 24   ;;  %vm5040_vm11 = vcmask 195584  }
  0x30   :  { %v12163_v24 = vpack.c.bf16 %v115_v23, %v114_v22  ;;  %v35_v26 = vld [vmem:[%s15262_s0 + $0x58] sm:$0xff]  ;;  %v357_v45 = vld [vmem:[%s15264_s2 + $0x300] sm:$0xff]  ;;  %v406_v1 = vld [vmem:[%s15266_s4 + $0x8] sm:$0xff]  ;;  %vm5122_vm12 = vcmask 254976   ;;  %vm10555_vm13 = vcmask 25600  }
  0x31   :  { %v405_v4 = vld [vmem:[%s15266_s4] sm:$0xff]  ;;  %v407_v5 = vld [vmem:[%s15266_s4 + $0x10] sm:$0xff]  ;;  %v410_v7 = vld [vmem:[%s15266_s4 + $0x28] sm:$0xff] }
  0x32   :  { %12148 = vmatpush3.bf16.msra.mxu0 %v12147_v2  ;;  %v408_v2 = vld [vmem:[%s15266_s4 + $0x18] sm:$0xff]  ;;  %v12167_v6 = vpack.c.bf16 %v407_v5, %v405_v4  ;;  %v409_v10 = vld [vmem:[%s15266_s4 + $0x20] sm:$0xff]  ;;  %v411_v11 = vld [vmem:[%s15266_s4 + $0x30] sm:$0xff] }
  0x33   :  { %12150 = vmatprep.subr.bf16.mxu0 %v12149_v3  ;;  %v12165_v3 = vpack.c.bf16 %v408_v2, %v406_v1  ;;  %v12171_v12 = vpack.c.bf16 %v411_v11, %v409_v10  ;;  %v414_v13 = vld [vmem:[%s15266_s4 + $0x48] sm:$0xff]  ;;  %v413_v16 = vld [vmem:[%s15266_s4 + $0x40] sm:$0xff]  ;;  %v415_v17 = vld [vmem:[%s15266_s4 + $0x50] sm:$0xff] }
  0x34   :  { %v12175_v18 = vpack.c.bf16 %v415_v17, %v413_v16  ;;  %v418_v19 = vld [vmem:[%s15266_s4 + $0x68] sm:$0xff]  ;;  %v417_v22 = vld [vmem:[%s15266_s4 + $0x60] sm:$0xff]  ;;  %v419_v23 = vld [vmem:[%s15266_s4 + $0x70] sm:$0xff] }
  0x35   :  { %12166 = vmatprep.subr.bf16.mxu1 %v12165_v3 }
  0x36   :  { %12152 = vmatpush3.bf16.msra.mxu0 %v12151_v8  ;;  %12168 = vmatpush1.bf16.msra.mxu1 %v12167_v6  ;;  %v412_v8 = vld [vmem:[%s15266_s4 + $0x38] sm:$0xff] }
  0x37   :  { %12154 = vmatprep.subr.bf16.mxu0 %v12153_v9  ;;  %v12169_v9 = vpack.c.bf16 %v412_v8, %v410_v7 }
  0x39   :  { %12170 = vmatprep.subr.bf16.mxu1 %v12169_v9 }
  0x3a   :  { %12156 = vmatpush3.bf16.msra.mxu0 %v12155_v14  ;;  %12172 = vmatpush1.bf16.msra.mxu1 %v12171_v12  ;;  %v416_v14 = vld [vmem:[%s15266_s4 + $0x58] sm:$0xff] }
  0x3b   :  { %12158 = vmatprep.subr.bf16.mxu0 %v12157_v15  ;;  %v12173_v15 = vpack.c.bf16 %v416_v14, %v414_v13 }
  0x3d   :  { %12174 = vmatprep.subr.bf16.mxu1 %v12173_v15 }
  0x3e   :  { %12160 = vmatpush3.bf16.msra.mxu0 %v12159_v20  ;;  %12176 = vmatpush1.bf16.msra.mxu1 %v12175_v18  ;;  %v420_v20 = vld [vmem:[%s15266_s4 + $0x78] sm:$0xff] }
  0x3f   :  { %12162 = vmatprep.subr.bf16.mxu0 %v12161_v21  ;;  %v12177_v21 = vpack.c.bf16 %v420_v20, %v418_v19 }
  0x41   :  { %12178 = vmatprep.subr.bf16.mxu1 %v12177_v21 }
  0x42   :  { %12164 = vmatpush3.bf16.msra.mxu0 %v12163_v24  ;;  %v12179_v24 = vpack.c.bf16 %v419_v23, %v417_v22 }
  0x44   :  { %12180 = vmatpush1.bf16.msra.mxu1 %v12179_v24 }
  0x45   :  { %347 = vmatmul.mubr.f32.vlgmr.msra.gmra.mrb[4].mxu0 %v28_v25  ;;  %v12762_v25 = vmov 0.0  }
  0x46   :  { %351 = vmatprep.mubr.f32.mxu0 %v35_v26  ;;  %504 = vmatprep.mubr.f32.mxu1 %v12762_v25 }
  0x47   :  { %11347 = vmatprep.subr.mxu0 %v12762_v25  ;;  %11327 = vmatprep.subr.mxu1 %v12762_v25 }
  0x49   :  { %352 = vmatmul.mubr.f32.gmra.mrb[6].mxu0 %v34_v27 }
  0x4a   :  { %11349 = vmatprep.mubr.msk.f32.mxu0 %vm12763_vm1, %v12762_v25 }
  0xf8   :  { %v10849_v28 = vpop.f32.mrb[0].mxu0 }
  0xf9   :  { %v10887_v29 = vpop.f32.mrb[0].mxu1  ;;  %v10850_v30 = vpop.f32.mrb[1].mxu0 }
  0xfa   :  { %v10851_v31 = vadd.f32 %v10850_v30, %v10849_v28  ;;  %v10888_v32 = vpop.f32.mrb[1].mxu1 }
  0xfb   :  { %v10889_v33 = vadd.f32 %v10888_v32, %v10887_v29 }
  0xfc   :  { %v10852_v34 = vpop.f32.mrb[2].mxu0 }
  0xfd   :  { %v274_v35 = vadd.f32 %v10889_v33, %v10851_v31  ;;  %v10890_v36 = vpop.f32.mrb[2].mxu1  ;;  %v10853_v37 = vpop.f32.mrb[3].mxu0  ;;  %v10571_v33 = vld [vmem:[%s15264_s2 + $0x308] ss:$0 sm:$0xff] }
  0xfe   :  { %v10854_v38 = vadd.f32 %v10853_v37, %v10852_v34  ;;  %v10891_v39 = vpop.f32.mrb[3].mxu1 }
  0xff   :  { %v10892_v40 = vadd.f32 %v10891_v39, %v10890_v36 }
 0x101   :  { %v279_v41 = vadd.f32 %v10892_v40, %v10854_v38 }
 0x118   :  { %v10925_v42 = vpop.f32.mrb[4].mxu0 }
 0x119   :  { %v10926_v43 = vpop.f32.mrb[5].mxu0 }
 0x11a   :  { %v10927_v44 = vadd.f32 %v10926_v43, %v10925_v42  ;;  %v360_v42 = vlaneseq }
 0x11c   :  { %v349_v46 = vadd.f32 %v10927_v44, %v274_v35  ;;  %v10928_v47 = vpop.f32.mrb[6].mxu0  ;;  %v10572_v35 = vld [vmem:[%s15264_s2 + $0x310] ss:$0 sm:$0xff]  ;;  %v425_v43 = vshrl.u32 %v360_v42, 7 }
 0x11d   :  { %v10929_v48 = vpop.f32.mrb[7].mxu0 }
 0x11e   :  { %v10930_v49 = vadd.f32 %v10929_v48, %v10928_v47  ;;  %v13143_v50 = vadd.f32 %v357_v45, %v349_v46  ;;  %v13219_v44 = vsub.s32 0, %v425_v43  ;;  %v13225_v48 = vsub.s32 1, %v425_v43 }
 0x120   :  { %v354_v51 = vadd.f32 %v10930_v49, %v279_v41  ;;  %v366_v52 = vsel %vm365_vm0, %v13143_v50, 0.0 }
 0x121   :  { %367 = vadd.xlane.f32.xlu0 %v366_v52 }
 0x122   :  { %v13147_v53 = vadd.f32 %v357_v45, %v354_v51  ;;  %v10573_v45 = vld [vmem:[%s15266_s4 + $0x80] ss:$8 sm:$0x3] }
 0x123   :  { %v427_v46 = vrot.slane %v10573_v45, %v13219_v44  ;;  %v431_v52 = vrot.slane %v10573_v45, %v13225_v48 }
 0x124   :  { %v369_v54 = vsel %vm365_vm0, %v13147_v53, 0.0 }
 0x125   :  { %370 = vadd.xlane.f32.xlu0 %v369_v54 }
 0x1ae   :  { %v368_v55 = vpop.xlane.xlu0 %367 }
 0x1af   :  { %v373_v56 = vmul.f32 0.015625, %v368_v55 }
 0x1b1   :  { %v375_v57 = vsub.f32 %v13143_v50, %v373_v56 }
 0x1b2   :  { %v371_v58 = vpop.xlane.xlu0 %370 }
 0x1b3   :  { %v374_v59 = vmul.f32 0.015625, %v371_v58  ;;  %v377_v60 = vmul.f32 %v375_v57, %v375_v57 }
 0x1b5   :  { %v376_v61 = vsub.f32 %v13147_v53, %v374_v59  ;;  %v379_v62 = vsel %vm365_vm0, %v377_v60, 0.0 }
 0x1b6   :  { %380 = vadd.xlane.f32.xlu1 %v379_v62 }
 0x1b7   :  { %v378_v63 = vmul.f32 %v376_v61, %v376_v61 }
 0x1b9   :  { %v382_v0 = vsel %vm365_vm0, %v378_v63, 0.0 }
 0x1ba   :  { %383 = vadd.xlane.f32.xlu1 %v382_v0 }
 0x243   :  { %v381_v26 = vpop.xlane.xlu1 %380 }
 0x244   :  { %v385_v27 = vmul.f32 0.015625, %v381_v26 }
 0x246   :  { %v387_v28 = vadd.f32 1e-06, %v385_v27 }
 0x247   :  { %v384_v29 = vpop.xlane.xlu1 %383 }
 0x248   :  { %12518 = vrsqrt.f32 %v387_v28  ;;  %v386_v30 = vmul.f32 0.015625, %v384_v29 }
 0x24a   :  { %v388_v31 = vadd.f32 1e-06, %v386_v30 }
 0x24c   :  { %12520 = vrsqrt.f32 %v388_v31 }
 0x252   :  { %v12519_v32 = vpop.eup %12518 }
 0x253   :  { %v391_v34 = vmul.f32 %v12519_v32, %v375_v57 }
 0x255   :  { %v397_v36 = vmul.f32 %v10571_v33, %v391_v34 }
 0x256   :  { %v12521_v37 = vpop.eup %12520 }
 0x257   :  { %v403_v38 = vadd.f32 %v10572_v35, %v397_v36  ;;  %v392_v39 = vmul.f32 %v12521_v37, %v376_v61  ;;  %v13254_v61 = vand.u32 127, %v360_v42 }
 0x259   :  { %10574 = vmatmul.mubr.msk.f32.vlgmr.msra.gmra.mrb[4].mxu1 %vm365_vm0, %v403_v38  ;;  %v398_v40 = vmul.f32 %v10571_v33, %v392_v39  ;;  %vm362_vm3 = vcmp.lt.s32.totalorder %v13254_v61, 5 }
 0x25a   :  { %510 = vmatprep.mubr.f32.mxu1 %v12762_v25 }
 0x25b   :  { %v404_v41 = vadd.f32 %v10572_v35, %v398_v40 }
 0x25d   :  { %10575 = vmatmul.mubr.msk.f32.gmra.mrb[6].mxu1 %vm365_vm0, %v404_v41 }
 0x25e   :  { %11329 = vmatprep.mubr.msk.f32.mxu1 %vm12763_vm1, %v12762_v25 }
 0x32c   :  { %v506_v47 = vpop.f32.mrb[4].mxu1 }
 0x32d   :  { %v13227_v49 = vadd.f32 %v506_v47, %v427_v46  ;;  %v508_v51 = vpop.f32.mrb[5].mxu1 }
 0x32e   :  { %v13246_v60 = vadd.f32 %v508_v51, %v431_v52 }
 0x32f   :  { %518 = vrot.lane.b32.xlu0 %v13227_v49, %s12764_s11 }
 0x330   :  { %v512_v54 = vpop.f32.mrb[6].mxu1 }
 0x331   :  { %v13232_v55 = vadd.f32 %v512_v54, %v427_v46  ;;  %v514_v56 = vpop.f32.mrb[7].mxu1 }
 0x332   :  { %v13234_v57 = vadd.f32 %v514_v56, %v431_v52 }
 0x333   :  { %596 = vrot.lane.b32.xlu1 %v13232_v55, %s12764_s11 }
 0x3a1   :  { %v519_v58 = vpop.permute.xlu0 %518 }
 0x3a2   :  { %11328 = vmatpush3.xpose.msk.msra.mxu1 %vm520_vm2, %v519_v58 }
 0x3a3   :  { %11332 = vmatprep.subr.mxu1 %v12762_v25 }
 0x3a5   :  { %v597_v59 = vpop.permute.xlu1 %596  ;;  %11330 = vmatmul.mubr.msk.f32.vlgmr.msra.gmra.mrb[8].mxu1 %vm520_vm2, %v13227_v49 }
 0x3a6   :  { %11333 = vmatpush3.xpose.msk.msra.mxu1 %vm520_vm2, %v597_v59  ;;  %11334 = vmatprep.mubr.msk.f32.mxu1 %vm12763_vm1, %v12762_v25 }
 0x3a7   :  { %11337 = vmatprep.subr.mxu1 %v12762_v25 }
 0x3a9   :  { %11335 = vmatmul.mubr.msk.f32.vlgmr.msra.gmra.mrb[10].mxu1 %vm520_vm2, %v13232_v55 }
 0x3aa   :  { %11338 = vmatpush3.msra.mxu1 %v13246_v60  ;;  %11339 = vmatprep.mubr.msk.f32.mxu1 %vm12763_vm1, %v12762_v25 }
 0x3ab   :  { %11342 = vmatprep.subr.mxu1 %v12762_v25 }
 0x478   :  { %v591_v62 = vpop.f32.mrb[8].mxu1 }
 0x479   :  { %v674_v63 = vsel %vm362_vm3, %v591_v62, -1e+30  ;;  %v11331_v0 = vpop.f32.mrb[9].mxu1 }
 0x47a   :  { %v677_v1 = vsel %vm676_vm4, %v674_v63, -inf }
 0x47b   :  { %678 = vmax.xlane.f32.xlu1 %v677_v1 }
 0x47c   :  { %v668_v2 = vpop.f32.mrb[10].mxu1 }
 0x47d   :  { %v675_v3 = vsel %vm362_vm3, %v668_v2, -1e+30  ;;  %v11336_v4 = vpop.f32.mrb[11].mxu1 }
 0x47e   :  { %v680_v5 = vsel %vm676_vm4, %v675_v3, -inf }
 0x47f   :  { %681 = vmax.xlane.f32.xlu0 %v680_v5 }
 0x48c   :  { %925 = vrot.lane.b32.xlu1 %v13232_v55, %s12765_s12 }
 0x490   :  { %845 = vrot.lane.b32.xlu1 %v13227_v49, %s12766_s13 }
 0x508   :  { %v679_v6 = vpop.xlane.xlu1 %678 }
 0x509   :  { %v683_v7 = vsub.f32 %v674_v63, %v679_v6 }
 0x50b   :  { %v685_v8 = vmul.f32 1.442695, %v683_v7 }
 0x50c   :  { %v682_v9 = vpop.xlane.xlu0 %681  ;;  %v926_v16 = vpop.permute.xlu1 %925 }
 0x50d   :  { %12522 = vpow2.f32 %v685_v8  ;;  %v684_v10 = vsub.f32 %v675_v3, %v682_v9 }
 0x50f   :  { %v687_v11 = vmul.f32 1.442695, %v684_v10 }
 0x510   :  { %v846_v17 = vpop.permute.xlu1 %845 }
 0x511   :  { %12524 = vpow2.f32 %v687_v11 }
 0x517   :  { %v12523_v12 = vpop.eup %12522 }
 0x518   :  { %v689_v13 = vsel %vm676_vm4, %v12523_v12, 0.0 }
 0x519   :  { %690 = vadd.xlane.f32.xlu0 %v689_v13 }
 0x51b   :  { %v12525_v14 = vpop.eup %12524 }
 0x51c   :  { %v692_v15 = vsel %vm676_vm4, %v12525_v14, 0.0 }
 0x51d   :  { %693 = vadd.xlane.f32.xlu1 %v692_v15 }
 0x52e   :  { %923 = vrot.lane.b32.xlu1 %v13232_v55, %s12766_s13 }
 0x52f   :  { %847 = vrot.lane.b32.xlu0 %v13227_v49, %s12765_s12 }
 0x5a6   :  { %v691_v18 = vpop.xlane.xlu0 %690 }
 0x5a7   :  { %12526 = vrcp.f32 %v691_v18 }
 0x5aa   :  { %v694_v19 = vpop.xlane.xlu1 %693  ;;  %v848_v20 = vpop.permute.xlu0 %847 }
 0x5ab   :  { %12528 = vrcp.f32 %v694_v19  ;;  %11348 = vmatpush3.xpose.msk.msra.mxu0 %vm520_vm2, %v848_v20 }
 0x5ac   :  { %11357 = vmatprep.subr.mxu0 %v12762_v25 }
 0x5ae   :  { %11350 = vmatmul.mubr.msk.f32.vlgmr.msra.gmra.mrb[8].mxu0 %vm520_vm2, %v846_v17  ;;  %v924_v26 = vpop.permute.xlu1 %923 }
 0x5af   :  { %11359 = vmatprep.mubr.msk.f32.mxu0 %vm12763_vm1, %v12762_v25 }
 0x5b1   :  { %v12527_v21 = vpop.eup %12526 }
 0x5b2   :  { %v697_v22 = vmul.f32 %v12527_v21, %v12523_v12 }
 0x5b4   :  { %11340 = vmatmul.mubr.msk.f32.vlgmr.msra.gmra.mrb[12].mxu1 %vm676_vm4, %v697_v22 }
 0x5b5   :  { %v12529_v23 = vpop.eup %12528  ;;  %11343 = vmatpush3.msra.mxu1 %v13234_v57  ;;  %11344 = vmatprep.mubr.msk.f32.mxu1 %vm12763_vm1, %v12762_v25 }
 0x5b6   :  { %v698_v24 = vmul.f32 %v12529_v23, %v12525_v14  ;;  %11352 = vmatprep.subr.mxu1 %v12762_v25 }
 0x5b8   :  { %11345 = vmatmul.mubr.msk.f32.vlgmr.msra.gmra.mrb[14].mxu1 %vm676_vm4, %v698_v24 }
 0x5b9   :  { %11354 = vmatprep.mubr.msk.f32.mxu1 %vm12763_vm1, %v12762_v25 }
 0x5bc   :  { %11353 = vmatpush3.xpose.msk.msra.mxu1 %vm520_vm2, %v926_v16 }
 0x5bd   :  { %11362 = vmatprep.subr.mxu1 %v12762_v25 }
 0x5bf   :  { %11355 = vmatmul.mubr.msk.f32.vlgmr.msra.gmra.mrb[16].mxu1 %vm520_vm2, %v924_v26 }
 0x5c0   :  { %11364 = vmatprep.mubr.msk.f32.mxu1 %vm12763_vm1, %v12762_v25 }
 0x681   :  { %v919_v27 = vpop.f32.mrb[8].mxu0 }
 0x682   :  { %v1001_v28 = vsel %vm362_vm3, %v919_v27, -1e+30  ;;  %v11351_v29 = vpop.f32.mrb[9].mxu0 }
 0x683   :  { %v1003_v30 = vsel %vm676_vm4, %v1001_v28, -inf }
 0x684   :  { %1004 = vmax.xlane.f32.xlu0 %v1003_v30 }
 0x687   :  { %v13294_v31 = vpop.f32.mrb[12].mxu1 }
 0x688   :  { %v11341_v32 = vpop.f32.mrb[13].mxu1 }
 0x68b   :  { %v13296_v33 = vpop.f32.mrb[14].mxu1 }
 0x68c   :  { %v11346_v34 = vpop.f32.mrb[15].mxu1 }
 0x692   :  { %v997_v35 = vpop.f32.mrb[16].mxu1 }
 0x693   :  { %v1002_v36 = vsel %vm362_vm3, %v997_v35, -1e+30  ;;  %v11356_v37 = vpop.f32.mrb[17].mxu1 }
 0x694   :  { %v1006_v38 = vsel %vm676_vm4, %v1002_v36, -inf }
 0x695   :  { %1007 = vmax.xlane.f32.xlu1 %v1006_v38 }
 0x6a6   :  { %1103 = vrot.lane.b32.xlu1 %v13234_v57, %s12766_s13 }
 0x6aa   :  { %1181 = vrot.lane.b32.xlu1 %v13227_v49, %s12767_s14 }
 0x6ae   :  { %1259 = vrot.lane.b32.xlu1 %v13232_v55, %s12767_s14 }
 0x6b2   :  { %1257 = vrot.lane.b32.xlu1 %v13232_v55, %s12768_s15 }
 0x711   :  { %v1005_v39 = vpop.xlane.xlu0 %1004 }
 0x712   :  { %v1009_v40 = vsub.f32 %v1001_v28, %v1005_v39 }
 0x714   :  { %v1011_v41 = vmul.f32 1.442695, %v1009_v40 }
 0x716   :  { %12530 = vpow2.f32 %v1011_v41 }
 0x720   :  { %v12531_v42 = vpop.eup %12530 }
 0x721   :  { %v1015_v43 = vsel %vm676_vm4, %v12531_v42, 0.0 }
 0x722   :  { %v1008_v45 = vpop.xlane.xlu1 %1007  ;;  %1016 = vadd.xlane.f32.xlu0 %v1015_v43 }
 0x723   :  { %v1010_v47 = vsub.f32 %v1002_v36, %v1008_v45 }
 0x725   :  { %v1013_v51 = vmul.f32 1.442695, %v1010_v47 }
 0x726   :  { %v1104_v46 = vpop.permute.xlu1 %1103 }
 0x727   :  { %11363 = vmatpush3.msra.mxu1 %v1104_v46  ;;  %12532 = vpow2.f32 %v1013_v51 }
 0x728   :  { %11372 = vmatprep.subr.mxu1 %v12762_v25 }
 0x72a   :  { %v1182_v63 = vpop.permute.xlu1 %1181 }
 0x72e   :  { %v1260_v3 = vpop.permute.xlu1 %1259 }
 0x731   :  { %v12533_v52 = vpop.eup %12532 }
 0x732   :  { %v1018_v54 = vsel %vm676_vm4, %v12533_v52, 0.0  ;;  %v1258_v5 = vpop.permute.xlu1 %1257 }
 0x738   :  { %1026 = vrot.lane.b32.xlu0 %v13246_v60, %s12766_s13 }
 0x757   :  { %1019 = vadd.xlane.f32.xlu0 %v1018_v54 }
 0x76d   :  { %1179 = vrot.lane.b32.xlu0 %v13227_v49, %s12768_s15 }
 0x7af   :  { %v1017_v56 = vpop.xlane.xlu0 %1016 }
 0x7b0   :  { %12534 = vrcp.f32 %v1017_v56 }
 0x7b3   :  { %v1027_v58 = vpop.permute.xlu0 %1026 }
 0x7b4   :  { %11358 = vmatpush3.msra.mxu0 %v1027_v58 }
 0x7b5   :  { %11367 = vmatprep.subr.mxu0 %v12762_v25 }
 0x7ba   :  { %v12535_v59 = vpop.eup %12534 }
 0x7bb   :  { %v1023_v62 = vmul.f32 %v12535_v59, %v12531_v42 }
 0x7bd   :  { %11360 = vmatmul.mubr.msk.f32.vlgmr.msra.gmra.mrb[10].mxu0 %vm676_vm4, %v1023_v62 }
 0x7be   :  { %11368 = vmatpush3.xpose.msk.msra.mxu0 %vm520_vm2, %v1182_v63  ;;  %11369 = vmatprep.mubr.msk.f32.mxu0 %vm12763_vm1, %v12762_v25 }
 0x7bf   :  { %11377 = vmatprep.subr.mxu0 %v12762_v25 }
 0x7e4   :  { %v1020_v0 = vpop.xlane.xlu0 %1019 }
 0x7e5   :  { %12536 = vrcp.f32 %v1020_v0 }
 0x7e8   :  { %v1180_v1 = vpop.permute.xlu0 %1179 }
 0x7e9   :  { %11370 = vmatmul.mubr.msk.f32.vlgmr.msra.gmra.mrb[12].mxu0 %vm520_vm2, %v1180_v1 }
 0x7ea   :  { %11379 = vmatprep.mubr.msk.f32.mxu0 %vm12763_vm1, %v12762_v25 }
 0x7ef   :  { %v12537_v2 = vpop.eup %12536 }
 0x7f0   :  { %v1024_v4 = vmul.f32 %v12537_v2, %v12533_v52 }
 0x7f2   :  { %11365 = vmatmul.mubr.msk.f32.vlgmr.msra.gmra.mrb[18].mxu1 %vm676_vm4, %v1024_v4 }
 0x7f3   :  { %11373 = vmatpush3.xpose.msk.msra.mxu1 %vm520_vm2, %v1260_v3  ;;  %11374 = vmatprep.mubr.msk.f32.mxu1 %vm12763_vm1, %v12762_v25 }
 0x7f4   :  { %11382 = vmatprep.subr.mxu1 %v12762_v25 }
 0x7f6   :  { %11375 = vmatmul.mubr.msk.f32.vlgmr.msra.gmra.mrb[20].mxu1 %vm520_vm2, %v1258_v5 }
 0x7f7   :  { %11384 = vmatprep.mubr.msk.f32.mxu1 %vm12763_vm1, %v12762_v25 }
 0x890   :  { %v13333_v6 = vpop.f32.mrb[10].mxu0 }
 0x891   :  { %v11361_v7 = vpop.f32.mrb[11].mxu0 }
 0x8bc   :  { %v1253_v8 = vpop.f32.mrb[12].mxu0 }
 0x8bd   :  { %v1335_v9 = vsel %vm362_vm3, %v1253_v8, -1e+30  ;;  %v11371_v10 = vpop.f32.mrb[13].mxu0 }
 0x8be   :  { %v1337_v11 = vsel %vm676_vm4, %v1335_v9, -inf }
 0x8bf   :  { %1338 = vmax.xlane.f32.xlu0 %v1337_v11 }
 0x8c5   :  { %v13338_v12 = vpop.f32.mrb[18].mxu1 }
 0x8c6   :  { %v11366_v13 = vpop.f32.mrb[19].mxu1 }
 0x8c9   :  { %v1331_v14 = vpop.f32.mrb[20].mxu1 }
 0x8ca   :  { %v1336_v15 = vsel %vm362_vm3, %v1331_v14, -1e+30  ;;  %v11376_v16 = vpop.f32.mrb[21].mxu1 }
 0x8cb   :  { %v1340_v17 = vsel %vm676_vm4, %v1336_v15, -inf  ;;  %v1877_v16 = vld [vmem:[%s15264_s2 + $0x328] sm:$0xff] }
 0x8cc   :  { %1341 = vmax.xlane.f32.xlu1 %v1340_v17 }
 0x8dd   :  { %1435 = vrot.lane.b32.xlu1 %v13234_v57, %s12768_s15 }
 0x8e1   :  { %1513 = vrot.lane.b32.xlu1 %v13227_v49, %s12769_s16 }
 0x8e5   :  { %1591 = vrot.lane.b32.xlu1 %v13232_v55, %s12769_s16 }
 0x8e9   :  { %1589 = vrot.lane.b32.xlu1 %v13232_v55, %s12770_s17 }
 0x94c   :  { %v1339_v18 = vpop.xlane.xlu0 %1338 }
 0x94d   :  { %v1343_v19 = vsub.f32 %v1335_v9, %v1339_v18  ;;  %v1878_v18 = vld [vmem:[%s15264_s2 + $0x330] sm:$0xff] }
 0x94f   :  { %v1345_v20 = vmul.f32 1.442695, %v1343_v19  ;;  %v12185_v19 = vpack.c.bf16 %v1878_v18, %v1877_v16  ;;  %v2019_v16 = vld [vmem:[%s15267_s5 + $0x40] sm:$0xff] }
 0x951   :  { %12538 = vpow2.f32 %v1345_v20  ;;  %v1879_v20 = vld [vmem:[%s15264_s2 + $0x338] sm:$0xff] }
 0x959   :  { %v1342_v21 = vpop.xlane.xlu1 %1341 }
 0x95a   :  { %v1344_v26 = vsub.f32 %v1336_v15, %v1342_v21  ;;  %v1876_v15 = vld [vmem:[%s15264_s2 + $0x320] sm:$0xff] }
 0x95b   :  { %v12539_v22 = vpop.eup %12538  ;;  %v1880_v21 = vld [vmem:[%s15264_s2 + $0x340] sm:$0xff] }
 0x95c   :  { %v1349_v23 = vsel %vm676_vm4, %v12539_v22, 0.0  ;;  %v1347_v27 = vmul.f32 1.442695, %v1344_v26 }
 0x95d   :  { %1350 = vadd.xlane.f32.xlu0 %v1349_v23  ;;  %v1436_v24 = vpop.permute.xlu1 %1435  ;;  %v1881_v23 = vld [vmem:[%s15264_s2 + $0x348] sm:$0xff] }
 0x95e   :  { %11383 = vmatpush3.msra.mxu1 %v1436_v24  ;;  %12540 = vpow2.f32 %v1347_v27  ;;  %v1882_v24 = vld [vmem:[%s15264_s2 + $0x350] sm:$0xff] }
 0x95f   :  { %11392 = vmatprep.subr.mxu1 %v12762_v25  ;;  %v12193_v26 = vpack.c.bf16 %v1882_v24, %v1881_v23  ;;  %v2025_v23 = vld [vmem:[%s15267_s5 + $0x70] sm:$0xff] }
 0x961   :  { %v1514_v35 = vpop.permute.xlu1 %1513 }
 0x965   :  { %v1592_v38 = vpop.permute.xlu1 %1591 }
 0x968   :  { %v12541_v55 = vpop.eup %12540 }
 0x969   :  { %v1352_v28 = vsel %vm676_vm4, %v12541_v55, 0.0  ;;  %v1590_v40 = vpop.permute.xlu1 %1589 }
 0x973   :  { %1359 = vrot.lane.b32.xlu0 %v13246_v60, %s12768_s15 }
 0x992   :  { %1353 = vadd.xlane.f32.xlu0 %v1352_v28 }
 0x9a8   :  { %1511 = vrot.lane.b32.xlu0 %v13227_v49, %s12770_s17 }
 0x9ea   :  { %v1351_v29 = vpop.xlane.xlu0 %1350 }
 0x9eb   :  { %12542 = vrcp.f32 %v1351_v29 }
 0x9ee   :  { %v1360_v30 = vpop.permute.xlu0 %1359 }
 0x9ef   :  { %11378 = vmatpush3.msra.mxu0 %v1360_v30 }
 0x9f0   :  { %11387 = vmatprep.subr.mxu0 %v12762_v25 }
 0x9f5   :  { %v12543_v32 = vpop.eup %12542 }
 0x9f6   :  { %v1357_v34 = vmul.f32 %v12543_v32, %v12539_v22  ;;  %v12189_v22 = vpack.c.bf16 %v1880_v21, %v1879_v20  ;;  %v2026_v20 = vld [vmem:[%s15267_s5 + $0x78] sm:$0xff]  ;;  %v2023_v21 = vld [vmem:[%s15267_s5 + $0x60] sm:$0xff] }
 0x9f7   :  { %v12211_v24 = vpack.c.bf16 %v2025_v23, %v2023_v21  ;;  %v2156_v23 = vld [vmem:[%s15264_s2 + $0x3d8] sm:$0xff] }
 0x9f8   :  { %11380 = vmatmul.mubr.msk.f32.vlgmr.msra.gmra.mrb[14].mxu0 %vm676_vm4, %v1357_v34 }
 0x9f9   :  { %11388 = vmatpush3.xpose.msk.msra.mxu0 %vm520_vm2, %v1514_v35  ;;  %11389 = vmatprep.mubr.msk.f32.mxu0 %vm12763_vm1, %v12762_v25 }
 0x9fa   :  { %11397 = vmatprep.subr.mxu0 %v12762_v25 }
 0xa1f   :  { %v1354_v36 = vpop.xlane.xlu0 %1353 }
 0xa20   :  { %12544 = vrcp.f32 %v1354_v36 }
 0xa23   :  { %v1512_v49 = vpop.permute.xlu0 %1511 }
 0xa24   :  { %11390 = vmatmul.mubr.msk.f32.vlgmr.msra.gmra.mrb[16].mxu0 %vm520_vm2, %v1512_v49 }
 0xa25   :  { %11399 = vmatprep.mubr.msk.f32.mxu0 %vm12763_vm1, %v12762_v25 }
 0xa2a   :  { %v12545_v37 = vpop.eup %12544 }
 0xa2b   :  { %v1358_v39 = vmul.f32 %v12545_v37, %v12541_v55 }
 0xa2d   :  { %11385 = vmatmul.mubr.msk.f32.vlgmr.msra.gmra.mrb[22].mxu1 %vm676_vm4, %v1358_v39 }
 0xa2e   :  { %11393 = vmatpush3.xpose.msk.msra.mxu1 %vm520_vm2, %v1592_v38  ;;  %11394 = vmatprep.mubr.msk.f32.mxu1 %vm12763_vm1, %v12762_v25 }
 0xa2f   :  { %11402 = vmatprep.subr.mxu1 %v12762_v25 }
 0xa31   :  { %11395 = vmatmul.mubr.msk.f32.vlgmr.msra.gmra.mrb[24].mxu1 %vm520_vm2, %v1590_v40 }
 0xa32   :  { %11404 = vmatprep.mubr.msk.f32.mxu1 %vm12763_vm1, %v12762_v25 }
 0xacb   :  { %v1431_v41 = vpop.f32.mrb[14].mxu0 }
 0xacc   :  { %v11381_v42 = vpop.f32.mrb[15].mxu0 }
 0xaf7   :  { %v1585_v43 = vpop.f32.mrb[16].mxu0 }
 0xaf8   :  { %v1667_v45 = vsel %vm362_vm3, %v1585_v43, -1e+30  ;;  %v11391_v46 = vpop.f32.mrb[17].mxu0 }
 0xaf9   :  { %v1669_v47 = vsel %vm676_vm4, %v1667_v45, -inf }
 0xafa   :  { %1670 = vmax.xlane.f32.xlu0 %v1669_v47 }
 0xb00   :  { %v1507_v51 = vpop.f32.mrb[22].mxu1 }
 0xb01   :  { %v11386_v52 = vpop.f32.mrb[23].mxu1 }
 0xb04   :  { %v1663_v54 = vpop.f32.mrb[24].mxu1 }
 0xb05   :  { %v1668_v56 = vsel %vm362_vm3, %v1663_v54, -1e+30  ;;  %v11396_v58 = vpop.f32.mrb[25].mxu1 }
 0xb06   :  { %v1672_v59 = vsel %vm676_vm4, %v1668_v56, -inf }
 0xb07   :  { %1673 = vmax.xlane.f32.xlu1 %v1672_v59 }
 0xb18   :  { %1767 = vrot.lane.b32.xlu1 %v13234_v57, %s12770_s17 }
 0xb1c   :  { %1845 = vrot.lane.b32.xlu1 %v13333_v6, %s12769_s16 }
 0xb20   :  { %1847 = vrot.lane.b32.xlu1 %v13338_v12, %s12769_s16 }
 0xb24   :  { %1855 = vrot.lane.b32.xlu1 %v1507_v51, %s12767_s14 }
 0xb87   :  { %v1671_v62 = vpop.xlane.xlu0 %1670 }
 0xb88   :  { %v1675_v63 = vsub.f32 %v1667_v45, %v1671_v62 }
 0xb8a   :  { %v1677_v0 = vmul.f32 1.442695, %v1675_v63 }
 0xb8c   :  { %12546 = vpow2.f32 %v1677_v0 }
 0xb94   :  { %v1674_v1 = vpop.xlane.xlu1 %1673 }
 0xb95   :  { %v1676_v2 = vsub.f32 %v1668_v56, %v1674_v1 }
 0xb96   :  { %v12547_v3 = vpop.eup %12546 }
 0xb97   :  { %v1679_v4 = vmul.f32 1.442695, %v1676_v2  ;;  %v1681_v5 = vsel %vm676_vm4, %v12547_v3, 0.0 }
 0xb98   :  { %1682 = vadd.xlane.f32.xlu0 %v1681_v5  ;;  %v1768_v57 = vpop.permute.xlu1 %1767 }
 0xb99   :  { %12548 = vpow2.f32 %v1679_v4  ;;  %11403 = vmatpush3.msra.mxu1 %v1768_v57  ;;  %v2014_v4 = vld [vmem:[%s15267_s5 + $0x18] sm:$0xff]  ;;  %v2011_v57 = vld [vmem:[%s15267_s5] sm:$0xff] }
 0xb9c   :  { %v1846_v30 = vpop.permute.xlu1 %1845 }
 0xb9d   :  { %v1867_v35 = vsel %vm520_vm2, %v13294_v31, %v1846_v30  ;;  %v10600_v31 = vld [vmem:[%s15264_s2 + $0x358] ss:$0 sm:$0xff]  ;;  %v2161_v30 = vld [vmem:[%s15264_s2 + $0x400] sm:$0xff] }
 0xba0   :  { %v1848_v34 = vpop.permute.xlu1 %1847 }
 0xba1   :  { %v1868_v39 = vsel %vm520_vm2, %v13296_v33, %v1848_v34 }
 0xba3   :  { %v12549_v6 = vpop.eup %12548 }
 0xba4   :  { %v1684_v7 = vsel %vm676_vm4, %v12549_v6, 0.0  ;;  %v1856_v38 = vpop.permute.xlu1 %1855 }
 0xba5   :  { %1685 = vadd.xlane.f32.xlu0 %v1684_v7  ;;  %v1871_v40 = vsel %vm1869_vm6, %v1868_v39, %v1856_v38  ;;  %v2164_v38 = vld [vmem:[%s15264_s2 + $0x418] sm:$0xff] }
 0xbbb   :  { %1691 = vrot.lane.b32.xlu0 %v13246_v60, %s12770_s17  ;;  %v1875_v60 = vld [vmem:[%s15264_s2 + $0x318] sm:$0xff] }
 0xbbc   :  { %v12181_v17 = vpack.c.bf16 %v1876_v15, %v1875_v60  ;;  %v2022_v60 = vld [vmem:[%s15267_s5 + $0x58] sm:$0xff] }
 0xbbf   :  { %1853 = vrot.lane.b32.xlu0 %v1431_v41, %s12767_s14 }
 0xc25   :  { %v1683_v8 = vpop.xlane.xlu0 %1682 }
 0xc26   :  { %12550 = vrcp.f32 %v1683_v8  ;;  %v2016_v8 = vld [vmem:[%s15267_s5 + $0x28] sm:$0xff] }
 0xc30   :  { %v12551_v10 = vpop.eup %12550 }
 0xc31   :  { %v1689_v12 = vmul.f32 %v12551_v10, %v12547_v3  ;;  %v2012_v3 = vld [vmem:[%s15267_s5 + $0x8] sm:$0xff] }
 0xc32   :  { %v1686_v9 = vpop.xlane.xlu0 %1685  ;;  %v12197_v5 = vpack.c.bf16 %v2014_v4, %v2012_v3 }
 0xc33   :  { %12552 = vrcp.f32 %v1686_v9  ;;  %v2018_v9 = vld [vmem:[%s15267_s5 + $0x38] sm:$0xff] }
 0xc34   :  { %12198 = vmatprep.subr.bf16.mxu1 %v12197_v5  ;;  %v12201_v10 = vpack.c.bf16 %v2018_v9, %v2016_v8  ;;  %v2166_v5 = vld [vmem:[%s15264_s2 + $0x428] sm:$0xff]  ;;  %v2167_v8 = vld [vmem:[%s15264_s2 + $0x430] sm:$0xff]  ;;  %v2168_v9 = vld [vmem:[%s15264_s2 + $0x438] sm:$0xff] }
 0xc36   :  { %v1692_v11 = vpop.permute.xlu0 %1691 }
 0xc37   :  { %11398 = vmatpush3.msra.mxu0 %v1692_v11  ;;  %v2015_v11 = vld [vmem:[%s15267_s5 + $0x20] sm:$0xff] }
 0xc38   :  { %11400 = vmatmul.mubr.msk.f32.vlgmr.msra.gmra.mrb[18].mxu0 %vm676_vm4, %v1689_v12  ;;  %12182 = vmatprep.subr.bf16.mxu0 %v12181_v17  ;;  %v2017_v12 = vld [vmem:[%s15267_s5 + $0x30] sm:$0xff] }
 0xc39   :  { %12184 = vmatpush3.bf16.msra.mxu0 %v12181_v17  ;;  %v2021_v17 = vld [vmem:[%s15267_s5 + $0x50] sm:$0xff] }
 0xc3a   :  { %12186 = vmatprep.subr.bf16.mxu0 %v12185_v19  ;;  %v1854_v32 = vpop.permute.xlu0 %1853  ;;  %v12207_v18 = vpack.c.bf16 %v2021_v17, %v2019_v16  ;;  %v2153_v16 = vld [vmem:[%s15264_s2 + $0x3c0] sm:$0xff]  ;;  %v2154_v17 = vld [vmem:[%s15264_s2 + $0x3c8] sm:$0xff] }
 0xc3b   :  { %v1870_v36 = vsel %vm1869_vm6, %v1867_v35, %v1854_v32  ;;  %v2162_v32 = vld [vmem:[%s15264_s2 + $0x408] sm:$0xff] }
 0xc3c   :  { %v12217_v35 = vpack.c.bf16 %v2162_v32, %v2161_v30  ;;  %v10605_v32 = vld [vmem:[%s15267_s5 + $0x80] ss:$8 sm:$0x3] }
 0xc3d   :  { %v12553_v13 = vpop.eup %12552  ;;  %12188 = vmatpush3.bf16.msra.mxu0 %v12185_v19  ;;  %v2024_v19 = vld [vmem:[%s15267_s5 + $0x68] sm:$0xff] }
 0xc3e   :  { %v1690_v14 = vmul.f32 %v12553_v13, %v12549_v6  ;;  %12190 = vmatprep.subr.bf16.mxu0 %v12189_v22  ;;  %v2013_v6 = vld [vmem:[%s15267_s5 + $0x10] sm:$0xff]  ;;  %v12203_v13 = vpack.c.bf16 %v2017_v12, %v2015_v11  ;;  %v2152_v12 = vld [vmem:[%s15264_s2 + $0x3b8] sm:$0xff] }
 0xc3f   :  { %v12199_v7 = vpack.c.bf16 %v2013_v6, %v2011_v57  ;;  %v2150_v6 = vld [vmem:[%s15264_s2 + $0x3a8] sm:$0xff]  ;;  %v2151_v11 = vld [vmem:[%s15264_s2 + $0x3b0] sm:$0xff] }
 0xc40   :  { %11405 = vmatmul.mubr.msk.f32.vlgmr.msra.gmra.mrb[26].mxu1 %vm676_vm4, %v1690_v14  ;;  %v2020_v14 = vld [vmem:[%s15267_s5 + $0x48] sm:$0xff] }
 0xc41   :  { %2110 = vmatprep.mubr.f32.mxu1 %v12762_v25  ;;  %12192 = vmatpush3.bf16.msra.mxu0 %v12189_v22  ;;  %v12205_v15 = vpack.c.bf16 %v2022_v60, %v2020_v14  ;;  %v12209_v22 = vpack.c.bf16 %v2026_v20, %v2024_v19  ;;  %v2169_v14 = vld [vmem:[%s15264_s2 + $0x440] sm:$0xff]  ;;  %v2170_v60 = vld [vmem:[%s15264_s2 + $0x448] sm:$0xff]  ;;  %v2171_v19 = vld [vmem:[%s15264_s2 + $0x450] sm:$0xff] }
 0xc42   :  { %12194 = vmatprep.subr.bf16.mxu0 %v12193_v26  ;;  %12200 = vmatpush1.bf16.msra.mxu1 %v12199_v7  ;;  %v2172_v20 = vld [vmem:[%s15264_s2 + $0x458] sm:$0xff] }
 0xc43   :  { %12202 = vmatprep.subr.bf16.mxu1 %v12201_v10  ;;  %v12229_v10 = vpack.c.bf16 %v2168_v9, %v2167_v8  ;;  %v12237_v21 = vpack.c.bf16 %v2172_v20, %v2171_v19 }
 0xc45   :  { %12196 = vmatpush3.bf16.msra.mxu0 %v12193_v26  ;;  %v2159_v26 = vld [vmem:[%s15264_s2 + $0x3f0] sm:$0xff] }
 0xc46   :  { %12204 = vmatpush1.bf16.msra.mxu1 %v12203_v13  ;;  %v12231_v13 = vpack.c.bf16 %v2152_v12, %v2151_v11 }
 0xc47   :  { %12206 = vmatprep.subr.bf16.mxu1 %v12205_v15  ;;  %v12233_v15 = vpack.c.bf16 %v2170_v60, %v2169_v14 }
 0xc4a   :  { %12208 = vmatpush1.bf16.msra.mxu1 %v12207_v18  ;;  %v12235_v18 = vpack.c.bf16 %v2154_v17, %v2153_v16 }
 0xc4b   :  { %12210 = vmatprep.subr.bf16.mxu1 %v12209_v22  ;;  %v2155_v22 = vld [vmem:[%s15264_s2 + $0x3d0] sm:$0xff] }
 0xc4e   :  { %12212 = vmatpush1.bf16.msra.mxu1 %v12211_v24  ;;  %v12239_v24 = vpack.c.bf16 %v2156_v23, %v2155_v22 }
 0xd0b   :  { %v1763_v27 = vpop.f32.mrb[18].mxu0 }
 0xd0c   :  { %1861 = vrot.lane.b32.xlu0 %v1763_v27, %s12765_s12  ;;  %v11401_v55 = vpop.f32.mrb[19].mxu0  ;;  %v2160_v27 = vld [vmem:[%s15264_s2 + $0x3f8] sm:$0xff] }
 0xd0d   :  { %v2143_v55 = vld [vmem:[%s15264_s2 + $0x370] sm:$0xff] }
 0xd13   :  { %v1839_v28 = vpop.f32.mrb[26].mxu1 }
 0xd14   :  { %1863 = vrot.lane.b32.xlu1 %v1839_v28, %s12765_s12  ;;  %v11406_v29 = vpop.f32.mrb[27].mxu1  ;;  %v12213_v28 = vpack.c.bf16 %v2160_v27, %v2159_v26  ;;  %v2173_v26 = vld [vmem:[%s15264_s2 + $0x460] sm:$0xff]  ;;  %v2174_v27 = vld [vmem:[%s15264_s2 + $0x468] sm:$0xff] }
 0xd15   :  { %v2144_v29 = vld [vmem:[%s15264_s2 + $0x378] sm:$0xff] }
 0xd16   :  { %v12215_v34 = vpack.c.bf16 %v2144_v29, %v2143_v55  ;;  %12214 = vmatprep.subr.bf16.mxu0 %v12213_v28  ;;  %v12241_v55 = vpack.c.bf16 %v2174_v27, %v2173_v26  ;;  %v2157_v28 = vld [vmem:[%s15264_s2 + $0x3e0] sm:$0xff]  ;;  %v2158_v29 = vld [vmem:[%s15264_s2 + $0x3e8] sm:$0xff]  ;;  %v2298_v26 = vld [vmem:[%s15266_s4 + $0x98] sm:$0xff] }
 0xd17   :  { %v12243_v30 = vpack.c.bf16 %v2158_v29, %v2157_v28  ;;  %v2300_v27 = vld [vmem:[%s15266_s4 + $0xa8] sm:$0xff]  ;;  %v2297_v28 = vld [vmem:[%s15266_s4 + $0x90] sm:$0xff]  ;;  %v2299_v29 = vld [vmem:[%s15266_s4 + $0xa0] sm:$0xff] }
 0xd7e   :  { %v1862_v49 = vpop.permute.xlu0 %1861 }
 0xd7f   :  { %v1873_v37 = vsel %vm1872_vm5, %v1870_v36, %v1862_v49  ;;  %v2145_v36 = vld [vmem:[%s15264_s2 + $0x380] sm:$0xff]  ;;  %v2146_v49 = vld [vmem:[%s15264_s2 + $0x388] sm:$0xff] }
 0xd80   :  { %11423 = vmatprep.mubr.msk.f32.mxu0 %vm365_vm0, %v1873_v37  ;;  %v2163_v37 = vld [vmem:[%s15264_s2 + $0x410] sm:$0xff]  ;;  %v12219_v39 = vpack.c.bf16 %v2146_v49, %v2145_v36 }
 0xd86   :  { %v1864_v41 = vpop.permute.xlu1 %1863 }
 0xd87   :  { %v1874_v42 = vsel %vm1872_vm5, %v1871_v40, %v1864_v41  ;;  %v12221_v40 = vpack.c.bf16 %v2164_v38, %v2163_v37  ;;  %v2147_v41 = vld [vmem:[%s15264_s2 + $0x390] sm:$0xff] }
 0xd88   :  { %11424 = vmatmul.mubr.msk.f32.vlgmr.msra.gmra.mrb[20].mxu0 %vm365_vm0, %v1874_v42  ;;  %v2148_v42 = vld [vmem:[%s15264_s2 + $0x398] sm:$0xff] }
 0xd89   :  { %12216 = vmatpush3.bf16.msra.mxu0 %v12215_v34  ;;  %v2033_v34 = vrot.slane %v10605_v32, %v13219_v44 }
 0xd8a   :  { %12218 = vmatprep.subr.bf16.mxu0 %v12217_v35  ;;  %v2037_v35 = vrot.slane %v10605_v32, %v13225_v48  ;;  %v2302_v32 = vld [vmem:[%s15266_s4 + $0xb8] sm:$0xff] }
 0xd8d   :  { %12220 = vmatpush3.bf16.msra.mxu0 %v12219_v39 }
 0xd8e   :  { %12222 = vmatprep.subr.bf16.mxu0 %v12221_v40 }
 0xe5b   :  { %v11425_v43 = vpop.f32.mrb[20].mxu0 }
 0xe5c   :  { %v1966_v45 = vadd.f32 %v11425_v43, %v10600_v31  ;;  %v1960_v46 = vpop.f32.mrb[21].mxu0 }
 0xe5d   :  { %v1961_v47 = vadd.f32 %v10600_v31, %v1960_v46  ;;  %v12223_v31 = vpack.c.bf16 %v2148_v42, %v2147_v41 }
 0xe5e   :  { %v13436_v51 = vadd.f32 %v1966_v45, %v13147_v53 }
 0xe5f   :  { %v13439_v33 = vadd.f32 %v1961_v47, %v13143_v50  ;;  %12224 = vmatpush3.bf16.msra.mxu0 %v12223_v31 }
 0xe60   :  { %v1976_v52 = vsel %vm365_vm0, %v13436_v51, 0.0 }
 0xe61   :  { %1977 = vadd.xlane.f32.xlu1 %v1976_v52  ;;  %v1973_v54 = vsel %vm365_vm0, %v13439_v33, 0.0 }
 0xe62   :  { %1974 = vadd.xlane.f32.xlu0 %v1973_v54 }
 0xeee   :  { %v1978_v56 = vpop.xlane.xlu1 %1977 }
 0xeef   :  { %v1980_v58 = vmul.f32 0.015625, %v1978_v56  ;;  %v1975_v59 = vpop.xlane.xlu0 %1974 }
 0xef0   :  { %v1979_v62 = vmul.f32 0.015625, %v1975_v59 }
 0xef1   :  { %v13446_v63 = vsub.f32 %v13436_v51, %v1980_v58  ;;  %v10603_v58 = vld [vmem:[%s15264_s2 + $0x360] ss:$0 sm:$0xff] }
 0xef2   :  { %v13449_v53 = vsub.f32 %v13439_v33, %v1979_v62  ;;  %v10604_v62 = vld [vmem:[%s15264_s2 + $0x368] ss:$0 sm:$0xff] }
 0xef3   :  { %v1984_v1 = vmul.f32 %v13446_v63, %v13446_v63 }
 0xef4   :  { %v1983_v50 = vmul.f32 %v13449_v53, %v13449_v53 }
 0xef5   :  { %v1988_v2 = vsel %vm365_vm0, %v1984_v1, 0.0 }
 0xef6   :  { %v1985_v0 = vsel %vm365_vm0, %v1983_v50, 0.0 }
 0xef7   :  { %1986 = vadd.xlane.f32.xlu0 %v1985_v0 }
 0xefb   :  { %1989 = vadd.xlane.f32.xlu0 %v1988_v2 }
 0xf84   :  { %v1987_v43 = vpop.xlane.xlu0 %1986 }
 0xf85   :  { %v1991_v45 = vmul.f32 0.015625, %v1987_v43 }
 0xf87   :  { %v1993_v46 = vadd.f32 1e-06, %v1991_v45 }
 0xf88   :  { %v1990_v47 = vpop.xlane.xlu0 %1989 }
 0xf89   :  { %12554 = vrsqrt.f32 %v1993_v46  ;;  %v1992_v52 = vmul.f32 0.015625, %v1990_v47 }
 0xf8b   :  { %v1994_v54 = vadd.f32 1e-06, %v1992_v52 }
 0xf8d   :  { %12556 = vrsqrt.f32 %v1994_v54 }
 0xf93   :  { %v12555_v56 = vpop.eup %12554 }
 0xf94   :  { %v1997_v59 = vmul.f32 %v12555_v56, %v13449_v53  ;;  %v2165_v53 = vld [vmem:[%s15264_s2 + $0x420] sm:$0xff] }
 0xf95   :  { %v12225_v57 = vpack.c.bf16 %v2166_v5, %v2165_v53 }
 0xf96   :  { %v2003_v50 = vmul.f32 %v10603_v58, %v1997_v59 }
 0xf97   :  { %v12557_v0 = vpop.eup %12556  ;;  %12226 = vmatprep.subr.bf16.mxu0 %v12225_v57 }
 0xf98   :  { %v2009_v1 = vadd.f32 %v10604_v62, %v2003_v50  ;;  %v1998_v2 = vmul.f32 %v12557_v0, %v13446_v63  ;;  %v2149_v63 = vld [vmem:[%s15264_s2 + $0x3a0] sm:$0xff] }
 0xf99   :  { %v12227_v7 = vpack.c.bf16 %v2150_v6, %v2149_v63  ;;  %v10608_v6 = vld [vmem:[%s15264_s2 + $0x470] ss:$0 sm:$0xff] }
 0xf9a   :  { %10606 = vmatmul.mubr.msk.f32.vlgmr.msra.gmra.mrb[28].mxu1 %vm365_vm0, %v2009_v1  ;;  %v2004_v3 = vmul.f32 %v10603_v58, %v1998_v2 }
 0xf9b   :  { %2116 = vmatprep.mubr.f32.mxu1 %v12762_v25  ;;  %12228 = vmatpush3.bf16.msra.mxu0 %v12227_v7 }
 0xf9c   :  { %v2010_v4 = vadd.f32 %v10604_v62, %v2004_v3  ;;  %12230 = vmatprep.subr.bf16.mxu0 %v12229_v10 }
 0xf9e   :  { %10607 = vmatmul.mubr.msk.f32.gmra.mrb[30].mxu1 %vm365_vm0, %v2010_v4 }
 0xf9f   :  { %2396 = vmatprep.mubr.f32.mxu1 %v12762_v25  ;;  %12232 = vmatpush3.bf16.msra.mxu0 %v12231_v13 }
 0xfa0   :  { %12234 = vmatprep.subr.bf16.mxu0 %v12233_v15 }
 0xfa3   :  { %12236 = vmatpush3.bf16.msra.mxu0 %v12235_v18 }
 0xfa4   :  { %12238 = vmatprep.subr.bf16.mxu0 %v12237_v21 }
 0xfa7   :  { %12240 = vmatpush3.bf16.msra.mxu0 %v12239_v24 }
 0xfa8   :  { %12242 = vmatprep.subr.bf16.mxu0 %v12241_v55  ;;  %v12245_v55 = vpack.c.bf16 %v2300_v27, %v2298_v26 }
 0xfaa   :  { %12246 = vmatprep.subr.bf16.mxu1 %v12245_v55 }
 0xfab   :  { %12244 = vmatpush3.bf16.msra.mxu0 %v12243_v30  ;;  %v12247_v30 = vpack.c.bf16 %v2299_v29, %v2297_v28 }
 0xfac   :  { %11446 = vmatprep.subr.mxu0 %v12762_v25 }
 0xfad   :  { %12248 = vmatpush1.bf16.msra.mxu1 %v12247_v30 }
0x106d   :  { %v2112_v36 = vpop.f32.mrb[28].mxu1 }
0x106e   :  { %v2113_v49 = vadd.f32 %v2112_v36, %v2033_v34  ;;  %v2114_v37 = vpop.f32.mrb[29].mxu1  ;;  %v2301_v36 = vld [vmem:[%s15266_s4 + $0xb0] sm:$0xff] }
0x106f   :  { %v2115_v38 = vadd.f32 %v2114_v37, %v2037_v35 }
0x1070   :  { %v2127_v39 = vmul.f32 0.70710677, %v2113_v49  ;;  %v2123_v59 = vmul.f32 0.5, %v2113_v49  ;;  %v2303_v49 = vld [vmem:[%s15266_s4 + $0xc0] sm:$0xff] }
0x1071   :  { %v2128_v40 = vmul.f32 0.70710677, %v2115_v38  ;;  %v2118_v41 = vpop.f32.mrb[30].mxu1  ;;  %v2124_v56 = vmul.f32 0.5, %v2115_v38  ;;  %v12251_v37 = vpack.c.bf16 %v2303_v49, %v2301_v36  ;;  %v2306_v38 = vld [vmem:[%s15266_s4 + $0xd8] sm:$0xff] }
0x1072   :  { %12558 = verf.f32 %v2127_v39  ;;  %v2119_v42 = vadd.f32 %v2118_v41, %v2033_v34  ;;  %v2120_v31 = vpop.f32.mrb[31].mxu1  ;;  %v2304_v34 = vld [vmem:[%s15266_s4 + $0xc8] sm:$0xff]  ;;  %v2305_v41 = vld [vmem:[%s15266_s4 + $0xd0] sm:$0xff] }
0x1073   :  { %12560 = verf.f32 %v2128_v40  ;;  %v2121_v43 = vadd.f32 %v2120_v31, %v2037_v35  ;;  %v12249_v35 = vpack.c.bf16 %v2304_v34, %v2302_v32  ;;  %v2308_v39 = vld [vmem:[%s15266_s4 + $0xe8] sm:$0xff] }
0x1074   :  { %v2129_v45 = vmul.f32 0.70710677, %v2119_v42  ;;  %v2125_v53 = vmul.f32 0.5, %v2119_v42  ;;  %v12253_v40 = vpack.c.bf16 %v2308_v39, %v2306_v38  ;;  %v2307_v42 = vld [vmem:[%s15266_s4 + $0xe0] sm:$0xff] }
0x1075   :  { %v2130_v46 = vmul.f32 0.70710677, %v2121_v43  ;;  %v2126_v3 = vmul.f32 0.5, %v2121_v43  ;;  %12250 = vmatprep.subr.bf16.mxu1 %v12249_v35  ;;  %v12255_v31 = vpack.c.bf16 %v2307_v42, %v2305_v41  ;;  %v2310_v43 = vld [vmem:[%s15266_s4 + $0xf8] sm:$0xff] }
0x1076   :  { %12562 = verf.f32 %v2129_v45  ;;  %12252 = vmatpush1.bf16.msra.mxu1 %v12251_v37  ;;  %v2312_v45 = vld [vmem:[%s15266_s4 + $0x108] sm:$0xff] }
0x1077   :  { %12564 = verf.f32 %v2130_v46  ;;  %12254 = vmatprep.subr.bf16.mxu1 %v12253_v40  ;;  %v12257_v46 = vpack.c.bf16 %v2312_v45, %v2310_v43 }
0x107a   :  { %12256 = vmatpush1.bf16.msra.mxu1 %v12255_v31 }
0x107b   :  { %12258 = vmatprep.subr.bf16.mxu1 %v12257_v46 }
0x107c   :  { %v12559_v47 = vpop.eup %12558 }
0x107d   :  { %v12561_v52 = vpop.eup %12560  ;;  %v2135_v54 = vadd.f32 1.0, %v12559_v47  ;;  %v2309_v47 = vld [vmem:[%s15266_s4 + $0xf0] sm:$0xff] }
0x107e   :  { %v2136_v58 = vadd.f32 1.0, %v12561_v52  ;;  %v2311_v52 = vld [vmem:[%s15266_s4 + $0x100] sm:$0xff] }
0x107f   :  { %v2139_v1 = vmul.f32 %v2135_v54, %v2123_v59  ;;  %v12259_v54 = vpack.c.bf16 %v2311_v52, %v2309_v47 }
0x1080   :  { %v12563_v62 = vpop.eup %12562  ;;  %v2140_v50 = vmul.f32 %v2136_v58, %v2124_v56 }
0x1081   :  { %v12565_v0 = vpop.eup %12564  ;;  %v2137_v2 = vadd.f32 1.0, %v12563_v62  ;;  %12260 = vmatpush1.bf16.msra.mxu1 %v12259_v54 }
0x1082   :  { %v2138_v4 = vadd.f32 1.0, %v12565_v0  ;;  %2244 = vmatprep.mubr.f32.mxu0 %v2140_v50  ;;  %11426 = vmatprep.subr.mxu1 %v12762_v25 }
0x1083   :  { %2245 = vmatmul.mubr.f32.vlgmr.msra.gmra.mrb[22].mxu0 %v2139_v1  ;;  %v2141_v57 = vmul.f32 %v2137_v2, %v2125_v53  ;;  %v10609_v2 = vld [vmem:[%s15264_s2 + $0x478] ss:$0 sm:$0xff] }
0x1084   :  { %v2142_v5 = vmul.f32 %v2138_v4, %v2126_v3  ;;  %v10610_v4 = vld [vmem:[%s15264_s2 + $0x480] ss:$0 sm:$0xff] }
0x1086   :  { %2249 = vmatprep.mubr.f32.mxu0 %v2142_v5 }
0x1087   :  { %2250 = vmatmul.mubr.f32.gmra.mrb[24].mxu0 %v2141_v57 }
0x1088   :  { %11448 = vmatprep.mubr.msk.f32.mxu0 %vm12763_vm1, %v12762_v25 }
0x1156   :  { %v11005_v63 = vpop.f32.mrb[22].mxu0 }
0x1157   :  { %v11006_v7 = vpop.f32.mrb[23].mxu0 }
0x1158   :  { %v11007_v8 = vadd.f32 %v11006_v7, %v11005_v63 }
0x115a   :  { %v2247_v9 = vadd.f32 %v11007_v8, %v10608_v6  ;;  %v11008_v10 = vpop.f32.mrb[24].mxu0  ;;  %v10611_v8 = vld [vmem:[%s15266_s4 + $0x110] ss:$8 sm:$0x3] }
0x115b   :  { %v11009_v11 = vpop.f32.mrb[25].mxu0 }
0x115c   :  { %v13625_v12 = vadd.f32 %v2247_v9, %v13439_v33  ;;  %v11010_v13 = vadd.f32 %v11009_v11, %v11008_v10  ;;  %v2319_v9 = vrot.slane %v10611_v8, %v13219_v44 }
0x115e   :  { %v2252_v14 = vadd.f32 %v11010_v13, %v10608_v6  ;;  %v2259_v60 = vsel %vm365_vm0, %v13625_v12, 0.0 }
0x115f   :  { %2260 = vadd.xlane.f32.xlu0 %v2259_v60 }
0x1160   :  { %v13630_v15 = vadd.f32 %v2252_v14, %v13436_v51  ;;  %v2323_v14 = vrot.slane %v10611_v8, %v13225_v48 }
0x1162   :  { %v2262_v16 = vsel %vm365_vm0, %v13630_v15, 0.0 }
0x1163   :  { %2263 = vadd.xlane.f32.xlu1 %v2262_v16 }
0x11ec   :  { %v2261_v17 = vpop.xlane.xlu0 %2260 }
0x11ed   :  { %v2265_v18 = vmul.f32 0.015625, %v2261_v17 }
0x11ef   :  { %v2267_v19 = vsub.f32 %v13625_v12, %v2265_v18 }
0x11f0   :  { %v2264_v20 = vpop.xlane.xlu1 %2263 }
0x11f1   :  { %v2266_v33 = vmul.f32 0.015625, %v2264_v20  ;;  %v2269_v21 = vmul.f32 %v2267_v19, %v2267_v19 }
0x11f3   :  { %v2268_v22 = vsub.f32 %v13630_v15, %v2266_v33  ;;  %v2271_v23 = vsel %vm365_vm0, %v2269_v21, 0.0 }
0x11f4   :  { %2272 = vadd.xlane.f32.xlu0 %v2271_v23 }
0x11f5   :  { %v2270_v24 = vmul.f32 %v2268_v22, %v2268_v22 }
0x11f7   :  { %v2274_v51 = vsel %vm365_vm0, %v2270_v24, 0.0 }
0x11f8   :  { %2275 = vadd.xlane.f32.xlu1 %v2274_v51 }
0x1281   :  { %v2273_v56 = vpop.xlane.xlu0 %2272 }
0x1282   :  { %v2277_v58 = vmul.f32 0.015625, %v2273_v56 }
0x1284   :  { %v2279_v59 = vadd.f32 1e-06, %v2277_v58 }
0x1285   :  { %v2276_v62 = vpop.xlane.xlu1 %2275 }
0x1286   :  { %12566 = vrsqrt.f32 %v2279_v59  ;;  %v2278_v50 = vmul.f32 0.015625, %v2276_v62 }
0x1288   :  { %v2280_v0 = vadd.f32 1e-06, %v2278_v50 }
0x128a   :  { %12568 = vrsqrt.f32 %v2280_v0 }
0x1290   :  { %v12567_v1 = vpop.eup %12566 }
0x1291   :  { %v2283_v3 = vmul.f32 %v12567_v1, %v2267_v19 }
0x1293   :  { %v2289_v53 = vmul.f32 %v10609_v2, %v2283_v3 }
0x1294   :  { %v12569_v5 = vpop.eup %12568 }
0x1295   :  { %v2295_v57 = vadd.f32 %v10610_v4, %v2289_v53  ;;  %v2284_v63 = vmul.f32 %v12569_v5, %v2268_v22 }
0x1297   :  { %10612 = vmatmul.mubr.msk.f32.vlgmr.msra.gmra.mrb[32].mxu1 %vm365_vm0, %v2295_v57  ;;  %v2290_v6 = vmul.f32 %v10609_v2, %v2284_v63 }
0x1298   :  { %2402 = vmatprep.mubr.f32.mxu1 %v12762_v25 }
0x1299   :  { %v2296_v7 = vadd.f32 %v10610_v4, %v2290_v6 }
0x129b   :  { %10613 = vmatmul.mubr.msk.f32.gmra.mrb[34].mxu1 %vm365_vm0, %v2296_v7 }
0x129c   :  { %11428 = vmatprep.mubr.msk.f32.mxu1 %vm12763_vm1, %v12762_v25 }
0x136a   :  { %v2398_v10 = vpop.f32.mrb[32].mxu1 }
0x136b   :  { %v13702_v11 = vadd.f32 %v2398_v10, %v2319_v9  ;;  %v2400_v13 = vpop.f32.mrb[33].mxu1 }
0x136c   :  { %v13721_v33 = vadd.f32 %v2400_v13, %v2323_v14 }
0x136d   :  { %2410 = vrot.lane.b32.xlu0 %v13702_v11, %s12764_s11 }
0x136e   :  { %v2404_v60 = vpop.f32.mrb[34].mxu1 }
0x136f   :  { %v13707_v16 = vadd.f32 %v2404_v60, %v2319_v9  ;;  %v2406_v17 = vpop.f32.mrb[35].mxu1 }
0x1370   :  { %v13709_v18 = vadd.f32 %v2406_v17, %v2323_v14 }
0x1371   :  { %2487 = vrot.lane.b32.xlu1 %v13707_v16, %s12764_s11 }
0x13df   :  { %v2411_v19 = vpop.permute.xlu0 %2410 }
0x13e0   :  { %11427 = vmatpush3.xpose.msk.msra.mxu1 %vm520_vm2, %v2411_v19 }
0x13e1   :  { %11431 = vmatprep.subr.mxu1 %v12762_v25 }
0x13e3   :  { %v2488_v20 = vpop.permute.xlu1 %2487  ;;  %11429 = vmatmul.mubr.msk.f32.vlgmr.msra.gmra.mrb[36].mxu1 %vm520_vm2, %v13702_v11 }
0x13e4   :  { %11432 = vmatpush3.xpose.msk.msra.mxu1 %vm520_vm2, %v2488_v20  ;;  %11433 = vmatprep.mubr.msk.f32.mxu1 %vm12763_vm1, %v12762_v25 }
0x13e5   :  { %11436 = vmatprep.subr.mxu1 %v12762_v25 }
0x13e7   :  { %11434 = vmatmul.mubr.msk.f32.vlgmr.msra.gmra.mrb[38].mxu1 %vm520_vm2, %v13707_v16 }
0x13e8   :  { %11437 = vmatpush3.msra.mxu1 %v13721_v33  ;;  %11438 = vmatprep.mubr.msk.f32.mxu1 %vm12763_vm1, %v12762_v25 }
0x13e9   :  { %11441 = vmatprep.subr.mxu1 %v12762_v25 }
0x14b6   :  { %v2482_v21 = vpop.f32.mrb[36].mxu1 }
0x14b7   :  { %v2563_v22 = vsel %vm362_vm3, %v2482_v21, -1e+30  ;;  %v11430_v23 = vpop.f32.mrb[37].mxu1 }
0x14b8   :  { %v2565_v24 = vsel %vm676_vm4, %v2563_v22, -inf }
0x14b9   :  { %2566 = vmax.xlane.f32.xlu1 %v2565_v24 }
0x14ba   :  { %v2559_v51 = vpop.f32.mrb[38].mxu1 }
0x14bb   :  { %v2564_v26 = vsel %vm362_vm3, %v2559_v51, -1e+30  ;;  %v11435_v27 = vpop.f32.mrb[39].mxu1 }
0x14bc   :  { %v2568_v55 = vsel %vm676_vm4, %v2564_v26, -inf }
0x14bd   :  { %2569 = vmax.xlane.f32.xlu0 %v2568_v55 }
0x14ca   :  { %2813 = vrot.lane.b32.xlu1 %v13707_v16, %s12765_s12 }
0x14ce   :  { %2733 = vrot.lane.b32.xlu1 %v13702_v11, %s12766_s13 }
0x1546   :  { %v2567_v28 = vpop.xlane.xlu1 %2566 }
0x1547   :  { %v2571_v29 = vsub.f32 %v2563_v22, %v2567_v28 }
0x1549   :  { %v2573_v30 = vmul.f32 1.442695, %v2571_v29 }
0x154a   :  { %v2570_v32 = vpop.xlane.xlu0 %2569  ;;  %v2814_v39 = vpop.permute.xlu1 %2813 }
0x154b   :  { %12570 = vpow2.f32 %v2573_v30  ;;  %v2572_v34 = vsub.f32 %v2564_v26, %v2570_v32 }
0x154d   :  { %v2575_v35 = vmul.f32 1.442695, %v2572_v34 }
0x154e   :  { %v2734_v40 = vpop.permute.xlu1 %2733 }
0x154f   :  { %12572 = vpow2.f32 %v2575_v35 }
0x1555   :  { %v12571_v36 = vpop.eup %12570 }
0x1556   :  { %v2577_v49 = vsel %vm676_vm4, %v12571_v36, 0.0 }
0x1557   :  { %2578 = vadd.xlane.f32.xlu0 %v2577_v49 }
0x1559   :  { %v12573_v37 = vpop.eup %12572 }
0x155a   :  { %v2580_v38 = vsel %vm676_vm4, %v12573_v37, 0.0 }
0x155b   :  { %2581 = vadd.xlane.f32.xlu1 %v2580_v38 }
0x156c   :  { %2811 = vrot.lane.b32.xlu1 %v13707_v16, %s12766_s13 }
0x156d   :  { %2735 = vrot.lane.b32.xlu0 %v13702_v11, %s12765_s12 }
0x15e4   :  { %v2579_v41 = vpop.xlane.xlu0 %2578 }
0x15e5   :  { %12574 = vrcp.f32 %v2579_v41 }
0x15e8   :  { %v2582_v42 = vpop.xlane.xlu1 %2581  ;;  %v2736_v31 = vpop.permute.xlu0 %2735 }
0x15e9   :  { %12576 = vrcp.f32 %v2582_v42  ;;  %11447 = vmatpush3.xpose.msk.msra.mxu0 %vm520_vm2, %v2736_v31 }
0x15ea   :  { %11456 = vmatprep.subr.mxu0 %v12762_v25 }
0x15ec   :  { %11449 = vmatmul.mubr.msk.f32.vlgmr.msra.gmra.mrb[26].mxu0 %vm520_vm2, %v2734_v40  ;;  %v2812_v52 = vpop.permute.xlu1 %2811 }
0x15ed   :  { %11458 = vmatprep.mubr.msk.f32.mxu0 %vm12763_vm1, %v12762_v25 }
0x15ef   :  { %v12575_v43 = vpop.eup %12574 }
0x15f0   :  { %v2585_v45 = vmul.f32 %v12575_v43, %v12571_v36 }
0x15f2   :  { %11439 = vmatmul.mubr.msk.f32.vlgmr.msra.gmra.mrb[40].mxu1 %vm676_vm4, %v2585_v45 }
0x15f3   :  { %v12577_v46 = vpop.eup %12576  ;;  %11442 = vmatpush3.msra.mxu1 %v13709_v18  ;;  %11443 = vmatprep.mubr.msk.f32.mxu1 %vm12763_vm1, %v12762_v25 }
0x15f4   :  { %v2586_v47 = vmul.f32 %v12577_v46, %v12573_v37  ;;  %11451 = vmatprep.subr.mxu1 %v12762_v25 }
0x15f6   :  { %11444 = vmatmul.mubr.msk.f32.vlgmr.msra.gmra.mrb[42].mxu1 %vm676_vm4, %v2586_v47 }
0x15f7   :  { %11453 = vmatprep.mubr.msk.f32.mxu1 %vm12763_vm1, %v12762_v25 }
0x15fa   :  { %11452 = vmatpush3.xpose.msk.msra.mxu1 %vm520_vm2, %v2814_v39 }
0x15fb   :  { %11461 = vmatprep.subr.mxu1 %v12762_v25 }
0x15fd   :  { %11454 = vmatmul.mubr.msk.f32.vlgmr.msra.gmra.mrb[44].mxu1 %vm520_vm2, %v2812_v52 }
0x15fe   :  { %11463 = vmatprep.mubr.msk.f32.mxu1 %vm12763_vm1, %v12762_v25 }
0x16bf   :  { %v2807_v54 = vpop.f32.mrb[26].mxu0 }
0x16c0   :  { %v2889_v56 = vsel %vm362_vm3, %v2807_v54, -1e+30  ;;  %v11450_v58 = vpop.f32.mrb[27].mxu0 }
0x16c1   :  { %v2891_v59 = vsel %vm676_vm4, %v2889_v56, -inf }
0x16c2   :  { %2892 = vmax.xlane.f32.xlu0 %v2891_v59 }
0x16c5   :  { %v13766_v62 = vpop.f32.mrb[40].mxu1 }
0x16c6   :  { %v11440_v50 = vpop.f32.mrb[41].mxu1 }
0x16c9   :  { %v13768_v0 = vpop.f32.mrb[42].mxu1 }
0x16ca   :  { %v11445_v1 = vpop.f32.mrb[43].mxu1 }
0x16d0   :  { %v2885_v2 = vpop.f32.mrb[44].mxu1 }
0x16d1   :  { %v2890_v3 = vsel %vm362_vm3, %v2885_v2, -1e+30  ;;  %v11455_v4 = vpop.f32.mrb[45].mxu1 }
0x16d2   :  { %v2894_v53 = vsel %vm676_vm4, %v2890_v3, -inf }
0x16d3   :  { %2895 = vmax.xlane.f32.xlu1 %v2894_v53 }
0x16e4   :  { %2991 = vrot.lane.b32.xlu1 %v13709_v18, %s12766_s13 }
0x16e8   :  { %3069 = vrot.lane.b32.xlu1 %v13702_v11, %s12767_s14 }
0x16ec   :  { %3147 = vrot.lane.b32.xlu1 %v13707_v16, %s12767_s14 }
0x16f0   :  { %3145 = vrot.lane.b32.xlu1 %v13707_v16, %s12768_s15 }
0x174f   :  { %v2893_v5 = vpop.xlane.xlu0 %2892 }
0x1750   :  { %v2897_v57 = vsub.f32 %v2889_v56, %v2893_v5 }
0x1752   :  { %v2899_v63 = vmul.f32 1.442695, %v2897_v57 }
0x1754   :  { %12578 = vpow2.f32 %v2899_v63 }
0x175e   :  { %v12579_v6 = vpop.eup %12578 }
0x175f   :  { %v2903_v7 = vsel %vm676_vm4, %v12579_v6, 0.0 }
0x1760   :  { %v2896_v8 = vpop.xlane.xlu1 %2895  ;;  %2904 = vadd.xlane.f32.xlu0 %v2903_v7 }
0x1761   :  { %v2898_v10 = vsub.f32 %v2890_v3, %v2896_v8 }
0x1763   :  { %v2901_v13 = vmul.f32 1.442695, %v2898_v10 }
0x1764   :  { %v2992_v9 = vpop.permute.xlu1 %2991 }
0x1765   :  { %11462 = vmatpush3.msra.mxu1 %v2992_v9  ;;  %12580 = vpow2.f32 %v2901_v13 }
0x1766   :  { %11471 = vmatprep.subr.mxu1 %v12762_v25 }
0x1768   :  { %v3070_v22 = vpop.permute.xlu1 %3069 }
0x176c   :  { %v3148_v26 = vpop.permute.xlu1 %3147 }
0x176f   :  { %v12581_v14 = vpop.eup %12580 }
0x1770   :  { %v2906_v60 = vsel %vm676_vm4, %v12581_v14, 0.0  ;;  %v3146_v55 = vpop.permute.xlu1 %3145 }
0x1776   :  { %2914 = vrot.lane.b32.xlu0 %v13721_v33, %s12766_s13 }
0x1795   :  { %2907 = vadd.xlane.f32.xlu0 %v2906_v60 }
0x17ab   :  { %3067 = vrot.lane.b32.xlu0 %v13702_v11, %s12768_s15 }
0x17ed   :  { %v2905_v17 = vpop.xlane.xlu0 %2904 }
0x17ee   :  { %12582 = vrcp.f32 %v2905_v17 }
0x17f1   :  { %v2915_v19 = vpop.permute.xlu0 %2914 }
0x17f2   :  { %11457 = vmatpush3.msra.mxu0 %v2915_v19 }
0x17f3   :  { %11466 = vmatprep.subr.mxu0 %v12762_v25 }
0x17f8   :  { %v12583_v20 = vpop.eup %12582 }
0x17f9   :  { %v2911_v21 = vmul.f32 %v12583_v20, %v12579_v6 }
0x17fb   :  { %11459 = vmatmul.mubr.msk.f32.vlgmr.msra.gmra.mrb[28].mxu0 %vm676_vm4, %v2911_v21 }
0x17fc   :  { %11467 = vmatpush3.xpose.msk.msra.mxu0 %vm520_vm2, %v3070_v22  ;;  %11468 = vmatprep.mubr.msk.f32.mxu0 %vm12763_vm1, %v12762_v25 }
0x17fd   :  { %11476 = vmatprep.subr.mxu0 %v12762_v25 }
0x1822   :  { %v2908_v23 = vpop.xlane.xlu0 %2907 }
0x1823   :  { %12584 = vrcp.f32 %v2908_v23 }
0x1826   :  { %v3068_v24 = vpop.permute.xlu0 %3067 }
0x1827   :  { %11469 = vmatmul.mubr.msk.f32.vlgmr.msra.gmra.mrb[30].mxu0 %vm520_vm2, %v3068_v24 }
0x1828   :  { %11478 = vmatprep.mubr.msk.f32.mxu0 %vm12763_vm1, %v12762_v25 }
0x182d   :  { %v12585_v51 = vpop.eup %12584 }
0x182e   :  { %v2912_v27 = vmul.f32 %v12585_v51, %v12581_v14 }
0x1830   :  { %11464 = vmatmul.mubr.msk.f32.vlgmr.msra.gmra.mrb[46].mxu1 %vm676_vm4, %v2912_v27 }
0x1831   :  { %11472 = vmatpush3.xpose.msk.msra.mxu1 %vm520_vm2, %v3148_v26  ;;  %11473 = vmatprep.mubr.msk.f32.mxu1 %vm12763_vm1, %v12762_v25 }
0x1832   :  { %11481 = vmatprep.subr.mxu1 %v12762_v25 }
0x1834   :  { %11474 = vmatmul.mubr.msk.f32.vlgmr.msra.gmra.mrb[48].mxu1 %vm520_vm2, %v3146_v55 }
0x1835   :  { %11483 = vmatprep.mubr.msk.f32.mxu1 %vm12763_vm1, %v12762_v25 }
0x18ce   :  { %v13805_v28 = vpop.f32.mrb[28].mxu0 }
0x18cf   :  { %v11460_v29 = vpop.f32.mrb[29].mxu0 }
0x18fa   :  { %v3141_v30 = vpop.f32.mrb[30].mxu0 }
0x18fb   :  { %v3223_v32 = vsel %vm362_vm3, %v3141_v30, -1e+30  ;;  %v11470_v34 = vpop.f32.mrb[31].mxu0 }
0x18fc   :  { %v3225_v35 = vsel %vm676_vm4, %v3223_v32, -inf }
0x18fd   :  { %3226 = vmax.xlane.f32.xlu0 %v3225_v35 }
0x1903   :  { %v13810_v36 = vpop.f32.mrb[46].mxu1 }
0x1904   :  { %v11465_v49 = vpop.f32.mrb[47].mxu1 }
0x1907   :  { %v3219_v37 = vpop.f32.mrb[48].mxu1 }
0x1908   :  { %v3224_v38 = vsel %vm362_vm3, %v3219_v37, -1e+30  ;;  %v11475_v39 = vpop.f32.mrb[49].mxu1  ;;  %v3762_v37 = vld [vmem:[%s15264_s2 + $0x490] sm:$0xff] }
0x1909   :  { %v3228_v40 = vsel %vm676_vm4, %v3224_v38, -inf }
0x190a   :  { %3229 = vmax.xlane.f32.xlu1 %v3228_v40  ;;  %v3764_v40 = vld [vmem:[%s15264_s2 + $0x4a0] sm:$0xff] }
0x191b   :  { %3323 = vrot.lane.b32.xlu1 %v13709_v18, %s12768_s15 }
0x191f   :  { %3401 = vrot.lane.b32.xlu1 %v13702_v11, %s12769_s16 }
0x1923   :  { %3479 = vrot.lane.b32.xlu1 %v13707_v16, %s12769_s16 }
0x1927   :  { %3477 = vrot.lane.b32.xlu1 %v13707_v16, %s12770_s17 }
0x198a   :  { %v3227_v41 = vpop.xlane.xlu0 %3226 }
0x198b   :  { %v3231_v42 = vsub.f32 %v3223_v32, %v3227_v41 }
0x198d   :  { %v3233_v31 = vmul.f32 1.442695, %v3231_v42  ;;  %v3765_v42 = vld [vmem:[%s15264_s2 + $0x4a8] sm:$0xff] }
0x198f   :  { %12586 = vpow2.f32 %v3233_v31  ;;  %v3766_v31 = vld [vmem:[%s15264_s2 + $0x4b0] sm:$0xff] }
0x1997   :  { %v3230_v43 = vpop.xlane.xlu1 %3229 }
0x1998   :  { %v3232_v52 = vsub.f32 %v3224_v38, %v3230_v43  ;;  %v3763_v38 = vld [vmem:[%s15264_s2 + $0x498] sm:$0xff]  ;;  %v12269_v43 = vpack.c.bf16 %v3766_v31, %v3765_v42  ;;  %v3909_v42 = vld [vmem:[%s15267_s5 + $0xf0] sm:$0xff] }
0x1999   :  { %v12587_v45 = vpop.eup %12586  ;;  %v12265_v41 = vpack.c.bf16 %v3764_v40, %v3763_v38  ;;  %v3907_v38 = vld [vmem:[%s15267_s5 + $0xe0] sm:$0xff]  ;;  %v3910_v40 = vld [vmem:[%s15267_s5 + $0xf8] sm:$0xff] }
0x199a   :  { %v3237_v46 = vsel %vm676_vm4, %v12587_v45, 0.0  ;;  %v3235_v54 = vmul.f32 1.442695, %v3232_v52 }
0x199b   :  { %3238 = vadd.xlane.f32.xlu0 %v3237_v46  ;;  %v3324_v47 = vpop.permute.xlu1 %3323  ;;  %v3768_v46 = vld [vmem:[%s15264_s2 + $0x4c0] sm:$0xff] }
0x199c   :  { %11482 = vmatpush3.msra.mxu1 %v3324_v47  ;;  %12588 = vpow2.f32 %v3235_v54 }
0x199d   :  { %11491 = vmatprep.subr.mxu1 %v12762_v25 }
0x199f   :  { %v3402_v2 = vpop.permute.xlu1 %3401 }
0x19a3   :  { %v3480_v53 = vpop.permute.xlu1 %3479 }
0x19a6   :  { %v12589_v16 = vpop.eup %12588 }
0x19a7   :  { %v3240_v56 = vsel %vm676_vm4, %v12589_v16, 0.0  ;;  %v3478_v57 = vpop.permute.xlu1 %3477 }
0x19b1   :  { %3247 = vrot.lane.b32.xlu0 %v13721_v33, %s12768_s15 }
0x19d0   :  { %3241 = vadd.xlane.f32.xlu0 %v3240_v56 }
0x19e6   :  { %3399 = vrot.lane.b32.xlu0 %v13702_v11, %s12770_s17 }
0x1a28   :  { %v3239_v58 = vpop.xlane.xlu0 %3238 }
0x1a29   :  { %12590 = vrcp.f32 %v3239_v58 }
0x1a2c   :  { %v3248_v59 = vpop.permute.xlu0 %3247 }
0x1a2d   :  { %11477 = vmatpush3.msra.mxu0 %v3248_v59 }
0x1a2e   :  { %11486 = vmatprep.subr.mxu0 %v12762_v25 }
0x1a33   :  { %v12591_v50 = vpop.eup %12590 }
0x1a34   :  { %v3245_v1 = vmul.f32 %v12591_v50, %v12587_v45  ;;  %v3767_v45 = vld [vmem:[%s15264_s2 + $0x4b8] sm:$0xff] }
0x1a35   :  { %v12273_v47 = vpack.c.bf16 %v3768_v46, %v3767_v45  ;;  %v4045_v46 = vld [vmem:[%s15264_s2 + $0x560] sm:$0xff] }
0x1a36   :  { %11479 = vmatmul.mubr.msk.f32.vlgmr.msra.gmra.mrb[32].mxu0 %vm676_vm4, %v3245_v1 }
0x1a37   :  { %11487 = vmatpush3.xpose.msk.msra.mxu0 %vm520_vm2, %v3402_v2  ;;  %11488 = vmatprep.mubr.msk.f32.mxu0 %vm12763_vm1, %v12762_v25 }
0x1a38   :  { %11496 = vmatprep.subr.mxu0 %v12762_v25 }
0x1a5d   :  { %v3242_v3 = vpop.xlane.xlu0 %3241 }
0x1a5e   :  { %12592 = vrcp.f32 %v3242_v3 }
0x1a61   :  { %v3400_v11 = vpop.permute.xlu0 %3399 }
0x1a62   :  { %11489 = vmatmul.mubr.msk.f32.vlgmr.msra.gmra.mrb[34].mxu0 %vm520_vm2, %v3400_v11 }
0x1a63   :  { %11498 = vmatprep.mubr.msk.f32.mxu0 %vm12763_vm1, %v12762_v25 }
0x1a68   :  { %v12593_v4 = vpop.eup %12592 }
0x1a69   :  { %v3246_v5 = vmul.f32 %v12593_v4, %v12589_v16 }
0x1a6b   :  { %11484 = vmatmul.mubr.msk.f32.vlgmr.msra.gmra.mrb[50].mxu1 %vm676_vm4, %v3246_v5 }
0x1a6c   :  { %11492 = vmatpush3.xpose.msk.msra.mxu1 %vm520_vm2, %v3480_v53  ;;  %11493 = vmatprep.mubr.msk.f32.mxu1 %vm12763_vm1, %v12762_v25 }
0x1a6d   :  { %11501 = vmatprep.subr.mxu1 %v12762_v25 }
0x1a6f   :  { %11494 = vmatmul.mubr.msk.f32.vlgmr.msra.gmra.mrb[52].mxu1 %vm520_vm2, %v3478_v57 }
0x1a70   :  { %11503 = vmatprep.mubr.msk.f32.mxu1 %vm12763_vm1, %v12762_v25 }
0x1b09   :  { %v3319_v63 = vpop.f32.mrb[32].mxu0 }
0x1b0a   :  { %v11480_v6 = vpop.f32.mrb[33].mxu0 }
0x1b35   :  { %v3473_v7 = vpop.f32.mrb[34].mxu0 }
0x1b36   :  { %v3555_v8 = vsel %vm362_vm3, %v3473_v7, -1e+30  ;;  %v11490_v9 = vpop.f32.mrb[35].mxu0 }
0x1b37   :  { %v3557_v10 = vsel %vm676_vm4, %v3555_v8, -inf }
0x1b38   :  { %3558 = vmax.xlane.f32.xlu0 %v3557_v10 }
0x1b3e   :  { %v3395_v13 = vpop.f32.mrb[50].mxu1 }
0x1b3f   :  { %v11485_v14 = vpop.f32.mrb[51].mxu1 }
0x1b42   :  { %v3551_v60 = vpop.f32.mrb[52].mxu1 }
0x1b43   :  { %v3556_v17 = vsel %vm362_vm3, %v3551_v60, -1e+30  ;;  %v11495_v19 = vpop.f32.mrb[53].mxu1 }
0x1b44   :  { %v3560_v20 = vsel %vm676_vm4, %v3556_v17, -inf }
0x1b45   :  { %3561 = vmax.xlane.f32.xlu1 %v3560_v20 }
0x1b56   :  { %3655 = vrot.lane.b32.xlu1 %v13709_v18, %s12770_s17 }
0x1b5a   :  { %3733 = vrot.lane.b32.xlu1 %v13805_v28, %s12769_s16 }
0x1b5e   :  { %3735 = vrot.lane.b32.xlu1 %v13810_v36, %s12769_s16 }
0x1b62   :  { %3743 = vrot.lane.b32.xlu1 %v3395_v13, %s12767_s14 }
0x1bc5   :  { %v3559_v21 = vpop.xlane.xlu0 %3558 }
0x1bc6   :  { %v3563_v22 = vsub.f32 %v3555_v8, %v3559_v21 }
0x1bc8   :  { %v3565_v23 = vmul.f32 1.442695, %v3563_v22 }
0x1bca   :  { %12594 = vpow2.f32 %v3565_v23 }
0x1bd2   :  { %v3562_v61 = vpop.xlane.xlu1 %3561 }
0x1bd3   :  { %v3564_v24 = vsub.f32 %v3556_v17, %v3562_v61 }
0x1bd4   :  { %v12595_v51 = vpop.eup %12594 }
0x1bd5   :  { %v3567_v26 = vmul.f32 1.442695, %v3564_v24  ;;  %v3569_v27 = vsel %vm676_vm4, %v12595_v51, 0.0  ;;  %v3898_v24 = vld [vmem:[%s15267_s5 + $0x98] sm:$0xff] }
0x1bd6   :  { %3570 = vadd.xlane.f32.xlu0 %v3569_v27  ;;  %v3656_v18 = vpop.permute.xlu1 %3655  ;;  %v3897_v27 = vld [vmem:[%s15267_s5 + $0x90] sm:$0xff] }
0x1bd7   :  { %12596 = vpow2.f32 %v3567_v26  ;;  %11502 = vmatpush3.msra.mxu1 %v3656_v18  ;;  %v3899_v18 = vld [vmem:[%s15267_s5 + $0xa0] sm:$0xff] }
0x1bda   :  { %v3734_v58 = vpop.permute.xlu1 %3733 }
0x1bdb   :  { %v3755_v1 = vsel %vm520_vm2, %v13766_v62, %v3734_v58  ;;  %v10638_v62 = vld [vmem:[%s15264_s2 + $0x4c8] ss:$0 sm:$0xff]  ;;  %v4048_v58 = vld [vmem:[%s15264_s2 + $0x578] sm:$0xff] }
0x1bde   :  { %v3736_v50 = vpop.permute.xlu1 %3735 }
0x1bdf   :  { %v3756_v53 = vsel %vm520_vm2, %v13768_v0, %v3736_v50 }
0x1be1   :  { %v12597_v55 = vpop.eup %12596 }
0x1be2   :  { %v3572_v28 = vsel %vm676_vm4, %v12597_v55, 0.0  ;;  %v3744_v4 = vpop.permute.xlu1 %3743 }
0x1be3   :  { %3573 = vadd.xlane.f32.xlu0 %v3572_v28  ;;  %v3758_v5 = vsel %vm1869_vm6, %v3756_v53, %v3744_v4  ;;  %v3902_v28 = vld [vmem:[%s15267_s5 + $0xb8] sm:$0xff] }
0x1bf9   :  { %3579 = vrot.lane.b32.xlu0 %v13721_v33, %s12770_s17  ;;  %v3761_v33 = vld [vmem:[%s15264_s2 + $0x488] sm:$0xff] }
0x1bfa   :  { %v12261_v39 = vpack.c.bf16 %v3762_v37, %v3761_v33  ;;  %v3905_v37 = vld [vmem:[%s15267_s5 + $0xd0] sm:$0xff] }
0x1bfd   :  { %3741 = vrot.lane.b32.xlu0 %v3319_v63, %s12767_s14 }
0x1c63   :  { %v3571_v29 = vpop.xlane.xlu0 %3570 }
0x1c64   :  { %12598 = vrcp.f32 %v3571_v29  ;;  %v3904_v29 = vld [vmem:[%s15267_s5 + $0xc8] sm:$0xff] }
0x1c6e   :  { %v12599_v32 = vpop.eup %12598 }
0x1c6f   :  { %v3577_v35 = vmul.f32 %v12599_v32, %v12595_v51  ;;  %v3900_v51 = vld [vmem:[%s15267_s5 + $0xa8] sm:$0xff]  ;;  %v3901_v32 = vld [vmem:[%s15267_s5 + $0xb0] sm:$0xff] }
0x1c70   :  { %v3574_v30 = vpop.xlane.xlu0 %3573  ;;  %v12277_v26 = vpack.c.bf16 %v3900_v51, %v3898_v24  ;;  %v4052_v51 = vld [vmem:[%s15264_s2 + $0x598] sm:$0xff] }
0x1c71   :  { %12600 = vrcp.f32 %v3574_v30  ;;  %v12281_v30 = vpack.c.bf16 %v3904_v29, %v3902_v28  ;;  %v4054_v28 = vld [vmem:[%s15264_s2 + $0x5a8] sm:$0xff] }
0x1c72   :  { %12278 = vmatprep.subr.bf16.mxu1 %v12277_v26  ;;  %v4035_v26 = vld [vmem:[%s15264_s2 + $0x510] sm:$0xff] }
0x1c74   :  { %v3580_v34 = vpop.permute.xlu0 %3579 }
0x1c75   :  { %11497 = vmatpush3.msra.mxu0 %v3580_v34  ;;  %v3903_v34 = vld [vmem:[%s15267_s5 + $0xc0] sm:$0xff] }
0x1c76   :  { %11499 = vmatmul.mubr.msk.f32.vlgmr.msra.gmra.mrb[36].mxu0 %vm676_vm4, %v3577_v35  ;;  %12262 = vmatprep.subr.bf16.mxu0 %v12261_v39  ;;  %v12283_v35 = vpack.c.bf16 %v3903_v34, %v3901_v32  ;;  %v4038_v32 = vld [vmem:[%s15264_s2 + $0x528] sm:$0xff] }
0x1c77   :  { %12264 = vmatpush3.bf16.msra.mxu0 %v12261_v39  ;;  %v12287_v39 = vpack.c.bf16 %v3907_v38, %v3905_v37  ;;  %v4040_v37 = vld [vmem:[%s15264_s2 + $0x538] sm:$0xff] }
0x1c78   :  { %12266 = vmatprep.subr.bf16.mxu0 %v12265_v41  ;;  %v3742_v59 = vpop.permute.xlu0 %3741 }
0x1c79   :  { %v3757_v2 = vsel %vm1869_vm6, %v3755_v1, %v3742_v59  ;;  %v4031_v1 = vld [vmem:[%s15264_s2 + $0x4f0] sm:$0xff] }
0x1c7b   :  { %v12601_v36 = vpop.eup %12600  ;;  %12268 = vmatpush3.bf16.msra.mxu0 %v12265_v41  ;;  %v3912_v41 = vld [vmem:[%s15267_s5 + $0x108] sm:$0xff] }
0x1c7c   :  { %v3578_v49 = vmul.f32 %v12601_v36, %v12597_v55  ;;  %12270 = vmatprep.subr.bf16.mxu0 %v12269_v43  ;;  %v12279_v55 = vpack.c.bf16 %v3899_v18, %v3897_v27  ;;  %v3906_v36 = vld [vmem:[%s15267_s5 + $0xd8] sm:$0xff]  ;;  %v12289_v31 = vpack.c.bf16 %v3912_v41, %v3910_v40  ;;  %v4058_v40 = vld [vmem:[%s15264_s2 + $0x5c8] sm:$0xff] }
0x1c7d   :  { %v4036_v27 = vld [vmem:[%s15264_s2 + $0x518] sm:$0xff] }
0x1c7e   :  { %11504 = vmatmul.mubr.msk.f32.vlgmr.msra.gmra.mrb[54].mxu1 %vm676_vm4, %v3578_v49  ;;  %v3908_v49 = vld [vmem:[%s15267_s5 + $0xe8] sm:$0xff]  ;;  %v12307_v18 = vpack.c.bf16 %v4036_v27, %v4035_v26 }
0x1c7f   :  { %3996 = vmatprep.mubr.f32.mxu1 %v12762_v25  ;;  %12272 = vmatpush3.bf16.msra.mxu0 %v12269_v43  ;;  %v12285_v33 = vpack.c.bf16 %v3908_v49, %v3906_v36  ;;  %v3911_v43 = vld [vmem:[%s15267_s5 + $0x100] sm:$0xff]  ;;  %v4056_v36 = vld [vmem:[%s15264_s2 + $0x5b8] sm:$0xff] }
0x1c80   :  { %12274 = vmatprep.subr.bf16.mxu0 %v12273_v47  ;;  %12280 = vmatpush1.bf16.msra.mxu1 %v12279_v55  ;;  %v12291_v45 = vpack.c.bf16 %v3911_v43, %v3909_v42  ;;  %v4053_v55 = vld [vmem:[%s15264_s2 + $0x5a0] sm:$0xff] }
0x1c81   :  { %12282 = vmatprep.subr.bf16.mxu1 %v12281_v30  ;;  %v12309_v29 = vpack.c.bf16 %v4054_v28, %v4053_v55  ;;  %v4037_v30 = vld [vmem:[%s15264_s2 + $0x520] sm:$0xff] }
0x1c82   :  { %v12311_v34 = vpack.c.bf16 %v4038_v32, %v4037_v30  ;;  %v4041_v42 = vld [vmem:[%s15264_s2 + $0x540] sm:$0xff] }
0x1c83   :  { %12276 = vmatpush3.bf16.msra.mxu0 %v12273_v47  ;;  %v4046_v47 = vld [vmem:[%s15264_s2 + $0x568] sm:$0xff] }
0x1c84   :  { %12284 = vmatpush1.bf16.msra.mxu1 %v12283_v35  ;;  %v4055_v35 = vld [vmem:[%s15264_s2 + $0x5b0] sm:$0xff] }
0x1c85   :  { %12286 = vmatprep.subr.bf16.mxu1 %v12285_v33  ;;  %v12313_v49 = vpack.c.bf16 %v4056_v36, %v4055_v35  ;;  %v4039_v33 = vld [vmem:[%s15264_s2 + $0x530] sm:$0xff] }
0x1c86   :  { %v12315_v38 = vpack.c.bf16 %v4040_v37, %v4039_v33 }
0x1c88   :  { %12288 = vmatpush1.bf16.msra.mxu1 %v12287_v39  ;;  %v4057_v39 = vld [vmem:[%s15264_s2 + $0x5c0] sm:$0xff] }
0x1c89   :  { %12290 = vmatprep.subr.bf16.mxu1 %v12289_v31  ;;  %v12317_v41 = vpack.c.bf16 %v4058_v40, %v4057_v39  ;;  %v4042_v31 = vld [vmem:[%s15264_s2 + $0x548] sm:$0xff] }
0x1c8a   :  { %v12319_v43 = vpack.c.bf16 %v4042_v31, %v4041_v42  ;;  %v4184_v31 = vld [vmem:[%s15263_s1 + $0x8] sm:$0xff] }
0x1c8c   :  { %12292 = vmatpush1.bf16.msra.mxu1 %v12291_v45  ;;  %v4059_v45 = vld [vmem:[%s15264_s2 + $0x5d0] sm:$0xff] }
0x1d49   :  { %v3651_v52 = vpop.f32.mrb[36].mxu0 }
0x1d4a   :  { %3749 = vrot.lane.b32.xlu0 %v3651_v52, %s12765_s12  ;;  %v11500_v54 = vpop.f32.mrb[37].mxu0  ;;  %v4029_v52 = vld [vmem:[%s15264_s2 + $0x4e0] sm:$0xff] }
0x1d4b   :  { %v12293_v54 = vpack.c.bf16 %v4046_v47, %v4045_v46  ;;  %v4060_v46 = vld [vmem:[%s15264_s2 + $0x5d8] sm:$0xff] }
0x1d4c   :  { %v12321_v47 = vpack.c.bf16 %v4060_v46, %v4059_v45  ;;  %v12771_v45 = vmov 0.0|0.0   ;;  %v4185_v46 = vld [vmem:[%s15263_s1 + $0x10] sm:$0xff] }
0x1d4d   :  { %12294 = vmatprep.subr.bf16.mxu0 %v12293_v54  ;;  %v4044_v54 = vld [vmem:[%s15264_s2 + $0x558] sm:$0xff]  ;;  %12325 = vmatprep.subr.bf16.mxu1 %v12771_v45 }
0x1d51   :  { %v3727_v16 = vpop.f32.mrb[54].mxu1 }
0x1d52   :  { %3751 = vrot.lane.b32.xlu1 %v3727_v16, %s12765_s12  ;;  %v11505_v56 = vpop.f32.mrb[55].mxu1  ;;  %v4030_v16 = vld [vmem:[%s15264_s2 + $0x4e8] sm:$0xff] }
0x1d53   :  { %v4047_v56 = vld [vmem:[%s15264_s2 + $0x570] sm:$0xff]  ;;  %v12295_v59 = vpack.c.bf16 %v4030_v16, %v4029_v52 }
0x1d54   :  { %v12297_v50 = vpack.c.bf16 %v4048_v58, %v4047_v56  ;;  %v4043_v52 = vld [vmem:[%s15264_s2 + $0x550] sm:$0xff] }
0x1d55   :  { %v12323_v16 = vpack.c.bf16 %v4044_v54, %v4043_v52  ;;  %v10643_v56 = vld [vmem:[%s15267_s5 + $0x110] ss:$8 sm:$0x3]  ;;  %v4187_v54 = vld [vmem:[%s15263_s1 + $0x20] sm:$0xff] }
0x1d56   :  { %v3919_v58 = vrot.slane %v10643_v56, %v13219_v44 }
0x1dbc   :  { %v3750_v3 = vpop.permute.xlu0 %3749 }
0x1dbd   :  { %v3759_v11 = vsel %vm1872_vm5, %v3757_v2, %v3750_v3  ;;  %v4032_v2 = vld [vmem:[%s15264_s2 + $0x4f8] sm:$0xff]  ;;  %v4049_v3 = vld [vmem:[%s15264_s2 + $0x580] sm:$0xff] }
0x1dbe   :  { %11522 = vmatprep.mubr.msk.f32.mxu0 %vm365_vm0, %v3759_v11  ;;  %v4050_v11 = vld [vmem:[%s15264_s2 + $0x588] sm:$0xff]  ;;  %v12299_v4 = vpack.c.bf16 %v4032_v2, %v4031_v1 }
0x1dbf   :  { %v12301_v53 = vpack.c.bf16 %v4050_v11, %v4049_v3 }
0x1dc4   :  { %v3752_v57 = vpop.permute.xlu1 %3751 }
0x1dc5   :  { %v3760_v63 = vsel %vm1872_vm5, %v3758_v5, %v3752_v57  ;;  %v4033_v5 = vld [vmem:[%s15264_s2 + $0x500] sm:$0xff]  ;;  %v4034_v57 = vld [vmem:[%s15264_s2 + $0x508] sm:$0xff] }
0x1dc6   :  { %11523 = vmatmul.mubr.msk.f32.vlgmr.msra.gmra.mrb[38].mxu0 %vm365_vm0, %v3760_v63  ;;  %v12303_v63 = vpack.c.bf16 %v4034_v57, %v4033_v5 }
0x1dc7   :  { %12296 = vmatpush3.bf16.msra.mxu0 %v12295_v59  ;;  %v3923_v59 = vrot.slane %v10643_v56, %v13225_v48  ;;  %v4189_v56 = vld [vmem:[%s15263_s1 + $0x30] sm:$0xff] }
0x1dc8   :  { %12298 = vmatprep.subr.bf16.mxu0 %v12297_v50 }
0x1dcb   :  { %12300 = vmatpush3.bf16.msra.mxu0 %v12299_v4 }
0x1dcc   :  { %12302 = vmatprep.subr.bf16.mxu0 %v12301_v53 }
0x1dcf   :  { %12304 = vmatpush3.bf16.msra.mxu0 %v12303_v63 }
0x1e99   :  { %v11524_v6 = vpop.f32.mrb[38].mxu0 }
0x1e9a   :  { %v3852_v7 = vadd.f32 %v11524_v6, %v10638_v62  ;;  %v3846_v8 = vpop.f32.mrb[39].mxu0 }
0x1e9b   :  { %v3847_v9 = vadd.f32 %v10638_v62, %v3846_v8 }
0x1e9c   :  { %v13908_v10 = vadd.f32 %v3852_v7, %v13630_v15 }
0x1e9d   :  { %v13911_v0 = vadd.f32 %v3847_v9, %v13625_v12 }
0x1e9e   :  { %v3862_v13 = vsel %vm365_vm0, %v13908_v10, 0.0 }
0x1e9f   :  { %3863 = vadd.xlane.f32.xlu1 %v3862_v13  ;;  %v3859_v14 = vsel %vm365_vm0, %v13911_v0, 0.0 }
0x1ea0   :  { %3860 = vadd.xlane.f32.xlu0 %v3859_v14 }
0x1f2c   :  { %v3864_v60 = vpop.xlane.xlu1 %3863 }
0x1f2d   :  { %v3866_v17 = vmul.f32 0.015625, %v3864_v60  ;;  %v3861_v19 = vpop.xlane.xlu0 %3860  ;;  %v10641_v60 = vld [vmem:[%s15264_s2 + $0x4d0] ss:$0 sm:$0xff] }
0x1f2e   :  { %v3865_v20 = vmul.f32 0.015625, %v3861_v19  ;;  %v10642_v19 = vld [vmem:[%s15264_s2 + $0x4d8] ss:$0 sm:$0xff] }
0x1f2f   :  { %v13918_v21 = vsub.f32 %v13908_v10, %v3866_v17 }
0x1f30   :  { %v13921_v15 = vsub.f32 %v13911_v0, %v3865_v20 }
0x1f31   :  { %v3870_v23 = vmul.f32 %v13918_v21, %v13918_v21 }
0x1f32   :  { %v3869_v12 = vmul.f32 %v13921_v15, %v13921_v15 }
0x1f33   :  { %v3874_v61 = vsel %vm365_vm0, %v3870_v23, 0.0 }
0x1f34   :  { %v3871_v22 = vsel %vm365_vm0, %v3869_v12, 0.0 }
0x1f35   :  { %3872 = vadd.xlane.f32.xlu0 %v3871_v22 }
0x1f39   :  { %3875 = vadd.xlane.f32.xlu0 %v3874_v61 }
0x1fc2   :  { %v3873_v62 = vpop.xlane.xlu0 %3872 }
0x1fc3   :  { %v3877_v6 = vmul.f32 0.015625, %v3873_v62 }
0x1fc5   :  { %v3879_v7 = vadd.f32 1e-06, %v3877_v6 }
0x1fc6   :  { %v3876_v8 = vpop.xlane.xlu0 %3875 }
0x1fc7   :  { %12602 = vrsqrt.f32 %v3879_v7  ;;  %v3878_v9 = vmul.f32 0.015625, %v3876_v8 }
0x1fc9   :  { %v3880_v13 = vadd.f32 1e-06, %v3878_v9 }
0x1fcb   :  { %12604 = vrsqrt.f32 %v3880_v13 }
0x1fd1   :  { %v12603_v14 = vpop.eup %12602 }
0x1fd2   :  { %v3883_v17 = vmul.f32 %v12603_v14, %v13921_v15  ;;  %v4051_v15 = vld [vmem:[%s15264_s2 + $0x590] sm:$0xff] }
0x1fd4   :  { %v3889_v20 = vmul.f32 %v10641_v60, %v3883_v17 }
0x1fd5   :  { %v12605_v12 = vpop.eup %12604 }
0x1fd6   :  { %v3895_v22 = vadd.f32 %v10642_v19, %v3889_v20  ;;  %v3884_v23 = vmul.f32 %v12605_v12, %v13918_v21  ;;  %v12305_v21 = vpack.c.bf16 %v4052_v51, %v4051_v15  ;;  %v10646_v51 = vld [vmem:[%s15264_s2 + $0x5e0] ss:$0 sm:$0xff] }
0x1fd8   :  { %10644 = vmatmul.mubr.msk.f32.vlgmr.msra.gmra.mrb[56].mxu1 %vm365_vm0, %v3895_v22  ;;  %v3890_v61 = vmul.f32 %v10641_v60, %v3884_v23  ;;  %12306 = vmatprep.subr.bf16.mxu0 %v12305_v21 }
0x1fd9   :  { %4002 = vmatprep.mubr.f32.mxu1 %v12762_v25  ;;  %12308 = vmatpush3.bf16.msra.mxu0 %v12307_v18 }
0x1fda   :  { %v3896_v24 = vadd.f32 %v10642_v19, %v3890_v61  ;;  %12310 = vmatprep.subr.bf16.mxu0 %v12309_v29 }
0x1fdc   :  { %10645 = vmatmul.mubr.msk.f32.gmra.mrb[58].mxu1 %vm365_vm0, %v3896_v24 }
0x1fdd   :  { %11541 = vmatprep.mubr.msk.f32.mxu1 %vm12763_vm1, %v12762_v25  ;;  %12312 = vmatpush3.bf16.msra.mxu0 %v12311_v34 }
0x1fde   :  { %12314 = vmatprep.subr.bf16.mxu0 %v12313_v49 }
0x1fe1   :  { %12316 = vmatpush3.bf16.msra.mxu0 %v12315_v38 }
0x1fe2   :  { %12318 = vmatprep.subr.bf16.mxu0 %v12317_v41 }
0x1fe5   :  { %12320 = vmatpush3.bf16.msra.mxu0 %v12319_v43 }
0x1fe6   :  { %12322 = vmatprep.subr.bf16.mxu0 %v12321_v47  ;;  %v4186_v47 = vld [vmem:[%s15263_s1 + $0x18] sm:$0xff] }
0x1fe7   :  { %v12329_v52 = vpack.c.bf16 %v4186_v47, %v4185_v46 }
0x1fe9   :  { %12324 = vmatpush3.bf16.msra.mxu0 %v12323_v16  ;;  %v4188_v16 = vld [vmem:[%s15263_s1 + $0x28] sm:$0xff] }
0x1fea   :  { %11570 = vmatprep.subr.mxu0 %v12762_v25 }
0x20ab   :  { %v3998_v50 = vpop.f32.mrb[56].mxu1 }
0x20ac   :  { %v3999_v1 = vadd.f32 %v3998_v50, %v3919_v58  ;;  %v4000_v2 = vpop.f32.mrb[57].mxu1 }
0x20ad   :  { %v4001_v3 = vadd.f32 %v4000_v2, %v3923_v59 }
0x20ae   :  { %v4013_v11 = vmul.f32 0.70710677, %v3999_v1  ;;  %v4009_v13 = vmul.f32 0.5, %v3999_v1 }
0x20af   :  { %v4014_v4 = vmul.f32 0.70710677, %v4001_v3  ;;  %v4004_v53 = vpop.f32.mrb[58].mxu1  ;;  %v4010_v48 = vmul.f32 0.5, %v4001_v3 }
0x20b0   :  { %12606 = verf.f32 %v4013_v11  ;;  %v4005_v5 = vadd.f32 %v4004_v53, %v3919_v58  ;;  %v4006_v57 = vpop.f32.mrb[59].mxu1  ;;  %v12332_v58 = vpack.c.bf16 %v4188_v16, %v4187_v54 }
0x20b1   :  { %12608 = verf.f32 %v4014_v4  ;;  %v4007_v63 = vadd.f32 %v4006_v57, %v3923_v59  ;;  %v4190_v59 = vld [vmem:[%s15263_s1 + $0x38] sm:$0xff] }
0x20b2   :  { %v4015_v62 = vmul.f32 0.70710677, %v4005_v5  ;;  %v4011_v23 = vmul.f32 0.5, %v4005_v5  ;;  %v12335_v50 = vpack.c.bf16 %v4190_v59, %v4189_v56 }
0x20b3   :  { %v4016_v6 = vmul.f32 0.70710677, %v4007_v63  ;;  %v4012_v12 = vmul.f32 0.5, %v4007_v63 }
0x20b4   :  { %12610 = verf.f32 %v4015_v62  ;;  %v10647_v62 = vld [vmem:[%s15264_s2 + $0x5e8] ss:$0 sm:$0xff] }
0x20b5   :  { %12612 = verf.f32 %v4016_v6 }
0x20ba   :  { %v12607_v7 = vpop.eup %12606 }
0x20bb   :  { %v12609_v44 = vpop.eup %12608  ;;  %v4021_v8 = vadd.f32 1.0, %v12607_v7 }
0x20bc   :  { %v4022_v9 = vadd.f32 1.0, %v12609_v44 }
0x20bd   :  { %v4025_v19 = vmul.f32 %v4021_v8, %v4009_v13  ;;  %v10648_v8 = vld [vmem:[%s15264_s2 + $0x5f0] ss:$0 sm:$0xff] }
0x20be   :  { %v12611_v14 = vpop.eup %12610  ;;  %v4026_v60 = vmul.f32 %v4022_v9, %v4010_v48  ;;  %v4273_v48 = vld [vmem:[%s15265_s3] sm:$0xff]  ;;  %v4274_v9 = vld [vmem:[%s15265_s3 + $0x8] sm:$0xff] }
0x20bf   :  { %v12613_v17 = vpop.eup %12612  ;;  %v4023_v20 = vadd.f32 1.0, %v12611_v14 }
0x20c0   :  { %v4024_v22 = vadd.f32 1.0, %v12613_v17  ;;  %4130 = vmatprep.mubr.f32.mxu0 %v4026_v60  ;;  %v12338_v17 = vpack.c.bf16 %v4274_v9, %v4273_v48 }
0x20c1   :  { %4131 = vmatmul.mubr.f32.vlgmr.msra.gmra.mrb[40].mxu0 %v4025_v19  ;;  %v4027_v24 = vmul.f32 %v4023_v20, %v4011_v23  ;;  %v4275_v20 = vld [vmem:[%s15265_s3 + $0x10] sm:$0xff]  ;;  %v10649_v23 = vld [vmem:[%s15263_s1 + $0x40] ss:$0 sm:$0xff] }
0x20c2   :  { %v4028_v61 = vmul.f32 %v4024_v22, %v4012_v12  ;;  %v4276_v12 = vld [vmem:[%s15265_s3 + $0x18] sm:$0xff] }
0x20c3   :  { %v12341_v22 = vpack.c.bf16 %v4276_v12, %v4275_v20 }
0x20c4   :  { %4135 = vmatprep.mubr.f32.mxu0 %v4028_v61 }
0x20c5   :  { %4136 = vmatmul.mubr.f32.gmra.mrb[42].mxu0 %v4027_v24 }
0x20c6   :  { %11572 = vmatprep.mubr.msk.f32.mxu0 %vm12763_vm1, %v12762_v25 }
0x2194   :  { %v11085_v15 = vpop.f32.mrb[40].mxu0 }
0x2195   :  { %v11086_v21 = vpop.f32.mrb[41].mxu0 }
0x2196   :  { %v11087_v26 = vadd.f32 %v11086_v21, %v11085_v15 }
0x2198   :  { %v4133_v27 = vadd.f32 %v11087_v26, %v10646_v51  ;;  %v11088_v18 = vpop.f32.mrb[42].mxu0 }
0x2199   :  { %v11089_v55 = vpop.f32.mrb[43].mxu0 }
0x219a   :  { %v11090_v28 = vadd.f32 %v11089_v55, %v11088_v18  ;;  %v4141_v29 = vadd.f32 %v4133_v27, %v13911_v0 }
0x219c   :  { %v4138_v30 = vadd.f32 %v11090_v28, %v10646_v51  ;;  %v4145_v32 = vsel %vm365_vm0, %v4141_v29, 0.0  ;;  %v10651_v51 = vld [vmem:[%s15265_s3 + $0x20] ss:$0 sm:$0xff] }
0x219d   :  { %4146 = vadd.xlane.f32.xlu1 %v4145_v32 }
0x219e   :  { %v4142_v34 = vadd.f32 %v4138_v30, %v13908_v10  ;;  %v4183_v10 = vld [vmem:[%s15263_s1] sm:$0xff] }
0x219f   :  { %v12326_v43 = vpack.c.bf16 %v4184_v31, %v4183_v10 }
0x21a0   :  { %v4148_v35 = vsel %vm365_vm0, %v4142_v34, 0.0 }
0x21a1   :  { %4149 = vadd.xlane.f32.xlu0 %v4148_v35  ;;  %12327 = vmatpush3.bf16.msra.mxu1 %v12326_v43 }
0x21a2   :  { %12328 = vmatprep.subr.bf16.mxu1 %v12771_v45 }
0x21a5   :  { %12330 = vmatpush3.bf16.msra.mxu1 %v12329_v52 }
0x21a6   :  { %12331 = vmatprep.subr.bf16.mxu1 %v12771_v45 }
0x21a9   :  { %12333 = vmatpush3.bf16.msra.mxu1 %v12332_v58 }
0x21aa   :  { %12334 = vmatprep.subr.bf16.mxu1 %v12771_v45 }
0x21ad   :  { %12336 = vmatpush3.bf16.msra.mxu1 %v12335_v50 }
0x21ae   :  { %12337 = vmatprep.subr.bf16.mxu1 %v12771_v45 }
0x222a   :  { %v4147_v36 = vpop.xlane.xlu1 %4146 }
0x222b   :  { %v4151_v49 = vmul.f32 0.015625, %v4147_v36 }
0x222d   :  { %v4153_v33 = vsub.f32 %v4141_v29, %v4151_v49 }
0x222e   :  { %v4150_v37 = vpop.xlane.xlu0 %4149 }
0x222f   :  { %v4152_v38 = vmul.f32 0.015625, %v4150_v37  ;;  %v4155_v39 = vmul.f32 %v4153_v33, %v4153_v33 }
0x2231   :  { %v4154_v40 = vsub.f32 %v4142_v34, %v4152_v38  ;;  %v4157_v41 = vsel %vm365_vm0, %v4155_v39, 0.0 }
0x2232   :  { %4158 = vadd.xlane.f32.xlu1 %v4157_v41 }
0x2233   :  { %v4156_v0 = vmul.f32 %v4154_v40, %v4154_v40 }
0x2235   :  { %v4160_v42 = vsel %vm365_vm0, %v4156_v0, 0.0 }
0x2236   :  { %4161 = vadd.xlane.f32.xlu0 %v4160_v42 }
0x22bf   :  { %v4159_v1 = vpop.xlane.xlu1 %4158 }
0x22c0   :  { %v4163_v2 = vmul.f32 0.015625, %v4159_v1 }
0x22c2   :  { %v4165_v3 = vadd.f32 1e-06, %v4163_v2 }
0x22c3   :  { %v4162_v11 = vpop.xlane.xlu0 %4161 }
0x22c4   :  { %12614 = vrsqrt.f32 %v4165_v3  ;;  %v4164_v4 = vmul.f32 0.015625, %v4162_v11 }
0x22c6   :  { %v4166_v53 = vadd.f32 1e-06, %v4164_v4 }
0x22c8   :  { %12616 = vrsqrt.f32 %v4166_v53 }
0x22ce   :  { %v12615_v5 = vpop.eup %12614 }
0x22cf   :  { %v4169_v57 = vmul.f32 %v12615_v5, %v4153_v33 }
0x22d1   :  { %v4175_v7 = vmul.f32 %v10647_v62, %v4169_v57 }
0x22d2   :  { %v12617_v63 = vpop.eup %12616 }
0x22d3   :  { %v4170_v6 = vmul.f32 %v12617_v63, %v4154_v40  ;;  %v4181_v14 = vadd.f32 %v10648_v8, %v4175_v7 }
0x22d5   :  { %v4176_v44 = vmul.f32 %v10647_v62, %v4170_v6 }
0x22d7   :  { %v4182_v13 = vadd.f32 %v10648_v8, %v4176_v44 }
0x22d9   :  { %v4198_v60 = vrot.slane %v4182_v13, 7 }
0x22db   :  { %v4200_v19 = vsel %vm4199_vm7, %v4198_v60, %v4181_v14 }
0x22dc   :  { %11542 = vmatmul.mubr.msk.f32.vlgmr.msra.gmra.mrb[60].mxu1 %vm365_vm0, %v4200_v19 }
0x22dd   :  { %12339 = vmatpush3.bf16.msra.mxu1 %v12338_v17  ;;  %11552 = vmatprep.mubr.msk.f32.mxu1 %vm12763_vm1, %v12762_v25 }
0x22de   :  { %12340 = vmatprep.subr.bf16.mxu1 %v12771_v45 }
0x22e1   :  { %12342 = vmatpush3.bf16.msra.mxu1 %v12341_v22 }
0x22e2   :  { %11555 = vmatprep.subr.mxu1 %v12762_v25 }
0x23af   :  { %v4269_v61 = vpop.f32.mrb[60].mxu1 }
0x23b0   :  { %v14158_v24 = vadd.f32 %v10649_v23, %v4269_v61  ;;  %v11543_v15 = vpop.f32.mrb[61].mxu1 }
0x23b2   :  { %11553 = vmatmul.mubr.msk.f32.vlgmr.msra.gmra.mrb[62].mxu1 %vm1869_vm6, %v14158_v24 }
0x23b3   :  { %11557 = vmatprep.mubr.msk.f32.mxu1 %vm12763_vm1, %v12762_v25 }
0x2485   :  { %v4356_v21 = vpop.f32.mrb[62].mxu1 }
0x2486   :  { %v14167_v26 = vadd.f32 %v10651_v51, %v4356_v21  ;;  %v11554_v27 = vpop.f32.mrb[63].mxu1  ;;  %v4278_v51 = vld [vmem:[%s15263_s1 + $0x48] sm:$0xff]  ;;  %v4279_v21 = vld [vmem:[%s15263_s1 + $0x50] sm:$0xff] }
0x2487   :  { %v4280_v27 = vld [vmem:[%s15263_s1 + $0x58] sm:$0xff] }
0x2488   :  { %4361 = vrot.lane.b32.xlu0 %v14167_v26, %s12768_s15 }
0x248c   :  { %4530 = vrot.lane.b32.xlu0 %v14167_v26, %s12772_s25 }
0x2490   :  { %4696 = vrot.lane.b32.xlu0 %v14167_v26, %s12770_s17 }
0x2494   :  { %4862 = vrot.lane.b32.xlu0 %v14167_v26, %s12773_s26 }
0x24fa   :  { %v4362_v18 = vpop.permute.xlu0 %4361 }
0x24fb   :  { %11556 = vmatpush3.xpose.msk.msra.mxu1 %vm676_vm4, %v4362_v18  ;;  %v4281_v18 = vld [vmem:[%s15263_s1 + $0x60] sm:$0xff] }
0x24fc   :  { %11560 = vmatprep.subr.mxu1 %v12762_v25 }
0x24fe   :  { %11558 = vmatmul.mubr.msk.f32.vlgmr.msra.gmra.mrb[64].mxu1 %vm676_vm4, %v14167_v26  ;;  %v4531_v38 = vpop.permute.xlu0 %4530 }
0x24ff   :  { %11562 = vmatprep.mubr.msk.f32.mxu1 %vm12763_vm1, %v12762_v25 }
0x2502   :  { %v4697_v41 = vpop.permute.xlu0 %4696 }
0x2506   :  { %v4863_v42 = vpop.permute.xlu0 %4862 }
0x25d1   :  { %v4433_v55 = vpop.f32.mrb[64].mxu1 }
0x25d2   :  { %v11559_v28 = vpop.f32.mrb[65].mxu1  ;;  %v4438_v29 = vsel %vm4437_vm8, %v4433_v55, -inf }
0x25d3   :  { %4439 = vmax.xlane.f32.xlu1 %v4438_v29 }
0x25e4   :  { %4449 = vrot.lane.b32.xlu1 %v14167_v26, %s12764_s11 }
0x25e8   :  { %4528 = vrot.lane.b32.xlu1 %v14167_v26, %s12774_s27 }
0x2660   :  { %v4440_v30 = vpop.xlane.xlu1 %4439 }
0x2661   :  { %v4441_v32 = vsub.f32 %v4433_v55, %v4440_v30  ;;  %v12347_v55 = vpack.c.bf16 %v4281_v18, %v4280_v27 }
0x2663   :  { %v4442_v34 = vmul.f32 1.442695, %v4441_v32 }
0x2664   :  { %v4450_v35 = vpop.permute.xlu1 %4449 }
0x2665   :  { %12618 = vpow2.f32 %v4442_v34  ;;  %11561 = vmatpush3.msk.msra.mxu1 %vm4455_vm9, %v4450_v35 }
0x2666   :  { %11565 = vmatprep.subr.mxu1 %v12762_v25 }
0x2668   :  { %v4529_v33 = vpop.permute.xlu1 %4528 }
0x266f   :  { %v12619_v36 = vpop.eup %12618 }
0x2670   :  { %v4444_v49 = vsel %vm4437_vm8, %v12619_v36, 0.0 }
0x2671   :  { %4445 = vadd.xlane.f32.xlu1 %v4444_v49 }
0x2682   :  { %4694 = vrot.lane.b32.xlu1 %v14167_v26, %s12766_s13 }
0x2686   :  { %4860 = vrot.lane.b32.xlu1 %v14167_v26, %s12775_s28 }
0x26fe   :  { %v4446_v37 = vpop.xlane.xlu1 %4445 }
0x26ff   :  { %12620 = vrcp.f32 %v4446_v37 }
0x2702   :  { %v4695_v0 = vpop.permute.xlu1 %4694 }
0x2706   :  { %v4861_v10 = vpop.permute.xlu1 %4860 }
0x2709   :  { %v12621_v39 = vpop.eup %12620 }
0x270a   :  { %v4448_v40 = vmul.f32 %v12621_v39, %v12619_v36 }
0x270c   :  { %11563 = vmatmul.mubr.msk.f32.vlgmr.msra.gmra.mrb[66].mxu1 %vm4451_vm10, %v4448_v40  ;;  %v10669_v40 = vld [vmem:[%s15263_s1 + $0x68] ss:$0 sm:$0xff] }
0x270d   :  { %11566 = vmatpush3.xpose.msk.msra.mxu1 %vm676_vm4, %v4531_v38  ;;  %11567 = vmatprep.mubr.msk.f32.mxu1 %vm12763_vm1, %v12762_v25 }
0x270e   :  { %11575 = vmatprep.subr.mxu1 %v12762_v25 }
0x2710   :  { %11568 = vmatmul.mubr.msk.f32.vlgmr.msra.gmra.mrb[68].mxu1 %vm676_vm4, %v4529_v33 }
0x2711   :  { %11576 = vmatpush3.xpose.msk.msra.mxu1 %vm676_vm4, %v4697_v41  ;;  %11577 = vmatprep.mubr.msk.f32.mxu1 %vm12763_vm1, %v12762_v25 }
0x2712   :  { %11585 = vmatprep.subr.mxu1 %v12762_v25 }
0x2714   :  { %11578 = vmatmul.mubr.msk.f32.vlgmr.msra.gmra.mrb[70].mxu1 %vm676_vm4, %v4695_v0 }
0x2715   :  { %11586 = vmatpush3.xpose.msk.msra.mxu1 %vm676_vm4, %v4863_v42  ;;  %11587 = vmatprep.mubr.msk.f32.mxu1 %vm12763_vm1, %v12762_v25 }
0x2716   :  { %12343 = vmatprep.subr.bf16.mxu1 %v12771_v45 }
0x2718   :  { %11588 = vmatmul.mubr.msk.f32.vlgmr.msra.gmra.mrb[72].mxu1 %vm676_vm4, %v4861_v10 }
0x2719   :  { %11603 = vmatprep.mubr.msk.f32.mxu1 %vm12763_vm1, %v12762_v25 }
0x27df   :  { %v14213_v31 = vpop.f32.mrb[66].mxu1 }
0x27e0   :  { %v11564_v43 = vpop.f32.mrb[67].mxu1 }
0x27e3   :  { %v4602_v46 = vpop.f32.mrb[68].mxu1 }
0x27e4   :  { %v11569_v47 = vpop.f32.mrb[69].mxu1  ;;  %v4606_v52 = vsel %vm4437_vm8, %v4602_v46, -inf }
0x27e5   :  { %4607 = vmax.xlane.f32.xlu0 %v4606_v52 }
0x27e7   :  { %v4768_v54 = vpop.f32.mrb[70].mxu1 }
0x27e8   :  { %v11579_v16 = vpop.f32.mrb[71].mxu1  ;;  %v4772_v56 = vsel %vm4437_vm8, %v4768_v54, -inf }
0x27e9   :  { %4773 = vmax.xlane.f32.xlu1 %v4772_v56  ;;  %v5147_v16 = vld [vmem:[%s15264_s2 + $0x5f8] sm:$0xff]  ;;  %v5148_v56 = vld [vmem:[%s15264_s2 + $0x600] sm:$0xff] }
0x27eb   :  { %v4934_v58 = vpop.f32.mrb[72].mxu1 }
0x27ec   :  { %v11589_v59 = vpop.f32.mrb[73].mxu1  ;;  %v4938_v50 = vsel %vm4437_vm8, %v4934_v58, -inf }
0x27ed   :  { %4939 = vmax.xlane.f32.xlu0 %v4938_v50  ;;  %v5149_v59 = vld [vmem:[%s15264_s2 + $0x608] sm:$0xff]  ;;  %v5150_v50 = vld [vmem:[%s15264_s2 + $0x610] sm:$0xff] }
0x27fa   :  { %4783 = vrot.lane.b32.xlu1 %v14167_v26, %s12765_s12 }
0x2872   :  { %v4608_v1 = vpop.xlane.xlu0 %4607 }
0x2873   :  { %v4609_v2 = vsub.f32 %v4602_v46, %v4608_v1  ;;  %v12353_v1 = vpack.c.bf16 %v5150_v50, %v5149_v59 }
0x2875   :  { %v4610_v3 = vmul.f32 1.442695, %v4609_v2  ;;  %v5230_v2 = vld [vmem:[%s15263_s1 + $0x80] sm:$0xff] }
0x2876   :  { %v4774_v11 = vpop.xlane.xlu1 %4773 }
0x2877   :  { %12622 = vpow2.f32 %v4610_v3  ;;  %v4775_v4 = vsub.f32 %v4768_v54, %v4774_v11  ;;  %v5231_v3 = vld [vmem:[%s15263_s1 + $0x88] sm:$0xff]  ;;  %v5232_v11 = vld [vmem:[%s15263_s1 + $0x90] sm:$0xff] }
0x2879   :  { %v4776_v53 = vmul.f32 1.442695, %v4775_v4  ;;  %v12356_v4 = vpack.c.bf16 %v5231_v3, %v5230_v2 }
0x287a   :  { %v4940_v5 = vpop.xlane.xlu0 %4939  ;;  %v4784_v13 = vpop.permute.xlu1 %4783 }
0x287b   :  { %12624 = vpow2.f32 %v4776_v53  ;;  %v4941_v57 = vsub.f32 %v4934_v58, %v4940_v5  ;;  %v12350_v58 = vpack.c.bf16 %v5148_v56, %v5147_v16  ;;  %v5233_v53 = vld [vmem:[%s15263_s1 + $0x98] sm:$0xff] }
0x287c   :  { %v12359_v5 = vpack.c.bf16 %v5233_v53, %v5232_v11 }
0x287d   :  { %v4942_v63 = vmul.f32 1.442695, %v4941_v57  ;;  %v5234_v57 = vld [vmem:[%s15263_s1 + $0xa0] sm:$0xff] }
0x287f   :  { %12626 = vpow2.f32 %v4942_v63  ;;  %v5235_v63 = vld [vmem:[%s15263_s1 + $0xa8] sm:$0xff] }
0x2881   :  { %v12623_v62 = vpop.eup %12622 }
0x2882   :  { %v4612_v6 = vsel %vm4437_vm8, %v12623_v62, 0.0 }
0x2883   :  { %4613 = vadd.xlane.f32.xlu0 %v4612_v6 }
0x2885   :  { %v12625_v7 = vpop.eup %12624 }
0x2886   :  { %v4778_v44 = vsel %vm4437_vm8, %v12625_v7, 0.0 }
0x2887   :  { %4779 = vadd.xlane.f32.xlu0 %v4778_v44 }
0x2889   :  { %v12627_v8 = vpop.eup %12626 }
0x288a   :  { %v4944_v48 = vsel %vm4437_vm8, %v12627_v8, 0.0 }
0x288b   :  { %4945 = vadd.xlane.f32.xlu1 %v4944_v48  ;;  %v10671_v48 = vld [vmem:[%s15263_s1 + $0x70] ss:$0 sm:$0xff] }
0x289c   :  { %4949 = vrot.lane.b32.xlu1 %v14167_v26, %s12776_s29 }
0x289d   :  { %4617 = vrot.lane.b32.xlu0 %v14167_v26, %s12777_s30  ;;  %v12344_v26 = vpack.c.bf16 %v4279_v21, %v4278_v51  ;;  %v10675_v51 = vld [vmem:[%s15263_s1 + $0xc0] ss:$0 sm:$0xff] }
0x289f   :  { %12345 = vmatpush3.bf16.msra.mxu1 %v12344_v26 }
0x28a0   :  { %12346 = vmatprep.subr.bf16.mxu1 %v12771_v45 }
0x28a3   :  { %12348 = vmatpush3.bf16.msra.mxu1 %v12347_v55 }
0x28a4   :  { %12355 = vmatprep.subr.bf16.mxu1 %v12771_v45 }
0x2910   :  { %v4614_v9 = vpop.xlane.xlu0 %4613 }
0x2911   :  { %12628 = vrcp.f32 %v4614_v9 }
0x2914   :  { %v4780_v14 = vpop.xlane.xlu0 %4779 }
0x2915   :  { %12630 = vrcp.f32 %v4780_v14 }
0x2918   :  { %v4946_v60 = vpop.xlane.xlu1 %4945  ;;  %v4618_v17 = vpop.permute.xlu0 %4617 }
0x2919   :  { %12632 = vrcp.f32 %v4946_v60  ;;  %11571 = vmatpush3.msk.msra.mxu0 %vm4455_vm9, %v4618_v17  ;;  %v5236_v17 = vld [vmem:[%s15263_s1 + $0xb0] sm:$0xff] }
0x291a   :  { %11580 = vmatprep.subr.mxu0 %v12762_v25 }
0x291b   :  { %v12629_v19 = vpop.eup %12628 }
0x291c   :  { %v4616_v20 = vmul.f32 %v12629_v19, %v12623_v62  ;;  %v4950_v23 = vpop.permute.xlu1 %4949  ;;  %v12362_v62 = vpack.c.bf16 %v5235_v63, %v5234_v57  ;;  %v5237_v19 = vld [vmem:[%s15263_s1 + $0xb8] sm:$0xff] }
0x291e   :  { %11573 = vmatmul.mubr.msk.f32.vlgmr.msra.gmra.mrb[44].mxu0 %vm4451_vm10, %v4616_v20  ;;  %v12365_v20 = vpack.c.bf16 %v5237_v19, %v5236_v17 }
0x291f   :  { %v12631_v12 = vpop.eup %12630  ;;  %11581 = vmatpush3.msk.msra.mxu0 %vm4455_vm9, %v4784_v13  ;;  %11582 = vmatprep.mubr.msk.f32.mxu0 %vm12763_vm1, %v12762_v25  ;;  %v10672_v13 = vld [vmem:[%s15263_s1 + $0x78] ss:$0 sm:$0xff] }
0x2920   :  { %11590 = vmatprep.subr.mxu0 %v12762_v25  ;;  %v4782_v22 = vmul.f32 %v12631_v12, %v12625_v7  ;;  %v10673_v12 = vld [vmem:[%s15264_s2 + $0x618] ss:$0 sm:$0xff] }
0x2922   :  { %11583 = vmatmul.mubr.msk.f32.vlgmr.msra.gmra.mrb[46].mxu0 %vm4451_vm10, %v4782_v22 }
0x2923   :  { %v12633_v61 = vpop.eup %12632  ;;  %11591 = vmatpush3.msk.msra.mxu0 %vm4455_vm9, %v4950_v23  ;;  %11592 = vmatprep.mubr.msk.f32.mxu0 %vm12763_vm1, %v12762_v25 }
0x2924   :  { %v4948_v15 = vmul.f32 %v12633_v61, %v12627_v8  ;;  %12349 = vmatprep.subr.bf16.mxu0 %v12771_v45 }
0x2926   :  { %11593 = vmatmul.mubr.msk.f32.vlgmr.msra.gmra.mrb[48].mxu0 %vm4451_vm10, %v4948_v15 }
0x2927   :  { %11614 = vmatprep.mubr.msk.f32.mxu0 %vm12763_vm1, %v12762_v25  ;;  %12351 = vmatpush3.bf16.msra.mxu0 %v12350_v58 }
0x2928   :  { %12352 = vmatprep.subr.bf16.mxu0 %v12771_v45 }
0x292b   :  { %12354 = vmatpush3.bf16.msra.mxu0 %v12353_v1 }
0x292c   :  { %12367 = vmatprep.subr.bf16.mxu0 %v12771_v45 }
0x29f1   :  { %v4690_v28 = vpop.f32.mrb[44].mxu0 }
0x29f2   :  { %5027 = vrot.lane.b32.xlu1 %v4690_v28, %s12778_s19  ;;  %v11574_v29 = vpop.f32.mrb[45].mxu0 }
0x29f5   :  { %v4856_v30 = vpop.f32.mrb[46].mxu0 }
0x29f6   :  { %5031 = vrot.lane.b32.xlu0 %v4856_v30, %s12769_s16  ;;  %v11584_v32 = vpop.f32.mrb[47].mxu0 }
0x29f9   :  { %v5022_v34 = vpop.f32.mrb[48].mxu0 }
0x29fa   :  { %5035 = vrot.lane.b32.xlu1 %v5022_v34, %s12779_s20  ;;  %v11594_v35 = vpop.f32.mrb[49].mxu0 }
0x29fb   :  { %v5342_v35 = vld [vmem:[%s15265_s3 + $0x28] sm:$0xff] }
0x2a64   :  { %v5028_v36 = vpop.permute.xlu1 %5027 }
0x2a65   :  { %v5038_v33 = vsel %vm676_vm4, %v14213_v31, %v5028_v36  ;;  %v5343_v36 = vld [vmem:[%s15265_s3 + $0x30] sm:$0xff] }
0x2a68   :  { %v5032_v49 = vpop.permute.xlu0 %5031 }
0x2a69   :  { %v5039_v37 = vsel %vm520_vm2, %v5038_v33, %v5032_v49  ;;  %v12368_v49 = vpack.c.bf16 %v5343_v36, %v5342_v35  ;;  %v5344_v33 = vld [vmem:[%s15265_s3 + $0x38] sm:$0xff] }
0x2a6c   :  { %v5036_v38 = vpop.permute.xlu1 %5035 }
0x2a6d   :  { %v5041_v39 = vsel %vm5040_vm11, %v5039_v37, %v5036_v38  ;;  %v5345_v37 = vld [vmem:[%s15265_s3 + $0x40] sm:$0xff] }
0x2a6e   :  { %11604 = vmatmul.mubr.msk.f32.vlgmr.msra.gmra.mrb[74].mxu1 %vm1869_vm6, %v5041_v39  ;;  %v12371_v38 = vpack.c.bf16 %v5345_v37, %v5344_v33 }
0x2a6f   :  { %11633 = vmatprep.mubr.msk.f32.mxu1 %vm12763_vm1, %v12762_v25  ;;  %12357 = vmatpush3.bf16.msra.mxu1 %v12356_v4 }
0x2a70   :  { %12358 = vmatprep.subr.bf16.mxu1 %v12771_v45 }
0x2a73   :  { %12360 = vmatpush3.bf16.msra.mxu1 %v12359_v5 }
0x2a74   :  { %12361 = vmatprep.subr.bf16.mxu1 %v12771_v45 }
0x2a77   :  { %12363 = vmatpush3.bf16.msra.mxu1 %v12362_v62 }
0x2a78   :  { %12364 = vmatprep.subr.bf16.mxu1 %v12771_v45 }
0x2a7b   :  { %12366 = vmatpush3.bf16.msra.mxu1 %v12365_v20 }
0x2a7c   :  { %11657 = vmatprep.subr.mxu1 %v12762_v25 }
0x2b41   :  { %v5115_v41 = vpop.f32.mrb[74].mxu1 }
0x2b42   :  { %v5116_v0 = vadd.f32 %v10669_v40, %v5115_v41  ;;  %v11605_v42 = vpop.f32.mrb[75].mxu1 }
0x2b43   :  { %v10677_v42 = vld [vmem:[%s15263_s1 + $0xc8] ss:$0 sm:$0xff] }
0x2b44   :  { %v5119_v10 = vadd.f32 %v5116_v0, %v14158_v24 }
0x2b46   :  { %v5123_v31 = vsel %vm5122_vm12, %v5119_v10, 0.0 }
0x2b47   :  { %5124 = vadd.xlane.f32.xlu0 %v5123_v31  ;;  %v10678_v31 = vld [vmem:[%s15263_s1 + $0xd0] ss:$0 sm:$0xff] }
0x2bd4   :  { %v5125_v43 = vpop.xlane.xlu0 %5124 }
0x2bd5   :  { %v5127_v46 = vmul.f32 0.03125, %v5125_v43 }
0x2bd7   :  { %v5128_v47 = vsub.f32 %v5119_v10, %v5127_v46 }
0x2bd9   :  { %v5129_v52 = vmul.f32 %v5128_v47, %v5128_v47 }
0x2bdb   :  { %v5130_v54 = vsel %vm5122_vm12, %v5129_v52, 0.0 }
0x2bdc   :  { %5131 = vadd.xlane.f32.xlu1 %v5130_v54 }
0x2c69   :  { %v5132_v6 = vpop.xlane.xlu1 %5131 }
0x2c6a   :  { %v5133_v7 = vmul.f32 0.03125, %v5132_v6 }
0x2c6c   :  { %v5134_v44 = vadd.f32 1e-05, %v5133_v7 }
0x2c6e   :  { %12634 = vrsqrt.f32 %v5134_v44 }
0x2c78   :  { %v12635_v8 = vpop.eup %12634 }
0x2c79   :  { %v5136_v9 = vmul.f32 %v12635_v8, %v5128_v47  ;;  %v10679_v47 = vld [vmem:[%s15265_s3 + $0x48] ss:$0 sm:$0xff] }
0x2c7b   :  { %v5141_v14 = vmul.f32 %v10671_v48, %v5136_v9 }
0x2c7d   :  { %v5146_v60 = vadd.f32 %v10672_v13, %v5141_v14 }
0x2c7f   :  { %11615 = vmatmul.mubr.msk.f32.vlgmr.msra.gmra.mrb[50].mxu0 %vm1869_vm6, %v5146_v60 }
0x2c80   :  { %11644 = vmatprep.mubr.msk.f32.mxu0 %vm12763_vm1, %v12762_v25  ;;  %12369 = vmatpush3.bf16.msra.mxu0 %v12368_v49 }
0x2c81   :  { %12370 = vmatprep.subr.bf16.mxu0 %v12771_v45 }
0x2c84   :  { %12372 = vmatpush3.bf16.msra.mxu0 %v12371_v38 }
0x2c85   :  { %11647 = vmatprep.subr.mxu0 %v12762_v25 }
0x2d52   :  { %v5225_v22 = vpop.f32.mrb[50].mxu0 }
0x2d53   :  { %v5226_v23 = vadd.f32 %v10673_v12, %v5225_v22  ;;  %v11616_v61 = vpop.f32.mrb[51].mxu0 }
0x2d55   :  { %v5229_v15 = vmax.f32 %v5226_v23, 0.0 }
0x2d57   :  { %11634 = vmatmul.mubr.msk.f32.vlgmr.msra.gmra.mrb[76].mxu1 %vm365_vm0, %v5229_v15 }
0x2d58   :  { %11659 = vmatprep.mubr.msk.f32.mxu1 %vm12763_vm1, %v12762_v25 }
0x2e2a   :  { %v5312_v21 = vpop.f32.mrb[76].mxu1 }
0x2e2b   :  { %v5313_v26 = vadd.f32 %v10675_v51, %v5312_v21  ;;  %v11635_v27 = vpop.f32.mrb[77].mxu1 }
0x2e2d   :  { %v5316_v18 = vadd.f32 %v5313_v26, %v5146_v60 }
0x2e2f   :  { %v5319_v55 = vsel %vm5122_vm12, %v5316_v18, 0.0 }
0x2e30   :  { %5320 = vadd.xlane.f32.xlu0 %v5319_v55 }
0x2ebd   :  { %v5321_v28 = vpop.xlane.xlu0 %5320 }
0x2ebe   :  { %v5322_v29 = vmul.f32 0.03125, %v5321_v28 }
0x2ec0   :  { %v5323_v30 = vsub.f32 %v5316_v18, %v5322_v29 }
0x2ec2   :  { %v5324_v32 = vmul.f32 %v5323_v30, %v5323_v30 }
0x2ec4   :  { %v5325_v34 = vsel %vm5122_vm12, %v5324_v32, 0.0 }
0x2ec5   :  { %5326 = vadd.xlane.f32.xlu0 %v5325_v34 }
0x2f52   :  { %v5327_v39 = vpop.xlane.xlu0 %5326 }
0x2f53   :  { %v5328_v40 = vmul.f32 0.03125, %v5327_v39 }
0x2f55   :  { %v5329_v41 = vadd.f32 1e-05, %v5328_v40 }
0x2f57   :  { %12636 = vrsqrt.f32 %v5329_v41 }
0x2f61   :  { %v12637_v0 = vpop.eup %12636 }
0x2f62   :  { %v5331_v10 = vmul.f32 %v12637_v0, %v5323_v30 }
0x2f64   :  { %v5336_v43 = vmul.f32 %v10677_v42, %v5331_v10 }
0x2f66   :  { %v14354_v46 = vadd.f32 %v10678_v31, %v5336_v43  ;;  %v5347_v43 = vld [vmem:[%s15263_s1 + $0xd8] sm:$0xff] }
0x2f68   :  { %11645 = vmatmul.mubr.msk.f32.vlgmr.msra.gmra.mrb[52].mxu0 %vm1869_vm6, %v14354_v46 }
0x2f69   :  { %11649 = vmatprep.mubr.msk.f32.mxu0 %vm12763_vm1, %v12762_v25 }
0x303b   :  { %v5425_v52 = vpop.f32.mrb[52].mxu0 }
0x303c   :  { %v14363_v54 = vadd.f32 %v10679_v47, %v5425_v52  ;;  %v11646_v16 = vpop.f32.mrb[53].mxu0  ;;  %v5348_v47 = vld [vmem:[%s15263_s1 + $0xe0] sm:$0xff] }
0x303d   :  { %v12374_v52 = vpack.c.bf16 %v5348_v47, %v5347_v43  ;;  %v5350_v16 = vld [vmem:[%s15263_s1 + $0xf0] sm:$0xff]  ;;  %v6299_v43 = vld [vmem:[%s15263_s1 + $0x140] sm:$0xff]  ;;  %v6300_v47 = vld [vmem:[%s15263_s1 + $0x148] sm:$0xff] }
0x303e   :  { %5596 = vrot.lane.b32.xlu1 %v14363_v54, %s12772_s25  ;;  %5430 = vrot.lane.b32.xlu0 %v14363_v54, %s12768_s15 }
0x3042   :  { %5594 = vrot.lane.b32.xlu1 %v14363_v54, %s12774_s27  ;;  %5760 = vrot.lane.b32.xlu0 %v14363_v54, %s12766_s13 }
0x3046   :  { %5762 = vrot.lane.b32.xlu1 %v14363_v54, %s12770_s17  ;;  %5926 = vrot.lane.b32.xlu0 %v14363_v54, %s12775_s28 }
0x304a   :  { %5928 = vrot.lane.b32.xlu1 %v14363_v54, %s12773_s26 }
0x30b0   :  { %v5597_v56 = vpop.permute.xlu1 %5596  ;;  %v5431_v58 = vpop.permute.xlu0 %5430 }
0x30b1   :  { %11648 = vmatpush3.xpose.msk.msra.mxu0 %vm676_vm4, %v5431_v58  ;;  %11658 = vmatpush3.xpose.msk.msra.mxu1 %vm676_vm4, %v5597_v56 }
0x30b2   :  { %11667 = vmatprep.subr.mxu1 %v12762_v25  ;;  %11652 = vmatprep.subr.mxu0 %v12762_v25 }
0x30b4   :  { %v5595_v59 = vpop.permute.xlu1 %5594  ;;  %11650 = vmatmul.mubr.msk.f32.vlgmr.msra.gmra.mrb[54].mxu0 %vm676_vm4, %v14363_v54  ;;  %v5761_v1 = vpop.permute.xlu0 %5760 }
0x30b5   :  { %11660 = vmatmul.mubr.msk.f32.vlgmr.msra.gmra.mrb[78].mxu1 %vm676_vm4, %v5595_v59  ;;  %11654 = vmatprep.mubr.msk.f32.mxu0 %vm12763_vm1, %v12762_v25 }
0x30b6   :  { %11669 = vmatprep.mubr.msk.f32.mxu1 %vm12763_vm1, %v12762_v25 }
0x30b8   :  { %v5763_v50 = vpop.permute.xlu1 %5762  ;;  %v5927_v3 = vpop.permute.xlu0 %5926 }
0x30b9   :  { %11668 = vmatpush3.xpose.msk.msra.mxu1 %vm676_vm4, %v5763_v50 }
0x30ba   :  { %11677 = vmatprep.subr.mxu1 %v12762_v25 }
0x30bc   :  { %v5929_v2 = vpop.permute.xlu1 %5928  ;;  %11670 = vmatmul.mubr.msk.f32.vlgmr.msra.gmra.mrb[80].mxu1 %vm676_vm4, %v5761_v1 }
0x30bd   :  { %11678 = vmatpush3.xpose.msk.msra.mxu1 %vm676_vm4, %v5929_v2  ;;  %11679 = vmatprep.mubr.msk.f32.mxu1 %vm12763_vm1, %v12762_v25 }
0x30be   :  { %12373 = vmatprep.subr.bf16.mxu1 %v12771_v45 }
0x30c0   :  { %11680 = vmatmul.mubr.msk.f32.vlgmr.msra.gmra.mrb[82].mxu1 %vm676_vm4, %v5927_v3 }
0x30c1   :  { %11695 = vmatprep.mubr.msk.f32.mxu1 %vm12763_vm1, %v12762_v25  ;;  %12375 = vmatpush3.bf16.msra.mxu1 %v12374_v52  ;;  %v12395_v52 = vpack.c.bf16 %v6300_v47, %v6299_v43 }
0x30c2   :  { %12376 = vmatprep.subr.bf16.mxu1 %v12771_v45 }
0x3187   :  { %v5502_v11 = vpop.f32.mrb[54].mxu0 }
0x3188   :  { %v11651_v4 = vpop.f32.mrb[55].mxu0  ;;  %v5668_v53 = vpop.f32.mrb[78].mxu1  ;;  %v5506_v5 = vsel %vm4437_vm8, %v5502_v11, -inf }
0x3189   :  { %5507 = vmax.xlane.f32.xlu1 %v5506_v5  ;;  %v11661_v57 = vpop.f32.mrb[79].mxu1  ;;  %v5672_v63 = vsel %vm4437_vm8, %v5668_v53, -inf }
0x318a   :  { %5673 = vmax.xlane.f32.xlu0 %v5672_v63 }
0x318f   :  { %v5834_v62 = vpop.f32.mrb[80].mxu1 }
0x3190   :  { %v11671_v6 = vpop.f32.mrb[81].mxu1  ;;  %v5838_v7 = vsel %vm4437_vm8, %v5834_v62, -inf }
0x3191   :  { %5839 = vmax.xlane.f32.xlu0 %v5838_v7  ;;  %v10697_v7 = vld [vmem:[%s15263_s1 + $0xf8] ss:$0 sm:$0xff] }
0x3193   :  { %v6000_v44 = vpop.f32.mrb[82].mxu1 }
0x3194   :  { %v11681_v8 = vpop.f32.mrb[83].mxu1  ;;  %v6004_v48 = vsel %vm4437_vm8, %v6000_v44, -inf }
0x3195   :  { %6005 = vmax.xlane.f32.xlu0 %v6004_v48 }
0x319a   :  { %5517 = vrot.lane.b32.xlu1 %v14363_v54, %s12764_s11 }
0x3216   :  { %v5508_v9 = vpop.xlane.xlu1 %5507 }
0x3217   :  { %v5509_v13 = vsub.f32 %v5502_v11, %v5508_v9  ;;  %v5674_v14 = vpop.xlane.xlu0 %5673 }
0x3218   :  { %v5675_v60 = vsub.f32 %v5668_v53, %v5674_v14 }
0x3219   :  { %v5510_v17 = vmul.f32 1.442695, %v5509_v13 }
0x321a   :  { %v5676_v19 = vmul.f32 1.442695, %v5675_v60  ;;  %v5518_v20 = vpop.permute.xlu1 %5517 }
0x321b   :  { %12638 = vpow2.f32 %v5510_v17  ;;  %11653 = vmatpush3.msk.msra.mxu0 %vm4455_vm9, %v5518_v20 }
0x321c   :  { %12640 = vpow2.f32 %v5676_v19  ;;  %11662 = vmatprep.subr.mxu0 %v12762_v25 }
0x321e   :  { %v5840_v12 = vpop.xlane.xlu0 %5839 }
0x321f   :  { %v5841_v22 = vsub.f32 %v5834_v62, %v5840_v12  ;;  %v6210_v12 = vld [vmem:[%s15264_s2 + $0x620] sm:$0xff] }
0x3221   :  { %v5842_v23 = vmul.f32 1.442695, %v5841_v22  ;;  %v6211_v22 = vld [vmem:[%s15264_s2 + $0x628] sm:$0xff] }
0x3222   :  { %v6006_v61 = vpop.xlane.xlu0 %6005 }
0x3223   :  { %12642 = vpow2.f32 %v5842_v23  ;;  %v6007_v15 = vsub.f32 %v6000_v44, %v6006_v61  ;;  %v12380_v23 = vpack.c.bf16 %v6211_v22, %v6210_v12  ;;  %v6213_v61 = vld [vmem:[%s15264_s2 + $0x638] sm:$0xff] }
0x3225   :  { %v12639_v51 = vpop.eup %12638  ;;  %v6008_v21 = vmul.f32 1.442695, %v6007_v15 }
0x3226   :  { %v12641_v26 = vpop.eup %12640  ;;  %v5512_v27 = vsel %vm4437_vm8, %v12639_v51, 0.0 }
0x3227   :  { %12644 = vpow2.f32 %v6008_v21  ;;  %5513 = vadd.xlane.f32.xlu1 %v5512_v27  ;;  %v5678_v18 = vsel %vm4437_vm8, %v12641_v26, 0.0  ;;  %v6294_v21 = vld [vmem:[%s15263_s1 + $0x118] sm:$0xff] }
0x3228   :  { %5679 = vadd.xlane.f32.xlu0 %v5678_v18  ;;  %v6296_v18 = vld [vmem:[%s15263_s1 + $0x128] sm:$0xff] }
0x322d   :  { %v12643_v55 = vpop.eup %12642 }
0x322e   :  { %v5844_v28 = vsel %vm4437_vm8, %v12643_v55, 0.0 }
0x322f   :  { %5845 = vadd.xlane.f32.xlu1 %v5844_v28  ;;  %v6297_v28 = vld [vmem:[%s15263_s1 + $0x130] sm:$0xff] }
0x3231   :  { %v12645_v29 = vpop.eup %12644 }
0x3232   :  { %v6010_v30 = vsel %vm4437_vm8, %v12645_v29, 0.0 }
0x3233   :  { %6011 = vadd.xlane.f32.xlu0 %v6010_v30 }
0x3240   :  { %5849 = vrot.lane.b32.xlu1 %v14363_v54, %s12765_s12 }
0x3244   :  { %6015 = vrot.lane.b32.xlu1 %v14363_v54, %s12776_s29 }
0x3249   :  { %5683 = vrot.lane.b32.xlu0 %v14363_v54, %s12777_s30  ;;  %v5349_v54 = vld [vmem:[%s15263_s1 + $0xe8] sm:$0xff] }
0x324a   :  { %v12377_v56 = vpack.c.bf16 %v5350_v16, %v5349_v54  ;;  %v10701_v54 = vld [vmem:[%s15264_s2 + $0x640] ss:$0 sm:$0xff] }
0x324c   :  { %12378 = vmatpush3.bf16.msra.mxu1 %v12377_v56 }
0x324d   :  { %12385 = vmatprep.subr.bf16.mxu1 %v12771_v45 }
0x32b4   :  { %v5514_v32 = vpop.xlane.xlu1 %5513 }
0x32b5   :  { %12646 = vrcp.f32 %v5514_v32  ;;  %v5680_v34 = vpop.xlane.xlu0 %5679 }
0x32b6   :  { %12648 = vrcp.f32 %v5680_v34 }
0x32bc   :  { %v5846_v35 = vpop.xlane.xlu1 %5845 }
0x32bd   :  { %12650 = vrcp.f32 %v5846_v35 }
0x32bf   :  { %v12647_v36 = vpop.eup %12646 }
0x32c0   :  { %v6012_v49 = vpop.xlane.xlu0 %6011  ;;  %v5516_v33 = vmul.f32 %v12647_v36, %v12639_v51  ;;  %v12649_v37 = vpop.eup %12648  ;;  %v6293_v51 = vld [vmem:[%s15263_s1 + $0x110] sm:$0xff] }
0x32c1   :  { %12652 = vrcp.f32 %v6012_v49  ;;  %v5850_v38 = vpop.permute.xlu1 %5849  ;;  %v5682_v40 = vmul.f32 %v12649_v37, %v12641_v26  ;;  %v6295_v26 = vld [vmem:[%s15263_s1 + $0x120] sm:$0xff]  ;;  %v12386_v27 = vpack.c.bf16 %v6294_v21, %v6293_v51  ;;  %v6430_v37 = vld [vmem:[%s15265_s3 + $0x50] sm:$0xff] }
0x32c2   :  { %11655 = vmatmul.mubr.msk.f32.vlgmr.msra.gmra.mrb[56].mxu0 %vm4451_vm10, %v5516_v33  ;;  %v10699_v49 = vld [vmem:[%s15263_s1 + $0x100] ss:$0 sm:$0xff] }
0x32c3   :  { %11664 = vmatprep.mubr.msk.f32.mxu0 %vm12763_vm1, %v12762_v25 }
0x32c4   :  { %v5684_v39 = vpop.permute.xlu0 %5683 }
0x32c5   :  { %11663 = vmatpush3.msk.msra.mxu0 %vm4455_vm9, %v5684_v39  ;;  %v6016_v42 = vpop.permute.xlu1 %6015  ;;  %v10700_v39 = vld [vmem:[%s15263_s1 + $0x108] ss:$0 sm:$0xff] }
0x32c6   :  { %11665 = vmatmul.mubr.msk.f32.vlgmr.msra.gmra.mrb[58].mxu0 %vm4451_vm10, %v5682_v40  ;;  %11672 = vmatprep.subr.mxu0 %v12762_v25 }
0x32c7   :  { %v12651_v41 = vpop.eup %12650  ;;  %11673 = vmatpush3.msk.msra.mxu0 %vm4455_vm9, %v5850_v38  ;;  %11674 = vmatprep.mubr.msk.f32.mxu0 %vm12763_vm1, %v12762_v25  ;;  %v6431_v38 = vld [vmem:[%s15265_s3 + $0x58] sm:$0xff] }
0x32c8   :  { %11682 = vmatprep.subr.mxu0 %v12762_v25  ;;  %v5848_v0 = vmul.f32 %v12651_v41, %v12643_v55  ;;  %v12389_v55 = vpack.c.bf16 %v6296_v18, %v6295_v26  ;;  %v12398_v41 = vpack.c.bf16 %v6431_v38, %v6430_v37 }
0x32ca   :  { %11675 = vmatmul.mubr.msk.f32.vlgmr.msra.gmra.mrb[60].mxu0 %vm4451_vm10, %v5848_v0 }
0x32cb   :  { %v12653_v10 = vpop.eup %12652  ;;  %11683 = vmatpush3.msk.msra.mxu0 %vm4455_vm9, %v6016_v42  ;;  %11684 = vmatprep.mubr.msk.f32.mxu0 %vm12763_vm1, %v12762_v25  ;;  %v6432_v42 = vld [vmem:[%s15265_s3 + $0x60] sm:$0xff] }
0x32cc   :  { %v6014_v31 = vmul.f32 %v12653_v10, %v12645_v29  ;;  %12379 = vmatprep.subr.bf16.mxu0 %v12771_v45  ;;  %v6298_v29 = vld [vmem:[%s15263_s1 + $0x138] sm:$0xff]  ;;  %v6433_v10 = vld [vmem:[%s15265_s3 + $0x68] sm:$0xff] }
0x32cd   :  { %v12392_v30 = vpack.c.bf16 %v6298_v29, %v6297_v28 }
0x32ce   :  { %11685 = vmatmul.mubr.msk.f32.vlgmr.msra.gmra.mrb[62].mxu0 %vm4451_vm10, %v6014_v31  ;;  %v12401_v31 = vpack.c.bf16 %v6433_v10, %v6432_v42 }
0x32cf   :  { %11706 = vmatprep.mubr.msk.f32.mxu0 %vm12763_vm1, %v12762_v25  ;;  %12381 = vmatpush3.bf16.msra.mxu0 %v12380_v23 }
0x32d0   :  { %12382 = vmatprep.subr.bf16.mxu0 %v12771_v45 }
0x3395   :  { %v5590_v58 = vpop.f32.mrb[56].mxu0 }
0x3396   :  { %v11656_v59 = vpop.f32.mrb[57].mxu0 }
0x3399   :  { %v5756_v50 = vpop.f32.mrb[58].mxu0 }
0x339a   :  { %6093 = vrot.lane.b32.xlu1 %v5756_v50, %s12778_s19  ;;  %v11666_v1 = vpop.f32.mrb[59].mxu0  ;;  %v10709_v50 = vld [vmem:[%s15265_s3 + $0x70] ss:$0 sm:$0xff] }
0x339d   :  { %v5922_v2 = vpop.f32.mrb[60].mxu0 }
0x339e   :  { %6097 = vrot.lane.b32.xlu0 %v5922_v2, %s12769_s16  ;;  %v11676_v3 = vpop.f32.mrb[61].mxu0 }
0x33a1   :  { %v6088_v11 = vpop.f32.mrb[62].mxu0 }
0x33a2   :  { %6101 = vrot.lane.b32.xlu1 %v6088_v11, %s12779_s20  ;;  %v11686_v4 = vpop.f32.mrb[63].mxu0 }
0x340c   :  { %v6094_v53 = vpop.permute.xlu1 %6093 }
0x340d   :  { %v6104_v57 = vsel %vm676_vm4, %v5590_v58, %v6094_v53 }
0x3410   :  { %v6098_v5 = vpop.permute.xlu0 %6097 }
0x3411   :  { %v6105_v63 = vsel %vm520_vm2, %v6104_v57, %v6098_v5 }
0x3414   :  { %v6102_v62 = vpop.permute.xlu1 %6101 }
0x3415   :  { %v6106_v6 = vsel %vm5040_vm11, %v6105_v63, %v6102_v62 }
0x3416   :  { %11696 = vmatmul.mubr.msk.f32.vlgmr.msra.gmra.mrb[84].mxu1 %vm1869_vm6, %v6106_v6 }
0x3417   :  { %11725 = vmatprep.mubr.msk.f32.mxu1 %vm12763_vm1, %v12762_v25  ;;  %12387 = vmatpush3.bf16.msra.mxu1 %v12386_v27 }
0x3418   :  { %12388 = vmatprep.subr.bf16.mxu1 %v12771_v45 }
0x341b   :  { %12390 = vmatpush3.bf16.msra.mxu1 %v12389_v55 }
0x341c   :  { %12391 = vmatprep.subr.bf16.mxu1 %v12771_v45 }
0x341f   :  { %12393 = vmatpush3.bf16.msra.mxu1 %v12392_v30 }
0x3420   :  { %12394 = vmatprep.subr.bf16.mxu1 %v12771_v45 }
0x3423   :  { %12396 = vmatpush3.bf16.msra.mxu1 %v12395_v52 }
0x3424   :  { %11749 = vmatprep.subr.mxu1 %v12762_v25 }
0x34e9   :  { %v6180_v44 = vpop.f32.mrb[84].mxu1 }
0x34ea   :  { %v6181_v8 = vadd.f32 %v10697_v7, %v6180_v44  ;;  %v11697_v48 = vpop.f32.mrb[85].mxu1 }
0x34ec   :  { %v6184_v9 = vadd.f32 %v6181_v8, %v14354_v46  ;;  %v6212_v46 = vld [vmem:[%s15264_s2 + $0x630] sm:$0xff] }
0x34ed   :  { %v12383_v15 = vpack.c.bf16 %v6213_v61, %v6212_v46 }
0x34ee   :  { %v6187_v13 = vsel %vm5122_vm12, %v6184_v9, 0.0 }
0x34ef   :  { %6188 = vadd.xlane.f32.xlu0 %v6187_v13  ;;  %12384 = vmatpush3.bf16.msra.mxu0 %v12383_v15 }
0x34f0   :  { %12397 = vmatprep.subr.bf16.mxu0 %v12771_v45 }
0x357c   :  { %v6189_v14 = vpop.xlane.xlu0 %6188 }
0x357d   :  { %v6190_v60 = vmul.f32 0.03125, %v6189_v14 }
0x357f   :  { %v6191_v17 = vsub.f32 %v6184_v9, %v6190_v60 }
0x3581   :  { %v6192_v19 = vmul.f32 %v6191_v17, %v6191_v17 }
0x3583   :  { %v6193_v20 = vsel %vm5122_vm12, %v6192_v19, 0.0 }
0x3584   :  { %6194 = vadd.xlane.f32.xlu1 %v6193_v20 }
0x3611   :  { %v6195_v32 = vpop.xlane.xlu1 %6194 }
0x3612   :  { %v6196_v34 = vmul.f32 0.03125, %v6195_v32 }
0x3614   :  { %v6197_v35 = vadd.f32 1e-05, %v6196_v34 }
0x3616   :  { %12654 = vrsqrt.f32 %v6197_v35 }
0x3620   :  { %v12655_v36 = vpop.eup %12654 }
0x3621   :  { %v6199_v33 = vmul.f32 %v12655_v36, %v6191_v17 }
0x3623   :  { %v6204_v40 = vmul.f32 %v10699_v49, %v6199_v33 }
0x3625   :  { %v14512_v0 = vadd.f32 %v10700_v39, %v6204_v40 }
0x3627   :  { %11707 = vmatmul.mubr.msk.f32.vlgmr.msra.gmra.mrb[64].mxu0 %vm1869_vm6, %v14512_v0 }
0x3628   :  { %12399 = vmatpush3.bf16.msra.mxu0 %v12398_v41  ;;  %11736 = vmatprep.mubr.msk.f32.mxu0 %vm12763_vm1, %v12762_v25 }
0x3629   :  { %12400 = vmatprep.subr.bf16.mxu0 %v12771_v45 }
0x362c   :  { %12402 = vmatpush3.bf16.msra.mxu0 %v12401_v31 }
0x362d   :  { %11739 = vmatprep.subr.mxu0 %v12762_v25 }
0x362f   :  { %11737 = vmatmul.mubr.msk.f32.vlgmr.msra.gmra.mrb[66].mxu0 %vm1869_vm6, %v14158_v24 }
0x3630   :  { %11741 = vmatprep.mubr.msk.f32.mxu0 %vm12763_vm1, %v12762_v25 }
0x36fa   :  { %v6288_v16 = vpop.f32.mrb[64].mxu0 }
0x36fb   :  { %v6289_v56 = vadd.f32 %v10701_v54, %v6288_v16  ;;  %v11708_v58 = vpop.f32.mrb[65].mxu0 }
0x36fd   :  { %v6292_v59 = vmax.f32 %v6289_v56, 0.0 }
0x36ff   :  { %11726 = vmatmul.mubr.msk.f32.vlgmr.msra.gmra.mrb[86].mxu1 %vm365_vm0, %v6292_v59 }
0x3700   :  { %11751 = vmatprep.mubr.msk.f32.mxu1 %vm12763_vm1, %v12762_v25 }
0x3702   :  { %v6510_v1 = vpop.f32.mrb[66].mxu0 }
0x3703   :  { %v14546_v2 = vadd.f32 %v10709_v50, %v6510_v1  ;;  %v11738_v3 = vpop.f32.mrb[67].mxu0  ;;  %v6435_v1 = vld [vmem:[%s15263_s1 + $0x168] sm:$0xff] }
0x3705   :  { %6681 = vrot.lane.b32.xlu1 %v14546_v2, %s12772_s25  ;;  %6515 = vrot.lane.b32.xlu0 %v14546_v2, %s12768_s15 }
0x3709   :  { %6847 = vrot.lane.b32.xlu1 %v14546_v2, %s12770_s17  ;;  %6679 = vrot.lane.b32.xlu0 %v14546_v2, %s12774_s27 }
0x370d   :  { %7013 = vrot.lane.b32.xlu1 %v14546_v2, %s12773_s26  ;;  %6845 = vrot.lane.b32.xlu0 %v14546_v2, %s12766_s13 }
0x3711   :  { %7011 = vrot.lane.b32.xlu0 %v14546_v2, %s12775_s28 }
0x3777   :  { %v6682_v11 = vpop.permute.xlu1 %6681  ;;  %v6516_v4 = vpop.permute.xlu0 %6515 }
0x3778   :  { %11740 = vmatpush3.xpose.msk.msra.mxu0 %vm676_vm4, %v6516_v4  ;;  %11750 = vmatpush3.xpose.msk.msra.mxu1 %vm676_vm4, %v6682_v11  ;;  %v6437_v11 = vld [vmem:[%s15263_s1 + $0x178] sm:$0xff]  ;;  %v6438_v4 = vld [vmem:[%s15263_s1 + $0x180] sm:$0xff] }
0x3779   :  { %11759 = vmatprep.subr.mxu1 %v12762_v25  ;;  %11744 = vmatprep.subr.mxu0 %v12762_v25 }
0x377b   :  { %v6848_v53 = vpop.permute.xlu1 %6847  ;;  %11742 = vmatmul.mubr.msk.f32.vlgmr.msra.gmra.mrb[68].mxu0 %vm676_vm4, %v14546_v2  ;;  %v6680_v5 = vpop.permute.xlu0 %6679 }
0x377c   :  { %11752 = vmatmul.mubr.msk.f32.vlgmr.msra.gmra.mrb[88].mxu1 %vm676_vm4, %v6680_v5  ;;  %11746 = vmatprep.mubr.msk.f32.mxu0 %vm12763_vm1, %v12762_v25 }
0x377d   :  { %11760 = vmatpush3.xpose.msk.msra.mxu1 %vm676_vm4, %v6848_v53  ;;  %11761 = vmatprep.mubr.msk.f32.mxu1 %vm12763_vm1, %v12762_v25  ;;  %v12407_v53 = vpack.c.bf16 %v6438_v4, %v6437_v11  ;;  %v7298_v11 = vld [vmem:[%s15263_s1 + $0x1b8] sm:$0xff] }
0x377e   :  { %11769 = vmatprep.subr.mxu1 %v12762_v25 }
0x377f   :  { %v7014_v57 = vpop.permute.xlu1 %7013  ;;  %v6846_v63 = vpop.permute.xlu0 %6845 }
0x3780   :  { %11762 = vmatmul.mubr.msk.f32.vlgmr.msra.gmra.mrb[90].mxu1 %vm676_vm4, %v6846_v63 }
0x3781   :  { %11770 = vmatpush3.xpose.msk.msra.mxu1 %vm676_vm4, %v7014_v57  ;;  %11771 = vmatprep.mubr.msk.f32.mxu1 %vm12763_vm1, %v12762_v25 }
0x3782   :  { %12403 = vmatprep.subr.bf16.mxu1 %v12771_v45 }
0x3783   :  { %v7012_v62 = vpop.permute.xlu0 %7011 }
0x3784   :  { %11772 = vmatmul.mubr.msk.f32.vlgmr.msra.gmra.mrb[92].mxu1 %vm676_vm4, %v7012_v62 }
0x3785   :  { %11787 = vmatprep.mubr.msk.f32.mxu1 %vm12763_vm1, %v12762_v25 }
0x37d2   :  { %v14583_v6 = vpop.f32.mrb[86].mxu1 }
0x37d3   :  { %v11727_v7 = vpop.f32.mrb[87].mxu1 }
0x384e   :  { %v6587_v44 = vpop.f32.mrb[68].mxu0 }
0x384f   :  { %v11743_v8 = vpop.f32.mrb[69].mxu0  ;;  %v6753_v48 = vpop.f32.mrb[88].mxu1  ;;  %v6591_v9 = vsel %vm4437_vm8, %v6587_v44, -inf }
0x3850   :  { %6592 = vmax.xlane.f32.xlu1 %v6591_v9  ;;  %v11753_v13 = vpop.f32.mrb[89].mxu1  ;;  %v6757_v14 = vsel %vm4437_vm8, %v6753_v48, -inf  ;;  %v10703_v9 = vld [vmem:[%s15263_s1 + $0x150] ss:$0 sm:$0xff] }
0x3851   :  { %6758 = vmax.xlane.f32.xlu0 %v6757_v14  ;;  %v6376_v13 = vadd.f32 %v10703_v9, %v14583_v6  ;;  %v10708_v9 = vld [vmem:[%s15263_s1 + $0x350] ss:$0 sm:$0xff] }
0x3853   :  { %v6919_v60 = vpop.f32.mrb[90].mxu1  ;;  %v6379_v14 = vadd.f32 %v6376_v13, %v14512_v0 }
0x3854   :  { %v11763_v17 = vpop.f32.mrb[91].mxu1  ;;  %v6923_v19 = vsel %vm4437_vm8, %v6919_v60, -inf }
0x3855   :  { %6924 = vmax.xlane.f32.xlu0 %v6923_v19 }
0x3857   :  { %v7085_v20 = vpop.f32.mrb[92].mxu1 }
0x3858   :  { %v11773_v12 = vpop.f32.mrb[93].mxu1  ;;  %v7089_v22 = vsel %vm4437_vm8, %v7085_v20, -inf }
0x3859   :  { %7090 = vmax.xlane.f32.xlu0 %v7089_v22 }
0x3861   :  { %6602 = vrot.lane.b32.xlu1 %v14546_v2, %s12764_s11 }
0x38dd   :  { %v6593_v23 = vpop.xlane.xlu1 %6592 }
0x38de   :  { %v6594_v46 = vsub.f32 %v6587_v44, %v6593_v23  ;;  %v6759_v61 = vpop.xlane.xlu0 %6758 }
0x38df   :  { %v6760_v15 = vsub.f32 %v6753_v48, %v6759_v61 }
0x38e0   :  { %v6595_v51 = vmul.f32 1.442695, %v6594_v46 }
0x38e1   :  { %v6761_v21 = vmul.f32 1.442695, %v6760_v15  ;;  %v6603_v26 = vpop.permute.xlu1 %6602 }
0x38e2   :  { %12656 = vpow2.f32 %v6595_v51  ;;  %11745 = vmatpush3.msk.msra.mxu0 %vm4455_vm9, %v6603_v26  ;;  %v6925_v27 = vpop.xlane.xlu0 %6924 }
0x38e3   :  { %12658 = vpow2.f32 %v6761_v21  ;;  %v6926_v18 = vsub.f32 %v6919_v60, %v6925_v27  ;;  %11754 = vmatprep.subr.mxu0 %v12762_v25  ;;  %v6382_v60 = vsel %vm5122_vm12, %v6379_v14, 0.0 }
0x38e5   :  { %v6927_v55 = vmul.f32 1.442695, %v6926_v18 }
0x38e6   :  { %v7091_v28 = vpop.xlane.xlu0 %7090 }
0x38e7   :  { %12660 = vpow2.f32 %v6927_v55  ;;  %v7092_v29 = vsub.f32 %v7085_v20, %v7091_v28  ;;  %v10727_v28 = vld [vmem:[%s15263_s1 + $0x188] ss:$0 sm:$0xff] }
0x38e9   :  { %v7093_v30 = vmul.f32 1.442695, %v7092_v29  ;;  %v10705_v29 = vld [vmem:[%s15263_s1 + $0x158] ss:$0 sm:$0xff] }
0x38eb   :  { %12662 = vpow2.f32 %v7093_v30 }
0x38ec   :  { %v12657_v32 = vpop.eup %12656 }
0x38ed   :  { %v12659_v34 = vpop.eup %12658  ;;  %v6597_v35 = vsel %vm4437_vm8, %v12657_v32, 0.0 }
0x38ee   :  { %6598 = vadd.xlane.f32.xlu1 %v6597_v35  ;;  %v6763_v36 = vsel %vm4437_vm8, %v12659_v34, 0.0 }
0x38ef   :  { %6764 = vadd.xlane.f32.xlu0 %v6763_v36 }
0x38f1   :  { %v12661_v49 = vpop.eup %12660 }
0x38f2   :  { %v6929_v33 = vsel %vm4437_vm8, %v12661_v49, 0.0 }
0x38f3   :  { %6930 = vadd.xlane.f32.xlu1 %v6929_v33 }
0x38f5   :  { %v12663_v37 = vpop.eup %12662 }
0x38f6   :  { %v7095_v38 = vsel %vm4437_vm8, %v12663_v37, 0.0 }
0x38f7   :  { %7096 = vadd.xlane.f32.xlu0 %v7095_v38 }
0x3904   :  { %6934 = vrot.lane.b32.xlu1 %v14546_v2, %s12765_s12 }
0x3908   :  { %7100 = vrot.lane.b32.xlu1 %v14546_v2, %s12776_s29 }
0x390d   :  { %6768 = vrot.lane.b32.xlu0 %v14546_v2, %s12777_s30  ;;  %v6436_v2 = vld [vmem:[%s15263_s1 + $0x170] sm:$0xff] }
0x390e   :  { %v12404_v3 = vpack.c.bf16 %v6436_v2, %v6435_v1  ;;  %v7303_v1 = vld [vmem:[%s15264_s2 + $0x660] sm:$0xff] }
0x3910   :  { %12405 = vmatpush3.bf16.msra.mxu1 %v12404_v3  ;;  %v7297_v3 = vld [vmem:[%s15263_s1 + $0x1b0] sm:$0xff] }
0x3911   :  { %12406 = vmatprep.subr.bf16.mxu1 %v12771_v45  ;;  %v12413_v4 = vpack.c.bf16 %v7298_v11, %v7297_v3 }
0x3914   :  { %12408 = vmatpush3.bf16.msra.mxu1 %v12407_v53 }
0x3915   :  { %12415 = vmatprep.subr.bf16.mxu1 %v12771_v45 }
0x397b   :  { %v6599_v39 = vpop.xlane.xlu1 %6598 }
0x397c   :  { %12664 = vrcp.f32 %v6599_v39  ;;  %v6765_v40 = vpop.xlane.xlu0 %6764 }
0x397d   :  { %12666 = vrcp.f32 %v6765_v40 }
0x3980   :  { %v6931_v41 = vpop.xlane.xlu1 %6930 }
0x3981   :  { %12668 = vrcp.f32 %v6931_v41 }
0x3984   :  { %v7097_v42 = vpop.xlane.xlu0 %7096  ;;  %v6935_v54 = vpop.permute.xlu1 %6934 }
0x3985   :  { %12670 = vrcp.f32 %v7097_v42 }
0x3986   :  { %v12665_v10 = vpop.eup %12664 }
0x3987   :  { %v6601_v31 = vmul.f32 %v12665_v10, %v12657_v32  ;;  %v12667_v43 = vpop.eup %12666  ;;  %v10706_v32 = vld [vmem:[%s15263_s1 + $0x160] ss:$0 sm:$0xff] }
0x3988   :  { %v6769_v47 = vpop.permute.xlu0 %6768  ;;  %v6767_v52 = vmul.f32 %v12667_v43, %v12659_v34  ;;  %v7101_v59 = vpop.permute.xlu1 %7100 }
0x3989   :  { %11747 = vmatmul.mubr.msk.f32.vlgmr.msra.gmra.mrb[70].mxu0 %vm4451_vm10, %v6601_v31 }
0x398a   :  { %11755 = vmatpush3.msk.msra.mxu0 %vm4455_vm9, %v6769_v47  ;;  %11756 = vmatprep.mubr.msk.f32.mxu0 %vm12763_vm1, %v12762_v25 }
0x398b   :  { %11764 = vmatprep.subr.mxu0 %v12762_v25  ;;  %v12669_v16 = vpop.eup %12668 }
0x398c   :  { %v6933_v56 = vmul.f32 %v12669_v16, %v12661_v49 }
0x398d   :  { %11757 = vmatmul.mubr.msk.f32.vlgmr.msra.gmra.mrb[72].mxu0 %vm4451_vm10, %v6767_v52 }
0x398e   :  { %11765 = vmatpush3.msk.msra.mxu0 %vm4455_vm9, %v6935_v54  ;;  %11766 = vmatprep.mubr.msk.f32.mxu0 %vm12763_vm1, %v12762_v25  ;;  %v7301_v54 = vld [vmem:[%s15264_s2 + $0x650] sm:$0xff] }
0x398f   :  { %11774 = vmatprep.subr.mxu0 %v12762_v25  ;;  %v12671_v58 = vpop.eup %12670 }
0x3990   :  { %v7099_v50 = vmul.f32 %v12671_v58, %v12663_v37  ;;  %v7296_v58 = vld [vmem:[%s15263_s1 + $0x1a8] sm:$0xff] }
0x3991   :  { %11767 = vmatmul.mubr.msk.f32.vlgmr.msra.gmra.mrb[74].mxu0 %vm4451_vm10, %v6933_v56  ;;  %v7295_v56 = vld [vmem:[%s15263_s1 + $0x1a0] sm:$0xff] }
0x3992   :  { %11775 = vmatpush3.msk.msra.mxu0 %vm4455_vm9, %v7101_v59  ;;  %11776 = vmatprep.mubr.msk.f32.mxu0 %vm12763_vm1, %v12762_v25  ;;  %v7302_v59 = vld [vmem:[%s15264_s2 + $0x658] sm:$0xff] }
0x3993   :  { %12409 = vmatprep.subr.bf16.mxu0 %v12771_v45  ;;  %v12419_v2 = vpack.c.bf16 %v7303_v1, %v7302_v59 }
0x3995   :  { %11777 = vmatmul.mubr.msk.f32.vlgmr.msra.gmra.mrb[76].mxu0 %vm4451_vm10, %v7099_v50  ;;  %v12410_v50 = vpack.c.bf16 %v7296_v58, %v7295_v56 }
0x3996   :  { %11798 = vmatprep.mubr.msk.f32.mxu0 %vm12763_vm1, %v12762_v25 }
0x3997   :  { %12411 = vmatpush3.bf16.msra.mxu0 %v12410_v50 }
0x3998   :  { %12412 = vmatprep.subr.bf16.mxu0 %v12771_v45 }
0x399b   :  { %12414 = vmatpush3.bf16.msra.mxu0 %v12413_v4 }
0x399c   :  { %11812 = vmatprep.subr.mxu0 %v12762_v25 }
0x3a5c   :  { %v6675_v5 = vpop.f32.mrb[70].mxu0 }
0x3a5d   :  { %v11748_v57 = vpop.f32.mrb[71].mxu0 }
0x3a60   :  { %v6841_v63 = vpop.f32.mrb[72].mxu0 }
0x3a61   :  { %7178 = vrot.lane.b32.xlu1 %v6841_v63, %s12778_s19  ;;  %v11758_v62 = vpop.f32.mrb[73].mxu0 }
0x3a64   :  { %v7007_v7 = vpop.f32.mrb[74].mxu0 }
0x3a65   :  { %7182 = vrot.lane.b32.xlu0 %v7007_v7, %s12769_s16  ;;  %v11768_v44 = vpop.f32.mrb[75].mxu0 }
0x3a68   :  { %v7173_v8 = vpop.f32.mrb[76].mxu0 }
0x3a69   :  { %7186 = vrot.lane.b32.xlu1 %v7173_v8, %s12779_s20  ;;  %v11778_v48 = vpop.f32.mrb[77].mxu0  ;;  %v10707_v8 = vld [vmem:[%s15263_s1 + $0x348] ss:$0 sm:$0xff] }
0x3a84   :  { %6383 = vadd.xlane.f32.xlu0 %v6382_v60  ;;  %v10729_v60 = vld [vmem:[%s15263_s1 + $0x190] ss:$0 sm:$0xff] }
0x3ad3   :  { %v7179_v17 = vpop.permute.xlu1 %7178 }
0x3ad4   :  { %v7189_v20 = vsel %vm676_vm4, %v6675_v5, %v7179_v17 }
0x3ad7   :  { %v7183_v19 = vpop.permute.xlu0 %7182 }
0x3ad8   :  { %v7190_v12 = vsel %vm520_vm2, %v7189_v20, %v7183_v19  ;;  %v10730_v20 = vld [vmem:[%s15263_s1 + $0x198] ss:$0 sm:$0xff] }
0x3adb   :  { %v7187_v22 = vpop.permute.xlu1 %7186 }
0x3adc   :  { %v7191_v23 = vsel %vm5040_vm11, %v7190_v12, %v7187_v22 }
0x3add   :  { %11788 = vmatmul.mubr.msk.f32.vlgmr.msra.gmra.mrb[94].mxu1 %vm1869_vm6, %v7191_v23  ;;  %v10733_v23 = vld [vmem:[%s15264_s2 + $0x668] ss:$0 sm:$0xff] }
0x3ade   :  { %11809 = vmatprep.mubr.msk.f32.mxu1 %vm12763_vm1, %v12762_v25 }
0x3b11   :  { %v6384_v6 = vpop.xlane.xlu0 %6383 }
0x3b12   :  { %v6385_v46 = vmul.f32 0.03125, %v6384_v6 }
0x3b14   :  { %v6386_v0 = vsub.f32 %v6379_v14, %v6385_v46 }
0x3b16   :  { %v6387_v61 = vmul.f32 %v6386_v0, %v6386_v0 }
0x3b18   :  { %v6388_v15 = vsel %vm5122_vm12, %v6387_v61, 0.0  ;;  %v10731_v61 = vld [vmem:[%s15263_s1 + $0x1c0] ss:$0 sm:$0xff] }
0x3b19   :  { %6389 = vadd.xlane.f32.xlu1 %v6388_v15 }
0x3ba6   :  { %v6390_v51 = vpop.xlane.xlu1 %6389 }
0x3ba7   :  { %v6391_v21 = vmul.f32 0.03125, %v6390_v51 }
0x3ba9   :  { %v6392_v26 = vadd.f32 1e-05, %v6391_v21 }
0x3bab   :  { %12672 = vrsqrt.f32 %v6392_v26 }
0x3bb0   :  { %v7265_v27 = vpop.f32.mrb[94].mxu1 }
0x3bb1   :  { %v11789_v18 = vpop.f32.mrb[95].mxu1  ;;  %v7266_v34 = vadd.f32 %v10727_v28, %v7265_v27 }
0x3bb3   :  { %v7269_v49 = vadd.f32 %v7266_v34, %v14158_v24  ;;  %v7300_v24 = vld [vmem:[%s15264_s2 + $0x648] sm:$0xff] }
0x3bb4   :  { %v12416_v16 = vpack.c.bf16 %v7301_v54, %v7300_v24 }
0x3bb5   :  { %v12673_v55 = vpop.eup %12672  ;;  %v7272_v37 = vsel %vm5122_vm12, %v7269_v49, 0.0 }
0x3bb6   :  { %v6394_v30 = vmul.f32 %v12673_v55, %v6386_v0  ;;  %12417 = vmatpush3.bf16.msra.mxu1 %v12416_v16 }
0x3bb7   :  { %12418 = vmatprep.subr.bf16.mxu1 %v12771_v45 }
0x3bb8   :  { %v6399_v35 = vmul.f32 %v10705_v29, %v6394_v30 }
0x3bba   :  { %v6404_v36 = vadd.f32 %v10706_v32, %v6399_v35  ;;  %12420 = vmatpush3.bf16.msra.mxu1 %v12419_v2 }
0x3bbb   :  { %11822 = vmatprep.subr.mxu1 %v12762_v25 }
0x3bbc   :  { %v6407_v33 = vsel %vm5122_vm12, %v6404_v36, 0.0 }
0x3bbd   :  { %6408 = vadd.xlane.f32.xlu0 %v6407_v33 }
0x3bc1   :  { %7273 = vadd.xlane.f32.xlu0 %v7272_v37 }
0x3c4a   :  { %v6409_v38 = vpop.xlane.xlu0 %6408 }
0x3c4b   :  { %v6410_v39 = vmul.f32 0.03125, %v6409_v38 }
0x3c4d   :  { %v6411_v40 = vsub.f32 %v6404_v36, %v6410_v39 }
0x3c4e   :  { %v7274_v41 = vpop.xlane.xlu0 %7273 }
0x3c4f   :  { %v7275_v42 = vmul.f32 0.03125, %v7274_v41  ;;  %v6412_v10 = vmul.f32 %v6411_v40, %v6411_v40 }
0x3c51   :  { %v7276_v31 = vsub.f32 %v7269_v49, %v7275_v42  ;;  %v6413_v43 = vsel %vm5122_vm12, %v6412_v10, 0.0 }
0x3c52   :  { %6414 = vadd.xlane.f32.xlu0 %v6413_v43 }
0x3c53   :  { %v7277_v47 = vmul.f32 %v7276_v31, %v7276_v31 }
0x3c55   :  { %v7278_v52 = vsel %vm5122_vm12, %v7277_v47, 0.0 }
0x3c56   :  { %7279 = vadd.xlane.f32.xlu1 %v7278_v52 }
0x3cdf   :  { %v6415_v53 = vpop.xlane.xlu0 %6414 }
0x3ce0   :  { %v6416_v5 = vmul.f32 0.03125, %v6415_v53 }
0x3ce2   :  { %v6417_v57 = vadd.f32 1e-05, %v6416_v5 }
0x3ce3   :  { %v7280_v63 = vpop.xlane.xlu1 %7279 }
0x3ce4   :  { %12674 = vrsqrt.f32 %v6417_v57  ;;  %v7281_v62 = vmul.f32 0.03125, %v7280_v63 }
0x3ce6   :  { %v7282_v7 = vadd.f32 1e-05, %v7281_v62 }
0x3ce8   :  { %12676 = vrsqrt.f32 %v7282_v7 }
0x3cee   :  { %v12675_v44 = vpop.eup %12674 }
0x3cef   :  { %v6419_v48 = vmul.f32 %v12675_v44, %v6411_v40 }
0x3cf1   :  { %v6424_v13 = vmul.f32 %v10707_v8, %v6419_v48 }
0x3cf2   :  { %v12677_v14 = vpop.eup %12676 }
0x3cf3   :  { %v7284_v17 = vmul.f32 %v12677_v14, %v7276_v31  ;;  %v14702_v19 = vadd.f32 %v10708_v9, %v6424_v13 }
0x3cf5   :  { %11810 = vmatmul.mubr.msk.f32.vlgmr.msra.gmra.mrb[96].mxu1 %vm1869_vm6, %v14702_v19  ;;  %v7289_v12 = vmul.f32 %v10729_v60, %v7284_v17 }
0x3cf6   :  { %11824 = vmatprep.mubr.msk.f32.mxu1 %vm12763_vm1, %v12762_v25 }
0x3cf7   :  { %v14711_v22 = vadd.f32 %v10730_v20, %v7289_v12 }
0x3cf9   :  { %11799 = vmatmul.mubr.msk.f32.vlgmr.msra.gmra.mrb[78].mxu0 %vm1869_vm6, %v14711_v22 }
0x3cfa   :  { %11814 = vmatprep.mubr.msk.f32.mxu0 %vm12763_vm1, %v12762_v25 }
0x3dc8   :  { %v7460_v6 = vpop.f32.mrb[96].mxu1 }
0x3dc9   :  { %v14720_v46 = vadd.f32 %v10733_v23, %v7460_v6  ;;  %v11811_v0 = vpop.f32.mrb[97].mxu1 }
0x3dca   :  { %v7306_v0 = vld [vmem:[%s15263_s1 + $0x1d0] sm:$0xff] }
0x3dcb   :  { %7796 = vrot.lane.b32.xlu1 %v14720_v46, %s12766_s13  ;;  %7630 = vrot.lane.b32.xlu0 %v14720_v46, %s12774_s27 }
0x3dcc   :  { %11813 = vmatpush3.xpose.msk.msra.mxu0 %vm676_vm4, %v14720_v46  ;;  %v7383_v15 = vpop.f32.mrb[78].mxu0 }
0x3dcd   :  { %v7384_v51 = vadd.f32 %v10731_v61, %v7383_v15  ;;  %v11800_v21 = vpop.f32.mrb[79].mxu0  ;;  %11817 = vmatprep.subr.mxu0 %v12762_v25  ;;  %v7307_v61 = vld [vmem:[%s15263_s1 + $0x1d8] sm:$0xff] }
0x3dcf   :  { %7628 = vrot.lane.b32.xlu1 %v7384_v51, %s12774_s27  ;;  %7962 = vrot.lane.b32.xlu0 %v14720_v46, %s12775_s28 }
0x3dd0   :  { %11815 = vmatmul.mubr.msk.f32.vlgmr.msra.gmra.mrb[80].mxu0 %vm676_vm4, %v7384_v51 }
0x3dd1   :  { %11819 = vmatprep.mubr.msk.f32.mxu0 %vm12763_vm1, %v12762_v25 }
0x3dd3   :  { %7794 = vrot.lane.b32.xlu1 %v7384_v51, %s12766_s13 }
0x3dd7   :  { %7960 = vrot.lane.b32.xlu1 %v7384_v51, %s12775_s28  ;;  %v7308_v51 = vld [vmem:[%s15263_s1 + $0x1e0] sm:$0xff] }
0x3dd8   :  { %v12425_v21 = vpack.c.bf16 %v7308_v51, %v7307_v61  ;;  %v10757_v61 = vld [vmem:[%s15263_s1 + $0x240] ss:$0 sm:$0xff] }
0x3e3d   :  { %v7797_v26 = vpop.permute.xlu1 %7796  ;;  %v7631_v27 = vpop.permute.xlu0 %7630 }
0x3e3e   :  { %11823 = vmatpush3.xpose.msk.msra.mxu1 %vm676_vm4, %v7631_v27 }
0x3e3f   :  { %11832 = vmatprep.subr.mxu1 %v12762_v25 }
0x3e41   :  { %v7629_v18 = vpop.permute.xlu1 %7628  ;;  %v7963_v28 = vpop.permute.xlu0 %7962 }
0x3e42   :  { %11825 = vmatmul.mubr.msk.f32.vlgmr.msra.gmra.mrb[98].mxu1 %vm676_vm4, %v7629_v18 }
0x3e43   :  { %11833 = vmatpush3.xpose.msk.msra.mxu1 %vm676_vm4, %v7797_v26  ;;  %11834 = vmatprep.mubr.msk.f32.mxu1 %vm12763_vm1, %v12762_v25 }
0x3e44   :  { %11842 = vmatprep.subr.mxu1 %v12762_v25 }
0x3e45   :  { %v7795_v55 = vpop.permute.xlu1 %7794 }
0x3e46   :  { %11835 = vmatmul.mubr.msk.f32.vlgmr.msra.gmra.mrb[100].mxu1 %vm676_vm4, %v7795_v55 }
0x3e47   :  { %11843 = vmatpush3.xpose.msk.msra.mxu1 %vm676_vm4, %v7963_v28  ;;  %11844 = vmatprep.mubr.msk.f32.mxu1 %vm12763_vm1, %v12762_v25 }
0x3e48   :  { %12421 = vmatprep.subr.bf16.mxu1 %v12771_v45 }
0x3e49   :  { %v7961_v29 = vpop.permute.xlu1 %7960 }
0x3e4a   :  { %11845 = vmatmul.mubr.msk.f32.vlgmr.msra.gmra.mrb[102].mxu1 %vm676_vm4, %v7961_v29 }
0x3e4b   :  { %11860 = vmatprep.mubr.msk.f32.mxu1 %vm12763_vm1, %v12762_v25 }
0x3ea3   :  { %v7536_v30 = vpop.f32.mrb[80].mxu0 }
0x3ea4   :  { %v11816_v32 = vpop.f32.mrb[81].mxu0  ;;  %v7540_v34 = vsel %vm4437_vm8, %v7536_v30, -inf }
0x3ea5   :  { %7541 = vmax.xlane.f32.xlu0 %v7540_v34 }
0x3f15   :  { %v7702_v35 = vpop.f32.mrb[98].mxu1 }
0x3f16   :  { %v11826_v36 = vpop.f32.mrb[99].mxu1  ;;  %v7706_v49 = vsel %vm4437_vm8, %v7702_v35, -inf }
0x3f17   :  { %7707 = vmax.xlane.f32.xlu1 %v7706_v49 }
0x3f19   :  { %v7868_v33 = vpop.f32.mrb[100].mxu1 }
0x3f1a   :  { %v11836_v37 = vpop.f32.mrb[101].mxu1  ;;  %v7872_v38 = vsel %vm4437_vm8, %v7868_v33, -inf }
0x3f1b   :  { %7873 = vmax.xlane.f32.xlu0 %v7872_v38  ;;  %v10751_v38 = vld [vmem:[%s15263_s1 + $0x1e8] ss:$0 sm:$0xff] }
0x3f1d   :  { %v8034_v39 = vpop.f32.mrb[102].mxu1 }
0x3f1e   :  { %v11846_v40 = vpop.f32.mrb[103].mxu1  ;;  %v8038_v41 = vsel %vm4437_vm8, %v8034_v39, -inf }
0x3f1f   :  { %8039 = vmax.xlane.f32.xlu0 %v8038_v41 }
0x3f32   :  { %v7542_v42 = vpop.xlane.xlu0 %7541 }
0x3f33   :  { %v7543_v10 = vsub.f32 %v7536_v30, %v7542_v42 }
0x3f35   :  { %v7544_v31 = vmul.f32 1.442695, %v7543_v10 }
0x3f37   :  { %12678 = vpow2.f32 %v7544_v31 }
0x3f41   :  { %v12679_v43 = vpop.eup %12678 }
0x3f42   :  { %v7546_v47 = vsel %vm4437_vm8, %v12679_v43, 0.0 }
0x3f43   :  { %7547 = vadd.xlane.f32.xlu0 %v7546_v47 }
0x3fa4   :  { %v7708_v52 = vpop.xlane.xlu1 %7707 }
0x3fa5   :  { %v7709_v24 = vsub.f32 %v7702_v35, %v7708_v52 }
0x3fa7   :  { %v7710_v54 = vmul.f32 1.442695, %v7709_v24 }
0x3fa8   :  { %v7874_v16 = vpop.xlane.xlu0 %7873 }
0x3fa9   :  { %12680 = vpow2.f32 %v7710_v54  ;;  %v7875_v56 = vsub.f32 %v7868_v33, %v7874_v16  ;;  %v8244_v54 = vld [vmem:[%s15264_s2 + $0x670] sm:$0xff]  ;;  %v8245_v16 = vld [vmem:[%s15264_s2 + $0x678] sm:$0xff] }
0x3fab   :  { %v7876_v58 = vmul.f32 1.442695, %v7875_v56  ;;  %v12428_v56 = vpack.c.bf16 %v8245_v16, %v8244_v54 }
0x3fac   :  { %v8040_v3 = vpop.xlane.xlu0 %8039 }
0x3fad   :  { %12682 = vpow2.f32 %v7876_v58  ;;  %v8041_v11 = vsub.f32 %v8034_v39, %v8040_v3  ;;  %v8247_v58 = vld [vmem:[%s15264_s2 + $0x688] sm:$0xff] }
0x3faf   :  { %v8042_v4 = vmul.f32 1.442695, %v8041_v11  ;;  %v8330_v11 = vld [vmem:[%s15263_s1 + $0x218] sm:$0xff] }
0x3fb1   :  { %12684 = vpow2.f32 %v8042_v4 }
0x3fb3   :  { %v12681_v59 = vpop.eup %12680 }
0x3fb4   :  { %v7712_v50 = vsel %vm4437_vm8, %v12681_v59, 0.0 }
0x3fb5   :  { %7713 = vadd.xlane.f32.xlu1 %v7712_v50  ;;  %v8327_v50 = vld [vmem:[%s15263_s1 + $0x200] sm:$0xff] }
0x3fb7   :  { %v12683_v1 = vpop.eup %12682 }
0x3fb8   :  { %v7878_v2 = vsel %vm4437_vm8, %v12683_v1, 0.0 }
0x3fb9   :  { %7879 = vadd.xlane.f32.xlu0 %v7878_v2  ;;  %v8329_v2 = vld [vmem:[%s15263_s1 + $0x210] sm:$0xff] }
0x3fba   :  { %v12437_v4 = vpack.c.bf16 %v8330_v11, %v8329_v2 }
0x3fbb   :  { %v12685_v53 = vpop.eup %12684 }
0x3fbc   :  { %v8044_v5 = vsel %vm4437_vm8, %v12685_v53, 0.0 }
0x3fc6   :  { %7717 = vrot.lane.b32.xlu1 %v14720_v46, %s12772_s25 }
0x3fca   :  { %7883 = vrot.lane.b32.xlu1 %v14720_v46, %s12770_s17 }
0x3fcf   :  { %7551 = vrot.lane.b32.xlu0 %v14720_v46, %s12768_s15 }
0x3fd0   :  { %v7548_v57 = vpop.xlane.xlu0 %7547 }
0x3fd1   :  { %12686 = vrcp.f32 %v7548_v57 }
0x3fdb   :  { %v12687_v7 = vpop.eup %12686 }
0x3fdc   :  { %v7550_v44 = vmul.f32 %v12687_v7, %v12679_v43 }
0x3fee   :  { %8045 = vadd.xlane.f32.xlu1 %v8044_v5  ;;  %v8332_v5 = vld [vmem:[%s15263_s1 + $0x228] sm:$0xff] }
0x3fff   :  { %8049 = vrot.lane.b32.xlu1 %v14720_v46, %s12773_s26  ;;  %v7305_v46 = vld [vmem:[%s15263_s1 + $0x1c8] sm:$0xff] }
0x4000   :  { %v12422_v15 = vpack.c.bf16 %v7306_v0, %v7305_v46 }
0x4002   :  { %12423 = vmatpush3.bf16.msra.mxu1 %v12422_v15 }
0x4003   :  { %12424 = vmatprep.subr.bf16.mxu1 %v12771_v45 }
0x4006   :  { %12426 = vmatpush3.bf16.msra.mxu1 %v12425_v21 }
0x4007   :  { %12433 = vmatprep.subr.bf16.mxu1 %v12771_v45 }
0x4042   :  { %v7714_v63 = vpop.xlane.xlu1 %7713 }
0x4043   :  { %12688 = vrcp.f32 %v7714_v63 }
0x4046   :  { %v7880_v62 = vpop.xlane.xlu0 %7879  ;;  %v7718_v8 = vpop.permute.xlu1 %7717 }
0x4047   :  { %12690 = vrcp.f32 %v7880_v62 }
0x404a   :  { %v7552_v48 = vpop.permute.xlu0 %7551  ;;  %v7884_v14 = vpop.permute.xlu1 %7883 }
0x404b   :  { %11818 = vmatpush3.msk.msra.mxu0 %vm4455_vm9, %v7552_v48 }
0x404c   :  { %11820 = vmatmul.mubr.msk.f32.vlgmr.msra.gmra.mrb[82].mxu0 %vm4451_vm10, %v7550_v44  ;;  %11827 = vmatprep.subr.mxu0 %v12762_v25 }
0x404d   :  { %v12689_v9 = vpop.eup %12688  ;;  %11828 = vmatpush3.msk.msra.mxu0 %vm4455_vm9, %v7718_v8  ;;  %11829 = vmatprep.mubr.msk.f32.mxu0 %vm12763_vm1, %v12762_v25  ;;  %v10753_v8 = vld [vmem:[%s15263_s1 + $0x1f0] ss:$0 sm:$0xff] }
0x404e   :  { %v7716_v13 = vmul.f32 %v12689_v9, %v12681_v59  ;;  %11837 = vmatprep.subr.mxu0 %v12762_v25  ;;  %v10754_v9 = vld [vmem:[%s15263_s1 + $0x1f8] ss:$0 sm:$0xff] }
0x4050   :  { %11830 = vmatmul.mubr.msk.f32.vlgmr.msra.gmra.mrb[84].mxu0 %vm4451_vm10, %v7716_v13 }
0x4051   :  { %v12691_v60 = vpop.eup %12690  ;;  %11838 = vmatpush3.msk.msra.mxu0 %vm4455_vm9, %v7884_v14  ;;  %11839 = vmatprep.mubr.msk.f32.mxu0 %vm12763_vm1, %v12762_v25 }
0x4052   :  { %v7882_v17 = vmul.f32 %v12691_v60, %v12683_v1  ;;  %11847 = vmatprep.subr.mxu0 %v12762_v25  ;;  %v8328_v1 = vld [vmem:[%s15263_s1 + $0x208] sm:$0xff]  ;;  %v8333_v60 = vld [vmem:[%s15263_s1 + $0x230] sm:$0xff] }
0x4053   :  { %v12434_v3 = vpack.c.bf16 %v8328_v1, %v8327_v50 }
0x4054   :  { %11840 = vmatmul.mubr.msk.f32.vlgmr.msra.gmra.mrb[86].mxu0 %vm4451_vm10, %v7882_v17  ;;  %v8334_v17 = vld [vmem:[%s15263_s1 + $0x238] sm:$0xff] }
0x4055   :  { %11849 = vmatprep.mubr.msk.f32.mxu0 %vm12763_vm1, %v12762_v25 }
0x407b   :  { %v8046_v20 = vpop.xlane.xlu1 %8045 }
0x407c   :  { %12692 = vrcp.f32 %v8046_v20  ;;  %v12443_v20 = vpack.c.bf16 %v8334_v17, %v8333_v60 }
0x407f   :  { %v8050_v12 = vpop.permute.xlu1 %8049 }
0x4080   :  { %11848 = vmatpush3.msk.msra.mxu0 %vm4455_vm9, %v8050_v12  ;;  %v10755_v12 = vld [vmem:[%s15264_s2 + $0x690] ss:$0 sm:$0xff] }
0x4081   :  { %12427 = vmatprep.subr.bf16.mxu0 %v12771_v45 }
0x4086   :  { %v12693_v23 = vpop.eup %12692 }
0x4087   :  { %v8048_v6 = vmul.f32 %v12693_v23, %v12685_v53  ;;  %v8331_v53 = vld [vmem:[%s15263_s1 + $0x220] sm:$0xff] }
0x4088   :  { %v12440_v57 = vpack.c.bf16 %v8332_v5, %v8331_v53 }
0x4089   :  { %11850 = vmatmul.mubr.msk.f32.vlgmr.msra.gmra.mrb[88].mxu0 %vm4451_vm10, %v8048_v6 }
0x408a   :  { %11871 = vmatprep.mubr.msk.f32.mxu0 %vm12763_vm1, %v12762_v25  ;;  %12429 = vmatpush3.bf16.msra.mxu0 %v12428_v56 }
0x408b   :  { %12430 = vmatprep.subr.bf16.mxu0 %v12771_v45 }
0x411f   :  { %v7624_v26 = vpop.f32.mrb[82].mxu0 }
0x4120   :  { %v11821_v27 = vpop.f32.mrb[83].mxu0 }
0x4123   :  { %v7790_v18 = vpop.f32.mrb[84].mxu0 }
0x4124   :  { %8127 = vrot.lane.b32.xlu0 %v7790_v18, %s12778_s19  ;;  %v11831_v55 = vpop.f32.mrb[85].mxu0 }
0x4127   :  { %v7956_v28 = vpop.f32.mrb[86].mxu0 }
0x4128   :  { %8131 = vrot.lane.b32.xlu1 %v7956_v28, %s12769_s16  ;;  %v11841_v29 = vpop.f32.mrb[87].mxu0 }
0x415c   :  { %v8122_v30 = vpop.f32.mrb[88].mxu0 }
0x415d   :  { %8135 = vrot.lane.b32.xlu0 %v8122_v30, %s12779_s20  ;;  %v11851_v32 = vpop.f32.mrb[89].mxu0 }
0x415e   :  { %v8439_v32 = vld [vmem:[%s15265_s3 + $0x78] sm:$0xff] }
0x4196   :  { %v8128_v34 = vpop.permute.xlu0 %8127 }
0x4197   :  { %v8138_v36 = vsel %vm676_vm4, %v7624_v26, %v8128_v34  ;;  %v8440_v34 = vld [vmem:[%s15265_s3 + $0x80] sm:$0xff] }
0x419a   :  { %v8132_v35 = vpop.permute.xlu1 %8131 }
0x419b   :  { %v8139_v49 = vsel %vm520_vm2, %v8138_v36, %v8132_v35  ;;  %v12446_v35 = vpack.c.bf16 %v8440_v34, %v8439_v32  ;;  %v8441_v36 = vld [vmem:[%s15265_s3 + $0x88] sm:$0xff] }
0x41cf   :  { %v8136_v33 = vpop.permute.xlu0 %8135 }
0x41d0   :  { %v8140_v37 = vsel %vm5040_vm11, %v8139_v49, %v8136_v33  ;;  %v8442_v49 = vld [vmem:[%s15265_s3 + $0x90] sm:$0xff] }
0x41d1   :  { %11861 = vmatmul.mubr.msk.f32.vlgmr.msra.gmra.mrb[104].mxu1 %vm1869_vm6, %v8140_v37  ;;  %v12449_v33 = vpack.c.bf16 %v8442_v49, %v8441_v36 }
0x41d2   :  { %11890 = vmatprep.mubr.msk.f32.mxu1 %vm12763_vm1, %v12762_v25  ;;  %12435 = vmatpush3.bf16.msra.mxu1 %v12434_v3 }
0x41d3   :  { %12436 = vmatprep.subr.bf16.mxu1 %v12771_v45 }
0x41d6   :  { %12438 = vmatpush3.bf16.msra.mxu1 %v12437_v4 }
0x41d7   :  { %12439 = vmatprep.subr.bf16.mxu1 %v12771_v45 }
0x41da   :  { %12441 = vmatpush3.bf16.msra.mxu1 %v12440_v57 }
0x41db   :  { %12442 = vmatprep.subr.bf16.mxu1 %v12771_v45 }
0x41de   :  { %12444 = vmatpush3.bf16.msra.mxu1 %v12443_v20 }
0x41df   :  { %11914 = vmatprep.subr.mxu1 %v12762_v25 }
0x42a4   :  { %v8214_v39 = vpop.f32.mrb[104].mxu1 }
0x42a5   :  { %v8215_v40 = vadd.f32 %v10751_v38, %v8214_v39  ;;  %v11862_v41 = vpop.f32.mrb[105].mxu1 }
0x42a6   :  { %v10759_v41 = vld [vmem:[%s15263_s1 + $0x248] ss:$0 sm:$0xff] }
0x42a7   :  { %v8218_v42 = vadd.f32 %v8215_v40, %v14711_v22  ;;  %v8246_v22 = vld [vmem:[%s15264_s2 + $0x680] sm:$0xff] }
0x42a8   :  { %v12431_v59 = vpack.c.bf16 %v8247_v58, %v8246_v22 }
0x42a9   :  { %v8221_v10 = vsel %vm5122_vm12, %v8218_v42, 0.0 }
0x42aa   :  { %8222 = vadd.xlane.f32.xlu1 %v8221_v10  ;;  %12432 = vmatpush3.bf16.msra.mxu0 %v12431_v59  ;;  %v10760_v10 = vld [vmem:[%s15263_s1 + $0x250] ss:$0 sm:$0xff] }
0x42ab   :  { %12445 = vmatprep.subr.bf16.mxu0 %v12771_v45 }
0x4337   :  { %v8223_v31 = vpop.xlane.xlu1 %8222 }
0x4338   :  { %v8224_v43 = vmul.f32 0.03125, %v8223_v31 }
0x433a   :  { %v8225_v47 = vsub.f32 %v8218_v42, %v8224_v43 }
0x433c   :  { %v8226_v52 = vmul.f32 %v8225_v47, %v8225_v47 }
0x433e   :  { %v8227_v24 = vsel %vm5122_vm12, %v8226_v52, 0.0 }
0x433f   :  { %8228 = vadd.xlane.f32.xlu0 %v8227_v24 }
0x43cc   :  { %v8229_v63 = vpop.xlane.xlu0 %8228 }
0x43cd   :  { %v8230_v62 = vmul.f32 0.03125, %v8229_v63 }
0x43cf   :  { %v8231_v7 = vadd.f32 1e-05, %v8230_v62 }
0x43d1   :  { %12694 = vrsqrt.f32 %v8231_v7 }
0x43db   :  { %v12695_v44 = vpop.eup %12694 }
0x43dc   :  { %v8233_v48 = vmul.f32 %v12695_v44, %v8225_v47  ;;  %v10761_v47 = vld [vmem:[%s15265_s3 + $0x98] ss:$0 sm:$0xff] }
0x43de   :  { %v8238_v13 = vmul.f32 %v10753_v8, %v8233_v48 }
0x43e0   :  { %v8243_v14 = vadd.f32 %v10754_v9, %v8238_v13 }
0x43e2   :  { %11872 = vmatmul.mubr.msk.f32.vlgmr.msra.gmra.mrb[90].mxu0 %vm1869_vm6, %v8243_v14 }
0x43e3   :  { %11901 = vmatprep.mubr.msk.f32.mxu0 %vm12763_vm1, %v12762_v25  ;;  %12447 = vmatpush3.bf16.msra.mxu0 %v12446_v35 }
0x43e4   :  { %12448 = vmatprep.subr.bf16.mxu0 %v12771_v45 }
0x43e7   :  { %12450 = vmatpush3.bf16.msra.mxu0 %v12449_v33 }
0x43e8   :  { %11904 = vmatprep.subr.mxu0 %v12762_v25 }
0x44b5   :  { %v8322_v23 = vpop.f32.mrb[90].mxu0 }
0x44b6   :  { %v8323_v6 = vadd.f32 %v10755_v12, %v8322_v23  ;;  %v11873_v46 = vpop.f32.mrb[91].mxu0 }
0x44b8   :  { %v8326_v0 = vmax.f32 %v8323_v6, 0.0 }
0x44ba   :  { %11891 = vmatmul.mubr.msk.f32.vlgmr.msra.gmra.mrb[106].mxu1 %vm365_vm0, %v8326_v0 }
0x44bb   :  { %11916 = vmatprep.mubr.msk.f32.mxu1 %vm12763_vm1, %v12762_v25 }
0x458d   :  { %v8409_v15 = vpop.f32.mrb[106].mxu1 }
0x458e   :  { %v8410_v51 = vadd.f32 %v10757_v61, %v8409_v15  ;;  %v11892_v21 = vpop.f32.mrb[107].mxu1 }
0x4590   :  { %v8413_v26 = vadd.f32 %v8410_v51, %v8243_v14 }
0x4592   :  { %v8416_v27 = vsel %vm5122_vm12, %v8413_v26, 0.0 }
0x4593   :  { %8417 = vadd.xlane.f32.xlu0 %v8416_v27 }
0x4620   :  { %v8418_v18 = vpop.xlane.xlu0 %8417 }
0x4621   :  { %v8419_v55 = vmul.f32 0.03125, %v8418_v18 }
0x4623   :  { %v8420_v28 = vsub.f32 %v8413_v26, %v8419_v55 }
0x4625   :  { %v8421_v29 = vmul.f32 %v8420_v28, %v8420_v28 }
0x4627   :  { %v8422_v30 = vsel %vm5122_vm12, %v8421_v29, 0.0 }
0x4628   :  { %8423 = vadd.xlane.f32.xlu0 %v8422_v30 }
0x46b5   :  { %v8424_v37 = vpop.xlane.xlu0 %8423 }
0x46b6   :  { %v8425_v38 = vmul.f32 0.03125, %v8424_v37 }
0x46b8   :  { %v8426_v39 = vadd.f32 1e-05, %v8425_v38 }
0x46ba   :  { %12696 = vrsqrt.f32 %v8426_v39 }
0x46c4   :  { %v12697_v40 = vpop.eup %12696 }
0x46c5   :  { %v8428_v42 = vmul.f32 %v12697_v40, %v8420_v28 }
0x46c7   :  { %v8433_v31 = vmul.f32 %v10759_v41, %v8428_v42 }
0x46c9   :  { %v14902_v43 = vadd.f32 %v10760_v10, %v8433_v31  ;;  %v8444_v31 = vld [vmem:[%s15263_s1 + $0x258] sm:$0xff] }
0x46cb   :  { %11902 = vmatmul.mubr.msk.f32.vlgmr.msra.gmra.mrb[92].mxu0 %vm1869_vm6, %v14902_v43 }
0x46cc   :  { %11906 = vmatprep.mubr.msk.f32.mxu0 %vm12763_vm1, %v12762_v25 }
0x479e   :  { %v8522_v52 = vpop.f32.mrb[92].mxu0 }
0x479f   :  { %v14911_v24 = vadd.f32 %v10761_v47, %v8522_v52  ;;  %v11903_v54 = vpop.f32.mrb[93].mxu0  ;;  %v8445_v47 = vld [vmem:[%s15263_s1 + $0x260] sm:$0xff]  ;;  %v8446_v52 = vld [vmem:[%s15263_s1 + $0x268] sm:$0xff] }
0x47a0   :  { %v8447_v54 = vld [vmem:[%s15263_s1 + $0x270] sm:$0xff] }
0x47a1   :  { %8693 = vrot.lane.b32.xlu0 %v14911_v24, %s12772_s25  ;;  %8527 = vrot.lane.b32.xlu1 %v14911_v24, %s12768_s15 }
0x47a5   :  { %9025 = vrot.lane.b32.xlu0 %v14911_v24, %s12773_s26  ;;  %8691 = vrot.lane.b32.xlu1 %v14911_v24, %s12774_s27 }
0x47a9   :  { %8859 = vrot.lane.b32.xlu1 %v14911_v24, %s12770_s17 }
0x47ad   :  { %8857 = vrot.lane.b32.xlu1 %v14911_v24, %s12766_s13 }
0x47b1   :  { %9023 = vrot.lane.b32.xlu1 %v14911_v24, %s12775_s28 }
0x4813   :  { %v8694_v16 = vpop.permute.xlu0 %8693  ;;  %v8528_v56 = vpop.permute.xlu1 %8527 }
0x4814   :  { %11905 = vmatpush3.xpose.msk.msra.mxu0 %vm676_vm4, %v8528_v56  ;;  %11915 = vmatpush3.xpose.msk.msra.mxu1 %vm676_vm4, %v8694_v16  ;;  %v12455_v16 = vpack.c.bf16 %v8447_v54, %v8446_v52 }
0x4815   :  { %11924 = vmatprep.subr.mxu1 %v12762_v25  ;;  %11909 = vmatprep.subr.mxu0 %v12762_v25 }
0x4817   :  { %11907 = vmatmul.mubr.msk.f32.vlgmr.msra.gmra.mrb[94].mxu0 %vm676_vm4, %v14911_v24  ;;  %v8692_v22 = vpop.permute.xlu1 %8691  ;;  %v9026_v50 = vpop.permute.xlu0 %9025 }
0x4818   :  { %11917 = vmatmul.mubr.msk.f32.vlgmr.msra.gmra.mrb[108].mxu1 %vm676_vm4, %v8692_v22  ;;  %11911 = vmatprep.mubr.msk.f32.mxu0 %vm12763_vm1, %v12762_v25 }
0x4819   :  { %11926 = vmatprep.mubr.msk.f32.mxu1 %vm12763_vm1, %v12762_v25 }
0x481b   :  { %v8860_v58 = vpop.permute.xlu1 %8859 }
0x481c   :  { %11925 = vmatpush3.xpose.msk.msra.mxu1 %vm676_vm4, %v8860_v58 }
0x481d   :  { %11934 = vmatprep.subr.mxu1 %v12762_v25 }
0x481f   :  { %v8858_v59 = vpop.permute.xlu1 %8857 }
0x4820   :  { %11927 = vmatmul.mubr.msk.f32.vlgmr.msra.gmra.mrb[110].mxu1 %vm676_vm4, %v8858_v59 }
0x4821   :  { %11935 = vmatpush3.xpose.msk.msra.mxu1 %vm676_vm4, %v9026_v50  ;;  %11936 = vmatprep.mubr.msk.f32.mxu1 %vm12763_vm1, %v12762_v25 }
0x4822   :  { %12451 = vmatprep.subr.bf16.mxu1 %v12771_v45 }
0x4823   :  { %v9024_v1 = vpop.permute.xlu1 %9023 }
0x4824   :  { %11937 = vmatmul.mubr.msk.f32.vlgmr.msra.gmra.mrb[112].mxu1 %vm676_vm4, %v9024_v1 }
0x4825   :  { %11952 = vmatprep.mubr.msk.f32.mxu1 %vm12763_vm1, %v12762_v25 }
0x48ea   :  { %v8599_v2 = vpop.f32.mrb[94].mxu0 }
0x48eb   :  { %v11908_v3 = vpop.f32.mrb[95].mxu0  ;;  %v8765_v11 = vpop.f32.mrb[108].mxu1  ;;  %v8603_v4 = vsel %vm4437_vm8, %v8599_v2, -inf }
0x48ec   :  { %8604 = vmax.xlane.f32.xlu0 %v8603_v4  ;;  %v11918_v53 = vpop.f32.mrb[109].mxu1  ;;  %v8769_v5 = vsel %vm4437_vm8, %v8765_v11, -inf  ;;  %v9312_v4 = vld [vmem:[%s15264_s2 + $0x698] sm:$0xff] }
0x48ed   :  { %8770 = vmax.xlane.f32.xlu1 %v8769_v5  ;;  %v9313_v53 = vld [vmem:[%s15264_s2 + $0x6a0] sm:$0xff] }
0x48f3   :  { %v8931_v57 = vpop.f32.mrb[110].mxu1 }
0x48f4   :  { %v11928_v63 = vpop.f32.mrb[111].mxu1  ;;  %v8935_v62 = vsel %vm4437_vm8, %v8931_v57, -inf }
0x48f5   :  { %8936 = vmax.xlane.f32.xlu0 %v8935_v62  ;;  %v12464_v63 = vpack.c.bf16 %v9313_v53, %v9312_v4 }
0x48f7   :  { %v9097_v7 = vpop.f32.mrb[112].mxu1 }
0x48f8   :  { %v11938_v44 = vpop.f32.mrb[113].mxu1  ;;  %v9101_v8 = vsel %vm4437_vm8, %v9097_v7, -inf }
0x48f9   :  { %9102 = vmax.xlane.f32.xlu0 %v9101_v8  ;;  %v9314_v44 = vld [vmem:[%s15264_s2 + $0x6a8] sm:$0xff]  ;;  %v9315_v8 = vld [vmem:[%s15264_s2 + $0x6b0] sm:$0xff] }
0x4979   :  { %v8605_v48 = vpop.xlane.xlu0 %8604 }
0x497a   :  { %v8606_v9 = vsub.f32 %v8599_v2, %v8605_v48  ;;  %v8771_v13 = vpop.xlane.xlu1 %8770 }
0x497b   :  { %v8772_v14 = vsub.f32 %v8765_v11, %v8771_v13  ;;  %v10779_v13 = vld [vmem:[%s15263_s1 + $0x278] ss:$0 sm:$0xff] }
0x497c   :  { %v8607_v60 = vmul.f32 1.442695, %v8606_v9  ;;  %v12467_v9 = vpack.c.bf16 %v9315_v8, %v9314_v44 }
0x497d   :  { %v8773_v17 = vmul.f32 1.442695, %v8772_v14 }
0x497e   :  { %12698 = vpow2.f32 %v8607_v60 }
0x497f   :  { %12700 = vpow2.f32 %v8773_v17 }
0x4982   :  { %v8937_v20 = vpop.xlane.xlu0 %8936 }
0x4983   :  { %v8938_v12 = vsub.f32 %v8931_v57, %v8937_v20 }
0x4985   :  { %v8939_v23 = vmul.f32 1.442695, %v8938_v12 }
0x4986   :  { %v9103_v21 = vpop.xlane.xlu0 %9102 }
0x4987   :  { %12702 = vpow2.f32 %v8939_v23  ;;  %v9104_v26 = vsub.f32 %v9097_v7, %v9103_v21 }
0x4988   :  { %v12699_v6 = vpop.eup %12698 }
0x4989   :  { %v12701_v46 = vpop.eup %12700  ;;  %v8609_v0 = vsel %vm4437_vm8, %v12699_v6, 0.0  ;;  %v9105_v27 = vmul.f32 1.442695, %v9104_v26  ;;  %v9308_v26 = vld [vmem:[%s15263_s1 + $0x298] sm:$0xff] }
0x498a   :  { %8610 = vadd.xlane.f32.xlu0 %v8609_v0  ;;  %v8775_v61 = vsel %vm4437_vm8, %v12701_v46, 0.0 }
0x498b   :  { %8776 = vadd.xlane.f32.xlu1 %v8775_v61  ;;  %12704 = vpow2.f32 %v9105_v27 }
0x4991   :  { %v12703_v15 = vpop.eup %12702 }
0x4992   :  { %v8941_v51 = vsel %vm4437_vm8, %v12703_v15, 0.0 }
0x4993   :  { %8942 = vadd.xlane.f32.xlu0 %v8941_v51  ;;  %v10785_v51 = vld [vmem:[%s15264_s2 + $0x6b8] ss:$0 sm:$0xff] }
0x4995   :  { %v12705_v18 = vpop.eup %12704 }
0x4996   :  { %v9107_v55 = vsel %vm4437_vm8, %v12705_v18, 0.0 }
0x499c   :  { %8780 = vrot.lane.b32.xlu1 %v14911_v24, %s12777_s30 }
0x49a0   :  { %8946 = vrot.lane.b32.xlu1 %v14911_v24, %s12765_s12 }
0x49a9   :  { %8614 = vrot.lane.b32.xlu0 %v14911_v24, %s12764_s11 }
0x49c4   :  { %9108 = vadd.xlane.f32.xlu1 %v9107_v55  ;;  %v9310_v55 = vld [vmem:[%s15263_s1 + $0x2a8] sm:$0xff] }
0x49d5   :  { %9112 = vrot.lane.b32.xlu1 %v14911_v24, %s12776_s29  ;;  %v12452_v24 = vpack.c.bf16 %v8445_v47, %v8444_v31 }
0x49d7   :  { %12453 = vmatpush3.bf16.msra.mxu1 %v12452_v24 }
0x49d8   :  { %12454 = vmatprep.subr.bf16.mxu1 %v12771_v45 }
0x49db   :  { %12456 = vmatpush3.bf16.msra.mxu1 %v12455_v16 }
0x49dc   :  { %12463 = vmatprep.subr.bf16.mxu1 %v12771_v45 }
0x4a17   :  { %v8611_v28 = vpop.xlane.xlu0 %8610 }
0x4a18   :  { %12706 = vrcp.f32 %v8611_v28  ;;  %v8777_v29 = vpop.xlane.xlu1 %8776 }
0x4a19   :  { %12708 = vrcp.f32 %v8777_v29 }
0x4a1c   :  { %v8781_v35 = vpop.permute.xlu1 %8780 }
0x4a20   :  { %v8943_v30 = vpop.xlane.xlu0 %8942  ;;  %v8947_v37 = vpop.permute.xlu1 %8946 }
0x4a21   :  { %12710 = vrcp.f32 %v8943_v30 }
0x4a22   :  { %v12707_v32 = vpop.eup %12706 }
0x4a23   :  { %v8613_v34 = vmul.f32 %v12707_v32, %v12699_v6  ;;  %v12709_v49 = vpop.eup %12708 }
0x4a24   :  { %v8615_v36 = vpop.permute.xlu0 %8614  ;;  %v8779_v33 = vmul.f32 %v12709_v49, %v12701_v46 }
0x4a25   :  { %11910 = vmatpush3.msk.msra.mxu0 %vm4455_vm9, %v8615_v36  ;;  %v10781_v36 = vld [vmem:[%s15263_s1 + $0x280] ss:$0 sm:$0xff] }
0x4a26   :  { %11912 = vmatmul.mubr.msk.f32.vlgmr.msra.gmra.mrb[96].mxu0 %vm4451_vm10, %v8613_v34  ;;  %11919 = vmatprep.subr.mxu0 %v12762_v25 }
0x4a27   :  { %11920 = vmatpush3.msk.msra.mxu0 %vm4455_vm9, %v8781_v35  ;;  %11921 = vmatprep.mubr.msk.f32.mxu0 %vm12763_vm1, %v12762_v25 }
0x4a28   :  { %11929 = vmatprep.subr.mxu0 %v12762_v25 }
0x4a2a   :  { %11922 = vmatmul.mubr.msk.f32.vlgmr.msra.gmra.mrb[98].mxu0 %vm4451_vm10, %v8779_v33  ;;  %v10782_v33 = vld [vmem:[%s15263_s1 + $0x288] ss:$0 sm:$0xff] }
0x4a2b   :  { %v12711_v38 = vpop.eup %12710  ;;  %11930 = vmatpush3.msk.msra.mxu0 %vm4455_vm9, %v8947_v37  ;;  %11931 = vmatprep.mubr.msk.f32.mxu0 %vm12763_vm1, %v12762_v25 }
0x4a2c   :  { %v8945_v39 = vmul.f32 %v12711_v38, %v12703_v15  ;;  %11939 = vmatprep.subr.mxu0 %v12762_v25 }
0x4a2e   :  { %11932 = vmatmul.mubr.msk.f32.vlgmr.msra.gmra.mrb[100].mxu0 %vm4451_vm10, %v8945_v39  ;;  %v10783_v39 = vld [vmem:[%s15263_s1 + $0x2b0] ss:$0 sm:$0xff] }
0x4a2f   :  { %11941 = vmatprep.mubr.msk.f32.mxu0 %vm12763_vm1, %v12762_v25 }
0x4a51   :  { %v9109_v40 = vpop.xlane.xlu1 %9108 }
0x4a52   :  { %12712 = vrcp.f32 %v9109_v40 }
0x4a55   :  { %v9113_v41 = vpop.permute.xlu1 %9112 }
0x4a56   :  { %11940 = vmatpush3.msk.msra.mxu0 %vm4455_vm9, %v9113_v41 }
0x4a57   :  { %12457 = vmatprep.subr.bf16.mxu0 %v12771_v45 }
0x4a5c   :  { %v12713_v42 = vpop.eup %12712 }
0x4a5d   :  { %v9111_v10 = vmul.f32 %v12713_v42, %v12705_v18  ;;  %v9309_v18 = vld [vmem:[%s15263_s1 + $0x2a0] sm:$0xff] }
0x4a5e   :  { %v12461_v28 = vpack.c.bf16 %v9310_v55, %v9309_v18 }
0x4a5f   :  { %11942 = vmatmul.mubr.msk.f32.vlgmr.msra.gmra.mrb[102].mxu0 %vm4451_vm10, %v9111_v10 }
0x4a60   :  { %11963 = vmatprep.mubr.msk.f32.mxu0 %vm12763_vm1, %v12762_v25 }
0x4af9   :  { %v8687_v56 = vpop.f32.mrb[96].mxu0 }
0x4afa   :  { %v11913_v22 = vpop.f32.mrb[97].mxu0 }
0x4afd   :  { %v8853_v58 = vpop.f32.mrb[98].mxu0 }
0x4afe   :  { %9190 = vrot.lane.b32.xlu0 %v8853_v58, %s12778_s19  ;;  %v11923_v59 = vpop.f32.mrb[99].mxu0 }
0x4b01   :  { %v9019_v50 = vpop.f32.mrb[100].mxu0 }
0x4b02   :  { %9194 = vrot.lane.b32.xlu1 %v9019_v50, %s12769_s16  ;;  %v11933_v1 = vpop.f32.mrb[101].mxu0 }
0x4b32   :  { %v9185_v2 = vpop.f32.mrb[102].mxu0 }
0x4b33   :  { %9198 = vrot.lane.b32.xlu0 %v9185_v2, %s12779_s20  ;;  %v11943_v3 = vpop.f32.mrb[103].mxu0 }
0x4b70   :  { %v9191_v11 = vpop.permute.xlu0 %9190 }
0x4b71   :  { %v9201_v57 = vsel %vm676_vm4, %v8687_v56, %v9191_v11 }
0x4b74   :  { %v9195_v5 = vpop.permute.xlu1 %9194 }
0x4b75   :  { %v9202_v62 = vsel %vm520_vm2, %v9201_v57, %v9195_v5 }
0x4ba5   :  { %v9199_v7 = vpop.permute.xlu0 %9198 }
0x4ba6   :  { %v9203_v48 = vsel %vm5040_vm11, %v9202_v62, %v9199_v7 }
0x4ba7   :  { %11953 = vmatmul.mubr.msk.f32.vlgmr.msra.gmra.mrb[114].mxu1 %vm1869_vm6, %v9203_v48 }
0x4ba8   :  { %12465 = vmatpush3.bf16.msra.mxu1 %v12464_v63  ;;  %11974 = vmatprep.mubr.msk.f32.mxu1 %vm12763_vm1, %v12762_v25 }
0x4ba9   :  { %12466 = vmatprep.subr.bf16.mxu1 %v12771_v45 }
0x4bac   :  { %12468 = vmatpush3.bf16.msra.mxu1 %v12467_v9 }
0x4bad   :  { %11987 = vmatprep.subr.mxu1 %v12762_v25 }
0x4baf   :  { %11975 = vmatmul.mubr.msk.f32.vlgmr.msra.gmra.mrb[116].mxu1 %vm1869_vm6, %v14702_v19 }
0x4bb0   :  { %11989 = vmatprep.mubr.msk.f32.mxu1 %vm12763_vm1, %v12762_v25 }
0x4c7a   :  { %v9277_v14 = vpop.f32.mrb[114].mxu1 }
0x4c7b   :  { %v9278_v60 = vadd.f32 %v10779_v13, %v9277_v14  ;;  %v11954_v17 = vpop.f32.mrb[115].mxu1 }
0x4c7d   :  { %v9281_v20 = vadd.f32 %v9278_v60, %v14902_v43  ;;  %v9307_v43 = vld [vmem:[%s15263_s1 + $0x290] sm:$0xff] }
0x4c7e   :  { %v12458_v27 = vpack.c.bf16 %v9308_v26, %v9307_v43 }
0x4c7f   :  { %v9284_v12 = vsel %vm5122_vm12, %v9281_v20, 0.0 }
0x4c80   :  { %9285 = vadd.xlane.f32.xlu1 %v9284_v12  ;;  %12459 = vmatpush3.bf16.msra.mxu0 %v12458_v27 }
0x4c81   :  { %12460 = vmatprep.subr.bf16.mxu0 %v12771_v45 }
0x4c82   :  { %v9469_v23 = vpop.f32.mrb[116].mxu1 }
0x4c83   :  { %v11976_v6 = vpop.f32.mrb[117].mxu1  ;;  %v15034_v21 = vadd.f32 %v10785_v51, %v9469_v23 }
0x4c84   :  { %12462 = vmatpush3.bf16.msra.mxu0 %v12461_v28 }
0x4c85   :  { %11977 = vmatprep.subr.mxu0 %v12762_v25 }
0x4d0d   :  { %v9286_v46 = vpop.xlane.xlu1 %9285 }
0x4d0e   :  { %v9287_v0 = vmul.f32 0.03125, %v9286_v46 }
0x4d10   :  { %v9288_v19 = vsub.f32 %v9281_v20, %v9287_v0 }
0x4d12   :  { %v9289_v61 = vmul.f32 %v9288_v19, %v9288_v19 }
0x4d14   :  { %v9290_v15 = vsel %vm5122_vm12, %v9289_v61, 0.0 }
0x4d15   :  { %9291 = vadd.xlane.f32.xlu0 %v9290_v15 }
0x4d2b   :  { %9639 = vrot.lane.b32.xlu0 %v15034_v21, %s12774_s27 }
0x4da2   :  { %v9292_v29 = vpop.xlane.xlu0 %9291 }
0x4da3   :  { %v9293_v30 = vmul.f32 0.03125, %v9292_v29 }
0x4da5   :  { %v9294_v32 = vadd.f32 1e-05, %v9293_v30 }
0x4da6   :  { %v9640_v34 = vpop.permute.xlu0 %9639 }
0x4da7   :  { %12714 = vrsqrt.f32 %v9294_v32  ;;  %11988 = vmatpush3.xpose.msk.msra.mxu1 %vm676_vm4, %v9640_v34 }
0x4da8   :  { %11997 = vmatprep.subr.mxu1 %v12762_v25 }
0x4db1   :  { %v12715_v35 = vpop.eup %12714 }
0x4db2   :  { %v9296_v49 = vmul.f32 %v12715_v35, %v9288_v19 }
0x4db4   :  { %v9301_v37 = vmul.f32 %v10781_v36, %v9296_v49 }
0x4db6   :  { %v15060_v38 = vadd.f32 %v10782_v33, %v9301_v37  ;;  %v9317_v33 = vld [vmem:[%s15263_s1 + $0x2b8] sm:$0xff]  ;;  %v9318_v37 = vld [vmem:[%s15263_s1 + $0x2c0] sm:$0xff] }
0x4db8   :  { %11964 = vmatmul.mubr.msk.f32.vlgmr.msra.gmra.mrb[104].mxu0 %vm1869_vm6, %v15060_v38 }
0x4db9   :  { %11978 = vmatpush3.xpose.msk.msra.mxu0 %vm676_vm4, %v15034_v21  ;;  %11979 = vmatprep.mubr.msk.f32.mxu0 %vm12763_vm1, %v12762_v25 }
0x4dba   :  { %11982 = vmatprep.subr.mxu0 %v12762_v25 }
0x4e8b   :  { %v9395_v40 = vpop.f32.mrb[104].mxu0 }
0x4e8c   :  { %v9396_v41 = vadd.f32 %v10783_v39, %v9395_v40  ;;  %v11965_v42 = vpop.f32.mrb[105].mxu0  ;;  %v12470_v39 = vpack.c.bf16 %v9318_v37, %v9317_v33  ;;  %v9319_v40 = vld [vmem:[%s15263_s1 + $0x2c8] sm:$0xff] }
0x4e8e   :  { %9637 = vrot.lane.b32.xlu1 %v9396_v41, %s12774_s27  ;;  %9803 = vrot.lane.b32.xlu0 %v9396_v41, %s12766_s13 }
0x4e8f   :  { %11980 = vmatmul.mubr.msk.f32.vlgmr.msra.gmra.mrb[106].mxu0 %vm676_vm4, %v9396_v41 }
0x4e90   :  { %11984 = vmatprep.mubr.msk.f32.mxu0 %vm12763_vm1, %v12762_v25 }
0x4e92   :  { %9805 = vrot.lane.b32.xlu1 %v15034_v21, %s12766_s13  ;;  %9969 = vrot.lane.b32.xlu0 %v9396_v41, %s12775_s28  ;;  %v9320_v41 = vld [vmem:[%s15263_s1 + $0x2d0] sm:$0xff] }
0x4e93   :  { %v12473_v42 = vpack.c.bf16 %v9320_v41, %v9319_v40 }
0x4e96   :  { %9971 = vrot.lane.b32.xlu1 %v15034_v21, %s12775_s28 }
0x4f00   :  { %v9638_v10 = vpop.permute.xlu1 %9637  ;;  %v9804_v47 = vpop.permute.xlu0 %9803 }
0x4f01   :  { %11990 = vmatmul.mubr.msk.f32.vlgmr.msra.gmra.mrb[118].mxu1 %vm676_vm4, %v9638_v10 }
0x4f02   :  { %11999 = vmatprep.mubr.msk.f32.mxu1 %vm12763_vm1, %v12762_v25 }
0x4f04   :  { %v9806_v31 = vpop.permute.xlu1 %9805  ;;  %v9970_v24 = vpop.permute.xlu0 %9969 }
0x4f05   :  { %11998 = vmatpush3.xpose.msk.msra.mxu1 %vm676_vm4, %v9806_v31 }
0x4f06   :  { %12007 = vmatprep.subr.mxu1 %v12762_v25 }
0x4f08   :  { %v9972_v52 = vpop.permute.xlu1 %9971  ;;  %12000 = vmatmul.mubr.msk.f32.vlgmr.msra.gmra.mrb[120].mxu1 %vm676_vm4, %v9804_v47 }
0x4f09   :  { %12008 = vmatpush3.xpose.msk.msra.mxu1 %vm676_vm4, %v9972_v52  ;;  %12009 = vmatprep.mubr.msk.f32.mxu1 %vm12763_vm1, %v12762_v25 }
0x4f0a   :  { %12469 = vmatprep.subr.bf16.mxu1 %v12771_v45 }
0x4f0c   :  { %12010 = vmatmul.mubr.msk.f32.vlgmr.msra.gmra.mrb[122].mxu1 %vm676_vm4, %v9970_v24 }
0x4f0d   :  { %12025 = vmatprep.mubr.msk.f32.mxu1 %vm12763_vm1, %v12762_v25  ;;  %12471 = vmatpush3.bf16.msra.mxu1 %v12470_v39 }
0x4f0e   :  { %12472 = vmatprep.subr.bf16.mxu1 %v12771_v45 }
0x4f11   :  { %12474 = vmatpush3.bf16.msra.mxu1 %v12473_v42 }
0x4f12   :  { %12481 = vmatprep.subr.bf16.mxu1 %v12771_v45 }
0x4f62   :  { %v9545_v54 = vpop.f32.mrb[106].mxu0 }
0x4f63   :  { %v11981_v16 = vpop.f32.mrb[107].mxu0  ;;  %v9549_v56 = vsel %vm4437_vm8, %v9545_v54, -inf }
0x4f64   :  { %9550 = vmax.xlane.f32.xlu1 %v9549_v56 }
0x4f75   :  { %9560 = vrot.lane.b32.xlu1 %v15034_v21, %s12768_s15 }
0x4fd4   :  { %v9711_v22 = vpop.f32.mrb[118].mxu1 }
0x4fd5   :  { %v11991_v58 = vpop.f32.mrb[119].mxu1  ;;  %v9715_v59 = vsel %vm4437_vm8, %v9711_v22, -inf }
0x4fd6   :  { %9716 = vmax.xlane.f32.xlu0 %v9715_v59 }
0x4fdb   :  { %v9877_v50 = vpop.f32.mrb[120].mxu1 }
0x4fdc   :  { %v12001_v1 = vpop.f32.mrb[121].mxu1  ;;  %v9881_v2 = vsel %vm4437_vm8, %v9877_v50, -inf }
0x4fdd   :  { %9882 = vmax.xlane.f32.xlu0 %v9881_v2  ;;  %v10803_v1 = vld [vmem:[%s15263_s1 + $0x2d8] ss:$0 sm:$0xff] }
0x4fdf   :  { %v10043_v3 = vpop.f32.mrb[122].mxu1 }
0x4fe0   :  { %v12011_v11 = vpop.f32.mrb[123].mxu1  ;;  %v10047_v4 = vsel %vm4437_vm8, %v10043_v3, -inf }
0x4fe1   :  { %10048 = vmax.xlane.f32.xlu0 %v10047_v4 }
0x4ff1   :  { %v9551_v53 = vpop.xlane.xlu1 %9550 }
0x4ff2   :  { %v9552_v5 = vsub.f32 %v9545_v54, %v9551_v53 }
0x4ff4   :  { %v9553_v57 = vmul.f32 1.442695, %v9552_v5 }
0x4ff5   :  { %v9561_v63 = vpop.permute.xlu1 %9560 }
0x4ff6   :  { %12716 = vpow2.f32 %v9553_v57  ;;  %11983 = vmatpush3.msk.msra.mxu0 %vm4455_vm9, %v9561_v63 }
0x4ff7   :  { %11992 = vmatprep.subr.mxu0 %v12762_v25 }
0x5000   :  { %v12717_v62 = vpop.eup %12716 }
0x5001   :  { %v9555_v7 = vsel %vm4437_vm8, %v12717_v62, 0.0 }
0x5002   :  { %9556 = vadd.xlane.f32.xlu1 %v9555_v7 }
0x5063   :  { %v9717_v44 = vpop.xlane.xlu0 %9716 }
0x5064   :  { %v9718_v8 = vsub.f32 %v9711_v22, %v9717_v44  ;;  %v10253_v44 = vld [vmem:[%s15264_s2 + $0x6c0] sm:$0xff] }
0x5066   :  { %v9719_v48 = vmul.f32 1.442695, %v9718_v8  ;;  %v10254_v8 = vld [vmem:[%s15264_s2 + $0x6c8] sm:$0xff] }
0x5068   :  { %12718 = vpow2.f32 %v9719_v48  ;;  %v12476_v48 = vpack.c.bf16 %v10254_v8, %v10253_v44 }
0x506a   :  { %v9883_v9 = vpop.xlane.xlu0 %9882 }
0x506b   :  { %v9884_v13 = vsub.f32 %v9877_v50, %v9883_v9  ;;  %v10256_v9 = vld [vmem:[%s15264_s2 + $0x6d8] sm:$0xff] }
0x506d   :  { %v9885_v14 = vmul.f32 1.442695, %v9884_v13 }
0x506e   :  { %v10049_v60 = vpop.xlane.xlu0 %10048 }
0x506f   :  { %12720 = vpow2.f32 %v9885_v14  ;;  %v10050_v17 = vsub.f32 %v10043_v3, %v10049_v60  ;;  %v10336_v14 = vld [vmem:[%s15263_s1 + $0x2f0] sm:$0xff]  ;;  %v10337_v60 = vld [vmem:[%s15263_s1 + $0x2f8] sm:$0xff] }
0x5071   :  { %v10051_v20 = vmul.f32 1.442695, %v10050_v17  ;;  %v10338_v17 = vld [vmem:[%s15263_s1 + $0x300] sm:$0xff] }
0x5072   :  { %v12719_v12 = vpop.eup %12718 }
0x5073   :  { %12722 = vpow2.f32 %v10051_v20  ;;  %v9721_v23 = vsel %vm4437_vm8, %v12719_v12, 0.0  ;;  %v12482_v20 = vpack.c.bf16 %v10337_v60, %v10336_v14  ;;  %v10814_v14 = vld [vmem:[%s15263_s1 + $0x360] ss:$0 sm:$0xff] }
0x5074   :  { %9722 = vadd.xlane.f32.xlu0 %v9721_v23 }
0x5079   :  { %v12721_v6 = vpop.eup %12720 }
0x507a   :  { %v9887_v46 = vsel %vm4437_vm8, %v12721_v6, 0.0 }
0x507b   :  { %9888 = vadd.xlane.f32.xlu1 %v9887_v46  ;;  %v10341_v46 = vld [vmem:[%s15263_s1 + $0x318] sm:$0xff] }
0x507d   :  { %v12723_v0 = vpop.eup %12722 }
0x507e   :  { %v10053_v19 = vsel %vm4437_vm8, %v12723_v0, 0.0 }
0x507f   :  { %10054 = vadd.xlane.f32.xlu0 %v10053_v19 }
0x508c   :  { %9892 = vrot.lane.b32.xlu1 %v15034_v21, %s12770_s17 }
0x508f   :  { %v9557_v61 = vpop.xlane.xlu1 %9556 }
0x5090   :  { %12724 = vrcp.f32 %v9557_v61  ;;  %10058 = vrot.lane.b32.xlu1 %v15034_v21, %s12773_s26 }
0x5095   :  { %9726 = vrot.lane.b32.xlu0 %v15034_v21, %s12772_s25  ;;  %s12780_s25 = smov [#allocation2]  }
0x5096   :  { %s10563_s26 = sshll.u32 %s12780_s25, 4  ;;  %s10564_s26 = int_to_ptr.vmem [resolvable:$true] %s10563_s26 }
0x5097   :  { %s12738_s27 = scalar_lea.vmem %s10564_s26, 32  ;;  %p12743_p1 = scmp.lt.s32.totalorder %s10564_s26, %s10564_s26 }
0x5098   :  { %p12739_p0 = scmp.ne.s32.totalorder %s10564_s26, %s12738_s27  ;;  %p12744_p2 = scmp.lt.s32.totalorder %s12738_s27, %s12738_s27 }
0x509a   :  { %v12725_v15 = vpop.eup %12724  ;;  %p12745_p3 = por %p12744_p2, %p12743_p1 }
0x509b   :  { %v9559_v51 = vmul.f32 %v12725_v15, %v12717_v62 }
0x509c   :  { %p12746_p4 = pnand %p12745_p3, %p12739_p0 }
0x509d   :  { %11985 = vmatmul.mubr.msk.f32.vlgmr.msra.gmra.mrb[108].mxu0 %vm4451_vm10, %v9559_v51 }
0x509e   :  { %11994 = vmatprep.mubr.msk.f32.mxu0 %vm12763_vm1, %v12762_v25 }
0x5101   :  { %v9723_v43 = vpop.xlane.xlu0 %9722 }
0x5102   :  { %12726 = vrcp.f32 %v9723_v43  ;;  %v10805_v43 = vld [vmem:[%s15263_s1 + $0x2e0] ss:$0 sm:$0xff] }
0x5108   :  { %v9889_v26 = vpop.xlane.xlu1 %9888 }
0x5109   :  { %12728 = vrcp.f32 %v9889_v26 }
0x510c   :  { %v10055_v27 = vpop.xlane.xlu0 %10054  ;;  %v12727_v18 = vpop.eup %12726 }
0x510d   :  { %12730 = vrcp.f32 %v10055_v27  ;;  %v9725_v55 = vmul.f32 %v12727_v18, %v12719_v12  ;;  %v9893_v28 = vpop.permute.xlu1 %9892  ;;  %v10339_v12 = vld [vmem:[%s15263_s1 + $0x308] sm:$0xff] }
0x510e   :  { %v12485_v23 = vpack.c.bf16 %v10339_v12, %v10338_v17  ;;  %v10806_v27 = vld [vmem:[%s15263_s1 + $0x2e8] ss:$0 sm:$0xff] }
0x5110   :  { %v9727_v29 = vpop.permute.xlu0 %9726 }
0x5111   :  { %11993 = vmatpush3.msk.msra.mxu0 %vm4455_vm9, %v9727_v29  ;;  %v10059_v32 = vpop.permute.xlu1 %10058  ;;  %v10343_v29 = vld [vmem:[%s15263_s1 + $0x328] sm:$0xff] }
0x5112   :  { %11995 = vmatmul.mubr.msk.f32.vlgmr.msra.gmra.mrb[110].mxu0 %vm4451_vm10, %v9725_v55  ;;  %12002 = vmatprep.subr.mxu0 %v12762_v25 }
0x5113   :  { %v12729_v21 = vpop.eup %12728  ;;  %12003 = vmatpush3.msk.msra.mxu0 %vm4455_vm9, %v9893_v28  ;;  %12004 = vmatprep.mubr.msk.f32.mxu0 %vm12763_vm1, %v12762_v25  ;;  %v10342_v28 = vld [vmem:[%s15263_s1 + $0x320] sm:$0xff] }
0x5114   :  { %v9891_v30 = vmul.f32 %v12729_v21, %v12721_v6  ;;  %12012 = vmatprep.subr.mxu0 %v12762_v25  ;;  %v10340_v6 = vld [vmem:[%s15263_s1 + $0x310] sm:$0xff]  ;;  %v12491_v21 = vpack.c.bf16 %v10343_v29, %v10342_v28 }
0x5116   :  { %12005 = vmatmul.mubr.msk.f32.vlgmr.msra.gmra.mrb[112].mxu0 %vm4451_vm10, %v9891_v30  ;;  %v10807_v30 = vld [vmem:[%s15264_s2 + $0x6e0] ss:$0 sm:$0xff] }
0x5117   :  { %v12731_v34 = vpop.eup %12730  ;;  %12013 = vmatpush3.msk.msra.mxu0 %vm4455_vm9, %v10059_v32  ;;  %12014 = vmatprep.mubr.msk.f32.mxu0 %vm12763_vm1, %v12762_v25 }
0x5118   :  { %v10057_v35 = vmul.f32 %v12731_v34, %v12723_v0  ;;  %12475 = vmatprep.subr.bf16.mxu0 %v12771_v45  ;;  %v12488_v0 = vpack.c.bf16 %v10341_v46, %v10340_v6 }
0x511a   :  { %12015 = vmatmul.mubr.msk.f32.vlgmr.msra.gmra.mrb[114].mxu0 %vm4451_vm10, %v10057_v35 }
0x511b   :  { %12036 = vmatprep.mubr.msk.f32.mxu0 %vm12763_vm1, %v12762_v25  ;;  %12477 = vmatpush3.bf16.msra.mxu0 %v12476_v48 }
0x511c   :  { %12478 = vmatprep.subr.bf16.mxu0 %v12771_v45 }
0x5170   :  { %v9633_v36 = vpop.f32.mrb[108].mxu0 }
0x5171   :  { %v11986_v49 = vpop.f32.mrb[109].mxu0 }
0x51e5   :  { %v9799_v10 = vpop.f32.mrb[110].mxu0 }
0x51e6   :  { %10136 = vrot.lane.b32.xlu1 %v9799_v10, %s12778_s19  ;;  %v11996_v31 = vpop.f32.mrb[111].mxu0 }
0x51e9   :  { %v9965_v47 = vpop.f32.mrb[112].mxu0 }
0x51ea   :  { %10140 = vrot.lane.b32.xlu0 %v9965_v47, %s12769_s16  ;;  %v12006_v52 = vpop.f32.mrb[113].mxu0 }
0x51ed   :  { %v10131_v24 = vpop.f32.mrb[114].mxu0 }
0x51ee   :  { %10144 = vrot.lane.b32.xlu1 %v10131_v24, %s12779_s20  ;;  %v12016_v54 = vpop.f32.mrb[115].mxu0 }
0x5258   :  { %v10137_v16 = vpop.permute.xlu1 %10136 }
0x5259   :  { %v10147_v22 = vsel %vm676_vm4, %v9633_v36, %v10137_v16 }
0x525c   :  { %v10141_v56 = vpop.permute.xlu0 %10140 }
0x525d   :  { %v10148_v58 = vsel %vm520_vm2, %v10147_v22, %v10141_v56  ;;  %v10811_v56 = vld [vmem:[%s15263_s1 + $0x338] ss:$0 sm:$0xff] }
0x5260   :  { %v10145_v59 = vpop.permute.xlu1 %10144 }
0x5261   :  { %v10149_v50 = vsel %vm5040_vm11, %v10148_v58, %v10145_v59  ;;  %v10812_v58 = vld [vmem:[%s15263_s1 + $0x340] ss:$0 sm:$0xff] }
0x5262   :  { %12026 = vmatmul.mubr.msk.f32.vlgmr.msra.gmra.mrb[124].mxu1 %vm1869_vm6, %v10149_v50 }
0x5263   :  { %12055 = vmatprep.mubr.msk.f32.mxu1 %vm12763_vm1, %v12762_v25  ;;  %12483 = vmatpush3.bf16.msra.mxu1 %v12482_v20  ;;  %v10815_v20 = vld [vmem:[%s15263_s1 + $0x388] ss:$0 sm:$0xff] }
0x5264   :  { %12484 = vmatprep.subr.bf16.mxu1 %v12771_v45 }
0x5267   :  { %12486 = vmatpush3.bf16.msra.mxu1 %v12485_v23 }
0x5268   :  { %12487 = vmatprep.subr.bf16.mxu1 %v12771_v45 }
0x526b   :  { %12489 = vmatpush3.bf16.msra.mxu1 %v12488_v0 }
0x526c   :  { %12490 = vmatprep.subr.bf16.mxu1 %v12771_v45 }
0x526f   :  { %12492 = vmatpush3.bf16.msra.mxu1 %v12491_v21 }
0x5335   :  { %v10223_v2 = vpop.f32.mrb[124].mxu1 }
0x5336   :  { %v10224_v3 = vadd.f32 %v10803_v1, %v10223_v2  ;;  %v12027_v11 = vpop.f32.mrb[125].mxu1 }
0x5338   :  { %v10227_v4 = vadd.f32 %v10224_v3, %v15060_v38  ;;  %v10255_v38 = vld [vmem:[%s15264_s2 + $0x6d0] sm:$0xff] }
0x5339   :  { %v12479_v13 = vpack.c.bf16 %v10256_v9, %v10255_v38 }
0x533a   :  { %v10230_v53 = vsel %vm5122_vm12, %v10227_v4, 0.0 }
0x533b   :  { %10231 = vadd.xlane.f32.xlu0 %v10230_v53  ;;  %12480 = vmatpush3.bf16.msra.mxu0 %v12479_v13  ;;  %v10813_v13 = vld [vmem:[%s15263_s1 + $0x358] ss:$0 sm:$0xff] }
0x533c   :  { %12493 = vmatprep.subr.bf16.mxu0 %v12771_v45 }
0x53c8   :  { %v10232_v5 = vpop.xlane.xlu0 %10231 }
0x53c9   :  { %v10233_v57 = vmul.f32 0.03125, %v10232_v5  ;;  %v10473_v5 = vld [vmem:[%s15263_s1 + $0x368] sm:$0xff] }
0x53cb   :  { %v10234_v63 = vsub.f32 %v10227_v4, %v10233_v57  ;;  %v10474_v57 = vld [vmem:[%s15263_s1 + $0x370] sm:$0xff] }
0x53cd   :  { %v10235_v62 = vmul.f32 %v10234_v63, %v10234_v63 }
0x53cf   :  { %v10236_v7 = vsel %vm5122_vm12, %v10235_v62, 0.0  ;;  %v10475_v62 = vld [vmem:[%s15263_s1 + $0x378] sm:$0xff] }
0x53d0   :  { %10237 = vadd.xlane.f32.xlu1 %v10236_v7  ;;  %v10476_v7 = vld [vmem:[%s15263_s1 + $0x380] sm:$0xff] }
0x53d1   :  { %v12497_v44 = vpack.c.bf16 %v10476_v7, %v10475_v62 }
0x545d   :  { %v10238_v19 = vpop.xlane.xlu1 %10237 }
0x545e   :  { %v10239_v61 = vmul.f32 0.03125, %v10238_v19 }
0x5460   :  { %v10240_v15 = vadd.f32 1e-05, %v10239_v61 }
0x5462   :  { %12732 = vrsqrt.f32 %v10240_v15 }
0x546c   :  { %v12733_v51 = vpop.eup %12732 }
0x546d   :  { %v10242_v26 = vmul.f32 %v12733_v51, %v10234_v63  ;;  %v12494_v63 = vpack.c.bf16 %v10474_v57, %v10473_v5 }
0x546f   :  { %v10247_v18 = vmul.f32 %v10805_v43, %v10242_v26 }
0x5471   :  { %v10252_v55 = vadd.f32 %v10806_v27, %v10247_v18 }
0x5473   :  { %12037 = vmatmul.mubr.msk.f32.vlgmr.msra.gmra.mrb[116].mxu0 %vm1869_vm6, %v10252_v55 }
0x5474   :  { %12066 = vmatprep.mubr.msk.f32.mxu0 %vm12763_vm1, %v12762_v25  ;;  %v10809_v25 = vld [vmem:[%s15263_s1 + $0x330] ss:$0 sm:$0xff]  ;;  %12495 = vmatpush3.bf16.msra.mxu0 %v12494_v63 }
0x5475   :  { %12496 = vmatprep.subr.bf16.mxu0 %v12771_v45 }
0x5478   :  { %12498 = vmatpush3.bf16.msra.mxu0 %v12497_v44 }
0x5546   :  { %v10331_v32 = vpop.f32.mrb[116].mxu0 }
0x5547   :  { %v10332_v34 = vadd.f32 %v10807_v30, %v10331_v32  ;;  %v12038_v35 = vpop.f32.mrb[117].mxu0 }
0x5549   :  { %v10335_v36 = vmax.f32 %v10332_v34, 0.0 }
0x554b   :  { %12056 = vmatmul.mubr.msk.f32.vlgmr.msra.gmra.mrb[126].mxu1 %vm365_vm0, %v10335_v36 }
0x561e   :  { %v10418_v49 = vpop.f32.mrb[126].mxu1 }
0x561f   :  { %v10419_v33 = vadd.f32 %v10809_v25, %v10418_v49  ;;  %v12057_v37 = vpop.f32.mrb[127].mxu1 }
0x5621   :  { %v10422_v39 = vadd.f32 %v10419_v33, %v10252_v55 }
0x5623   :  { %v10425_v40 = vsel %vm5122_vm12, %v10422_v39, 0.0 }
0x5624   :  { %10426 = vadd.xlane.f32.xlu0 %v10425_v40 }
0x56b1   :  { %v10427_v41 = vpop.xlane.xlu0 %10426 }
0x56b2   :  { %v10428_v42 = vmul.f32 0.03125, %v10427_v41 }
0x56b4   :  { %v10429_v10 = vsub.f32 %v10422_v39, %v10428_v42 }
0x56b6   :  { %v10430_v31 = vmul.f32 %v10429_v10, %v10429_v10 }
0x56b8   :  { %v10431_v47 = vsel %vm5122_vm12, %v10430_v31, 0.0 }
0x56b9   :  { %10432 = vadd.xlane.f32.xlu0 %v10431_v47 }
0x5746   :  { %v10433_v52 = vpop.xlane.xlu0 %10432 }
0x5747   :  { %v10434_v24 = vmul.f32 0.03125, %v10433_v52 }
0x5749   :  { %v10435_v54 = vadd.f32 1e-05, %v10434_v24 }
0x574b   :  { %12734 = vrsqrt.f32 %v10435_v54 }
0x5755   :  { %v12735_v16 = vpop.eup %12734 }
0x5756   :  { %v10437_v22 = vmul.f32 %v12735_v16, %v10429_v10 }
0x5758   :  { %v10442_v59 = vmul.f32 %v10811_v56, %v10437_v22 }
0x575a   :  { %v10447_v50 = vadd.f32 %v10812_v58, %v10442_v59 }
0x575c   :  { %v10450_v1 = vsel %vm5122_vm12, %v10447_v50, 0.0 }
0x575d   :  { %10451 = vadd.xlane.f32.xlu0 %v10450_v1 }
0x57ea   :  { %v10452_v2 = vpop.xlane.xlu0 %10451 }
0x57eb   :  { %v10453_v3 = vmul.f32 0.03125, %v10452_v2 }
0x57ed   :  { %v10454_v11 = vsub.f32 %v10447_v50, %v10453_v3 }
0x57ef   :  { %v10455_v4 = vmul.f32 %v10454_v11, %v10454_v11 }
0x57f1   :  { %v10456_v53 = vsel %vm5122_vm12, %v10455_v4, 0.0 }
0x57f2   :  { %10457 = vadd.xlane.f32.xlu1 %v10456_v53 }
0x587f   :  { %v10458_v8 = vpop.xlane.xlu1 %10457 }
0x5880   :  { %v10459_v48 = vmul.f32 0.03125, %v10458_v8 }
0x5882   :  { %v10460_v38 = vadd.f32 1e-05, %v10459_v48 }
0x5884   :  { %12736 = vrsqrt.f32 %v10460_v38 }
0x588e   :  { %v12737_v9 = vpop.eup %12736 }
0x588f   :  { %v10462_v45 = vmul.f32 %v12737_v9, %v10454_v11 }
0x5891   :  { %v10467_v60 = vmul.f32 %v10813_v13, %v10462_v45 }
0x5893   :  { %v10472_v17 = vadd.f32 %v10814_v14, %v10467_v60 }
0x5895   :  { %12067 = vmatmul.mubr.msk.f32.vlgmr.msra.gmra.mrb[118].mxu0 %vm1869_vm6, %v10472_v17 }
0x5968   :  { %v10551_v12 = vpop.f32.mrb[118].mxu0 }
0x5969   :  { %v10552_v23 = vadd.f32 %v10815_v20, %v10551_v12  ;;  %v12068_v6 = vpop.f32.mrb[119].mxu0 }
0x596b   :  { %10556 = vst.msk [vmem:[#allocation2] sm:$0x3] %vm10555_vm13, %v10552_v23 }
0x596c   :  { %12749 = shalt.err (!%p12746_p4)
}
0x596d   :  { %s12750_s16 = scalar_lea.hbm %s15268_s6, 32 }
0x596e   :  { %p12751_p5 = scmp.ne.s32.totalorder %s15268_s6, %s12750_s16  ;;  %p12754_p6 = scmp.lt.u32.totalorder %s12750_s16, %s15268_s6 }
0x5970   :  { %p12756_p7 = pnand %p12754_p6, %p12751_p5 }
0x5972   :  { %12759 = shalt.err (!%p12756_p7)
}
0x5973   :  { %10566 = dma.vmem_to_hbm [thread:$0]  %s10564_s26, 32, %s15268_s6, [#allocation3]  }
0x5974   :  { %12760 = dma.done.wait [#allocation3], 32  }
0x5975   :  { %12761 = vsyncadd [#allocation3], 4294967264 }
0x5976   :  { %10570 = vsyncpa [#allocation3], 1 }

</bundles_post_ra>
